<compile_context>
chip_gen: v6e
topology: v6e:2x2x1
jax: 0.10.0
libtpu: 0.0.40
codegen_flags: <defaults>
</compile_context>

<pallas_src>
import jax
import jax.numpy as jnp
from jax import lax
from jax.experimental import pallas as pl
from jax.experimental.pallas import tpu as pltpu

EPS = 1e-5  # nn.BatchNorm2d default eps


# --------------------------------------------------------------------------
# in-kernel helpers
# --------------------------------------------------------------------------
def _im2col_conv3x3(act, col_ref, w_ref):
    """3x3 'same' conv via one im2col + one K=9C MXU matmul.

    act     : (bn, H, W, C) bf16 (Ref or value) activation
    col_ref : (bn, H, W, 9C) bf16 VMEM scratch (im2col buffer)
    w_ref   : (9C, C) bf16 weight block
    returns : (bn*H*W, C) float32 conv output (no bias -- cancels under BN).
    """
    bn, H, W, nine_c = col_ref.shape
    C = nine_c // 9
    M = bn * H * W
    zdt = col_ref.dtype

    for kh in range(3):
        for kw in range(3):
            t = kh * 3 + kw
            dy, dx = kh - 1, kw - 1
            cs = slice(t * C, (t + 1) * C)          # lane-aligned channel block
            # destination sub-window that maps to in-image source pixels
            h0d, h1d = max(0, -dy), H - max(0, dy)
            w0d, w1d = max(0, -dx), W - max(0, dx)
            h0s, w0s = h0d + dy, w0d + dx
            col_ref[:, h0d:h1d, w0d:w1d, cs] = (
                act[:, h0s:h0s + (h1d - h0d), w0s:w0s + (w1d - w0d), :])
            # zero only the out-of-image border strips for this tap.  This is
            # re-done every step: with a "parallel" grid axis each TensorCore
            # owns its own (uninitialized) scratch and its own subset of steps,
            # so a program_id==0 guard would leave one core's strips dirty.
            if dy < 0:
                col_ref[:, 0:1, :, cs] = jnp.zeros((bn, 1, W, C), zdt)
            if dy > 0:
                col_ref[:, H - 1:H, :, cs] = jnp.zeros((bn, 1, W, C), zdt)
            if dx < 0:
                col_ref[:, :, 0:1, cs] = jnp.zeros((bn, H, 1, C), zdt)
            if dx > 0:
                col_ref[:, :, W - 1:W, cs] = jnp.zeros((bn, H, 1, C), zdt)

    return jnp.dot(col_ref[...].reshape(M, 9 * C), w_ref[...],
                   preferred_element_type=jnp.float32)


def _partial_stats(y):
    """Per-tile (sum, sum_of_squares) over rows -> (2, C) float32."""
    return jnp.concatenate(
        [jnp.sum(y, axis=0, keepdims=True),
         jnp.sum(y * y, axis=0, keepdims=True)], axis=0)


# --------------------------------------------------------------------------
# kernels (one grid step == one batch tile)
# --------------------------------------------------------------------------
def _conv_stats_kernel(x_ref, w_ref, y_ref, stats_ref, col_ref):
    """Pass 1: conv1 (raw, pre-BN) + per-tile BatchNorm partial stats."""
    bn, H, W, C = x_ref.shape
    y = _im2col_conv3x3(x_ref, col_ref, w_ref)                 # (M, C) f32
    y_ref[...] = y.reshape(bn, H, W, C).astype(y_ref.dtype)    # bf16 store
    stats_ref[0] = _partial_stats(y)


def _bn_relu_conv_stats_kernel(scale_ref, bias_ref, y_in_ref, w_ref,
                               y_ref, stats_ref, col_ref):
    """Pass 2: bn1 (folded scale/bias) + relu1 + conv3 + partial stats."""
    bn, H, W, C = y_in_ref.shape
    a = jnp.maximum(
        y_in_ref[...].astype(jnp.float32) * scale_ref[...] + bias_ref[...],
        0.0).astype(jnp.bfloat16)
    y = _im2col_conv3x3(a, col_ref, w_ref)
    y_ref[...] = y.reshape(bn, H, W, C).astype(y_ref.dtype)
    stats_ref[0] = _partial_stats(y)


# --------------------------------------------------------------------------
# wrapper helpers
# --------------------------------------------------------------------------
def _fold_bn(partial_stats, gamma, beta, count):
    """Fold per-tile (sum, sumsq) partials into BN scale/bias (C-sized, tiny)."""
    s = jnp.sum(partial_stats, axis=0)                    # (2, C)
    mean = s[0] / count
    var = jnp.maximum(s[1] / count - mean * mean, 0.0)    # one-pass var, clamped
    scale = gamma * lax.rsqrt(var + EPS)                  # (1, C)
    bias = beta - mean * scale                            # (1, C)
    return scale.astype(jnp.float32), bias.astype(jnp.float32)


def _vmem_budget_bytes():
    """Per-generation VMEM budget for tile sizing (v7x has 64 MiB / TC)."""
    kind = ""
    try:
        kind = jax.devices()[0].device_kind.lower()
    except Exception:
        pass
    phys = 64 * (1 << 20) if "v7" in kind else 128 * (1 << 20)
    return int(phys * 0.7)  # leave headroom below physical


def _tile_footprint_bytes(bt, H, W, C):
    """Rough per-tile VMEM footprint (double-buffered blocks + scratch)."""
    rows = bt * H * W
    act_bf16 = rows * C * 2
    col = rows * 9 * C * 2            # im2col scratch (single-buffered)
    w = 9 * C * C * 2                 # weight block
    stats = 2 * C * 4
    f32_work = 2 * rows * C * 4       # f32 conv result / BN intermediate
    return 2 * (2 * act_bf16) + 2 * w + 2 * stats + col + f32_work + (4 << 20)


def _choose_batch_tile(N, H, W, C, budget, target_rows=512, min_steps=6):
    """Largest tile with M in the 512+ range that fits the VMEM budget,
    preferring tilings that keep several grid steps for pipelining."""
    divs = [d for d in range(1, N + 1) if N % d == 0]
    feasible = [d for d in divs if _tile_footprint_bytes(d, H, W, C) <= budget]
    if not feasible:
        return 1
    good = [d for d in feasible if d * H * W >= target_rows and N // d >= min_steps]
    if good:
        return good[0]
    good = [d for d in feasible if d * H * W >= target_rows]
    if good:
        return good[0]
    return feasible[-1]


# --------------------------------------------------------------------------
# forward pass
# --------------------------------------------------------------------------
def decoder_bottleneck_layer_nhwc(x_nhwc, params, *, batch_tile=None):
    """NHWC in / NHWC out. Core implementation (no layout transposes)."""
    N, H, W, C = x_nhwc.shape
    out_dtype = x_nhwc.dtype
    count = N * H * W  # BN reduction size per channel

    budget = _vmem_budget_bytes()
    if batch_tile is None:
        batch_tile = _choose_batch_tile(N, H, W, C, budget)
    assert N % batch_tile == 0, "batch must be divisible by batch_tile"
    g = N // batch_tile
    # TODO(synk): if a single batch element exceeds the VMEM budget, add an
    # H-row tile axis with a 1-row halo to the grid.

    # Input cast to bf16 once; conv weights HWIO (3,3,C,C) -> (9C, C) bf16.
    x_bf = x_nhwc.astype(jnp.bfloat16)
    w1m = params["w1"].reshape(9 * C, C).astype(jnp.bfloat16)
    w2m = params["w2"].reshape(9 * C, C).astype(jnp.bfloat16)

    vmem_limit = min(budget,
                     max(32 * (1 << 20),
                         2 * _tile_footprint_bytes(batch_tile, H, W, C)))
    compiler_params = pltpu.CompilerParams(
        dimension_semantics=("parallel",),        # shard batch steps across TCs
        vmem_limit_bytes=vmem_limit)

    act_spec = pl.BlockSpec((batch_tile, H, W, C), lambda i: (i, 0, 0, 0))
    w_spec = pl.BlockSpec((9 * C, C), lambda i: (0, 0))
    vec_spec = pl.BlockSpec((1, C), lambda i: (0, 0))
    stats_spec = pl.BlockSpec((1, 2, C), lambda i: (i, 0, 0))

    act_shape = jax.ShapeDtypeStruct((N, H, W, C), jnp.bfloat16)   # bf16 inter-pass
    stats_shape = jax.ShapeDtypeStruct((g, 2, C), jnp.float32)
    scratch = [pltpu.VMEM((batch_tile, H, W, 9 * C), jnp.bfloat16)]  # im2col

    # ---- pass 1: conv1 + partial stats ------------------------------------
    y1_raw, st1 = pl.pallas_call(
        _conv_stats_kernel,
        grid=(g,),
        in_specs=[act_spec, w_spec],
        out_specs=(act_spec, stats_spec),
        out_shape=(act_shape, stats_shape),
        scratch_shapes=scratch,
        compiler_params=compiler_params,
    )(x_bf, w1m)
    scale1, bias1 = _fold_bn(st1, params["g1"], params["be1"], count)

    # ---- pass 2: bn1 + relu1 + conv3 + partial stats -----------------------
    y2_raw, st2 = pl.pallas_call(
        _bn_relu_conv_stats_kernel,
        grid=(g,),
        in_specs=[vec_spec, vec_spec, act_spec, w_spec],
        out_specs=(act_spec, stats_spec),
        out_shape=(act_shape, stats_shape),
        scratch_shapes=scratch,
        compiler_params=compiler_params,
    )(scale1, bias1, y1_raw, w2m)
    scale2, bias2 = _fold_bn(st2, params["g2"], params["be2"], count)

    # ---- pass 3: bn3 + relu3 -- plain jnp so XLA fuses it with the caller's
    # layout transpose (a standalone elementwise Pallas call cannot beat the
    # HBM roofline and adds launch/pipeline overhead).
    y = jnp.maximum(
        y2_raw.astype(jnp.float32) * scale2.reshape(1, 1, 1, C)
        + bias2.reshape(1, 1, 1, C), 0.0)
    return y.astype(out_dtype)


def decoder_bottleneck_layer(x_nchw, params):
    """NCHW in / NCHW out, matching the PyTorch module's interface.

    The transposes exist only to honour the NCHW interface; an NHWC model
    should call decoder_bottleneck_layer_nhwc directly and skip them.
    """
    x = jnp.transpose(x_nchw, (0, 2, 3, 1))
    y = decoder_bottleneck_layer_nhwc(x, params)
    return jnp.transpose(y, (0, 3, 1, 2))


# --------------------------------------------------------------------------
# parameters + pure-JAX reference
# --------------------------------------------------------------------------
def init_params(key, C):
    """Synthetic parameters with the module's shapes.

    Conv2d(C, C, 3, padding=1): weight stored HWIO (3, 3, C, C), bias (C,).
    BatchNorm2d(C): gamma=1, beta=0 (PyTorch defaults).
    The conv biases are kept only so the reference can verify that they are
    exactly cancelled by training-mode BatchNorm; the kernels do not use them.
    """
    k1, k2, k3, k4 = jax.random.split(key, 4)
    fan_in = C * 9
    bound = 1.0 / jnp.sqrt(fan_in)
    return {
        "w1": jax.random.uniform(k1, (3, 3, C, C), jnp.float32, -bound, bound),
        "b1": jax.random.uniform(k2, (C,), jnp.float32, -bound, bound),
        "w2": jax.random.uniform(k3, (3, 3, C, C), jnp.float32, -bound, bound),
        "b2": jax.random.uniform(k4, (C,), jnp.float32, -bound, bound),
        "g1": jnp.ones((1, C), jnp.float32), "be1": jnp.zeros((1, C), jnp.float32),
        "g2": jnp.ones((1, C), jnp.float32), "be2": jnp.zeros((1, C), jnp.float32),
    }


def _ref_forward_nhwc(x, params):
    """Pure-JAX f32 reference of the PyTorch module (conv bias included)."""
    def conv(x, w, b):
        y = lax.conv_general_dilated(
            x, w, window_strides=(1, 1), padding="SAME",
            dimension_numbers=("NHWC", "HWIO", "NHWC"),
            precision=lax.Precision.HIGHEST)
        return y + b.reshape(1, 1, 1, -1)

    def bn_relu(y, gamma, beta):
        mean = jnp.mean(y, axis=(0, 1, 2), keepdims=True)
        var = jnp.mean((y - mean) ** 2, axis=(0, 1, 2), keepdims=True)
        yn = (y - mean) * lax.rsqrt(var + EPS)
        return jnp.maximum(yn * gamma.reshape(1, 1, 1, -1)
                           + beta.reshape(1, 1, 1, -1), 0.0)

    y = bn_relu(conv(x, params["w1"], params["b1"]), params["g1"], params["be1"])
    y = bn_relu(conv(y, params["w2"], params["b2"]), params["g2"], params["be2"])
    return y


if __name__ == "__main__":
    key = jax.random.PRNGKey(0)
    kx, kp = jax.random.split(key)

    # Small but lane-dense demo shape (C multiple of 128 keeps vregs full and
    # the output store unmasked).
    N, C, H, W = 2, 128, 16, 16
    x = jax.random.normal(kx, (N, C, H, W), jnp.float32)
    params = init_params(kp, C)

    y = jax.block_until_ready(decoder_bottleneck_layer(x, params))
    assert y.shape == (N, C, H, W)
    assert bool(jnp.all(y >= 0.0))            # final ReLU
    assert bool(jnp.all(jnp.isfinite(y)))

    # Validate against the faithful f32 reference. bf16 MXU operands plus bf16
    # inter-pass activation storage => loose tolerance.
    x_nhwc = jnp.transpose(x, (0, 2, 3, 1))
    y_ref = jnp.transpose(_ref_forward_nhwc(x_nhwc, params), (0, 3, 1, 2))
    err = float(jnp.max(jnp.abs(y - y_ref)))
    assert err < 0.15, f"max abs err vs reference: {err}"

    print("KERNEL_OK")
</pallas_src>

<mosaic_0001>
module attributes {stable_mosaic.version = 11 : i64} {
  func.func @_conv_stats_kernel(%arg0: i32, %arg1: memref<2x16x16x128xbf16, #tpu.memory_space<vmem>>, %arg2: memref<1152x128xbf16, #tpu.memory_space<vmem>>, %arg3: memref<2x16x16x128xbf16, #tpu.memory_space<vmem>>, %arg4: memref<1x2x128xf32, #tpu.memory_space<vmem>>, %arg5: memref<2x16x16x1152xbf16, #tpu.memory_space<vmem>>) attributes {dimension_semantics = [#tpu.dimension_semantics<parallel>], iteration_bounds = array<i64: 1>, scalar_prefetch = 0 : i64, scratch_operands = 1 : i64, tpu.core_type = #tpu.core_type<tc>, window_params = [{transform_indices = @transform_0, window_bounds = array<i64: 2, 16, 16, 128>}, {pipeline_mode = #tpu.pipeline_mode<synchronous>, transform_indices = @transform_1, window_bounds = array<i64: 1152, 128>}, {transform_indices = @transform_2, window_bounds = array<i64: 2, 16, 16, 128>}, {transform_indices = @transform_3, window_bounds = array<i64: 1, 2, 128>}]} {
    %c0 = arith.constant 0 : index
    %c0_0 = arith.constant 0 : index
    %c0_1 = arith.constant 0 : index
    %c0_2 = arith.constant 0 : index
    %0 = vector.load %arg1[%c0, %c0_0, %c0_1, %c0_2] : memref<2x16x16x128xbf16, #tpu.memory_space<vmem>>, vector<2x15x15x128xbf16>
    %c0_3 = arith.constant 0 : index
    %c1 = arith.constant 1 : index
    %c1_4 = arith.constant 1 : index
    %c0_5 = arith.constant 0 : index
    %1 = vector.load %arg5[%c0_3, %c1, %c1_4, %c0_5] : memref<2x16x16x1152xbf16, #tpu.memory_space<vmem>>, vector<2x15x15x128xbf16>
    tpu.vector_store %arg5[%c0_3, %c1, %c1_4, %c0_5], %0 {strides = array<i32>} : memref<2x16x16x1152xbf16, #tpu.memory_space<vmem>>, vector<2x15x15x128xbf16>,
    %cst = arith.constant 0.000000e+00 : bf16
    %2 = vector.broadcast %cst : bf16 to vector<2x1x16x128xbf16>
    %c0_6 = arith.constant 0 : index
    %c0_7 = arith.constant 0 : index
    %c0_8 = arith.constant 0 : index
    %c0_9 = arith.constant 0 : index
    %3 = vector.load %arg5[%c0_6, %c0_7, %c0_8, %c0_9] : memref<2x16x16x1152xbf16, #tpu.memory_space<vmem>>, vector<2x1x16x128xbf16>
    tpu.vector_store %arg5[%c0_6, %c0_7, %c0_8, %c0_9], %2 {strides = array<i32>} : memref<2x16x16x1152xbf16, #tpu.memory_space<vmem>>, vector<2x1x16x128xbf16>,
    %cst_10 = arith.constant 0.000000e+00 : bf16
    %4 = vector.broadcast %cst_10 : bf16 to vector<2x16x1x128xbf16>
    %c0_11 = arith.constant 0 : index
    %c0_12 = arith.constant 0 : index
    %c0_13 = arith.constant 0 : index
    %c0_14 = arith.constant 0 : index
    %5 = vector.load %arg5[%c0_11, %c0_12, %c0_13, %c0_14] : memref<2x16x16x1152xbf16, #tpu.memory_space<vmem>>, vector<2x16x1x128xbf16>
    tpu.vector_store %arg5[%c0_11, %c0_12, %c0_13, %c0_14], %4 {strides = array<i32>} : memref<2x16x16x1152xbf16, #tpu.memory_space<vmem>>, vector<2x16x1x128xbf16>,
    %c0_15 = arith.constant 0 : index
    %c0_16 = arith.constant 0 : index
    %c0_17 = arith.constant 0 : index
    %c0_18 = arith.constant 0 : index
    %6 = vector.load %arg1[%c0_15, %c0_16, %c0_17, %c0_18] : memref<2x16x16x128xbf16, #tpu.memory_space<vmem>>, vector<2x15x16x128xbf16>
    %c0_19 = arith.constant 0 : index
    %c1_20 = arith.constant 1 : index
    %c0_21 = arith.constant 0 : index
    %c128 = arith.constant 128 : index
    %7 = vector.load %arg5[%c0_19, %c1_20, %c0_21, %c128] : memref<2x16x16x1152xbf16, #tpu.memory_space<vmem>>, vector<2x15x16x128xbf16>
    tpu.vector_store %arg5[%c0_19, %c1_20, %c0_21, %c128], %6 {strides = array<i32>} : memref<2x16x16x1152xbf16, #tpu.memory_space<vmem>>, vector<2x15x16x128xbf16>,
    %cst_22 = arith.constant 0.000000e+00 : bf16
    %8 = vector.broadcast %cst_22 : bf16 to vector<2x1x16x128xbf16>
    %c0_23 = arith.constant 0 : index
    %c0_24 = arith.constant 0 : index
    %c0_25 = arith.constant 0 : index
    %c128_26 = arith.constant 128 : index
    %9 = vector.load %arg5[%c0_23, %c0_24, %c0_25, %c128_26] : memref<2x16x16x1152xbf16, #tpu.memory_space<vmem>>, vector<2x1x16x128xbf16>
    tpu.vector_store %arg5[%c0_23, %c0_24, %c0_25, %c128_26], %8 {strides = array<i32>} : memref<2x16x16x1152xbf16, #tpu.memory_space<vmem>>, vector<2x1x16x128xbf16>,
    %c0_27 = arith.constant 0 : index
    %c0_28 = arith.constant 0 : index
    %c1_29 = arith.constant 1 : index
    %c0_30 = arith.constant 0 : index
    %10 = vector.load %arg1[%c0_27, %c0_28, %c1_29, %c0_30] : memref<2x16x16x128xbf16, #tpu.memory_space<vmem>>, vector<2x15x15x128xbf16>
    %c0_31 = arith.constant 0 : index
    %c1_32 = arith.constant 1 : index
    %c0_33 = arith.constant 0 : index
    %c256 = arith.constant 256 : index
    %11 = vector.load %arg5[%c0_31, %c1_32, %c0_33, %c256] : memref<2x16x16x1152xbf16, #tpu.memory_space<vmem>>, vector<2x15x15x128xbf16>
    tpu.vector_store %arg5[%c0_31, %c1_32, %c0_33, %c256], %10 {strides = array<i32>} : memref<2x16x16x1152xbf16, #tpu.memory_space<vmem>>, vector<2x15x15x128xbf16>,
    %cst_34 = arith.constant 0.000000e+00 : bf16
    %12 = vector.broadcast %cst_34 : bf16 to vector<2x1x16x128xbf16>
    %c0_35 = arith.constant 0 : index
    %c0_36 = arith.constant 0 : index
    %c0_37 = arith.constant 0 : index
    %c256_38 = arith.constant 256 : index
    %13 = vector.load %arg5[%c0_35, %c0_36, %c0_37, %c256_38] : memref<2x16x16x1152xbf16, #tpu.memory_space<vmem>>, vector<2x1x16x128xbf16>
    tpu.vector_store %arg5[%c0_35, %c0_36, %c0_37, %c256_38], %12 {strides = array<i32>} : memref<2x16x16x1152xbf16, #tpu.memory_space<vmem>>, vector<2x1x16x128xbf16>,
    %cst_39 = arith.constant 0.000000e+00 : bf16
    %14 = vector.broadcast %cst_39 : bf16 to vector<2x16x1x128xbf16>
    %c0_40 = arith.constant 0 : index
    %c0_41 = arith.constant 0 : index
    %c15 = arith.constant 15 : index
    %c256_42 = arith.constant 256 : index
    %15 = vector.load %arg5[%c0_40, %c0_41, %c15, %c256_42] : memref<2x16x16x1152xbf16, #tpu.memory_space<vmem>>, vector<2x16x1x128xbf16>
    tpu.vector_store %arg5[%c0_40, %c0_41, %c15, %c256_42], %14 {strides = array<i32>} : memref<2x16x16x1152xbf16, #tpu.memory_space<vmem>>, vector<2x16x1x128xbf16>,
    %c0_43 = arith.constant 0 : index
    %c0_44 = arith.constant 0 : index
    %c0_45 = arith.constant 0 : index
    %c0_46 = arith.constant 0 : index
    %16 = vector.load %arg1[%c0_43, %c0_44, %c0_45, %c0_46] : memref<2x16x16x128xbf16, #tpu.memory_space<vmem>>, vector<2x16x15x128xbf16>
    %c0_47 = arith.constant 0 : index
    %c0_48 = arith.constant 0 : index
    %c1_49 = arith.constant 1 : index
    %c384 = arith.constant 384 : index
    %17 = vector.load %arg5[%c0_47, %c0_48, %c1_49, %c384] : memref<2x16x16x1152xbf16, #tpu.memory_space<vmem>>, vector<2x16x15x128xbf16>
    tpu.vector_store %arg5[%c0_47, %c0_48, %c1_49, %c384], %16 {strides = array<i32>} : memref<2x16x16x1152xbf16, #tpu.memory_space<vmem>>, vector<2x16x15x128xbf16>,
    %cst_50 = arith.constant 0.000000e+00 : bf16
    %18 = vector.broadcast %cst_50 : bf16 to vector<2x16x1x128xbf16>
    %c0_51 = arith.constant 0 : index
    %c0_52 = arith.constant 0 : index
    %c0_53 = arith.constant 0 : index
    %c384_54 = arith.constant 384 : index
    %19 = vector.load %arg5[%c0_51, %c0_52, %c0_53, %c384_54] : memref<2x16x16x1152xbf16, #tpu.memory_space<vmem>>, vector<2x16x1x128xbf16>
    tpu.vector_store %arg5[%c0_51, %c0_52, %c0_53, %c384_54], %18 {strides = array<i32>} : memref<2x16x16x1152xbf16, #tpu.memory_space<vmem>>, vector<2x16x1x128xbf16>,
    %c0_55 = arith.constant 0 : index
    %c0_56 = arith.constant 0 : index
    %c0_57 = arith.constant 0 : index
    %c0_58 = arith.constant 0 : index
    %20 = vector.load %arg1[%c0_55, %c0_56, %c0_57, %c0_58] : memref<2x16x16x128xbf16, #tpu.memory_space<vmem>>, vector<2x16x16x128xbf16>
    %c0_59 = arith.constant 0 : index
    %c0_60 = arith.constant 0 : index
    %c0_61 = arith.constant 0 : index
    %c512 = arith.constant 512 : index
    %21 = vector.load %arg5[%c0_59, %c0_60, %c0_61, %c512] : memref<2x16x16x1152xbf16, #tpu.memory_space<vmem>>, vector<2x16x16x128xbf16>
    tpu.vector_store %arg5[%c0_59, %c0_60, %c0_61, %c512], %20 {strides = array<i32>} : memref<2x16x16x1152xbf16, #tpu.memory_space<vmem>>, vector<2x16x16x128xbf16>,
    %c0_62 = arith.constant 0 : index
    %c0_63 = arith.constant 0 : index
    %c1_64 = arith.constant 1 : index
    %c0_65 = arith.constant 0 : index
    %22 = vector.load %arg1[%c0_62, %c0_63, %c1_64, %c0_65] : memref<2x16x16x128xbf16, #tpu.memory_space<vmem>>, vector<2x16x15x128xbf16>
    %c0_66 = arith.constant 0 : index
    %c0_67 = arith.constant 0 : index
    %c0_68 = arith.constant 0 : index
    %c640 = arith.constant 640 : index
    %23 = vector.load %arg5[%c0_66, %c0_67, %c0_68, %c640] : memref<2x16x16x1152xbf16, #tpu.memory_space<vmem>>, vector<2x16x15x128xbf16>
    tpu.vector_store %arg5[%c0_66, %c0_67, %c0_68, %c640], %22 {strides = array<i32>} : memref<2x16x16x1152xbf16, #tpu.memory_space<vmem>>, vector<2x16x15x128xbf16>,
    %cst_69 = arith.constant 0.000000e+00 : bf16
    %24 = vector.broadcast %cst_69 : bf16 to vector<2x16x1x128xbf16>
    %c0_70 = arith.constant 0 : index
    %c0_71 = arith.constant 0 : index
    %c15_72 = arith.constant 15 : index
    %c640_73 = arith.constant 640 : index
    %25 = vector.load %arg5[%c0_70, %c0_71, %c15_72, %c640_73] : memref<2x16x16x1152xbf16, #tpu.memory_space<vmem>>, vector<2x16x1x128xbf16>
    tpu.vector_store %arg5[%c0_70, %c0_71, %c15_72, %c640_73], %24 {strides = array<i32>} : memref<2x16x16x1152xbf16, #tpu.memory_space<vmem>>, vector<2x16x1x128xbf16>,
    %c0_74 = arith.constant 0 : index
    %c1_75 = arith.constant 1 : index
    %c0_76 = arith.constant 0 : index
    %c0_77 = arith.constant 0 : index
    %26 = vector.load %arg1[%c0_74, %c1_75, %c0_76, %c0_77] : memref<2x16x16x128xbf16, #tpu.memory_space<vmem>>, vector<2x15x15x128xbf16>
    %c0_78 = arith.constant 0 : index
    %c0_79 = arith.constant 0 : index
    %c1_80 = arith.constant 1 : index
    %c768 = arith.constant 768 : index
    %27 = vector.load %arg5[%c0_78, %c0_79, %c1_80, %c768] : memref<2x16x16x1152xbf16, #tpu.memory_space<vmem>>, vector<2x15x15x128xbf16>
    tpu.vector_store %arg5[%c0_78, %c0_79, %c1_80, %c768], %26 {strides = array<i32>} : memref<2x16x16x1152xbf16, #tpu.memory_space<vmem>>, vector<2x15x15x128xbf16>,
    %cst_81 = arith.constant 0.000000e+00 : bf16
    %28 = vector.broadcast %cst_81 : bf16 to vector<2x1x16x128xbf16>
    %c0_82 = arith.constant 0 : index
    %c15_83 = arith.constant 15 : index
    %c0_84 = arith.constant 0 : index
    %c768_85 = arith.constant 768 : index
    %29 = vector.load %arg5[%c0_82, %c15_83, %c0_84, %c768_85] : memref<2x16x16x1152xbf16, #tpu.memory_space<vmem>>, vector<2x1x16x128xbf16>
    tpu.vector_store %arg5[%c0_82, %c15_83, %c0_84, %c768_85], %28 {strides = array<i32>} : memref<2x16x16x1152xbf16, #tpu.memory_space<vmem>>, vector<2x1x16x128xbf16>,
    %cst_86 = arith.constant 0.000000e+00 : bf16
    %30 = vector.broadcast %cst_86 : bf16 to vector<2x16x1x128xbf16>
    %c0_87 = arith.constant 0 : index
    %c0_88 = arith.constant 0 : index
    %c0_89 = arith.constant 0 : index
    %c768_90 = arith.constant 768 : index
    %31 = vector.load %arg5[%c0_87, %c0_88, %c0_89, %c768_90] : memref<2x16x16x1152xbf16, #tpu.memory_space<vmem>>, vector<2x16x1x128xbf16>
    tpu.vector_store %arg5[%c0_87, %c0_88, %c0_89, %c768_90], %30 {strides = array<i32>} : memref<2x16x16x1152xbf16, #tpu.memory_space<vmem>>, vector<2x16x1x128xbf16>,
    %c0_91 = arith.constant 0 : index
    %c1_92 = arith.constant 1 : index
    %c0_93 = arith.constant 0 : index
    %c0_94 = arith.constant 0 : index
    %32 = vector.load %arg1[%c0_91, %c1_92, %c0_93, %c0_94] : memref<2x16x16x128xbf16, #tpu.memory_space<vmem>>, vector<2x15x16x128xbf16>
    %c0_95 = arith.constant 0 : index
    %c0_96 = arith.constant 0 : index
    %c0_97 = arith.constant 0 : index
    %c896 = arith.constant 896 : index
    %33 = vector.load %arg5[%c0_95, %c0_96, %c0_97, %c896] : memref<2x16x16x1152xbf16, #tpu.memory_space<vmem>>, vector<2x15x16x128xbf16>
    tpu.vector_store %arg5[%c0_95, %c0_96, %c0_97, %c896], %32 {strides = array<i32>} : memref<2x16x16x1152xbf16, #tpu.memory_space<vmem>>, vector<2x15x16x128xbf16>,
    %cst_98 = arith.constant 0.000000e+00 : bf16
    %34 = vector.broadcast %cst_98 : bf16 to vector<2x1x16x128xbf16>
    %c0_99 = arith.constant 0 : index
    %c15_100 = arith.constant 15 : index
    %c0_101 = arith.constant 0 : index
    %c896_102 = arith.constant 896 : index
    %35 = vector.load %arg5[%c0_99, %c15_100, %c0_101, %c896_102] : memref<2x16x16x1152xbf16, #tpu.memory_space<vmem>>, vector<2x1x16x128xbf16>
    tpu.vector_store %arg5[%c0_99, %c15_100, %c0_101, %c896_102], %34 {strides = array<i32>} : memref<2x16x16x1152xbf16, #tpu.memory_space<vmem>>, vector<2x1x16x128xbf16>,
    %c0_103 = arith.constant 0 : index
    %c1_104 = arith.constant 1 : index
    %c1_105 = arith.constant 1 : index
    %c0_106 = arith.constant 0 : index
    %36 = vector.load %arg1[%c0_103, %c1_104, %c1_105, %c0_106] : memref<2x16x16x128xbf16, #tpu.memory_space<vmem>>, vector<2x15x15x128xbf16>
    %c0_107 = arith.constant 0 : index
    %c0_108 = arith.constant 0 : index
    %c0_109 = arith.constant 0 : index
    %c1024 = arith.constant 1024 : index
    %37 = vector.load %arg5[%c0_107, %c0_108, %c0_109, %c1024] : memref<2x16x16x1152xbf16, #tpu.memory_space<vmem>>, vector<2x15x15x128xbf16>
    tpu.vector_store %arg5[%c0_107, %c0_108, %c0_109, %c1024], %36 {strides = array<i32>} : memref<2x16x16x1152xbf16, #tpu.memory_space<vmem>>, vector<2x15x15x128xbf16>,
    %cst_110 = arith.constant 0.000000e+00 : bf16
    %38 = vector.broadcast %cst_110 : bf16 to vector<2x1x16x128xbf16>
    %c0_111 = arith.constant 0 : index
    %c15_112 = arith.constant 15 : index
    %c0_113 = arith.constant 0 : index
    %c1024_114 = arith.constant 1024 : index
    %39 = vector.load %arg5[%c0_111, %c15_112, %c0_113, %c1024_114] : memref<2x16x16x1152xbf16, #tpu.memory_space<vmem>>, vector<2x1x16x128xbf16>
    tpu.vector_store %arg5[%c0_111, %c15_112, %c0_113, %c1024_114], %38 {strides = array<i32>} : memref<2x16x16x1152xbf16, #tpu.memory_space<vmem>>, vector<2x1x16x128xbf16>,
    %cst_115 = arith.constant 0.000000e+00 : bf16
    %40 = vector.broadcast %cst_115 : bf16 to vector<2x16x1x128xbf16>
    %c0_116 = arith.constant 0 : index
    %c0_117 = arith.constant 0 : index
    %c15_118 = arith.constant 15 : index
    %c1024_119 = arith.constant 1024 : index
    %41 = vector.load %arg5[%c0_116, %c0_117, %c15_118, %c1024_119] : memref<2x16x16x1152xbf16, #tpu.memory_space<vmem>>, vector<2x16x1x128xbf16>
    tpu.vector_store %arg5[%c0_116, %c0_117, %c15_118, %c1024_119], %40 {strides = array<i32>} : memref<2x16x16x1152xbf16, #tpu.memory_space<vmem>>, vector<2x16x1x128xbf16>,
    %c0_120 = arith.constant 0 : index
    %c0_121 = arith.constant 0 : index
    %c0_122 = arith.constant 0 : index
    %c0_123 = arith.constant 0 : index
    %42 = vector.load %arg5[%c0_120, %c0_121, %c0_122, %c0_123] : memref<2x16x16x1152xbf16, #tpu.memory_space<vmem>>, vector<2x16x16x1152xbf16>
    %43 = vector.shape_cast %42 : vector<2x16x16x1152xbf16> to vector<512x1152xbf16>
    %c0_124 = arith.constant 0 : index
    %c0_125 = arith.constant 0 : index
    %44 = vector.load %arg2[%c0_124, %c0_125] : memref<1152x128xbf16, #tpu.memory_space<vmem>>, vector<1152x128xbf16>
    %cst_126 = arith.constant dense<0.000000e+00> : vector<512x128xf32>
    %45 = tpu.matmul %43, %44, %cst_126 {dimension_numbers = #tpu.dot_dimension_numbers<[1], [0], [0], [1], [0, 0, 1, 1], [], []>} : vector<512x1152xbf16>, vector<1152x128xbf16>, vector<512x128xf32> -> vector<512x128xf32>
    %46 = vector.shape_cast %45 : vector<512x128xf32> to vector<2x16x16x128xf32>
    %47 = arith.truncf %46 : vector<2x16x16x128xf32> to vector<2x16x16x128xbf16>
    %c0_127 = arith.constant 0 : index
    %c0_128 = arith.constant 0 : index
    %c0_129 = arith.constant 0 : index
    %c0_130 = arith.constant 0 : index
    %48 = vector.load %arg3[%c0_127, %c0_128, %c0_129, %c0_130] : memref<2x16x16x128xbf16, #tpu.memory_space<vmem>>, vector<2x16x16x128xbf16>
    tpu.vector_store %arg3[%c0_127, %c0_128, %c0_129, %c0_130], %47 {strides = array<i32>} : memref<2x16x16x128xbf16, #tpu.memory_space<vmem>>, vector<2x16x16x128xbf16>,
    %cst_131 = arith.constant dense<0.000000e+00> : vector<128xf32>
    %49 = vector.multi_reduction <add>, %45, %cst_131 [0] : vector<512x128xf32> to vector<128xf32>
    %50 = vector.shape_cast %49 : vector<128xf32> to vector<1x128xf32>
    %51 = arith.mulf %45, %45 : vector<512x128xf32>
    %cst_132 = arith.constant dense<0.000000e+00> : vector<128xf32>
    %52 = vector.multi_reduction <add>, %51, %cst_132 [0] : vector<512x128xf32> to vector<128xf32>
    %53 = vector.shape_cast %52 : vector<128xf32> to vector<1x128xf32>
    %54 = tpu.concatenate %50, %53 in 0 : vector<1x128xf32>, vector<1x128xf32> -> vector<2x128xf32>
    %c0_133 = arith.constant 0 : index
    %c0_134 = arith.constant 0 : index
    %c0_135 = arith.constant 0 : index
    %55 = vector.load %arg4[%c0_133, %c0_134, %c0_135] : memref<1x2x128xf32, #tpu.memory_space<vmem>>, vector<1x2x128xf32>
    %56 = vector.shape_cast %55 : vector<1x2x128xf32> to vector<2x128xf32>
    %57 = vector.shape_cast %54 : vector<2x128xf32> to vector<1x2x128xf32>
    tpu.vector_store %arg4[%c0_133, %c0_134, %c0_135], %57 {strides = array<i32>} : memref<1x2x128xf32, #tpu.memory_space<vmem>>, vector<1x2x128xf32>,
    return
  }
  func.func @transform_0(%arg0: i32) -> (i32, i32, i32, i32) {
    %c0_i32 = arith.constant 0 : i32
    %c0_i32_0 = arith.constant 0 : i32
    %c0_i32_1 = arith.constant 0 : i32
    %c0_i32_2 = arith.constant 0 : i32
    return %arg0, %c0_i32, %c0_i32_0, %c0_i32_1 : i32, i32, i32, i32
  }
  func.func @transform_1(%arg0: i32) -> (i32, i32) {
    %c0_i32 = arith.constant 0 : i32
    %c0_i32_0 = arith.constant 0 : i32
    %c0_i32_1 = arith.constant 0 : i32
    return %c0_i32, %c0_i32_0 : i32, i32
  }
  func.func @transform_2(%arg0: i32) -> (i32, i32, i32, i32) {
    %c0_i32 = arith.constant 0 : i32
    %c0_i32_0 = arith.constant 0 : i32
    %c0_i32_1 = arith.constant 0 : i32
    %c0_i32_2 = arith.constant 0 : i32
    return %arg0, %c0_i32, %c0_i32_0, %c0_i32_1 : i32, i32, i32, i32
  }
  func.func @transform_3(%arg0: i32) -> (i32, i32, i32) {
    %c0_i32 = arith.constant 0 : i32
    %c0_i32_0 = arith.constant 0 : i32
    %c0_i32_1 = arith.constant 0 : i32
    return %arg0, %c0_i32, %c0_i32_0 : i32, i32, i32
  }
}

</mosaic_0001>

<bundles_post_ra>
// kernel: tpu_custom_call.1
= control target key start
LH: loop header
LB: loop body
LE: loop exit
PB: predicated region body
PF: predicated region fallthrough
CT: control target
= control target key end

     0   :  { %9 = vsyncpa [#allocation4], 0  ;;  %s13603_s0 = inlined_call_operand.hbm [shape: bf16[2,16,16,128], index: 0, kind: input, shape index: {}]   ;;  %s13604_s1 = inlined_call_operand.hbm [shape: bf16[1152,128], index: 1, kind: input, shape index: {}]   ;;  %s13605_s2 = inlined_call_operand.hbm [shape: bf16[2,16,16,128], index: 2, kind: output, shape index: {0}]   ;;  %s13606_s3 = inlined_call_operand.hbm [shape: f32[1,2,128], index: 3, kind: output, shape index: {1}]  }
   0x1   :  { %10 = vsyncpa [#allocation7], 0 }
   0x2   :  { %11 = vsyncpa [#allocation5], 0 }
   0x3   :  { %12 = vsyncpa [#allocation10], 0  ;;  %s11507_s12 = smov [#allocation3]  }
   0x4   :  { %s18_s13 = sshll.u32 %s11507_s12, 4  ;;  %s19_s13 = int_to_ptr.vmem [resolvable:$true] %s18_s13 }
   0x5   :  { %s11427_s14 = scalar_lea.vmem %s19_s13, 4096  ;;  %p11432_p1 = scmp.lt.s32.totalorder %s19_s13, %s19_s13 }
   0x6   :  { %p11428_p0 = scmp.ne.s32.totalorder %s19_s13, %s11427_s14  ;;  %p11433_p2 = scmp.lt.s32.totalorder %s11427_s14, %s11427_s14 }
   0x8   :  { %p11434_p3 = por %p11433_p2, %p11432_p1 }
   0xa   :  { %p11435_p4 = pnand %p11434_p3, %p11428_p0 }
   0xc   :  { %11438 = shalt.err (!%p11435_p4)
}
   0xd   :  { %s11508_s15 = smov 64   ;;  %s11509_s16 = smov 4  }
   0xe   :  { %24 = dma.hbm_to_vmem [thread:$0]  %s13603_s0, 4096, %s19_s13, [#allocation4], %s11508_s15, %s11508_s15, %s11509_s16  }
   0xf   :  { %s11510_s19 = smov [#allocation6]  }
  0x10   :  { %s30_s20 = sshll.u32 %s11510_s19, 4  ;;  %s31_s20 = int_to_ptr.vmem [resolvable:$true] %s30_s20 }
  0x11   :  { %s11447_s21 = scalar_lea.vmem %s31_s20, 9216  ;;  %p11452_p6 = scmp.lt.s32.totalorder %s31_s20, %s31_s20 }
  0x12   :  { %p11448_p5 = scmp.ne.s32.totalorder %s31_s20, %s11447_s21  ;;  %p11453_p7 = scmp.lt.s32.totalorder %s11447_s21, %s11447_s21 }
  0x14   :  { %p11454_p8 = por %p11453_p7, %p11452_p6 }
  0x16   :  { %p11455_p9 = pnand %p11454_p8, %p11448_p5 }
  0x18   :  { %11458 = shalt.err (!%p11455_p9)
}
  0x19   :  { %36 = dma.hbm_to_vmem [thread:$0]  %s13604_s1, 9216, %s31_s20, [#allocation7], %s11508_s15, %s11508_s15, %s11509_s16  }
  0x1a   :  { %11499 = dma.done.wait [#allocation4], 4096  }
  0x1b   :  { %11500 = vsyncadd [#allocation4], 4294963200 }
  0x1c   :  { %11501 = dma.done.wait [#allocation7], 9216  }
  0x1d   :  { %11502 = vsyncadd [#allocation7], 4294958080  ;;  %v13607_v0 = vmov 0   ;;  %v10930_v1 = vld [vmem:[#allocation6 + $0x38] sm:$0xff]   ;;  %v10931_v2 = vld [vmem:[#allocation6 + $0x30] sm:$0xff]   ;;  %vm775_vm1 = vcmask 1040384  }
  0x1e   :  { %8090 = vmatprep.subr.bf16.mxu0 %v13607_v0  ;;  %771 = vst [vmem:[#allocation2] sm:$0xf] %v13607_v0  ;;  %772 = vst [vmem:[#allocation2 + $0x24] sm:$0xf] %v13607_v0  ;;  %10891 = vmatprep.subr.bf16.mxu1 %v13607_v0  ;;  %v10932_v3 = vld [vmem:[#allocation6 + $0x28] sm:$0xff]   ;;  %v10933_v4 = vld [vmem:[#allocation6 + $0x20] sm:$0xff]  }
  0x1f   :  { %773 = vst [vmem:[#allocation2 + $0x480] sm:$0xf] %v13607_v0  ;;  %774 = vst [vmem:[#allocation2 + $0x4a4] sm:$0xf] %v13607_v0  ;;  %8091 = vmatpush1.bf16.msra.mxu0 %v10930_v1  ;;  %10907 = vmatpush1.bf16.msra.mxu1 %v10930_v1  ;;  %vm104_vm0 = vsmask.f32 256 }
  0x20   :  { %993 = vst [vmem:[#allocation2 + $0x4] sm:$0xf] %v13607_v0  ;;  %994 = vst [vmem:[#allocation2 + $0x28] sm:$0xf] %v13607_v0  ;;  %8092 = vmatprep.subr.bf16.mxu0 %v13607_v0  ;;  %10892 = vmatprep.subr.bf16.mxu1 %v13607_v0  ;;  %vm105_vm3 = vsmask.f32 4368 }
  0x21   :  { %995 = vst [vmem:[#allocation2 + $0x484] sm:$0xf] %v13607_v0  ;;  %996 = vst [vmem:[#allocation2 + $0x4a8] sm:$0xf] %v13607_v0  ;;  %v10934_v6 = vld [vmem:[#allocation6 + $0x18] sm:$0xff]   ;;  %vm648_vm5 = vcmask 1043456  }
  0x22   :  { %1811 = vst [vmem:[#allocation2 + $0x8] sm:$0xf] %v13607_v0  ;;  %1812 = vst [vmem:[#allocation2 + $0x2c] sm:$0xf] %v13607_v0  ;;  %vm649_vm4 = vsmask.f32 7938 }
  0x23   :  { %1813 = vst [vmem:[#allocation2 + $0x488] sm:$0xf] %v13607_v0  ;;  %1814 = vst [vmem:[#allocation2 + $0x4ac] sm:$0xf] %v13607_v0  ;;  %8093 = vmatpush1.bf16.msra.mxu0 %v10931_v2  ;;  %10908 = vmatpush1.bf16.msra.mxu1 %v10931_v2  ;;  %v88_v8 = vld [vmem:[#allocation3 + $0xb8] sm:$0xf] }
  0x24   :  { %4588 = vst [vmem:[#allocation2 + $0x450] sm:$0xf] %v13607_v0  ;;  %4589 = vst [vmem:[#allocation2 + $0x474] sm:$0xf] %v13607_v0  ;;  %8094 = vmatprep.subr.bf16.mxu0 %v13607_v0  ;;  %10893 = vmatprep.subr.bf16.mxu1 %v13607_v0  ;;  %v10935_v9 = vld [vmem:[#allocation6 + $0x10] sm:$0xff]   ;;  %v460_v12 = vshrl.u32 %v88_v8, 16 }
  0x25   :  { %4590 = vst [vmem:[#allocation2 + $0x8d0] sm:$0xf] %v13607_v0  ;;  %4591 = vst [vmem:[#allocation2 + $0x8f4] sm:$0xf] %v13607_v0  ;;  %v777_v7 = vld [vmem:[#allocation2] sm:$0x1] }
  0x26   :  { %4808 = vst [vmem:[#allocation2 + $0x454] sm:$0xf] %v13607_v0  ;;  %4809 = vst [vmem:[#allocation2 + $0x478] sm:$0xf] %v13607_v0  ;;  %v89_v11 = vld [vmem:[#allocation3 + $0xbc] sm:$0xf] }
  0x27   :  { %4810 = vst [vmem:[#allocation2 + $0x8d4] sm:$0xf] %v13607_v0  ;;  %4811 = vst [vmem:[#allocation2 + $0x8f8] sm:$0xf] %v13607_v0  ;;  %8095 = vmatpush1.bf16.msra.mxu0 %v10932_v3  ;;  %10909 = vmatpush1.bf16.msra.mxu1 %v10932_v3  ;;  %v463_v13 = vshll.u32 %v88_v8, 16  ;;  %v468_v14 = vshrl.u32 %v89_v11, 16 }
  0x28   :  { %5622 = vst [vmem:[#allocation2 + $0x458] sm:$0xf] %v13607_v0  ;;  %5623 = vst [vmem:[#allocation2 + $0x47c] sm:$0xf] %v13607_v0  ;;  %8096 = vmatprep.subr.bf16.mxu0 %v13607_v0  ;;  %10894 = vmatprep.subr.bf16.mxu1 %v13607_v0  ;;  %v471_v15 = vshll.u32 %v89_v11, 16  ;;  %v462_v19 = vrot.slane %v460_v12, 7 }
  0x29   :  { %5624 = vst [vmem:[#allocation2 + $0x8d8] sm:$0xf] %v13607_v0  ;;  %5625 = vst [vmem:[#allocation2 + $0x8fc] sm:$0xf] %v13607_v0  ;;  %v739_v16 = vld [vmem:[#allocation2 + $0x6c0] sm:$0xf] }
  0x2a   :  { %vm11580_vm2 = vmand %vm775_vm1, %vm104_vm0  ;;  %v917_v17 = vld [vmem:[#allocation3 + $0xb8] sm:$0xf]  ;;  %v918_v20 = vld [vmem:[#allocation3 + $0xbc] sm:$0xf]  ;;  %v470_v21 = vrot.slane %v468_v14, 7  ;;  %v465_v24 = vor.u32 %v463_v13, %v462_v19  ;;  %v466_v25 = vrot.slane %v462_v19, 4 }
  0x2b   :  { %8097 = vmatpush1.bf16.msra.mxu0 %v10933_v4  ;;  %10910 = vmatpush1.bf16.msra.mxu1 %v10933_v4  ;;  %v778_v10 = vsel %vm11580_vm2, 0, %v777_v7  ;;  %vm11592_vm6 = vmor %vm104_vm0, %vm105_vm3  ;;  %977 = vst [vmem:[#allocation2 + $0x6c4] sm:$0xf] %v917_v17  ;;  %v10936_v23 = vld [vmem:[#allocation6 + $0x8] sm:$0xff]   ;;  %v44_v27 = vld [vmem:[#allocation3] sm:$0xf] }
  0x2c   :  { %8098 = vmatprep.subr.bf16.mxu0 %v13607_v0  ;;  %10895 = vmatprep.subr.bf16.mxu1 %v13607_v0  ;;  %779 = vst [vmem:[#allocation2] sm:$0x1] %v778_v10  ;;  %vm11598_vm7 = vmand %vm648_vm5, %vm649_vm4  ;;  %v473_v26 = vor.u32 %v471_v15, %v470_v21  ;;  %v45_v28 = vld [vmem:[#allocation3 + $0x4] sm:$0xf]  ;;  %v108_v30 = vshrl.u32 %v44_v27, 16  ;;  %v111_v31 = vshll.u32 %v44_v27, 16 }
  0x2d   :  { %978 = vst [vmem:[#allocation2 + $0x6e8] sm:$0xf] %v918_v20  ;;  %v740_v29 = vsel %vm11598_vm7, %v465_v24, %v739_v16  ;;  %v116_v32 = vshrl.u32 %v45_v28, 16  ;;  %v119_v34 = vshll.u32 %v45_v28, 16  ;;  %v873_v35 = vld [vmem:[#allocation3] sm:$0xf] }
  0x2e   :  { %v474_v33 = vsel %vm11592_vm6, %v466_v25, %v473_v26  ;;  %741 = vst [vmem:[#allocation2 + $0x6c0] sm:$0xf] %v740_v29  ;;  %v874_v36 = vld [vmem:[#allocation3 + $0x4] sm:$0xf]  ;;  %v110_v38 = vrot.slane %v108_v30, 7  ;;  %v10938_v56 = vld [vmem:[#allocation6 + $0x78] sm:$0xff]  }
  0x2f   :  { %8099 = vmatpush1.bf16.msra.mxu0 %v10934_v6  ;;  %10911 = vmatpush1.bf16.msra.mxu1 %v10934_v6  ;;  %v10948_v37 = vld [vmem:[#allocation2 + $0x4] ss:$36 sps:$4 sm:$0xff]   ;;  %742 = vst [vmem:[#allocation2 + $0x6e4] sm:$0xf] %v474_v33  ;;  %933 = vst [vmem:[#allocation2 + $0x4c] sm:$0xf] %v873_v35 }
  0x30   :  { %8100 = vmatprep.subr.bf16.mxu0 %v13607_v0  ;;  %10896 = vmatprep.subr.bf16.mxu1 %v13607_v0  ;;  %v651_v39 = vld [vmem:[#allocation2 + $0x48] sm:$0xf]  ;;  %934 = vst [vmem:[#allocation2 + $0x70] sm:$0xf] %v874_v36  ;;  %v10937_v40 = vld [vmem:[#allocation6] sm:$0xff]   ;;  %v118_v41 = vrot.slane %v116_v32, 7  ;;  %v113_v44 = vor.u32 %v111_v31, %v110_v38 }
  0x31   :  { %v90_v42 = vld [vmem:[#allocation3 + $0xc0] sm:$0xf]  ;;  %v91_v43 = vld [vmem:[#allocation3 + $0xc4] sm:$0xf]  ;;  %v114_v45 = vrot.slane %v110_v38, 4  ;;  %8122 = vmatprep.mubr.bf16.mxu0 %v10948_v37  ;;  %v10939_v2 = vld [vmem:[#allocation6 + $0x70] sm:$0xff]  }
  0x32   :  { %v476_v46 = vshrl.u32 %v90_v42, 16  ;;  %v479_v47 = vshll.u32 %v90_v42, 16  ;;  %v121_v48 = vor.u32 %v119_v34, %v118_v41  ;;  %v484_v49 = vshrl.u32 %v91_v43, 16  ;;  %v743_v51 = vld [vmem:[#allocation2 + $0x708] sm:$0xf]  ;;  %s11512_s0 = smov [#allocation8]  }
  0x33   :  { %8101 = vmatpush1.bf16.msra.mxu0 %v10935_v9  ;;  %10912 = vmatpush1.bf16.msra.mxu1 %v10935_v9  ;;  %v487_v50 = vshll.u32 %v91_v43, 16  ;;  %v919_v52 = vld [vmem:[#allocation3 + $0xc0] sm:$0xf]  ;;  %v920_v53 = vld [vmem:[#allocation3 + $0xc4] sm:$0xf]  ;;  %v652_v54 = vsel %vm11598_vm7, %v113_v44, %v651_v39  ;;  %v10940_v16 = vld [vmem:[#allocation6 + $0x68] sm:$0xff]  }
  0x34   :  { %8102 = vmatprep.subr.bf16.mxu0 %v13607_v0  ;;  %10897 = vmatprep.subr.bf16.mxu1 %v13607_v0  ;;  %v478_v55 = vrot.slane %v476_v46, 7  ;;  %979 = vst [vmem:[#allocation2 + $0x70c] sm:$0xf] %v919_v52  ;;  %980 = vst [vmem:[#allocation2 + $0x730] sm:$0xf] %v920_v53  ;;  %v122_v57 = vsel %vm11592_vm6, %v114_v45, %v121_v48  ;;  %v486_v58 = vrot.slane %v484_v49, 7 }
  0x35   :  { %653 = vst [vmem:[#allocation2 + $0x48] sm:$0xf] %v652_v54  ;;  %v849_v59 = vld [vmem:[#allocation2 + $0x6c0] sm:$0x1]  ;;  %654 = vst [vmem:[#allocation2 + $0x6c] sm:$0xf] %v122_v57 }
  0x36   :  { %v481_v60 = vor.u32 %v479_v47, %v478_v55  ;;  %v482_v61 = vrot.slane %v478_v55, 4  ;;  %v850_v62 = vsel %vm11580_vm2, 0, %v849_v59  ;;  %v489_v63 = vor.u32 %v487_v50, %v486_v58  ;;  %v46_v1 = vld [vmem:[#allocation3 + $0x8] sm:$0xf]  ;;  %v47_v4 = vld [vmem:[#allocation3 + $0xc] sm:$0xf] }
  0x37   :  { %8103 = vmatpush1.bf16.msra.mxu0 %v10936_v23  ;;  %10913 = vmatpush1.bf16.msra.mxu1 %v10936_v23  ;;  %851 = vst [vmem:[#allocation2 + $0x6c0] sm:$0x1] %v850_v62  ;;  %v124_v6 = vshrl.u32 %v46_v1, 16  ;;  %v127_v7 = vshll.u32 %v46_v1, 16  ;;  %v132_v9 = vshrl.u32 %v47_v4, 16  ;;  %v135_v10 = vshll.u32 %v47_v4, 16 }
  0x38   :  { %8104 = vmatprep.subr.bf16.mxu0 %v13607_v0  ;;  %10898 = vmatprep.subr.bf16.mxu1 %v13607_v0  ;;  %v744_v3 = vsel %vm11598_vm7, %v481_v60, %v743_v51  ;;  %v490_v8 = vsel %vm11592_vm6, %v482_v61, %v489_v63  ;;  %v875_v11 = vld [vmem:[#allocation3 + $0x8] sm:$0xf]  ;;  %v876_v12 = vld [vmem:[#allocation3 + $0xc] sm:$0xf]  ;;  %v655_v19 = vld [vmem:[#allocation2 + $0x90] sm:$0xf] }
  0x39   :  { %745 = vst [vmem:[#allocation2 + $0x708] sm:$0xf] %v744_v3  ;;  %746 = vst [vmem:[#allocation2 + $0x72c] sm:$0xf] %v490_v8  ;;  %v126_v13 = vrot.slane %v124_v6, 7  ;;  %v134_v17 = vrot.slane %v132_v9, 7 }
  0x3a   :  { %935 = vst [vmem:[#allocation2 + $0x94] sm:$0xf] %v875_v11  ;;  %936 = vst [vmem:[#allocation2 + $0xb8] sm:$0xf] %v876_v12  ;;  %v92_v14 = vld [vmem:[#allocation3 + $0xc8] sm:$0xf] }
  0x3b   :  { %8105 = vmatpush1.bf16.msra.mxu0 %v10937_v40  ;;  %10914 = vmatpush1.bf16.msra.mxu1 %v10937_v40  ;;  %v93_v15 = vld [vmem:[#allocation3 + $0xcc] sm:$0xf]  ;;  %v492_v20 = vshrl.u32 %v92_v14, 16  ;;  %v495_v21 = vshll.u32 %v92_v14, 16  ;;  %v129_v25 = vor.u32 %v127_v7, %v126_v13  ;;  %v130_v26 = vrot.slane %v126_v13, 4  ;;  %v10941_v43 = vld [vmem:[#allocation6 + $0x60] sm:$0xff]  }
  0x3c   :  { %8106 = vmatprep.subr.bf16.mxu0 %v13607_v0  ;;  %10899 = vmatprep.subr.bf16.mxu1 %v13607_v0  ;;  %v500_v23 = vshrl.u32 %v93_v15, 16  ;;  %v780_v24 = vld [vmem:[#allocation2 + $0x48] sm:$0x1]  ;;  %v503_v27 = vshll.u32 %v93_v15, 16  ;;  %v747_v28 = vld [vmem:[#allocation2 + $0x750] sm:$0xf]  ;;  %v137_v31 = vor.u32 %v135_v10, %v134_v17 }
  0x3d   :  { %v921_v29 = vld [vmem:[#allocation3 + $0xc8] sm:$0xf]  ;;  %v781_v30 = vsel %vm11580_vm2, 0, %v780_v24  ;;  %v494_v32 = vrot.slane %v492_v20, 7  ;;  %v922_v34 = vld [vmem:[#allocation3 + $0xcc] sm:$0xf]  ;;  %v656_v35 = vsel %vm11598_vm7, %v129_v25, %v655_v19 }
  0x3e   :  { %v502_v33 = vrot.slane %v500_v23, 7  ;;  %981 = vst [vmem:[#allocation2 + $0x754] sm:$0xf] %v921_v29  ;;  %782 = vst [vmem:[#allocation2 + $0x48] sm:$0x1] %v781_v30  ;;  %v138_v37 = vsel %vm11592_vm6, %v130_v26, %v137_v31  ;;  %v10942_v59 = vld [vmem:[#allocation6 + $0x58] sm:$0xff]  }
  0x3f   :  { %8107 = vmatpush2.bf16.msra.mxu0 %v10938_v56  ;;  %10915 = vmatpush2.bf16.msra.mxu1 %v10938_v56  ;;  %982 = vst [vmem:[#allocation2 + $0x778] sm:$0xf] %v922_v34  ;;  %v10951_v36 = vld [vmem:[#allocation2 + $0x6c4] ss:$36 sps:$4 sm:$0xff]   ;;  %657 = vst [vmem:[#allocation2 + $0x90] sm:$0xf] %v656_v35  ;;  %v497_v38 = vor.u32 %v495_v21, %v494_v32 }
  0x40   :  { %8108 = vmatprep.subr.bf16.mxu0 %v13607_v0  ;;  %10900 = vmatprep.subr.bf16.mxu1 %v13607_v0  ;;  %v498_v39 = vrot.slane %v494_v32, 4  ;;  %v505_v40 = vor.u32 %v503_v27, %v502_v33  ;;  %v852_v41 = vld [vmem:[#allocation2 + $0x708] sm:$0x1]  ;;  %658 = vst [vmem:[#allocation2 + $0xb4] sm:$0xf] %v138_v37  ;;  %v10943_v13 = vld [vmem:[#allocation6 + $0x50] sm:$0xff]  }
  0x41   :  { %v48_v42 = vld [vmem:[#allocation3 + $0x10] sm:$0xf]  ;;  %v853_v44 = vsel %vm11580_vm2, 0, %v852_v41  ;;  %v748_v46 = vsel %vm11598_vm7, %v497_v38, %v747_v28  ;;  %v49_v47 = vld [vmem:[#allocation3 + $0x14] sm:$0xf]  ;;  %8314 = vmatprep.mubr.bf16.mxu1 %v10951_v36  ;;  %v10944_v24 = vld [vmem:[#allocation6 + $0x48] sm:$0xff]  }
  0x42   :  { %v506_v45 = vsel %vm11592_vm6, %v498_v39, %v505_v40  ;;  %v140_v48 = vshrl.u32 %v48_v42, 16  ;;  %854 = vst [vmem:[#allocation2 + $0x708] sm:$0x1] %v853_v44  ;;  %749 = vst [vmem:[#allocation2 + $0x750] sm:$0xf] %v748_v46  ;;  %v143_v49 = vshll.u32 %v48_v42, 16 }
  0x43   :  { %8109 = vmatpush2.bf16.msra.mxu0 %v10939_v2  ;;  %10916 = vmatpush2.bf16.msra.mxu1 %v10939_v2  ;;  %750 = vst [vmem:[#allocation2 + $0x774] sm:$0xf] %v506_v45  ;;  %v148_v50 = vshrl.u32 %v49_v47, 16  ;;  %v151_v51 = vshll.u32 %v49_v47, 16  ;;  %v659_v52 = vld [vmem:[#allocation2 + $0xd8] sm:$0xf] }
  0x44   :  { %8110 = vmatprep.subr.bf16.mxu0 %v13607_v0  ;;  %10901 = vmatprep.subr.bf16.mxu1 %v13607_v0  ;;  %v142_v53 = vrot.slane %v140_v48, 7  ;;  %v877_v54 = vld [vmem:[#allocation3 + $0x10] sm:$0xf]  ;;  %v878_v55 = vld [vmem:[#allocation3 + $0x14] sm:$0xf]  ;;  %v10945_v36 = vld [vmem:[#allocation6 + $0x40] sm:$0xff]  }
  0x45   :  { %v150_v56 = vrot.slane %v148_v50, 7  ;;  %937 = vst [vmem:[#allocation2 + $0xdc] sm:$0xf] %v877_v54  ;;  %938 = vst [vmem:[#allocation2 + $0x100] sm:$0xf] %v878_v55  ;;  %v10952_v47 = vld [vmem:[#allocation6 + $0xb8] sm:$0xff]  }
  0x46   :  { %v94_v57 = vld [vmem:[#allocation3 + $0xd0] sm:$0xf]  ;;  %v95_v58 = vld [vmem:[#allocation3 + $0xd4] sm:$0xf]  ;;  %v145_v60 = vor.u32 %v143_v49, %v142_v53  ;;  %v146_v61 = vrot.slane %v142_v53, 4  ;;  %v10953_v50 = vld [vmem:[#allocation6 + $0x138] sm:$0xff]  }
  0x47   :  { %8111 = vmatpush2.bf16.msra.mxu0 %v10940_v16  ;;  %10917 = vmatpush2.bf16.msra.mxu1 %v10940_v16  ;;  %v783_v62 = vld [vmem:[#allocation2 + $0x90] sm:$0x1]  ;;  %v153_v63 = vor.u32 %v151_v51, %v150_v56  ;;  %v508_v1 = vshrl.u32 %v94_v57, 16  ;;  %v511_v2 = vshll.u32 %v94_v57, 16  ;;  %v516_v3 = vshrl.u32 %v95_v58, 16  ;;  %s10065_s1 = sshll.u32 %s11512_s0, 4  ;;  %s10066_s1 = int_to_ptr.vmem [resolvable:$true] %s10065_s1 }
  0x48   :  { %8112 = vmatprep.subr.bf16.mxu0 %v13607_v0  ;;  %10902 = vmatprep.subr.bf16.mxu1 %v13607_v0  ;;  %v784_v4 = vsel %vm11580_vm2, 0, %v783_v62  ;;  %v660_v6 = vsel %vm11598_vm7, %v145_v60, %v659_v52  ;;  %v519_v7 = vshll.u32 %v95_v58, 16  ;;  %v923_v11 = vld [vmem:[#allocation3 + $0xd0] sm:$0xf]  ;;  %v924_v12 = vld [vmem:[#allocation3 + $0xd4] sm:$0xf]  ;;  %p11464_p11 = scmp.lt.s32.totalorder %s10066_s1, %s10066_s1 }
  0x49   :  { %785 = vst [vmem:[#allocation2 + $0x90] sm:$0x1] %v784_v4  ;;  %v154_v8 = vsel %vm11592_vm6, %v146_v61, %v153_v63  ;;  %661 = vst [vmem:[#allocation2 + $0xd8] sm:$0xf] %v660_v6  ;;  %v510_v9 = vrot.slane %v508_v1, 7  ;;  %v518_v10 = vrot.slane %v516_v3, 7 }
  0x4a   :  { %662 = vst [vmem:[#allocation2 + $0xfc] sm:$0xf] %v154_v8  ;;  %v751_v14 = vld [vmem:[#allocation2 + $0x798] sm:$0xf]  ;;  %983 = vst [vmem:[#allocation2 + $0x79c] sm:$0xf] %v923_v11 }
  0x4b   :  { %8113 = vmatpush2.bf16.msra.mxu0 %v10941_v43  ;;  %10918 = vmatpush2.bf16.msra.mxu1 %v10941_v43  ;;  %984 = vst [vmem:[#allocation2 + $0x7c0] sm:$0xf] %v924_v12  ;;  %v855_v15 = vld [vmem:[#allocation2 + $0x750] sm:$0x1]  ;;  %v513_v16 = vor.u32 %v511_v2, %v510_v9  ;;  %v514_v17 = vrot.slane %v510_v9, 4  ;;  %v521_v19 = vor.u32 %v519_v7, %v518_v10  ;;  %vm1815_vm9 = vcmask 1043459  }
  0x4c   :  { %8114 = vmatprep.subr.bf16.mxu0 %v13607_v0  ;;  %10903 = vmatprep.subr.bf16.mxu1 %v13607_v0  ;;  %v856_v20 = vsel %vm11580_vm2, 0, %v855_v15  ;;  %v50_v25 = vld [vmem:[#allocation3 + $0x18] sm:$0xf]  ;;  %v51_v26 = vld [vmem:[#allocation3 + $0x1c] sm:$0xf]  ;;  %v10954_v7 = vld [vmem:[#allocation6 + $0xb0] sm:$0xff]  }
  0x4d   :  { %857 = vst [vmem:[#allocation2 + $0x750] sm:$0x1] %v856_v20  ;;  %v522_v21 = vsel %vm11592_vm6, %v514_v17, %v521_v19  ;;  %v752_v23 = vsel %vm11598_vm7, %v513_v16, %v751_v14  ;;  %v156_v27 = vshrl.u32 %v50_v25, 16  ;;  %v159_v28 = vshll.u32 %v50_v25, 16  ;;  %v879_v31 = vld [vmem:[#allocation3 + $0x18] sm:$0xf] }
  0x4e   :  { %753 = vst [vmem:[#allocation2 + $0x798] sm:$0xf] %v752_v23  ;;  %754 = vst [vmem:[#allocation2 + $0x7bc] sm:$0xf] %v522_v21  ;;  %v164_v29 = vshrl.u32 %v51_v26, 16  ;;  %v167_v30 = vshll.u32 %v51_v26, 16 }
  0x4f   :  { %8115 = vmatpush2.bf16.msra.mxu0 %v10942_v59  ;;  %10919 = vmatpush2.bf16.msra.mxu1 %v10942_v59  ;;  %v663_v32 = vld [vmem:[#allocation2 + $0x120] sm:$0xf]  ;;  %939 = vst [vmem:[#allocation2 + $0x124] sm:$0xf] %v879_v31  ;;  %v158_v34 = vrot.slane %v156_v27, 7  ;;  %v10963_v8 = vld [vmem:[#allocation6 + $0x130] sm:$0xff]  }
  0x50   :  { %8116 = vmatprep.subr.bf16.mxu0 %v13607_v0  ;;  %10904 = vmatprep.subr.bf16.mxu1 %v13607_v0  ;;  %v786_v33 = vld [vmem:[#allocation2 + $0xd8] sm:$0x1]  ;;  %v166_v35 = vrot.slane %v164_v29, 7  ;;  %v880_v38 = vld [vmem:[#allocation3 + $0x1c] sm:$0xf]  ;;  %v10961_v17 = vld [vmem:[#allocation6 + $0xa8] sm:$0xff]  }
  0x51   :  { %v787_v37 = vsel %vm11580_vm2, 0, %v786_v33  ;;  %v96_v39 = vld [vmem:[#allocation3 + $0xd8] sm:$0xf]  ;;  %v10946_v40 = vld [vmem:[#allocation2] ss:$36 sps:$4 sm:$0xff]   ;;  %v161_v41 = vor.u32 %v159_v28, %v158_v34  ;;  %v162_v42 = vrot.slane %v158_v34, 4 }
  0x52   :  { %788 = vst [vmem:[#allocation2 + $0xd8] sm:$0x1] %v787_v37  ;;  %v169_v43 = vor.u32 %v167_v30, %v166_v35  ;;  %940 = vst [vmem:[#allocation2 + $0x148] sm:$0xf] %v880_v38  ;;  %v97_v44 = vld [vmem:[#allocation3 + $0xdc] sm:$0xf] }
  0x53   :  { %8117 = vmatpush2.bf16.msra.mxu0 %v10943_v13  ;;  %10920 = vmatpush2.bf16.msra.mxu1 %v10943_v13  ;;  %v524_v45 = vshrl.u32 %v96_v39, 16  ;;  %v10949_v46 = vld [vmem:[#allocation2 + $0x6c0] ss:$36 sps:$4 sm:$0xff]   ;;  %v527_v48 = vshll.u32 %v96_v39, 16  ;;  %v10955_v51 = vld [vmem:[#allocation2 + $0x4c] ss:$36 sps:$4 sm:$0xff]   ;;  %v664_v54 = vsel %vm11598_vm7, %v161_v41, %v663_v32 }
  0x54   :  { %8118 = vmatprep.subr.bf16.mxu0 %v13607_v0  ;;  %10905 = vmatprep.subr.bf16.mxu1 %v13607_v0  ;;  %v755_v49 = vld [vmem:[#allocation2 + $0x7e0] sm:$0xf]  ;;  %v170_v53 = vsel %vm11592_vm6, %v162_v42, %v169_v43  ;;  %v532_v56 = vshrl.u32 %v97_v44, 16  ;;  %v10957_v57 = vld [vmem:[#allocation2 + $0x70c] ss:$36 sps:$4 sm:$0xff]   ;;  %v535_v59 = vshll.u32 %v97_v44, 16 }
  0x55   :  { %v858_v52 = vld [vmem:[#allocation2 + $0x798] sm:$0x1]  ;;  %v526_v55 = vrot.slane %v524_v45, 7  ;;  %665 = vst [vmem:[#allocation2 + $0x120] sm:$0xf] %v664_v54  ;;  %v10979_v30 = vld [vmem:[#allocation6 + $0x128] sm:$0xff]  }
  0x56   :  { %v859_v58 = vsel %vm11580_vm2, 0, %v858_v52  ;;  %666 = vst [vmem:[#allocation2 + $0x144] sm:$0xf] %v170_v53  ;;  %v925_v60 = vld [vmem:[#allocation3 + $0xd8] sm:$0xf]  ;;  %v534_v1 = vrot.slane %v532_v56, 7 }
  0x57   :  { %8119 = vmatpush2.bf16.msra.mxu0 %v10944_v24  ;;  %10921 = vmatpush2.bf16.msra.mxu1 %v10944_v24  ;;  %v926_v61 = vld [vmem:[#allocation3 + $0xdc] sm:$0xf]  ;;  %860 = vst [vmem:[#allocation2 + $0x798] sm:$0x1] %v859_v58  ;;  %v529_v62 = vor.u32 %v527_v48, %v526_v55  ;;  %v530_v63 = vrot.slane %v526_v55, 4  ;;  %v10962_v41 = vld [vmem:[#allocation6 + $0xa0] sm:$0xff]  }
  0x58   :  { %8120 = vmatprep.subr.bf16.mxu0 %v13607_v0  ;;  %10906 = vmatprep.subr.bf16.mxu1 %v13607_v0  ;;  %985 = vst [vmem:[#allocation2 + $0x7e4] sm:$0xf] %v925_v60  ;;  %986 = vst [vmem:[#allocation2 + $0x808] sm:$0xf] %v926_v61  ;;  %v537_v2 = vor.u32 %v535_v59, %v534_v1  ;;  %v52_v4 = vld [vmem:[#allocation3 + $0x20] sm:$0xf] }
  0x59   :  { %v756_v3 = vsel %vm11598_vm7, %v529_v62, %v755_v49  ;;  %v53_v6 = vld [vmem:[#allocation3 + $0x24] sm:$0xf]  ;;  %v172_v9 = vshrl.u32 %v52_v4, 16  ;;  %v10959_v10 = vld [vmem:[#allocation2 + $0x48] ss:$36 sps:$4 sm:$0xff]   ;;  %v175_v13 = vshll.u32 %v52_v4, 16 }
  0x5a   :  { %757 = vst [vmem:[#allocation2 + $0x7e0] sm:$0xf] %v756_v3  ;;  %v10960_v11 = vld [vmem:[#allocation2 + $0x708] ss:$36 sps:$4 sm:$0xff]   ;;  %v538_v12 = vsel %vm11592_vm6, %v530_v63, %v537_v2  ;;  %v180_v14 = vshrl.u32 %v53_v6, 16  ;;  %v183_v15 = vshll.u32 %v53_v6, 16 }
  0x5b   :  { %8121 = vmatpush2.bf16.msra.mxu0 %v10945_v36  ;;  %10922 = vmatpush2.bf16.msra.mxu1 %v10945_v36  ;;  %v667_v16 = vld [vmem:[#allocation2 + $0x168] sm:$0xf]  ;;  %758 = vst [vmem:[#allocation2 + $0x804] sm:$0xf] %v538_v12  ;;  %v174_v19 = vrot.slane %v172_v9, 7  ;;  %s11459_s24 = scalar_lea.vmem %s10066_s1, 4096 }
  0x5c   :  { %8379 = vmatprep.subr.bf16.mxu1 %v13607_v0  ;;  %8668 = vmatprep.subr.bf16.mxu0 %v13607_v0  ;;  %v881_v20 = vld [vmem:[#allocation3 + $0x20] sm:$0xf]  ;;  %v882_v21 = vld [vmem:[#allocation3 + $0x24] sm:$0xf]  ;;  %v182_v24 = vrot.slane %v180_v14, 7  ;;  %p11460_p10 = scmp.ne.s32.totalorder %s10066_s1, %s11459_s24  ;;  %p11465_p12 = scmp.lt.s32.totalorder %s11459_s24, %s11459_s24 }
  0x5d   :  { %v789_v23 = vld [vmem:[#allocation2 + $0x120] sm:$0x1]  ;;  %941 = vst [vmem:[#allocation2 + $0x16c] sm:$0xf] %v881_v20  ;;  %942 = vst [vmem:[#allocation2 + $0x190] sm:$0xf] %v882_v21  ;;  %v177_v29 = vor.u32 %v175_v13, %v174_v19 }
  0x5e   :  { %8123 = vmatmul.mubr.bf16.vlgmr.msra.gmra.mxu0 %v10946_v40  ;;  %8315 = vmatmul.mubr.bf16.vlgmr.msra.gmra.mxu1 %v10949_v46  ;;  %v98_v25 = vld [vmem:[#allocation3 + $0xe0] sm:$0xf]  ;;  %v10964_v26 = vld [vmem:[#allocation2 + $0x94] ss:$36 sps:$4 sm:$0xff]   ;;  %v790_v28 = vsel %vm11580_vm2, 0, %v789_v23  ;;  %v178_v31 = vrot.slane %v174_v19, 4  ;;  %v185_v32 = vor.u32 %v183_v15, %v182_v24  ;;  %p11466_p13 = por %p11465_p12, %p11464_p11 }
  0x5f   :  { %8380 = vmatpush1.bf16.msra.mxu1 %v10952_v47  ;;  %8669 = vmatpush1.bf16.msra.mxu0 %v10953_v50  ;;  %v10966_v27 = vld [vmem:[#allocation2 + $0x754] ss:$36 sps:$4 sm:$0xff]   ;;  %791 = vst [vmem:[#allocation2 + $0x120] sm:$0x1] %v790_v28  ;;  %v99_v33 = vld [vmem:[#allocation3 + $0xe4] sm:$0xf]  ;;  %v668_v36 = vsel %vm11598_vm7, %v177_v29, %v667_v16 }
  0x60   :  { %8381 = vmatprep.subr.bf16.mxu1 %v13607_v0  ;;  %8130 = vmatprep.mubr.bf16.mxu0 %v10955_v51  ;;  %v540_v34 = vshrl.u32 %v98_v25, 16  ;;  %v543_v35 = vshll.u32 %v98_v25, 16  ;;  %v548_v37 = vshrl.u32 %v99_v33, 16  ;;  %v551_v38 = vshll.u32 %v99_v33, 16  ;;  %v759_v39 = vld [vmem:[#allocation2 + $0x828] sm:$0xf]  ;;  %p11467_p0 = pnand %p11466_p13, %p11460_p10 }
  0x61   :  { %8322 = vmatprep.mubr.bf16.mxu1 %v10957_v57  ;;  %8670 = vmatprep.subr.bf16.mxu0 %v13607_v0  ;;  %v927_v40 = vld [vmem:[#allocation3 + $0xe0] sm:$0xf]  ;;  %v186_v43 = vsel %vm11592_vm6, %v178_v31, %v185_v32  ;;  %669 = vst [vmem:[#allocation2 + $0x168] sm:$0xf] %v668_v36  ;;  %v928_v45 = vld [vmem:[#allocation3 + $0xe4] sm:$0xf] }
  0x62   :  { %v861_v42 = vld [vmem:[#allocation2 + $0x7e0] sm:$0x1]  ;;  %v542_v44 = vrot.slane %v540_v34, 7  ;;  %987 = vst [vmem:[#allocation2 + $0x82c] sm:$0xf] %v927_v40  ;;  %v550_v48 = vrot.slane %v548_v37, 7 }
  0x63   :  { %8382 = vmatpush1.bf16.msra.mxu1 %v10954_v7  ;;  %8671 = vmatpush1.bf16.msra.mxu0 %v10963_v8  ;;  %v862_v46 = vsel %vm11580_vm2, 0, %v861_v42  ;;  %v10989_v47 = vld [vmem:[#allocation6 + $0x120] sm:$0xff]   ;;  %670 = vst [vmem:[#allocation2 + $0x18c] sm:$0xf] %v186_v43  ;;  %988 = vst [vmem:[#allocation2 + $0x850] sm:$0xf] %v928_v45 }
  0x64   :  { %8383 = vmatprep.subr.bf16.mxu1 %v13607_v0  ;;  %8672 = vmatprep.subr.bf16.mxu0 %v13607_v0  ;;  %v10968_v49 = vld [vmem:[#allocation2 + $0x90] ss:$36 sps:$4 sm:$0xff]   ;;  %863 = vst [vmem:[#allocation2 + $0x7e0] sm:$0x1] %v862_v46  ;;  %v545_v51 = vor.u32 %v543_v35, %v542_v44  ;;  %v546_v52 = vrot.slane %v542_v44, 4  ;;  %v553_v54 = vor.u32 %v551_v38, %v550_v48  ;;  %v10970_v57 = vld [vmem:[#allocation6 + $0x98] sm:$0xff]  }
  0x65   :  { %v10969_v50 = vld [vmem:[#allocation2 + $0x750] ss:$36 sps:$4 sm:$0xff]   ;;  %v10972_v53 = vld [vmem:[#allocation2 + $0xdc] ss:$36 sps:$4 sm:$0xff]   ;;  %v54_v55 = vld [vmem:[#allocation3 + $0x28] sm:$0xf] }
  0x66   :  { %8131 = vmatmul.mubr.bf16.gmra.mxu0 %v10959_v10  ;;  %8323 = vmatmul.mubr.bf16.gmra.mxu1 %v10960_v11  ;;  %v55_v56 = vld [vmem:[#allocation3 + $0x2c] sm:$0xf]  ;;  %v760_v58 = vsel %vm11598_vm7, %v545_v51, %v759_v39  ;;  %v188_v59 = vshrl.u32 %v54_v55, 16  ;;  %v191_v60 = vshll.u32 %v54_v55, 16  ;;  %v883_v62 = vld [vmem:[#allocation3 + $0x28] sm:$0xf]  ;;  %v554_v1 = vsel %vm11592_vm6, %v546_v52, %v553_v54 }
  0x67   :  { %8384 = vmatpush1.bf16.msra.mxu1 %v10961_v17  ;;  %8138 = vmatprep.mubr.bf16.mxu0 %v10964_v26  ;;  %v196_v61 = vshrl.u32 %v55_v56, 16  ;;  %v10974_v63 = vld [vmem:[#allocation2 + $0x79c] ss:$36 sps:$4 sm:$0xff]   ;;  %761 = vst [vmem:[#allocation2 + $0x828] sm:$0xf] %v760_v58  ;;  %v199_v2 = vshll.u32 %v55_v56, 16 }
  0x68   :  { %8385 = vmatprep.subr.bf16.mxu1 %v13607_v0  ;;  %8330 = vmatprep.mubr.bf16.mxu1 %v10966_v27  ;;  %v671_v3 = vld [vmem:[#allocation2 + $0x1b0] sm:$0xf]  ;;  %943 = vst [vmem:[#allocation2 + $0x1b4] sm:$0xf] %v883_v62  ;;  %762 = vst [vmem:[#allocation2 + $0x84c] sm:$0xf] %v554_v1 }
  0x69   :  { %8673 = vmatpush1.bf16.msra.mxu0 %v10979_v30  ;;  %v190_v4 = vrot.slane %v188_v59, 7  ;;  %v198_v6 = vrot.slane %v196_v61, 7  ;;  %v884_v7 = vld [vmem:[#allocation3 + $0x2c] sm:$0xf]  ;;  %v100_v8 = vld [vmem:[#allocation3 + $0xe8] sm:$0xf] }
  0x6a   :  { %8674 = vmatprep.subr.bf16.mxu0 %v13607_v0  ;;  %v792_v9 = vld [vmem:[#allocation2 + $0x168] sm:$0x1]  ;;  %944 = vst [vmem:[#allocation2 + $0x1d8] sm:$0xf] %v884_v7  ;;  %v101_v10 = vld [vmem:[#allocation3 + $0xec] sm:$0xf] }
  0x6b   :  { %8386 = vmatpush1.bf16.msra.mxu1 %v10962_v41  ;;  %v556_v11 = vshrl.u32 %v100_v8, 16  ;;  %v559_v12 = vshll.u32 %v100_v8, 16  ;;  %v793_v13 = vsel %vm11580_vm2, 0, %v792_v9  ;;  %v193_v14 = vor.u32 %v191_v60, %v190_v4  ;;  %v11005_v17 = vld [vmem:[#allocation6 + $0x118] sm:$0xff]   ;;  %v10971_v19 = vld [vmem:[#allocation6 + $0x90] sm:$0xff]   ;;  %v10978_v31 = vld [vmem:[#allocation6 + $0x88] sm:$0xff]  }
  0x6c   :  { %8387 = vmatprep.subr.bf16.mxu1 %v13607_v0  ;;  %v194_v15 = vrot.slane %v190_v4, 4  ;;  %v201_v16 = vor.u32 %v199_v2, %v198_v6  ;;  %794 = vst [vmem:[#allocation2 + $0x168] sm:$0x1] %v793_v13  ;;  %v763_v21 = vld [vmem:[#allocation2 + $0x870] sm:$0xf]  ;;  %v564_v27 = vshrl.u32 %v101_v10, 16 }
  0x6d   :  { %8675 = vmatpush1.bf16.msra.mxu0 %v10989_v47  ;;  %v558_v20 = vrot.slane %v556_v11, 7  ;;  %v10976_v23 = vld [vmem:[#allocation2 + $0xd8] ss:$36 sps:$4 sm:$0xff]   ;;  %v672_v26 = vsel %vm11598_vm7, %v193_v14, %v671_v3  ;;  %v567_v28 = vshll.u32 %v101_v10, 16  ;;  %v929_v29 = vld [vmem:[#allocation3 + $0xe8] sm:$0xf] }
  0x6e   :  { %8139 = vmatmul.mubr.bf16.gmra.mxu0 %v10968_v49  ;;  %8331 = vmatmul.mubr.bf16.gmra.mxu1 %v10969_v50  ;;  %v10977_v24 = vld [vmem:[#allocation2 + $0x798] ss:$36 sps:$4 sm:$0xff]   ;;  %v202_v25 = vsel %vm11592_vm6, %v194_v15, %v201_v16  ;;  %v930_v30 = vld [vmem:[#allocation3 + $0xec] sm:$0xf]  ;;  %v10981_v32 = vld [vmem:[#allocation2 + $0x124] ss:$36 sps:$4 sm:$0xff]  }
  0x6f   :  { %8388 = vmatpush1.bf16.msra.mxu1 %v10970_v57  ;;  %8146 = vmatprep.mubr.bf16.mxu0 %v10972_v53  ;;  %673 = vst [vmem:[#allocation2 + $0x1b0] sm:$0xf] %v672_v26  ;;  %674 = vst [vmem:[#allocation2 + $0x1d4] sm:$0xf] %v202_v25  ;;  %v561_v33 = vor.u32 %v559_v12, %v558_v20  ;;  %v10983_v34 = vld [vmem:[#allocation2 + $0x7e4] ss:$36 sps:$4 sm:$0xff]  }
  0x70   :  { %8389 = vmatprep.subr.bf16.mxu1 %v13607_v0  ;;  %8338 = vmatprep.mubr.bf16.mxu1 %v10974_v63  ;;  %989 = vst [vmem:[#allocation2 + $0x874] sm:$0xf] %v929_v29  ;;  %990 = vst [vmem:[#allocation2 + $0x898] sm:$0xf] %v930_v30  ;;  %v864_v35 = vld [vmem:[#allocation2 + $0x828] sm:$0x1] }
  0x71   :  { %8676 = vmatprep.subr.bf16.mxu0 %v13607_v0  ;;  %v562_v36 = vrot.slane %v558_v20, 4  ;;  %v566_v37 = vrot.slane %v564_v27, 7  ;;  %v865_v38 = vsel %vm11580_vm2, 0, %v864_v35  ;;  %v764_v39 = vsel %vm11598_vm7, %v561_v33, %v763_v21  ;;  %v56_v41 = vld [vmem:[#allocation3 + $0x30] sm:$0xf]  ;;  %v10980_v48 = vld [vmem:[#allocation6 + $0x80] sm:$0xff]  }
  0x72   :  { %8677 = vmatpush1.bf16.msra.mxu0 %v11005_v17  ;;  %866 = vst [vmem:[#allocation2 + $0x828] sm:$0x1] %v865_v38  ;;  %765 = vst [vmem:[#allocation2 + $0x870] sm:$0xf] %v764_v39  ;;  %v57_v42 = vld [vmem:[#allocation3 + $0x34] sm:$0xf] }
  0x73   :  { %8390 = vmatpush1.bf16.msra.mxu1 %v10971_v19  ;;  %8678 = vmatprep.subr.bf16.mxu0 %v13607_v0  ;;  %v569_v40 = vor.u32 %v567_v28, %v566_v37  ;;  %v204_v43 = vshrl.u32 %v56_v41, 16  ;;  %v207_v44 = vshll.u32 %v56_v41, 16  ;;  %v212_v45 = vshrl.u32 %v57_v42, 16  ;;  %v11015_v47 = vld [vmem:[#allocation6 + $0x110] sm:$0xff]   ;;  %v675_v50 = vld [vmem:[#allocation2 + $0x1f8] sm:$0xf] }
  0x74   :  { %8391 = vmatprep.subr.bf16.mxu1 %v13607_v0  ;;  %v215_v46 = vshll.u32 %v57_v42, 16  ;;  %vm1816_vm8 = vsmask.f32 7950  ;;  %v885_v53 = vld [vmem:[#allocation3 + $0x30] sm:$0xf]  ;;  %v11029_v55 = vld [vmem:[#allocation6 + $0x108] sm:$0xff]  }
  0x75   :  { %v570_v49 = vsel %vm11592_vm6, %v562_v36, %v569_v40  ;;  %v206_v51 = vrot.slane %v204_v43, 7  ;;  %v214_v52 = vrot.slane %v212_v45, 7  ;;  %v886_v54 = vld [vmem:[#allocation3 + $0x34] sm:$0xf]  ;;  %v10985_v56 = vld [vmem:[#allocation2 + $0x120] ss:$36 sps:$4 sm:$0xff]   ;;  %vm11727_vm10 = vmand %vm1815_vm9, %vm1816_vm8 }
  0x76   :  { %8147 = vmatmul.mubr.bf16.gmra.mxu0 %v10976_v23  ;;  %8339 = vmatmul.mubr.bf16.gmra.mxu1 %v10977_v24  ;;  %766 = vst [vmem:[#allocation2 + $0x894] sm:$0xf] %v570_v49  ;;  %v10986_v57 = vld [vmem:[#allocation2 + $0x7e0] ss:$36 sps:$4 sm:$0xff]   ;;  %v795_v58 = vld [vmem:[#allocation2 + $0x1b0] sm:$0x1] }
  0x77   :  { %8392 = vmatpush1.bf16.msra.mxu1 %v10978_v31  ;;  %8154 = vmatprep.mubr.bf16.mxu0 %v10981_v32  ;;  %945 = vst [vmem:[#allocation2 + $0x1fc] sm:$0xf] %v885_v53  ;;  %946 = vst [vmem:[#allocation2 + $0x220] sm:$0xf] %v886_v54  ;;  %v102_v59 = vld [vmem:[#allocation3 + $0xf0] sm:$0xf]  ;;  %v209_v63 = vor.u32 %v207_v44, %v206_v51  ;;  %v217_v2 = vor.u32 %v215_v46, %v214_v52 }
  0x78   :  { %8393 = vmatprep.subr.bf16.mxu1 %v13607_v0  ;;  %8346 = vmatprep.mubr.bf16.mxu1 %v10983_v34  ;;  %v10987_v60 = vld [vmem:[#allocation6 + $0xf8] sm:$0xff]   ;;  %v10990_v61 = vld [vmem:[#allocation2 + $0x16c] ss:$36 sps:$4 sm:$0xff]   ;;  %v796_v62 = vsel %vm11580_vm2, 0, %v795_v58  ;;  %v210_v1 = vrot.slane %v206_v51, 4  ;;  %v572_v4 = vshrl.u32 %v102_v59, 16 }
  0x79   :  { %v103_v3 = vld [vmem:[#allocation3 + $0xf4] sm:$0xf]  ;;  %8679 = vmatpush1.bf16.msra.mxu0 %v11015_v47  ;;  %797 = vst [vmem:[#allocation2 + $0x1b0] sm:$0x1] %v796_v62  ;;  %v575_v6 = vshll.u32 %v102_v59, 16  ;;  %v676_v12 = vsel %vm11598_vm7, %v209_v63, %v675_v50  ;;  %v11036_v21 = vld [vmem:[#allocation6 + $0x100] sm:$0xff]  }
  0x7a   :  { %v580_v7 = vshrl.u32 %v103_v3, 16  ;;  %v583_v8 = vshll.u32 %v103_v3, 16  ;;  %v931_v9 = vld [vmem:[#allocation3 + $0xf0] sm:$0xf]  ;;  %8680 = vmatprep.subr.bf16.mxu0 %v13607_v0  ;;  %v218_v11 = vsel %vm11592_vm6, %v210_v1, %v217_v2  ;;  %v767_v13 = vld [vmem:[#allocation2 + $0x8b8] sm:$0xf] }
  0x7b   :  { %8394 = vmatpush1.bf16.msra.mxu1 %v10980_v48  ;;  %v10992_v10 = vld [vmem:[#allocation2 + $0x82c] ss:$36 sps:$4 sm:$0xff]   ;;  %991 = vst [vmem:[#allocation2 + $0x8bc] sm:$0xf] %v931_v9  ;;  %677 = vst [vmem:[#allocation2 + $0x1f8] sm:$0xf] %v676_v12 }
  0x7c   :  { %8395 = vmatprep.subr.bf16.mxu1 %v13607_v0  ;;  %v867_v14 = vld [vmem:[#allocation2 + $0x870] sm:$0x1]  ;;  %678 = vst [vmem:[#allocation2 + $0x21c] sm:$0xf] %v218_v11  ;;  %v574_v15 = vrot.slane %v572_v4, 7  ;;  %v582_v16 = vrot.slane %v580_v7, 7 }
  0x7d   :  { %v932_v17 = vld [vmem:[#allocation3 + $0xf4] sm:$0xf]  ;;  %v868_v20 = vsel %vm11580_vm2, 0, %v867_v14  ;;  %8681 = vmatpush1.bf16.msra.mxu0 %v11029_v55  ;;  %v58_v26 = vld [vmem:[#allocation3 + $0x38] sm:$0xf]  ;;  %v10996_v35 = vld [vmem:[#allocation6 + $0xe8] sm:$0xff]  }
  0x7e   :  { %v10988_v19 = vld [vmem:[#allocation6 + $0xf0] sm:$0xff]   ;;  %992 = vst [vmem:[#allocation2 + $0x8e0] sm:$0xf] %v932_v17  ;;  %8155 = vmatmul.mubr.bf16.gmra.mxu0 %v10985_v56  ;;  %8347 = vmatmul.mubr.bf16.gmra.mxu1 %v10986_v57  ;;  %869 = vst [vmem:[#allocation2 + $0x870] sm:$0x1] %v868_v20  ;;  %v577_v23 = vor.u32 %v575_v6, %v574_v15  ;;  %v578_v24 = vrot.slane %v574_v15, 4  ;;  %v585_v25 = vor.u32 %v583_v8, %v582_v16 }
  0x7f   :  { %8396 = vmatpush2.bf16.msra.mxu1 %v10987_v60  ;;  %8162 = vmatprep.mubr.bf16.mxu0 %v10990_v61  ;;  %v10994_v27 = vld [vmem:[#allocation2 + $0x168] ss:$36 sps:$4 sm:$0xff]   ;;  %v59_v31 = vld [vmem:[#allocation3 + $0x3c] sm:$0xf]  ;;  %v220_v32 = vshrl.u32 %v58_v26, 16  ;;  %v223_v33 = vshll.u32 %v58_v26, 16 }
  0x80   :  { %8397 = vmatprep.subr.bf16.mxu1 %v13607_v0  ;;  %8354 = vmatprep.mubr.bf16.mxu1 %v10992_v10  ;;  %v10995_v28 = vld [vmem:[#allocation2 + $0x828] ss:$36 sps:$4 sm:$0xff]   ;;  %v586_v29 = vsel %vm11592_vm6, %v578_v24, %v585_v25  ;;  %v768_v30 = vsel %vm11598_vm7, %v577_v23, %v767_v13  ;;  %v10998_v36 = vld [vmem:[#allocation2 + $0x1b4] ss:$36 sps:$4 sm:$0xff]   ;;  %v228_v37 = vshrl.u32 %v59_v31, 16  ;;  %v231_v40 = vshll.u32 %v59_v31, 16 }
  0x81   :  { %769 = vst [vmem:[#allocation2 + $0x8b8] sm:$0xf] %v768_v30  ;;  %770 = vst [vmem:[#allocation2 + $0x8dc] sm:$0xf] %v586_v29  ;;  %v679_v38 = vld [vmem:[#allocation2 + $0x240] sm:$0xf]  ;;  %8682 = vmatprep.subr.bf16.mxu0 %v13607_v0 }
  0x82   :  { %v222_v39 = vrot.slane %v220_v32, 7  ;;  %v887_v41 = vld [vmem:[#allocation3 + $0x38] sm:$0xf]  ;;  %v888_v42 = vld [vmem:[#allocation3 + $0x3c] sm:$0xf]  ;;  %8683 = vmatpush1.bf16.msra.mxu0 %v11036_v21  ;;  %v230_v44 = vrot.slane %v228_v37, 7 }
  0x83   :  { %8398 = vmatpush2.bf16.msra.mxu1 %v10988_v19  ;;  %v798_v43 = vld [vmem:[#allocation2 + $0x1f8] sm:$0x1]  ;;  %947 = vst [vmem:[#allocation2 + $0x244] sm:$0xf] %v887_v41  ;;  %948 = vst [vmem:[#allocation2 + $0x268] sm:$0xf] %v888_v42  ;;  %8684 = vmatprep.subr.bf16.mxu0 %v13607_v0 }
  0x84   :  { %v1818_v45 = vld [vmem:[#allocation2 + $0x2c] sm:$0x8]  ;;  %8399 = vmatprep.subr.bf16.mxu1 %v13607_v0  ;;  %v799_v46 = vsel %vm11580_vm2, 0, %v798_v43  ;;  %v225_v47 = vor.u32 %v223_v33, %v222_v39  ;;  %v226_v48 = vrot.slane %v222_v39, 4  ;;  %v1914_v50 = vld [vmem:[#allocation3] sm:$0xf]  ;;  %v233_v52 = vor.u32 %v231_v40, %v230_v44 }
  0x85   :  { %v1819_v49 = vsel %vm11727_vm10, 0, %v1818_v45  ;;  %v11000_v51 = vld [vmem:[#allocation2 + $0x874] ss:$36 sps:$4 sm:$0xff]   ;;  %800 = vst [vmem:[#allocation2 + $0x1f8] sm:$0x1] %v799_v46  ;;  %v1979_v53 = vshrl.u32 %v1914_v50, 16 }
  0x86   :  { %1820 = vst [vmem:[#allocation2 + $0x2c] sm:$0x8] %v1819_v49  ;;  %v11050_v54 = vld [vmem:[#allocation6 + $0x178] sm:$0xff]   ;;  %8163 = vmatmul.mubr.bf16.gmra.mxu0 %v10994_v27  ;;  %8355 = vmatmul.mubr.bf16.gmra.mxu1 %v10995_v28  ;;  %v10997_v55 = vld [vmem:[#allocation6 + $0xe0] sm:$0xff]   ;;  %v680_v56 = vsel %vm11598_vm7, %v225_v47, %v679_v38  ;;  %v1982_v58 = vshll.u32 %v1914_v50, 16  ;;  %v234_v60 = vsel %vm11592_vm6, %v226_v48, %v233_v52  ;;  %v11058_v1 = vld [vmem:[#allocation6 + $0x170] sm:$0xff]  }
  0x87   :  { %v1915_v57 = vld [vmem:[#allocation3 + $0x4] sm:$0xf]  ;;  %v2554_v59 = vld [vmem:[#allocation2 + $0xc] sm:$0xf]  ;;  %8400 = vmatpush2.bf16.msra.mxu1 %v10996_v35  ;;  %8170 = vmatprep.mubr.bf16.mxu0 %v10998_v36  ;;  %681 = vst [vmem:[#allocation2 + $0x240] sm:$0xf] %v680_v56 }
  0x88   :  { %v1981_v61 = vrot.slane %v1979_v53, 7  ;;  %v1987_v62 = vshrl.u32 %v1915_v57, 16  ;;  %v1990_v63 = vshll.u32 %v1915_v57, 16  ;;  %8401 = vmatprep.subr.bf16.mxu1 %v13607_v0  ;;  %8362 = vmatprep.mubr.bf16.mxu1 %v11000_v51  ;;  %v11002_v2 = vld [vmem:[#allocation2 + $0x1b0] ss:$36 sps:$4 sm:$0xff]   ;;  %v11004_v4 = vld [vmem:[#allocation6 + $0xd8] sm:$0xff]  }
  0x89   :  { %v870_v3 = vld [vmem:[#allocation2 + $0x8b8] sm:$0x1]  ;;  %682 = vst [vmem:[#allocation2 + $0x264] sm:$0xf] %v234_v60  ;;  %v60_v10 = vld [vmem:[#allocation3 + $0x40] sm:$0xf]  ;;  %8685 = vmatpush2.bf16.msra.mxu0 %v11050_v54 }
  0x8a   :  { %v871_v6 = vsel %vm11580_vm2, 0, %v870_v3  ;;  %v1984_v7 = vor.u32 %v1982_v58, %v1981_v61  ;;  %v1985_v8 = vrot.slane %v1981_v61, 4  ;;  %v1989_v9 = vrot.slane %v1987_v62, 7  ;;  %v11003_v11 = vld [vmem:[#allocation2 + $0x870] ss:$36 sps:$4 sm:$0xff]   ;;  %8686 = vmatprep.subr.bf16.mxu0 %v13607_v0  ;;  %v11072_v23 = vld [vmem:[#allocation6 + $0x168] sm:$0xff]  }
  0x8b   :  { %872 = vst [vmem:[#allocation2 + $0x8b8] sm:$0x1] %v871_v6  ;;  %v61_v12 = vld [vmem:[#allocation3 + $0x44] sm:$0xf]  ;;  %v236_v13 = vshrl.u32 %v60_v10, 16  ;;  %v239_v14 = vshll.u32 %v60_v10, 16  ;;  %8402 = vmatpush2.bf16.msra.mxu1 %v10997_v55 }
  0x8c   :  { %v1992_v15 = vor.u32 %v1990_v63, %v1989_v9  ;;  %v2555_v16 = vsel %vm11598_vm7, %v1984_v7, %v2554_v59  ;;  %v244_v17 = vshrl.u32 %v61_v12, 16  ;;  %v247_v19 = vshll.u32 %v61_v12, 16  ;;  %v889_v20 = vld [vmem:[#allocation3 + $0x40] sm:$0xf]  ;;  %v890_v21 = vld [vmem:[#allocation3 + $0x44] sm:$0xf]  ;;  %8403 = vmatprep.subr.bf16.mxu1 %v13607_v0 }
  0x8d   :  { %v11007_v24 = vld [vmem:[#allocation2 + $0x1fc] ss:$36 sps:$4 sm:$0xff]   ;;  %2556 = vst [vmem:[#allocation2 + $0xc] sm:$0xf] %v2555_v16  ;;  %v238_v25 = vrot.slane %v236_v13, 7  ;;  %8687 = vmatpush2.bf16.msra.mxu0 %v11058_v1  ;;  %v11006_v36 = vld [vmem:[#allocation6 + $0xd0] sm:$0xff]  }
  0x8e   :  { %v683_v26 = vld [vmem:[#allocation2 + $0x288] sm:$0xf]  ;;  %949 = vst [vmem:[#allocation2 + $0x28c] sm:$0xf] %v889_v20  ;;  %950 = vst [vmem:[#allocation2 + $0x2b0] sm:$0xf] %v890_v21  ;;  %v1993_v27 = vsel %vm11592_vm6, %v1985_v8, %v1992_v15  ;;  %8171 = vmatmul.mubr.bf16.gmra.mxu0 %v11002_v2  ;;  %8363 = vmatmul.mubr.bf16.gmra.mxu1 %v11003_v11 }
  0x8f   :  { %v246_v28 = vrot.slane %v244_v17, 7  ;;  %v997_v29 = vld [vmem:[#allocation3] sm:$0xf]  ;;  %v998_v30 = vld [vmem:[#allocation3 + $0x4] sm:$0xf]  ;;  %v241_v32 = vor.u32 %v239_v14, %v238_v25  ;;  %v242_v33 = vrot.slane %v238_v25, 4  ;;  %8404 = vmatpush2.bf16.msra.mxu1 %v11004_v4  ;;  %8178 = vmatprep.mubr.bf16.mxu0 %v11007_v24 }
  0x90   :  { %vm1057_vm11 = vsmask.f32 3328  ;;  %v801_v31 = vld [vmem:[#allocation2 + $0x240] sm:$0x1]  ;;  %2557 = vst [vmem:[#allocation2 + $0x30] sm:$0xf] %v1993_v27  ;;  %8405 = vmatprep.subr.bf16.mxu1 %v13607_v0  ;;  %8688 = vmatprep.subr.bf16.mxu0 %v13607_v0 }
  0x91   :  { %v1061_v35 = vshrl.u32 %v997_v29, 16  ;;  %v802_v37 = vsel %vm11580_vm2, 0, %v801_v31  ;;  %v249_v38 = vor.u32 %v247_v19, %v246_v28  ;;  %v1064_v39 = vshll.u32 %v997_v29, 16  ;;  %v11079_v41 = vld [vmem:[#allocation6 + $0x160] sm:$0xff]   ;;  %v11011_v42 = vld [vmem:[#allocation2 + $0x1f8] ss:$36 sps:$4 sm:$0xff]   ;;  %8689 = vmatpush2.bf16.msra.mxu0 %v11072_v23  ;;  %vm11771_vm14 = vmand %vm648_vm5, %vm1057_vm11 }
  0x92   :  { %v1070_v40 = vshll.u32 %v998_v30, 16  ;;  %803 = vst [vmem:[#allocation2 + $0x240] sm:$0x1] %v802_v37  ;;  %v684_v43 = vsel %vm11598_vm7, %v241_v32, %v683_v26  ;;  %v1074_v45 = vshrl.u32 %v998_v30, 16  ;;  %v1916_v46 = vld [vmem:[#allocation3 + $0x8] sm:$0xf]  ;;  %8690 = vmatprep.subr.bf16.mxu0 %v13607_v0 }
  0x93   :  { %v1063_v44 = vrot.slane %v1061_v35, 4  ;;  %v1917_v47 = vld [vmem:[#allocation3 + $0xc] sm:$0xf]  ;;  %v11009_v48 = vld [vmem:[#allocation2 + $0x8bc] ss:$36 sps:$4 sm:$0xff]   ;;  %v250_v50 = vsel %vm11592_vm6, %v242_v33, %v249_v38  ;;  %v1066_v51 = vrot.slane %v1064_v39, 5  ;;  %8406 = vmatpush2.bf16.msra.mxu1 %v11006_v36 }
  0x94   :  { %v11013_v49 = vld [vmem:[#allocation6 + $0xc8] sm:$0xff]   ;;  %685 = vst [vmem:[#allocation2 + $0x288] sm:$0xf] %v684_v43  ;;  %vm1058_vm12 = vsmask.f32 7440  ;;  %v1072_v53 = vrot.slane %v1070_v40, 5  ;;  %8370 = vmatprep.mubr.bf16.mxu1 %v11009_v48  ;;  %8407 = vmatprep.subr.bf16.mxu1 %v13607_v0 }
  0x95   :  { %v11012_v52 = vld [vmem:[#allocation2 + $0x8b8] ss:$36 sps:$4 sm:$0xff]   ;;  %686 = vst [vmem:[#allocation2 + $0x2ac] sm:$0xf] %v250_v50  ;;  %v1076_v54 = vrot.slane %v1074_v45, 4  ;;  %v1995_v55 = vshrl.u32 %v1916_v46, 16  ;;  %v1067_v58 = vor.u32 %v1066_v51, %v1063_v44  ;;  %vm11765_vm13 = vmor %vm1057_vm11, %vm1058_vm12  ;;  %8691 = vmatpush2.bf16.msra.mxu0 %v11079_v41 }
  0x96   :  { %v1998_v56 = vshll.u32 %v1916_v46, 16  ;;  %v2682_v57 = vld [vmem:[#allocation2 + $0xc] sm:$0x1]  ;;  %v1692_v59 = vld [vmem:[#allocation2 + $0x74] sm:$0xf]  ;;  %v2003_v60 = vshrl.u32 %v1917_v47, 16  ;;  %8179 = vmatmul.mubr.bf16.gmra.mxu0 %v11011_v42  ;;  %8371 = vmatmul.mubr.bf16.gmra.mxu1 %v11012_v52 }
  0x97   :  { %v2006_v61 = vshll.u32 %v1917_v47, 16  ;;  %v2558_v62 = vld [vmem:[#allocation2 + $0x54] sm:$0xf]  ;;  %v2683_v63 = vsel %vm11580_vm2, 0, %v2682_v57  ;;  %v1077_v2 = vor.u32 %v1076_v54, %v1072_v53  ;;  %v1997_v3 = vrot.slane %v1995_v55, 7  ;;  %v11014_v11 = vld [vmem:[#allocation6 + $0xc0] sm:$0xff]   ;;  %8408 = vmatpush2.bf16.msra.mxu1 %v11013_v49  ;;  %8692 = vmatprep.subr.bf16.mxu0 %v13607_v0 }
  0x98   :  { %v62_v4 = vld [vmem:[#allocation3 + $0x48] sm:$0xf]  ;;  %2684 = vst [vmem:[#allocation2 + $0xc] sm:$0x1] %v2683_v63  ;;  %v1068_v7 = vrot.slane %v1067_v58, 4  ;;  %v2005_v8 = vrot.slane %v2003_v60, 7  ;;  %8409 = vmatprep.subr.bf16.mxu1 %v13607_v0 }
  0x99   :  { %v63_v9 = vld [vmem:[#allocation3 + $0x4c] sm:$0xf]  ;;  %v252_v10 = vshrl.u32 %v62_v4, 16  ;;  %v1078_v12 = vrot.slane %v1077_v2, 4  ;;  %v2000_v13 = vor.u32 %v1998_v56, %v1997_v3  ;;  %v2001_v14 = vrot.slane %v1997_v3, 4  ;;  %v11022_v39 = vld [vmem:[#allocation6 + $0x1b8] sm:$0xff]  }
  0x9a   :  { %v255_v15 = vshll.u32 %v62_v4, 16  ;;  %v11016_v16 = vld [vmem:[#allocation2 + $0x244] ss:$36 sps:$4 sm:$0xff]   ;;  %v1073_v17 = vsel %vm11765_vm13, %v1068_v7, %v1072_v53  ;;  %v2008_v19 = vor.u32 %v2006_v61, %v2005_v8  ;;  %v687_v21 = vld [vmem:[#allocation2 + $0x2d0] sm:$0xf]  ;;  %v260_v26 = vshrl.u32 %v63_v9, 16 }
  0x9b   :  { %v254_v20 = vrot.slane %v252_v10, 7  ;;  %v804_v23 = vld [vmem:[#allocation2 + $0x288] sm:$0x1]  ;;  %1690 = vst [vmem:[#allocation2 + $0x50] sm:$0xf] %v1073_v17  ;;  %v1693_v24 = vsel %vm11771_vm14, %v1078_v12, %v1692_v59  ;;  %v2559_v25 = vsel %vm11598_vm7, %v2000_v13, %v2558_v62  ;;  %v263_v27 = vshll.u32 %v63_v9, 16  ;;  %8186 = vmatprep.mubr.bf16.mxu0 %v11016_v16  ;;  %8410 = vmatpush2.bf16.msra.mxu1 %v11014_v11 }
  0x9c   :  { %v891_v28 = vld [vmem:[#allocation3 + $0x48] sm:$0xf]  ;;  %v11021_v29 = vld [vmem:[#allocation2 + $0x240] ss:$36 sps:$4 sm:$0xff]   ;;  %v805_v30 = vsel %vm11580_vm2, 0, %v804_v23  ;;  %v2009_v31 = vsel %vm11592_vm6, %v2001_v14, %v2008_v19  ;;  %v262_v36 = vrot.slane %v260_v26, 7  ;;  %8957 = vmatprep.subr.bf16.mxu1 %v13607_v0 }
  0x9d   :  { %1694 = vst [vmem:[#allocation2 + $0x74] sm:$0xf] %v1693_v24  ;;  %2560 = vst [vmem:[#allocation2 + $0x54] sm:$0xf] %v2559_v25  ;;  %v257_v32 = vor.u32 %v255_v15, %v254_v20  ;;  %v892_v33 = vld [vmem:[#allocation3 + $0x4c] sm:$0xf] }
  0x9e   :  { %951 = vst [vmem:[#allocation2 + $0x2d4] sm:$0xf] %v891_v28  ;;  %806 = vst [vmem:[#allocation2 + $0x288] sm:$0x1] %v805_v30  ;;  %v258_v35 = vrot.slane %v254_v20, 4  ;;  %v265_v46 = vor.u32 %v263_v27, %v262_v36  ;;  %8187 = vmatmul.mubr.bf16.gmra.mxu0 %v11021_v29  ;;  %v11093_v57 = vld [vmem:[#allocation6 + $0x158] sm:$0xff]  }
  0x9f   :  { %2561 = vst [vmem:[#allocation2 + $0x78] sm:$0xf] %v2009_v31  ;;  %952 = vst [vmem:[#allocation2 + $0x2f8] sm:$0xf] %v892_v33  ;;  %v999_v37 = vld [vmem:[#allocation3 + $0x8] sm:$0xf]  ;;  %v688_v40 = vsel %vm11598_vm7, %v257_v32, %v687_v21  ;;  %8693 = vmatpush2.bf16.msra.mxu0 %v11093_v57 }
  0xa0   :  { %v1000_v38 = vld [vmem:[#allocation3 + $0xc] sm:$0xf]  ;;  %v1080_v41 = vshrl.u32 %v999_v37, 16  ;;  %v1083_v42 = vshll.u32 %v999_v37, 16  ;;  %689 = vst [vmem:[#allocation2 + $0x2d0] sm:$0xf] %v688_v40  ;;  %v266_v52 = vsel %vm11592_vm6, %v258_v35, %v265_v46  ;;  %8694 = vmatprep.subr.bf16.mxu0 %v13607_v0 }
  0xa1   :  { %v1089_v43 = vshll.u32 %v1000_v38, 16  ;;  %v11018_v44 = vld [vmem:[#allocation2 + $0x8] ss:$36 sps:$4 sm:$0xff]   ;;  %v1093_v47 = vshrl.u32 %v1000_v38, 16  ;;  %v1918_v51 = vld [vmem:[#allocation3 + $0x10] sm:$0xf] }
  0xa2   :  { %v11020_v45 = vld [vmem:[#allocation2 + $0xc] ss:$36 sps:$4 sm:$0xff]   ;;  %v1082_v48 = vrot.slane %v1080_v41, 4  ;;  %v1085_v49 = vrot.slane %v1083_v42, 5  ;;  %v1919_v54 = vld [vmem:[#allocation3 + $0x14] sm:$0xf] }
  0xa3   :  { %v1091_v50 = vrot.slane %v1089_v43, 5  ;;  %8411 = vmatprep.mubr.bf16.mxu1 %v11020_v45  ;;  %v1095_v53 = vrot.slane %v1093_v47, 4  ;;  %v2011_v55 = vshrl.u32 %v1918_v51, 16  ;;  %v2014_v56 = vshll.u32 %v1918_v51, 16  ;;  %690 = vst [vmem:[#allocation2 + $0x2f4] sm:$0xf] %v266_v52 }
  0xa4   :  { %8412 = vmatmul.mubr.bf16.vlgmr.msra.gmra.mxu1 %v11018_v44  ;;  %v1086_v58 = vor.u32 %v1085_v49, %v1082_v48  ;;  %v1696_v59 = vld [vmem:[#allocation2 + $0xbc] sm:$0xf]  ;;  %v2019_v60 = vshrl.u32 %v1919_v54, 16  ;;  %v11037_v62 = vld [vmem:[#allocation6 + $0x1b0] sm:$0xff]   ;;  %v2022_v7 = vshll.u32 %v1919_v54, 16  ;;  %v11051_v26 = vld [vmem:[#allocation6 + $0x1a8] sm:$0xff]  }
  0xa5   :  { %v2562_v61 = vld [vmem:[#allocation2 + $0x9c] sm:$0xf]  ;;  %8958 = vmatpush1.bf16.msra.mxu1 %v11022_v39  ;;  %v1821_v63 = vld [vmem:[#allocation2 + $0x74] sm:$0x8]  ;;  %v2685_v2 = vld [vmem:[#allocation2 + $0x54] sm:$0x1]  ;;  %v1096_v3 = vor.u32 %v1095_v53, %v1091_v50 }
  0xa6   :  { %v2013_v4 = vrot.slane %v2011_v55, 7  ;;  %v11023_v8 = vld [vmem:[#allocation2 + $0x28c] ss:$36 sps:$4 sm:$0xff]   ;;  %v1822_v9 = vsel %vm11727_vm10, 0, %v1821_v63  ;;  %v2686_v10 = vsel %vm11580_vm2, 0, %v2685_v2  ;;  %v1087_v11 = vrot.slane %v1086_v58, 4  ;;  %8959 = vmatprep.subr.bf16.mxu1 %v13607_v0 }
  0xa7   :  { %1823 = vst [vmem:[#allocation2 + $0x74] sm:$0x8] %v1822_v9  ;;  %2687 = vst [vmem:[#allocation2 + $0x54] sm:$0x1] %v2686_v10  ;;  %v11027_v12 = vld [vmem:[#allocation2 + $0x288] ss:$36 sps:$4 sm:$0xff]   ;;  %8194 = vmatprep.mubr.bf16.mxu0 %v11023_v8 }
  0xa8   :  { %v1097_v13 = vrot.slane %v1096_v3, 4  ;;  %v2016_v14 = vor.u32 %v2014_v56, %v2013_v4  ;;  %v2017_v15 = vrot.slane %v2013_v4, 4  ;;  %v2021_v16 = vrot.slane %v2019_v60, 7  ;;  %v807_v17 = vld [vmem:[#allocation2 + $0x2d0] sm:$0x1]  ;;  %8195 = vmatmul.mubr.bf16.gmra.mxu0 %v11027_v12  ;;  %v11065_v43 = vld [vmem:[#allocation6 + $0x1a0] sm:$0xff]  }
  0xa9   :  { %v1092_v19 = vsel %vm11765_vm13, %v1087_v11, %v1091_v50  ;;  %v808_v20 = vsel %vm11580_vm2, 0, %v807_v17  ;;  %8960 = vmatpush1.bf16.msra.mxu1 %v11037_v62  ;;  %v64_v25 = vld [vmem:[#allocation3 + $0x50] sm:$0xf]  ;;  %v65_v27 = vld [vmem:[#allocation3 + $0x54] sm:$0xf]  ;;  %v11080_v56 = vld [vmem:[#allocation6 + $0x198] sm:$0xff]  }
  0xaa   :  { %1695 = vst [vmem:[#allocation2 + $0x98] sm:$0xf] %v1092_v19  ;;  %v1697_v21 = vsel %vm11771_vm14, %v1097_v13, %v1696_v59  ;;  %v2024_v23 = vor.u32 %v2022_v7, %v2021_v16  ;;  %v2563_v24 = vsel %vm11598_vm7, %v2016_v14, %v2562_v61  ;;  %809 = vst [vmem:[#allocation2 + $0x2d0] sm:$0x1] %v808_v20  ;;  %v268_v28 = vshrl.u32 %v64_v25, 16  ;;  %v11101_v12 = vld [vmem:[#allocation6 + $0x150] sm:$0xff]  }
  0xab   :  { %1698 = vst [vmem:[#allocation2 + $0xbc] sm:$0xf] %v1697_v21  ;;  %2564 = vst [vmem:[#allocation2 + $0x9c] sm:$0xf] %v2563_v24  ;;  %v271_v29 = vshll.u32 %v64_v25, 16  ;;  %8961 = vmatprep.subr.bf16.mxu1 %v13607_v0  ;;  %v276_v31 = vshrl.u32 %v65_v27, 16  ;;  %8695 = vmatpush2.bf16.msra.mxu0 %v11101_v12 }
  0xac   :  { %v2025_v30 = vsel %vm11592_vm6, %v2017_v15, %v2024_v23  ;;  %v279_v32 = vshll.u32 %v65_v27, 16  ;;  %v691_v33 = vld [vmem:[#allocation2 + $0x318] sm:$0xf]  ;;  %v893_v35 = vld [vmem:[#allocation3 + $0x50] sm:$0xf]  ;;  %v270_v36 = vrot.slane %v268_v28, 7  ;;  %8696 = vmatprep.subr.bf16.mxu0 %v13607_v0 }
  0xad   :  { %2565 = vst [vmem:[#allocation2 + $0xc0] sm:$0xf] %v2025_v30  ;;  %v894_v37 = vld [vmem:[#allocation3 + $0x54] sm:$0xf]  ;;  %953 = vst [vmem:[#allocation2 + $0x31c] sm:$0xf] %v893_v35  ;;  %8962 = vmatpush1.bf16.msra.mxu1 %v11051_v26 }
  0xae   :  { %v1001_v38 = vld [vmem:[#allocation3 + $0x10] sm:$0xf]  ;;  %v278_v39 = vrot.slane %v276_v31, 7  ;;  %954 = vst [vmem:[#allocation2 + $0x340] sm:$0xf] %v894_v37  ;;  %v273_v45 = vor.u32 %v271_v29, %v270_v36  ;;  %v274_v46 = vrot.slane %v270_v36, 4  ;;  %8963 = vmatprep.subr.bf16.mxu1 %v13607_v0 }
  0xaf   :  { %v1002_v40 = vld [vmem:[#allocation3 + $0x14] sm:$0xf]  ;;  %v1099_v41 = vshrl.u32 %v1001_v38, 16  ;;  %v1102_v42 = vshll.u32 %v1001_v38, 16  ;;  %v1920_v55 = vld [vmem:[#allocation3 + $0x18] sm:$0xf] }
  0xb0   :  { %v11025_v44 = vld [vmem:[#allocation2 + $0x54] ss:$36 sps:$4 sm:$0xff]   ;;  %v1108_v47 = vshll.u32 %v1002_v40, 16  ;;  %v281_v49 = vor.u32 %v279_v32, %v278_v39  ;;  %v1112_v52 = vshrl.u32 %v1002_v40, 16  ;;  %v692_v53 = vsel %vm11598_vm7, %v273_v45, %v691_v33  ;;  %v1700_v3 = vld [vmem:[#allocation2 + $0x104] sm:$0xf] }
  0xb1   :  { %v11028_v48 = vld [vmem:[#allocation2 + $0x50] ss:$36 sps:$4 sm:$0xff]   ;;  %v1101_v50 = vrot.slane %v1099_v41, 4  ;;  %v1104_v51 = vrot.slane %v1102_v42, 5  ;;  %8419 = vmatprep.mubr.bf16.mxu1 %v11025_v44  ;;  %693 = vst [vmem:[#allocation2 + $0x318] sm:$0xf] %v692_v53  ;;  %8964 = vmatpush1.bf16.msra.mxu1 %v11065_v43 }
  0xb2   :  { %v1110_v54 = vrot.slane %v1108_v47, 5  ;;  %8420 = vmatmul.mubr.bf16.gmra.mxu1 %v11028_v48  ;;  %v11030_v57 = vld [vmem:[#allocation2 + $0x2d4] ss:$36 sps:$4 sm:$0xff]   ;;  %v1824_v58 = vld [vmem:[#allocation2 + $0xbc] sm:$0x8]  ;;  %v282_v59 = vsel %vm11592_vm6, %v274_v46, %v281_v49  ;;  %v1114_v61 = vrot.slane %v1112_v52, 4  ;;  %8965 = vmatprep.subr.bf16.mxu1 %v13607_v0 }
  0xb3   :  { %v1105_v60 = vor.u32 %v1104_v51, %v1101_v50  ;;  %v1825_v62 = vsel %vm11727_vm10, 0, %v1824_v58  ;;  %v2688_v63 = vld [vmem:[#allocation2 + $0x9c] sm:$0x1]  ;;  %v11034_v2 = vld [vmem:[#allocation2 + $0x2d0] ss:$36 sps:$4 sm:$0xff]   ;;  %v2027_v4 = vshrl.u32 %v1920_v55, 16  ;;  %8202 = vmatprep.mubr.bf16.mxu0 %v11030_v57 }
  0xb4   :  { %694 = vst [vmem:[#allocation2 + $0x33c] sm:$0xf] %v282_v59  ;;  %1826 = vst [vmem:[#allocation2 + $0xbc] sm:$0x8] %v1825_v62  ;;  %v2689_v7 = vsel %vm11580_vm2, 0, %v2688_v63  ;;  %v1115_v9 = vor.u32 %v1114_v61, %v1110_v54  ;;  %v2030_v11 = vshll.u32 %v1920_v55, 16  ;;  %8203 = vmatmul.mubr.bf16.gmra.mxu0 %v11034_v2 }
  0xb5   :  { %v1106_v8 = vrot.slane %v1105_v60, 4  ;;  %v1921_v10 = vld [vmem:[#allocation3 + $0x1c] sm:$0xf]  ;;  %2690 = vst [vmem:[#allocation2 + $0x9c] sm:$0x1] %v2689_v7  ;;  %v2029_v13 = vrot.slane %v2027_v4, 7  ;;  %8966 = vmatpush1.bf16.msra.mxu1 %v11080_v56 }
  0xb6   :  { %v2035_v14 = vshrl.u32 %v1921_v10, 16  ;;  %v2038_v15 = vshll.u32 %v1921_v10, 16  ;;  %v2566_v16 = vld [vmem:[#allocation2 + $0xe4] sm:$0xf]  ;;  %v1116_v19 = vrot.slane %v1115_v9, 4  ;;  %v11094_v27 = vld [vmem:[#allocation6 + $0x190] sm:$0xff]   ;;  %8967 = vmatprep.subr.bf16.mxu1 %v13607_v0 }
  0xb7   :  { %v1111_v17 = vsel %vm11765_vm13, %v1106_v8, %v1110_v54  ;;  %v66_v20 = vld [vmem:[#allocation3 + $0x58] sm:$0xf]  ;;  %v67_v21 = vld [vmem:[#allocation3 + $0x5c] sm:$0xf]  ;;  %v2032_v23 = vor.u32 %v2030_v11, %v2029_v13  ;;  %v2033_v24 = vrot.slane %v2029_v13, 4  ;;  %v11108_v60 = vld [vmem:[#allocation6 + $0x188] sm:$0xff]  }
  0xb8   :  { %1699 = vst [vmem:[#allocation2 + $0xe0] sm:$0xf] %v1111_v17  ;;  %v2037_v25 = vrot.slane %v2035_v14, 7  ;;  %v284_v26 = vshrl.u32 %v66_v20, 16  ;;  %v1701_v28 = vsel %vm11771_vm14, %v1116_v19, %v1700_v3  ;;  %v287_v29 = vshll.u32 %v66_v20, 16 }
  0xb9   :  { %v292_v30 = vshrl.u32 %v67_v21, 16  ;;  %v295_v31 = vshll.u32 %v67_v21, 16  ;;  %v695_v32 = vld [vmem:[#allocation2 + $0x360] sm:$0xf]  ;;  %v895_v33 = vld [vmem:[#allocation3 + $0x58] sm:$0xf]  ;;  %v2567_v37 = vsel %vm11598_vm7, %v2032_v23, %v2566_v16  ;;  %8968 = vmatpush1.bf16.msra.mxu1 %v11094_v27 }
  0xba   :  { %v810_v35 = vld [vmem:[#allocation2 + $0x318] sm:$0x1]  ;;  %1702 = vst [vmem:[#allocation2 + $0x104] sm:$0xf] %v1701_v28  ;;  %v2040_v36 = vor.u32 %v2038_v15, %v2037_v25  ;;  %v286_v38 = vrot.slane %v284_v26, 7  ;;  %8969 = vmatprep.subr.bf16.mxu1 %v13607_v0 }
  0xbb   :  { %v896_v39 = vld [vmem:[#allocation3 + $0x5c] sm:$0xf]  ;;  %955 = vst [vmem:[#allocation2 + $0x364] sm:$0xf] %v895_v33  ;;  %v811_v40 = vsel %vm11580_vm2, 0, %v810_v35  ;;  %v294_v41 = vrot.slane %v292_v30, 7 }
  0xbc   :  { %2568 = vst [vmem:[#allocation2 + $0xe4] sm:$0xf] %v2567_v37  ;;  %956 = vst [vmem:[#allocation2 + $0x388] sm:$0xf] %v896_v39  ;;  %v1003_v42 = vld [vmem:[#allocation3 + $0x18] sm:$0xf]  ;;  %v2041_v43 = vsel %vm11592_vm6, %v2033_v24, %v2040_v36  ;;  %v289_v44 = vor.u32 %v287_v29, %v286_v38 }
  0xbd   :  { %812 = vst [vmem:[#allocation2 + $0x318] sm:$0x1] %v811_v40  ;;  %v290_v45 = vrot.slane %v286_v38, 4  ;;  %v1004_v46 = vld [vmem:[#allocation3 + $0x1c] sm:$0xf]  ;;  %v1118_v47 = vshrl.u32 %v1003_v42, 16  ;;  %v297_v50 = vor.u32 %v295_v31, %v294_v41  ;;  %8970 = vmatpush1.bf16.msra.mxu1 %v11108_v60 }
  0xbe   :  { %v11032_v48 = vld [vmem:[#allocation2 + $0x9c] ss:$36 sps:$4 sm:$0xff]   ;;  %2569 = vst [vmem:[#allocation2 + $0x108] sm:$0xf] %v2041_v43  ;;  %v1121_v51 = vshll.u32 %v1003_v42, 16  ;;  %v696_v52 = vsel %vm11598_vm7, %v289_v44, %v695_v32  ;;  %v1127_v54 = vshll.u32 %v1004_v46, 16  ;;  %8971 = vmatprep.subr.bf16.mxu1 %v13607_v0 }
  0xbf   :  { %v11035_v49 = vld [vmem:[#allocation2 + $0x98] ss:$36 sps:$4 sm:$0xff]   ;;  %v1120_v53 = vrot.slane %v1118_v47, 4  ;;  %v1131_v55 = vshrl.u32 %v1004_v46, 16  ;;  %8427 = vmatprep.mubr.bf16.mxu1 %v11032_v48  ;;  %v298_v56 = vsel %vm11592_vm6, %v290_v45, %v297_v50  ;;  %697 = vst [vmem:[#allocation2 + $0x360] sm:$0xf] %v696_v52 }
  0xc0   :  { %v1123_v57 = vrot.slane %v1121_v51, 5  ;;  %v1922_v58 = vld [vmem:[#allocation3 + $0x20] sm:$0xf]  ;;  %v1923_v59 = vld [vmem:[#allocation3 + $0x24] sm:$0xf]  ;;  %8428 = vmatmul.mubr.bf16.gmra.mxu1 %v11035_v49  ;;  %v1129_v61 = vrot.slane %v1127_v54, 5 }
  0xc1   :  { %698 = vst [vmem:[#allocation2 + $0x384] sm:$0xf] %v298_v56  ;;  %v1133_v62 = vrot.slane %v1131_v55, 4  ;;  %v2043_v63 = vshrl.u32 %v1922_v58, 16  ;;  %v2046_v2 = vshll.u32 %v1922_v58, 16  ;;  %v2051_v8 = vshrl.u32 %v1923_v59, 16 }
  0xc2   :  { %v1827_v3 = vld [vmem:[#allocation2 + $0x104] sm:$0x8]  ;;  %v1124_v4 = vor.u32 %v1123_v57, %v1120_v53  ;;  %v1704_v7 = vld [vmem:[#allocation2 + $0x14c] sm:$0xf]  ;;  %v2054_v9 = vshll.u32 %v1923_v59, 16 }
  0xc3   :  { %v2570_v10 = vld [vmem:[#allocation2 + $0x12c] sm:$0xf]  ;;  %v1828_v11 = vsel %vm11727_vm10, 0, %v1827_v3  ;;  %v2691_v12 = vld [vmem:[#allocation2 + $0xe4] sm:$0x1]  ;;  %v1134_v13 = vor.u32 %v1133_v62, %v1129_v61  ;;  %v2045_v14 = vrot.slane %v2043_v63, 7 }
  0xc4   :  { %v11038_v15 = vld [vmem:[#allocation2 + $0x31c] ss:$36 sps:$4 sm:$0xff]   ;;  %1829 = vst [vmem:[#allocation2 + $0x104] sm:$0x8] %v1828_v11  ;;  %v2692_v16 = vsel %vm11580_vm2, 0, %v2691_v12  ;;  %v1125_v19 = vrot.slane %v1124_v4, 4 }
  0xc5   :  { %v11042_v17 = vld [vmem:[#allocation2 + $0x318] ss:$36 sps:$4 sm:$0xff]   ;;  %2693 = vst [vmem:[#allocation2 + $0xe4] sm:$0x1] %v2692_v16  ;;  %v1135_v20 = vrot.slane %v1134_v13, 4  ;;  %v2048_v21 = vor.u32 %v2046_v2, %v2045_v14  ;;  %8210 = vmatprep.mubr.bf16.mxu0 %v11038_v15  ;;  %v2049_v23 = vrot.slane %v2045_v14, 4 }
  0xc6   :  { %v2053_v24 = vrot.slane %v2051_v8, 7  ;;  %v68_v25 = vld [vmem:[#allocation3 + $0x60] sm:$0xf]  ;;  %8211 = vmatmul.mubr.bf16.gmra.mxu0 %v11042_v17  ;;  %v1130_v27 = vsel %vm11765_vm13, %v1125_v19, %v1129_v61  ;;  %v69_v30 = vld [vmem:[#allocation3 + $0x64] sm:$0xf]  ;;  %v11115_v59 = vld [vmem:[#allocation6 + $0x148] sm:$0xff]  }
  0xc7   :  { %v813_v26 = vld [vmem:[#allocation2 + $0x360] sm:$0x1]  ;;  %v1705_v28 = vsel %vm11771_vm14, %v1135_v20, %v1704_v7  ;;  %v2571_v29 = vsel %vm11598_vm7, %v2048_v21, %v2570_v10  ;;  %v300_v31 = vshrl.u32 %v68_v25, 16  ;;  %1703 = vst [vmem:[#allocation2 + $0x128] sm:$0xf] %v1130_v27  ;;  %v303_v35 = vshll.u32 %v68_v25, 16  ;;  %8697 = vmatpush2.bf16.msra.mxu0 %v11115_v59 }
  0xc8   :  { %v814_v32 = vsel %vm11580_vm2, 0, %v813_v26  ;;  %1706 = vst [vmem:[#allocation2 + $0x14c] sm:$0xf] %v1705_v28  ;;  %v2056_v33 = vor.u32 %v2054_v9, %v2053_v24  ;;  %2572 = vst [vmem:[#allocation2 + $0x12c] sm:$0xf] %v2571_v29  ;;  %v308_v36 = vshrl.u32 %v69_v30, 16  ;;  %8698 = vmatprep.subr.bf16.mxu0 %v13607_v0 }
  0xc9   :  { %v699_v37 = vld [vmem:[#allocation2 + $0x3a8] sm:$0xf]  ;;  %815 = vst [vmem:[#allocation2 + $0x360] sm:$0x1] %v814_v32  ;;  %v302_v38 = vrot.slane %v300_v31, 7  ;;  %v311_v39 = vshll.u32 %v69_v30, 16 }
  0xca   :  { %v897_v40 = vld [vmem:[#allocation3 + $0x60] sm:$0xf]  ;;  %v898_v41 = vld [vmem:[#allocation3 + $0x64] sm:$0xf]  ;;  %v2057_v42 = vsel %vm11592_vm6, %v2049_v23, %v2056_v33  ;;  %v310_v43 = vrot.slane %v308_v36, 7 }
  0xcb   :  { %957 = vst [vmem:[#allocation2 + $0x3ac] sm:$0xf] %v897_v40  ;;  %958 = vst [vmem:[#allocation2 + $0x3d0] sm:$0xf] %v898_v41  ;;  %v1005_v44 = vld [vmem:[#allocation3 + $0x20] sm:$0xf]  ;;  %v305_v46 = vor.u32 %v303_v35, %v302_v38 }
  0xcc   :  { %v1006_v45 = vld [vmem:[#allocation3 + $0x24] sm:$0xf]  ;;  %2573 = vst [vmem:[#allocation2 + $0x150] sm:$0xf] %v2057_v42  ;;  %v306_v47 = vrot.slane %v302_v38, 4  ;;  %v1137_v48 = vshrl.u32 %v1005_v44, 16  ;;  %v313_v52 = vor.u32 %v311_v39, %v310_v43 }
  0xcd   :  { %v1140_v49 = vshll.u32 %v1005_v44, 16  ;;  %v11040_v50 = vld [vmem:[#allocation2 + $0xe4] ss:$36 sps:$4 sm:$0xff]   ;;  %v1146_v53 = vshll.u32 %v1006_v45, 16  ;;  %v700_v54 = vsel %vm11598_vm7, %v305_v46, %v699_v37  ;;  %v1150_v57 = vshrl.u32 %v1006_v45, 16 }
  0xce   :  { %v11043_v51 = vld [vmem:[#allocation2 + $0xe0] ss:$36 sps:$4 sm:$0xff]   ;;  %v1139_v55 = vrot.slane %v1137_v48, 4  ;;  %v1924_v58 = vld [vmem:[#allocation3 + $0x28] sm:$0xf]  ;;  %8435 = vmatprep.mubr.bf16.mxu1 %v11040_v50  ;;  %v314_v60 = vsel %vm11592_vm6, %v306_v47, %v313_v52 }
  0xcf   :  { %v1142_v56 = vrot.slane %v1140_v49, 5  ;;  %701 = vst [vmem:[#allocation2 + $0x3a8] sm:$0xf] %v700_v54  ;;  %v1148_v61 = vrot.slane %v1146_v53, 5  ;;  %v1925_v62 = vld [vmem:[#allocation3 + $0x2c] sm:$0xf]  ;;  %8436 = vmatmul.mubr.bf16.gmra.mxu1 %v11043_v51 }
  0xd0   :  { %v2059_v63 = vshrl.u32 %v1924_v58, 16  ;;  %v2062_v2 = vshll.u32 %v1924_v58, 16  ;;  %v1830_v3 = vld [vmem:[#allocation2 + $0x14c] sm:$0x8]  ;;  %v2694_v4 = vld [vmem:[#allocation2 + $0x12c] sm:$0x1] }
  0xd1   :  { %702 = vst [vmem:[#allocation2 + $0x3cc] sm:$0xf] %v314_v60  ;;  %v1143_v7 = vor.u32 %v1142_v56, %v1139_v55  ;;  %v1152_v8 = vrot.slane %v1150_v57, 4  ;;  %v2067_v9 = vshrl.u32 %v1925_v62, 16  ;;  %v11044_v10 = vld [vmem:[#allocation2 + $0x364] ss:$36 sps:$4 sm:$0xff]  }
  0xd2   :  { %v1831_v11 = vsel %vm11727_vm10, 0, %v1830_v3  ;;  %v2695_v12 = vsel %vm11580_vm2, 0, %v2694_v4  ;;  %v1708_v13 = vld [vmem:[#allocation2 + $0x194] sm:$0xf]  ;;  %v2061_v14 = vrot.slane %v2059_v63, 7  ;;  %v2070_v20 = vshll.u32 %v1925_v62, 16  ;;  %8218 = vmatprep.mubr.bf16.mxu0 %v11044_v10 }
  0xd3   :  { %1832 = vst [vmem:[#allocation2 + $0x14c] sm:$0x8] %v1831_v11  ;;  %2696 = vst [vmem:[#allocation2 + $0x12c] sm:$0x1] %v2695_v12  ;;  %v11048_v15 = vld [vmem:[#allocation2 + $0x360] ss:$36 sps:$4 sm:$0xff]   ;;  %v1153_v17 = vor.u32 %v1152_v8, %v1148_v61 }
  0xd4   :  { %v1144_v16 = vrot.slane %v1143_v7, 4  ;;  %v2069_v19 = vrot.slane %v2067_v9, 7  ;;  %v2064_v21 = vor.u32 %v2062_v2, %v2061_v14  ;;  %v2065_v23 = vrot.slane %v2061_v14, 4  ;;  %v2574_v24 = vld [vmem:[#allocation2 + $0x174] sm:$0xf]  ;;  %8219 = vmatmul.mubr.bf16.gmra.mxu0 %v11048_v15  ;;  %v11122_v2 = vld [vmem:[#allocation6 + $0x140] sm:$0xff]  }
  0xd5   :  { %v1154_v26 = vrot.slane %v1153_v17, 4  ;;  %v70_v28 = vld [vmem:[#allocation3 + $0x68] sm:$0xf]  ;;  %v71_v30 = vld [vmem:[#allocation3 + $0x6c] sm:$0xf]  ;;  %8699 = vmatpush2.bf16.msra.mxu0 %v11122_v2  ;;  %v11123_v15 = vld [vmem:[#allocation6 + $0x180] sm:$0xff]  }
  0xd6   :  { %v1149_v25 = vsel %vm11765_vm13, %v1144_v16, %v1148_v61  ;;  %v2072_v27 = vor.u32 %v2070_v20, %v2069_v19  ;;  %v2575_v29 = vsel %vm11598_vm7, %v2064_v21, %v2574_v24  ;;  %v316_v31 = vshrl.u32 %v70_v28, 16  ;;  %v816_v33 = vld [vmem:[#allocation2 + $0x3a8] sm:$0x1]  ;;  %v703_v39 = vld [vmem:[#allocation2 + $0x3f0] sm:$0xf]  ;;  %8972 = vmatpush1.bf16.msra.mxu1 %v11123_v15 }
  0xd7   :  { %1707 = vst [vmem:[#allocation2 + $0x170] sm:$0xf] %v1149_v25  ;;  %v319_v32 = vshll.u32 %v70_v28, 16  ;;  %v1709_v35 = vsel %vm11771_vm14, %v1154_v26, %v1708_v13  ;;  %2576 = vst [vmem:[#allocation2 + $0x174] sm:$0xf] %v2575_v29  ;;  %v324_v37 = vshrl.u32 %v71_v30, 16  ;;  %8973 = vmatprep.subr.bf16.mxu1 %v13607_v0 }
  0xd8   :  { %v2073_v36 = vsel %vm11592_vm6, %v2065_v23, %v2072_v27  ;;  %v327_v38 = vshll.u32 %v71_v30, 16  ;;  %v899_v40 = vld [vmem:[#allocation3 + $0x68] sm:$0xf]  ;;  %v817_v41 = vsel %vm11580_vm2, 0, %v816_v33  ;;  %1710 = vst [vmem:[#allocation2 + $0x194] sm:$0xf] %v1709_v35 }
  0xd9   :  { %2577 = vst [vmem:[#allocation2 + $0x198] sm:$0xf] %v2073_v36  ;;  %v318_v42 = vrot.slane %v316_v31, 7  ;;  %v900_v43 = vld [vmem:[#allocation3 + $0x6c] sm:$0xf]  ;;  %v326_v44 = vrot.slane %v324_v37, 7 }
  0xda   :  { %959 = vst [vmem:[#allocation2 + $0x3f4] sm:$0xf] %v899_v40  ;;  %818 = vst [vmem:[#allocation2 + $0x3a8] sm:$0x1] %v817_v41  ;;  %v1007_v45 = vld [vmem:[#allocation3 + $0x28] sm:$0xf] }
  0xdb   :  { %960 = vst [vmem:[#allocation2 + $0x418] sm:$0xf] %v900_v43  ;;  %v1008_v46 = vld [vmem:[#allocation3 + $0x2c] sm:$0xf]  ;;  %v321_v48 = vor.u32 %v319_v32, %v318_v42  ;;  %v322_v49 = vrot.slane %v318_v42, 4  ;;  %v1156_v50 = vshrl.u32 %v1007_v45, 16  ;;  %v329_v52 = vor.u32 %v327_v38, %v326_v44 }
  0xdc   :  { %v11046_v47 = vld [vmem:[#allocation2 + $0x12c] ss:$36 sps:$4 sm:$0xff]   ;;  %v1159_v53 = vshll.u32 %v1007_v45, 16  ;;  %v1165_v54 = vshll.u32 %v1008_v46, 16  ;;  %v1169_v55 = vshrl.u32 %v1008_v46, 16 }
  0xdd   :  { %v11049_v51 = vld [vmem:[#allocation2 + $0x128] ss:$36 sps:$4 sm:$0xff]   ;;  %8443 = vmatprep.mubr.bf16.mxu1 %v11046_v47  ;;  %v704_v56 = vsel %vm11598_vm7, %v321_v48, %v703_v39  ;;  %v1158_v57 = vrot.slane %v1156_v50, 4  ;;  %v1926_v58 = vld [vmem:[#allocation3 + $0x30] sm:$0xf]  ;;  %v330_v59 = vsel %vm11592_vm6, %v322_v49, %v329_v52 }
  0xde   :  { %8444 = vmatmul.mubr.bf16.gmra.mxu1 %v11049_v51  ;;  %705 = vst [vmem:[#allocation2 + $0x3f0] sm:$0xf] %v704_v56  ;;  %v1161_v60 = vrot.slane %v1159_v53, 5  ;;  %v1167_v61 = vrot.slane %v1165_v54, 5  ;;  %v1171_v62 = vrot.slane %v1169_v55, 4  ;;  %v2075_v7 = vshrl.u32 %v1926_v58, 16 }
  0xdf   :  { %v1927_v63 = vld [vmem:[#allocation3 + $0x34] sm:$0xf]  ;;  %706 = vst [vmem:[#allocation2 + $0x414] sm:$0xf] %v330_v59  ;;  %v1712_v4 = vld [vmem:[#allocation2 + $0x1dc] sm:$0xf] }
  0xe0   :  { %v2697_v3 = vld [vmem:[#allocation2 + $0x174] sm:$0x1]  ;;  %v2078_v8 = vshll.u32 %v1926_v58, 16  ;;  %v2083_v9 = vshrl.u32 %v1927_v63, 16  ;;  %v1833_v10 = vld [vmem:[#allocation2 + $0x194] sm:$0x8]  ;;  %v1162_v12 = vor.u32 %v1161_v60, %v1158_v57  ;;  %v1172_v13 = vor.u32 %v1171_v62, %v1167_v61 }
  0xe1   :  { %v2698_v11 = vsel %vm11580_vm2, 0, %v2697_v3  ;;  %v2086_v14 = vshll.u32 %v1927_v63, 16  ;;  %v11052_v16 = vld [vmem:[#allocation2 + $0x3ac] ss:$36 sps:$4 sm:$0xff]   ;;  %v1834_v17 = vsel %vm11727_vm10, 0, %v1833_v10  ;;  %v2077_v24 = vrot.slane %v2075_v7, 7 }
  0xe2   :  { %2699 = vst [vmem:[#allocation2 + $0x174] sm:$0x1] %v2698_v11  ;;  %v11056_v19 = vld [vmem:[#allocation2 + $0x3a8] ss:$36 sps:$4 sm:$0xff]   ;;  %v2578_v20 = vld [vmem:[#allocation2 + $0x1bc] sm:$0xf]  ;;  %8226 = vmatprep.mubr.bf16.mxu0 %v11052_v16 }
  0xe3   :  { %1835 = vst [vmem:[#allocation2 + $0x194] sm:$0x8] %v1834_v17  ;;  %v1163_v21 = vrot.slane %v1162_v12, 4  ;;  %v1173_v23 = vrot.slane %v1172_v13, 4  ;;  %v2085_v25 = vrot.slane %v2083_v9, 7  ;;  %8227 = vmatmul.mubr.bf16.gmra.mxu0 %v11056_v19  ;;  %v2080_v30 = vor.u32 %v2078_v8, %v2077_v24 }
  0xe4   :  { %v72_v26 = vld [vmem:[#allocation3 + $0x70] sm:$0xf]  ;;  %v73_v27 = vld [vmem:[#allocation3 + $0x74] sm:$0xf]  ;;  %v2081_v31 = vrot.slane %v2077_v24, 4 }
  0xe5   :  { %v1168_v28 = vsel %vm11765_vm13, %v1163_v21, %v1167_v61  ;;  %v1713_v29 = vsel %vm11771_vm14, %v1173_v23, %v1712_v4  ;;  %v901_v32 = vld [vmem:[#allocation3 + $0x70] sm:$0xf]  ;;  %v2088_v35 = vor.u32 %v2086_v14, %v2085_v25  ;;  %v332_v36 = vshrl.u32 %v72_v26, 16  ;;  %v707_v42 = vld [vmem:[#allocation2 + $0x438] sm:$0xf] }
  0xe6   :  { %v819_v33 = vld [vmem:[#allocation2 + $0x3f0] sm:$0x1]  ;;  %1711 = vst [vmem:[#allocation2 + $0x1b8] sm:$0xf] %v1168_v28  ;;  %1714 = vst [vmem:[#allocation2 + $0x1dc] sm:$0xf] %v1713_v29  ;;  %v2579_v40 = vsel %vm11598_vm7, %v2080_v30, %v2578_v20 }
  0xe7   :  { %v335_v37 = vshll.u32 %v72_v26, 16  ;;  %v340_v38 = vshrl.u32 %v73_v27, 16  ;;  %961 = vst [vmem:[#allocation2 + $0x43c] sm:$0xf] %v901_v32  ;;  %v820_v39 = vsel %vm11580_vm2, 0, %v819_v33  ;;  %v343_v41 = vshll.u32 %v73_v27, 16 }
  0xe8   :  { %v902_v43 = vld [vmem:[#allocation3 + $0x74] sm:$0xf]  ;;  %821 = vst [vmem:[#allocation2 + $0x3f0] sm:$0x1] %v820_v39  ;;  %v2089_v44 = vsel %vm11592_vm6, %v2081_v31, %v2088_v35  ;;  %2580 = vst [vmem:[#allocation2 + $0x1bc] sm:$0xf] %v2579_v40 }
  0xe9   :  { %v334_v45 = vrot.slane %v332_v36, 7  ;;  %v342_v46 = vrot.slane %v340_v38, 7  ;;  %962 = vst [vmem:[#allocation2 + $0x460] sm:$0xf] %v902_v43  ;;  %v1009_v47 = vld [vmem:[#allocation3 + $0x30] sm:$0xf] }
  0xea   :  { %v1010_v48 = vld [vmem:[#allocation3 + $0x34] sm:$0xf]  ;;  %2581 = vst [vmem:[#allocation2 + $0x1e0] sm:$0xf] %v2089_v44  ;;  %v1175_v49 = vshrl.u32 %v1009_v47, 16  ;;  %v1178_v50 = vshll.u32 %v1009_v47, 16 }
  0xeb   :  { %v1184_v51 = vshll.u32 %v1010_v48, 16  ;;  %v1188_v52 = vshrl.u32 %v1010_v48, 16  ;;  %v11054_v53 = vld [vmem:[#allocation2 + $0x174] ss:$36 sps:$4 sm:$0xff]   ;;  %v337_v55 = vor.u32 %v335_v37, %v334_v45  ;;  %v338_v56 = vrot.slane %v334_v45, 4 }
  0xec   :  { %v11057_v54 = vld [vmem:[#allocation2 + $0x170] ss:$36 sps:$4 sm:$0xff]   ;;  %v345_v57 = vor.u32 %v343_v41, %v342_v46  ;;  %v1177_v58 = vrot.slane %v1175_v49, 4  ;;  %v1180_v59 = vrot.slane %v1178_v50, 5  ;;  %8451 = vmatprep.mubr.bf16.mxu1 %v11054_v53  ;;  %v1928_v2 = vld [vmem:[#allocation3 + $0x38] sm:$0xf] }
  0xed   :  { %v1186_v60 = vrot.slane %v1184_v51, 5  ;;  %v1190_v61 = vrot.slane %v1188_v52, 4  ;;  %v708_v63 = vsel %vm11598_vm7, %v337_v55, %v707_v42  ;;  %v1929_v3 = vld [vmem:[#allocation3 + $0x3c] sm:$0xf]  ;;  %8452 = vmatmul.mubr.bf16.gmra.mxu1 %v11057_v54  ;;  %v1716_v9 = vld [vmem:[#allocation2 + $0x224] sm:$0xf] }
  0xee   :  { %v346_v62 = vsel %vm11592_vm6, %v338_v56, %v345_v57  ;;  %v1836_v4 = vld [vmem:[#allocation2 + $0x1dc] sm:$0x8]  ;;  %709 = vst [vmem:[#allocation2 + $0x438] sm:$0xf] %v708_v63  ;;  %v1181_v7 = vor.u32 %v1180_v59, %v1177_v58  ;;  %v2091_v10 = vshrl.u32 %v1928_v2, 16  ;;  %v2094_v12 = vshll.u32 %v1928_v2, 16 }
  0xef   :  { %710 = vst [vmem:[#allocation2 + $0x45c] sm:$0xf] %v346_v62  ;;  %v1191_v8 = vor.u32 %v1190_v61, %v1186_v60  ;;  %v1837_v11 = vsel %vm11727_vm10, 0, %v1836_v4  ;;  %v2099_v13 = vshrl.u32 %v1929_v3, 16  ;;  %v2102_v14 = vshll.u32 %v1929_v3, 16  ;;  %v11136_v58 = vld [vmem:[#allocation6 + $0x238] sm:$0xff]  }
  0xf0   :  { %v11059_v15 = vld [vmem:[#allocation2 + $0x3f4] ss:$36 sps:$4 sm:$0xff]   ;;  %1838 = vst [vmem:[#allocation2 + $0x1dc] sm:$0x8] %v1837_v11  ;;  %v2700_v16 = vld [vmem:[#allocation2 + $0x1bc] sm:$0x1]  ;;  %10811 = vmatprep.subr.bf16.mxu0 %v11136_v58 }
  0xf1   :  { %v1182_v17 = vrot.slane %v1181_v7, 4  ;;  %v2582_v19 = vld [vmem:[#allocation2 + $0x204] sm:$0xf]  ;;  %v2701_v20 = vsel %vm11580_vm2, 0, %v2700_v16  ;;  %v11063_v21 = vld [vmem:[#allocation2 + $0x3f0] ss:$36 sps:$4 sm:$0xff]   ;;  %8234 = vmatprep.mubr.bf16.mxu0 %v11059_v15 }
  0xf2   :  { %v1192_v23 = vrot.slane %v1191_v8, 4  ;;  %v2093_v24 = vrot.slane %v2091_v10, 7  ;;  %v2101_v25 = vrot.slane %v2099_v13, 7  ;;  %2702 = vst [vmem:[#allocation2 + $0x1bc] sm:$0x1] %v2701_v20  ;;  %8235 = vmatmul.mubr.bf16.gmra.mxu0 %v11063_v21  ;;  %v11137_v10 = vld [vmem:[#allocation6 + $0x1f8] sm:$0xff]  }
  0xf3   :  { %v1187_v26 = vsel %vm11765_vm13, %v1182_v17, %v1186_v60  ;;  %v825_v27 = vld [vmem:[#allocation2 + $0x480] sm:$0x1]  ;;  %v1011_v28 = vld [vmem:[#allocation3 + $0x38] sm:$0xf]  ;;  %v1012_v29 = vld [vmem:[#allocation3 + $0x3c] sm:$0xf]  ;;  %8974 = vmatpush2.bf16.msra.mxu1 %v11137_v10 }
  0xf4   :  { %1715 = vst [vmem:[#allocation2 + $0x200] sm:$0xf] %v1187_v26  ;;  %v1717_v30 = vsel %vm11771_vm14, %v1192_v23, %v1716_v9  ;;  %v2096_v31 = vor.u32 %v2094_v12, %v2093_v24  ;;  %v2097_v32 = vrot.slane %v2093_v24, 4  ;;  %v2104_v33 = vor.u32 %v2102_v14, %v2101_v25  ;;  %v1930_v35 = vld [vmem:[#allocation3 + $0x40] sm:$0xf]  ;;  %8975 = vmatprep.subr.bf16.mxu1 %v13607_v0 }
  0xf5   :  { %1718 = vst [vmem:[#allocation2 + $0x224] sm:$0xf] %v1717_v30  ;;  %v826_v36 = vsel %vm11580_vm2, 0, %v825_v27  ;;  %v1194_v37 = vshrl.u32 %v1011_v28, 16  ;;  %v1197_v38 = vshll.u32 %v1011_v28, 16  ;;  %v1203_v39 = vshll.u32 %v1012_v29, 16 }
  0xf6   :  { %v1931_v40 = vld [vmem:[#allocation3 + $0x44] sm:$0xf]  ;;  %v822_v41 = vld [vmem:[#allocation2 + $0x438] sm:$0x1]  ;;  %v2105_v42 = vsel %vm11592_vm6, %v2097_v32, %v2104_v33  ;;  %v2583_v43 = vsel %vm11598_vm7, %v2096_v31, %v2582_v19  ;;  %827 = vst [vmem:[#allocation2 + $0x480] sm:$0x1] %v826_v36 }
  0xf7   :  { %v1207_v44 = vshrl.u32 %v1012_v29, 16  ;;  %v2107_v45 = vshrl.u32 %v1930_v35, 16  ;;  %v823_v46 = vsel %vm11580_vm2, 0, %v822_v41  ;;  %2584 = vst [vmem:[#allocation2 + $0x204] sm:$0xf] %v2583_v43  ;;  %v1196_v47 = vrot.slane %v1194_v37, 4 }
  0xf8   :  { %2585 = vst [vmem:[#allocation2 + $0x228] sm:$0xf] %v2105_v42  ;;  %v1199_v48 = vrot.slane %v1197_v38, 5  ;;  %v1205_v49 = vrot.slane %v1203_v39, 5  ;;  %v2586_v50 = vld [vmem:[#allocation2 + $0x24c] sm:$0xf] }
  0xf9   :  { %824 = vst [vmem:[#allocation2 + $0x438] sm:$0x1] %v823_v46  ;;  %v1209_v51 = vrot.slane %v1207_v44, 4  ;;  %v2109_v52 = vrot.slane %v2107_v45, 7  ;;  %v2110_v53 = vshll.u32 %v1930_v35, 16  ;;  %v2115_v54 = vshrl.u32 %v1931_v40, 16 }
  0xfa   :  { %v1200_v55 = vor.u32 %v1199_v48, %v1196_v47  ;;  %v1720_v56 = vld [vmem:[#allocation2 + $0x26c] sm:$0xf]  ;;  %v2118_v57 = vshll.u32 %v1931_v40, 16  ;;  %v11061_v59 = vld [vmem:[#allocation2 + $0x1bc] ss:$36 sps:$4 sm:$0xff]  }
  0xfb   :  { %v11064_v60 = vld [vmem:[#allocation2 + $0x1b8] ss:$36 sps:$4 sm:$0xff]   ;;  %v1210_v61 = vor.u32 %v1209_v51, %v1205_v49  ;;  %v2112_v62 = vor.u32 %v2110_v53, %v2109_v52  ;;  %v2113_v63 = vrot.slane %v2109_v52, 4  ;;  %v2117_v3 = vrot.slane %v2115_v54, 7  ;;  %8459 = vmatprep.mubr.bf16.mxu1 %v11061_v59  ;;  %v74_v9 = vld [vmem:[#allocation3 + $0x80] sm:$0xf] }
  0xfc   :  { %v1201_v2 = vrot.slane %v1200_v55, 4  ;;  %v1839_v4 = vld [vmem:[#allocation2 + $0x224] sm:$0x8]  ;;  %8460 = vmatmul.mubr.bf16.gmra.mxu1 %v11064_v60  ;;  %v348_v19 = vshrl.u32 %v74_v9, 16  ;;  %v351_v20 = vshll.u32 %v74_v9, 16 }
  0xfd   :  { %v1211_v7 = vrot.slane %v1210_v61, 4  ;;  %v2587_v8 = vsel %vm11598_vm7, %v2112_v62, %v2586_v50  ;;  %v1840_v11 = vsel %vm11727_vm10, 0, %v1839_v4  ;;  %v11073_v12 = vld [vmem:[#allocation2 + $0x484] ss:$36 sps:$4 sm:$0xff]   ;;  %v2120_v14 = vor.u32 %v2118_v57, %v2117_v3  ;;  %v11066_v21 = vld [vmem:[#allocation2 + $0x43c] ss:$36 sps:$4 sm:$0xff]  }
  0xfe   :  { %v1206_v13 = vsel %vm11765_vm13, %v1201_v2, %v1205_v49  ;;  %2588 = vst [vmem:[#allocation2 + $0x24c] sm:$0xf] %v2587_v8  ;;  %1841 = vst [vmem:[#allocation2 + $0x224] sm:$0x8] %v1840_v11  ;;  %v2703_v15 = vld [vmem:[#allocation2 + $0x204] sm:$0x1]  ;;  %8242 = vmatprep.mubr.bf16.mxu0 %v11066_v21 }
  0xff   :  { %1719 = vst [vmem:[#allocation2 + $0x248] sm:$0xf] %v1206_v13  ;;  %v1721_v16 = vsel %vm11771_vm14, %v1211_v7, %v1720_v56  ;;  %v75_v17 = vld [vmem:[#allocation3 + $0x84] sm:$0xf]  ;;  %v2704_v23 = vsel %vm11580_vm2, 0, %v2703_v15  ;;  %v2121_v25 = vsel %vm11592_vm6, %v2113_v63, %v2120_v14  ;;  %v350_v26 = vrot.slane %v348_v19, 7 }
 0x100   :  { %v11070_v24 = vld [vmem:[#allocation2 + $0x438] ss:$36 sps:$4 sm:$0xff]   ;;  %1722 = vst [vmem:[#allocation2 + $0x26c] sm:$0xf] %v1721_v16  ;;  %2705 = vst [vmem:[#allocation2 + $0x204] sm:$0x1] %v2704_v23 }
 0x101   :  { %2589 = vst [vmem:[#allocation2 + $0x270] sm:$0xf] %v2121_v25  ;;  %v356_v27 = vshrl.u32 %v75_v17, 16  ;;  %v359_v28 = vshll.u32 %v75_v17, 16  ;;  %v711_v29 = vld [vmem:[#allocation2 + $0x4c8] sm:$0xf]  ;;  %8243 = vmatmul.mubr.bf16.gmra.mxu0 %v11070_v24  ;;  %v353_v33 = vor.u32 %v351_v20, %v350_v26 }
 0x102   :  { %v903_v30 = vld [vmem:[#allocation3 + $0x80] sm:$0xf]  ;;  %v904_v31 = vld [vmem:[#allocation3 + $0x84] sm:$0xf]  ;;  %v354_v35 = vrot.slane %v350_v26, 4  ;;  %8250 = vmatprep.mubr.bf16.mxu0 %v11073_v12 }
 0x103   :  { %v1013_v32 = vld [vmem:[#allocation3 + $0x40] sm:$0xf]  ;;  %v358_v36 = vrot.slane %v356_v27, 7  ;;  %963 = vst [vmem:[#allocation2 + $0x4cc] sm:$0xf] %v903_v30  ;;  %v712_v45 = vsel %vm11598_vm7, %v353_v33, %v711_v29 }
 0x104   :  { %964 = vst [vmem:[#allocation2 + $0x4f0] sm:$0xf] %v904_v31  ;;  %v1014_v37 = vld [vmem:[#allocation3 + $0x44] sm:$0xf]  ;;  %v1213_v38 = vshrl.u32 %v1013_v32, 16  ;;  %v1216_v39 = vshll.u32 %v1013_v32, 16 }
 0x105   :  { %v1222_v40 = vshll.u32 %v1014_v37, 16  ;;  %v1226_v41 = vshrl.u32 %v1014_v37, 16  ;;  %v2706_v42 = vld [vmem:[#allocation2 + $0x24c] sm:$0x1]  ;;  %v11077_v43 = vld [vmem:[#allocation2 + $0x480] ss:$36 sps:$4 sm:$0xff]   ;;  %v361_v44 = vor.u32 %v359_v28, %v358_v36 }
 0x106   :  { %v1215_v46 = vrot.slane %v1213_v38, 4  ;;  %v1932_v47 = vld [vmem:[#allocation3 + $0x48] sm:$0xf]  ;;  %v2707_v48 = vsel %vm11580_vm2, 0, %v2706_v42  ;;  %713 = vst [vmem:[#allocation2 + $0x4c8] sm:$0xf] %v712_v45 }
 0x107   :  { %v1218_v49 = vrot.slane %v1216_v39, 5  ;;  %v1224_v50 = vrot.slane %v1222_v40, 5  ;;  %v1228_v51 = vrot.slane %v1226_v41, 4  ;;  %v1842_v52 = vld [vmem:[#allocation2 + $0x26c] sm:$0x8]  ;;  %v362_v53 = vsel %vm11592_vm6, %v354_v35, %v361_v44 }
 0x108   :  { %2708 = vst [vmem:[#allocation2 + $0x24c] sm:$0x1] %v2707_v48  ;;  %v1724_v54 = vld [vmem:[#allocation2 + $0x2b4] sm:$0xf]  ;;  %v1933_v55 = vld [vmem:[#allocation3 + $0x4c] sm:$0xf] }
 0x109   :  { %v2123_v56 = vshrl.u32 %v1932_v47, 16  ;;  %v2126_v57 = vshll.u32 %v1932_v47, 16  ;;  %v11068_v58 = vld [vmem:[#allocation2 + $0x204] ss:$36 sps:$4 sm:$0xff]   ;;  %v1843_v60 = vsel %vm11727_vm10, 0, %v1842_v52  ;;  %v1219_v61 = vor.u32 %v1218_v49, %v1215_v46  ;;  %8251 = vmatmul.mubr.bf16.gmra.mxu0 %v11077_v43 }
 0x10a   :  { %v11071_v59 = vld [vmem:[#allocation2 + $0x200] ss:$36 sps:$4 sm:$0xff]   ;;  %714 = vst [vmem:[#allocation2 + $0x4ec] sm:$0xf] %v362_v53  ;;  %v1229_v62 = vor.u32 %v1228_v51, %v1224_v50  ;;  %1844 = vst [vmem:[#allocation2 + $0x26c] sm:$0x8] %v1843_v60  ;;  %8467 = vmatprep.mubr.bf16.mxu1 %v11068_v58 }
 0x10b   :  { %v2125_v63 = vrot.slane %v2123_v56, 7  ;;  %v2131_v2 = vshrl.u32 %v1933_v55, 16  ;;  %v2134_v3 = vshll.u32 %v1933_v55, 16  ;;  %v2590_v4 = vld [vmem:[#allocation2 + $0x294] sm:$0xf]  ;;  %v1220_v7 = vrot.slane %v1219_v61, 4  ;;  %8468 = vmatmul.mubr.bf16.gmra.mxu1 %v11071_v59 }
 0x10c   :  { %v1230_v8 = vrot.slane %v1229_v62, 4  ;;  %v76_v9 = vld [vmem:[#allocation3 + $0x88] sm:$0xf]  ;;  %v77_v10 = vld [vmem:[#allocation3 + $0x8c] sm:$0xf] }
 0x10d   :  { %v2128_v11 = vor.u32 %v2126_v57, %v2125_v63  ;;  %v2129_v12 = vrot.slane %v2125_v63, 4  ;;  %v2133_v13 = vrot.slane %v2131_v2, 7  ;;  %v364_v14 = vshrl.u32 %v76_v9, 16  ;;  %v715_v20 = vld [vmem:[#allocation2 + $0x510] sm:$0xf] }
 0x10e   :  { %v1225_v15 = vsel %vm11765_vm13, %v1220_v7, %v1224_v50  ;;  %v1725_v16 = vsel %vm11771_vm14, %v1230_v8, %v1724_v54  ;;  %v367_v17 = vshll.u32 %v76_v9, 16  ;;  %v372_v19 = vshrl.u32 %v77_v10, 16  ;;  %v905_v21 = vld [vmem:[#allocation3 + $0x88] sm:$0xf]  ;;  %v906_v23 = vld [vmem:[#allocation3 + $0x8c] sm:$0xf] }
 0x10f   :  { %v828_v24 = vld [vmem:[#allocation2 + $0x4c8] sm:$0x1]  ;;  %1723 = vst [vmem:[#allocation2 + $0x290] sm:$0xf] %v1225_v15  ;;  %1726 = vst [vmem:[#allocation2 + $0x2b4] sm:$0xf] %v1725_v16  ;;  %v2136_v25 = vor.u32 %v2134_v3, %v2133_v13  ;;  %v2591_v26 = vsel %vm11598_vm7, %v2128_v11, %v2590_v4 }
 0x110   :  { %v366_v27 = vrot.slane %v364_v14, 7  ;;  %v375_v28 = vshll.u32 %v77_v10, 16  ;;  %965 = vst [vmem:[#allocation2 + $0x514] sm:$0xf] %v905_v21  ;;  %966 = vst [vmem:[#allocation2 + $0x538] sm:$0xf] %v906_v23 }
 0x111   :  { %v1015_v29 = vld [vmem:[#allocation3 + $0x48] sm:$0xf]  ;;  %v829_v30 = vsel %vm11580_vm2, 0, %v828_v24  ;;  %2592 = vst [vmem:[#allocation2 + $0x294] sm:$0xf] %v2591_v26  ;;  %v374_v31 = vrot.slane %v372_v19, 7  ;;  %v2137_v35 = vsel %vm11592_vm6, %v2129_v12, %v2136_v25 }
 0x112   :  { %v1016_v32 = vld [vmem:[#allocation3 + $0x4c] sm:$0xf]  ;;  %v1232_v33 = vshrl.u32 %v1015_v29, 16  ;;  %830 = vst [vmem:[#allocation2 + $0x4c8] sm:$0x1] %v829_v30  ;;  %v369_v36 = vor.u32 %v367_v17, %v366_v27  ;;  %v370_v37 = vrot.slane %v366_v27, 4 }
 0x113   :  { %v1235_v38 = vshll.u32 %v1015_v29, 16  ;;  %v11075_v39 = vld [vmem:[#allocation2 + $0x24c] ss:$36 sps:$4 sm:$0xff]   ;;  %2593 = vst [vmem:[#allocation2 + $0x2b8] sm:$0xf] %v2137_v35  ;;  %v377_v41 = vor.u32 %v375_v28, %v374_v31  ;;  %v1241_v45 = vshll.u32 %v1016_v32, 16 }
 0x114   :  { %v11078_v40 = vld [vmem:[#allocation2 + $0x248] ss:$36 sps:$4 sm:$0xff]   ;;  %v1234_v42 = vrot.slane %v1232_v33, 4  ;;  %v716_v43 = vsel %vm11598_vm7, %v369_v36, %v715_v20  ;;  %v1245_v46 = vshrl.u32 %v1016_v32, 16  ;;  %v1934_v47 = vld [vmem:[#allocation3 + $0x50] sm:$0xf]  ;;  %8475 = vmatprep.mubr.bf16.mxu1 %v11075_v39 }
 0x115   :  { %v1237_v44 = vrot.slane %v1235_v38, 5  ;;  %v378_v48 = vsel %vm11592_vm6, %v370_v37, %v377_v41  ;;  %717 = vst [vmem:[#allocation2 + $0x510] sm:$0xf] %v716_v43  ;;  %v1935_v49 = vld [vmem:[#allocation3 + $0x54] sm:$0xf]  ;;  %v2139_v50 = vshrl.u32 %v1934_v47, 16  ;;  %8476 = vmatmul.mubr.bf16.gmra.mxu1 %v11078_v40 }
 0x116   :  { %v2142_v51 = vshll.u32 %v1934_v47, 16  ;;  %718 = vst [vmem:[#allocation2 + $0x534] sm:$0xf] %v378_v48  ;;  %v1243_v53 = vrot.slane %v1241_v45, 5  ;;  %v1247_v54 = vrot.slane %v1245_v46, 4  ;;  %v2147_v55 = vshrl.u32 %v1935_v49, 16 }
 0x117   :  { %v1238_v52 = vor.u32 %v1237_v44, %v1234_v42  ;;  %v2594_v56 = vld [vmem:[#allocation2 + $0x2dc] sm:$0xf]  ;;  %v1845_v57 = vld [vmem:[#allocation2 + $0x2b4] sm:$0x8]  ;;  %v2141_v59 = vrot.slane %v2139_v50, 7  ;;  %v2150_v60 = vshll.u32 %v1935_v49, 16 }
 0x118   :  { %v1728_v58 = vld [vmem:[#allocation2 + $0x2fc] sm:$0xf]  ;;  %v1846_v61 = vsel %vm11727_vm10, 0, %v1845_v57  ;;  %v2709_v62 = vld [vmem:[#allocation2 + $0x294] sm:$0x1]  ;;  %v1248_v2 = vor.u32 %v1247_v54, %v1243_v53  ;;  %v2149_v3 = vrot.slane %v2147_v55, 7 }
 0x119   :  { %v1239_v63 = vrot.slane %v1238_v52, 4  ;;  %v11150_v4 = vld [vmem:[#allocation6 + $0x1f0] sm:$0xff]   ;;  %1847 = vst [vmem:[#allocation2 + $0x2b4] sm:$0x8] %v1846_v61  ;;  %v2710_v8 = vsel %vm11580_vm2, 0, %v2709_v62  ;;  %v2144_v10 = vor.u32 %v2142_v51, %v2141_v59  ;;  %v2145_v13 = vrot.slane %v2141_v59, 4 }
 0x11a   :  { %v11081_v7 = vld [vmem:[#allocation2 + $0x4cc] ss:$36 sps:$4 sm:$0xff]   ;;  %2711 = vst [vmem:[#allocation2 + $0x294] sm:$0x1] %v2710_v8  ;;  %v1249_v12 = vrot.slane %v1248_v2, 4  ;;  %v2152_v14 = vor.u32 %v2150_v60, %v2149_v3  ;;  %8976 = vmatpush2.bf16.msra.mxu1 %v11150_v4 }
 0x11b   :  { %v11085_v9 = vld [vmem:[#allocation2 + $0x4c8] ss:$36 sps:$4 sm:$0xff]   ;;  %v1244_v11 = vsel %vm11765_vm13, %v1239_v63, %v1243_v53  ;;  %8258 = vmatprep.mubr.bf16.mxu0 %v11081_v7  ;;  %v2595_v15 = vsel %vm11598_vm7, %v2144_v10, %v2594_v56  ;;  %v78_v16 = vld [vmem:[#allocation3 + $0x90] sm:$0xf]  ;;  %v79_v17 = vld [vmem:[#allocation3 + $0x94] sm:$0xf]  ;;  %8977 = vmatprep.subr.bf16.mxu1 %v13607_v0 }
 0x11c   :  { %1727 = vst [vmem:[#allocation2 + $0x2d8] sm:$0xf] %v1244_v11  ;;  %8259 = vmatmul.mubr.bf16.gmra.mxu0 %v11085_v9  ;;  %v831_v19 = vld [vmem:[#allocation2 + $0x510] sm:$0x1]  ;;  %v1729_v20 = vsel %vm11771_vm14, %v1249_v12, %v1728_v58  ;;  %v2153_v21 = vsel %vm11592_vm6, %v2145_v13, %v2152_v14  ;;  %2596 = vst [vmem:[#allocation2 + $0x2dc] sm:$0xf] %v2595_v15 }
 0x11d   :  { %v380_v23 = vshrl.u32 %v78_v16, 16  ;;  %v383_v24 = vshll.u32 %v78_v16, 16  ;;  %v907_v25 = vld [vmem:[#allocation3 + $0x90] sm:$0xf]  ;;  %v832_v26 = vsel %vm11580_vm2, 0, %v831_v19  ;;  %v388_v27 = vshrl.u32 %v79_v17, 16 }
 0x11e   :  { %1730 = vst [vmem:[#allocation2 + $0x2fc] sm:$0xf] %v1729_v20  ;;  %2597 = vst [vmem:[#allocation2 + $0x300] sm:$0xf] %v2153_v21  ;;  %v391_v28 = vshll.u32 %v79_v17, 16 }
 0x11f   :  { %v908_v29 = vld [vmem:[#allocation3 + $0x94] sm:$0xf]  ;;  %967 = vst [vmem:[#allocation2 + $0x55c] sm:$0xf] %v907_v25  ;;  %833 = vst [vmem:[#allocation2 + $0x510] sm:$0x1] %v832_v26 }
 0x120   :  { %v382_v30 = vrot.slane %v380_v23, 7  ;;  %968 = vst [vmem:[#allocation2 + $0x580] sm:$0xf] %v908_v29  ;;  %v1017_v31 = vld [vmem:[#allocation3 + $0x50] sm:$0xf]  ;;  %v390_v33 = vrot.slane %v388_v27, 7 }
 0x121   :  { %v1018_v32 = vld [vmem:[#allocation3 + $0x54] sm:$0xf]  ;;  %v719_v35 = vld [vmem:[#allocation2 + $0x558] sm:$0xf]  ;;  %v1251_v36 = vshrl.u32 %v1017_v31, 16  ;;  %v1254_v37 = vshll.u32 %v1017_v31, 16 }
 0x122   :  { %v1260_v38 = vshll.u32 %v1018_v32, 16  ;;  %v385_v39 = vor.u32 %v383_v24, %v382_v30  ;;  %v386_v40 = vrot.slane %v382_v30, 4  ;;  %v1264_v41 = vshrl.u32 %v1018_v32, 16  ;;  %v1936_v42 = vld [vmem:[#allocation3 + $0x58] sm:$0xf] }
 0x123   :  { %v11083_v43 = vld [vmem:[#allocation2 + $0x294] ss:$36 sps:$4 sm:$0xff]   ;;  %v393_v45 = vor.u32 %v391_v28, %v390_v33  ;;  %v1253_v46 = vrot.slane %v1251_v36, 4  ;;  %v1256_v48 = vrot.slane %v1254_v37, 5  ;;  %v1937_v51 = vld [vmem:[#allocation3 + $0x5c] sm:$0xf] }
 0x124   :  { %v11086_v44 = vld [vmem:[#allocation2 + $0x290] ss:$36 sps:$4 sm:$0xff]   ;;  %v720_v47 = vsel %vm11598_vm7, %v385_v39, %v719_v35  ;;  %v1262_v49 = vrot.slane %v1260_v38, 5  ;;  %v1266_v50 = vrot.slane %v1264_v41, 4  ;;  %8483 = vmatprep.mubr.bf16.mxu1 %v11083_v43  ;;  %v2712_v52 = vld [vmem:[#allocation2 + $0x2dc] sm:$0x1] }
 0x125   :  { %v394_v53 = vsel %vm11592_vm6, %v386_v40, %v393_v45  ;;  %721 = vst [vmem:[#allocation2 + $0x558] sm:$0xf] %v720_v47  ;;  %v2155_v54 = vshrl.u32 %v1936_v42, 16  ;;  %v2158_v55 = vshll.u32 %v1936_v42, 16  ;;  %v2163_v56 = vshrl.u32 %v1937_v51, 16  ;;  %8484 = vmatmul.mubr.bf16.gmra.mxu1 %v11086_v44 }
 0x126   :  { %v1848_v57 = vld [vmem:[#allocation2 + $0x2fc] sm:$0x8]  ;;  %v2713_v58 = vsel %vm11580_vm2, 0, %v2712_v52  ;;  %722 = vst [vmem:[#allocation2 + $0x57c] sm:$0xf] %v394_v53  ;;  %v1257_v59 = vor.u32 %v1256_v48, %v1253_v46  ;;  %v1267_v60 = vor.u32 %v1266_v50, %v1262_v49  ;;  %v2166_v62 = vshll.u32 %v1937_v51, 16 }
 0x127   :  { %v1732_v61 = vld [vmem:[#allocation2 + $0x344] sm:$0xf]  ;;  %v11087_v63 = vld [vmem:[#allocation2 + $0x514] ss:$36 sps:$4 sm:$0xff]   ;;  %v1849_v2 = vsel %vm11727_vm10, 0, %v1848_v57  ;;  %v2157_v9 = vrot.slane %v2155_v54, 7 }
 0x128   :  { %2714 = vst [vmem:[#allocation2 + $0x2dc] sm:$0x1] %v2713_v58  ;;  %v11091_v3 = vld [vmem:[#allocation2 + $0x510] ss:$36 sps:$4 sm:$0xff]   ;;  %v2598_v4 = vld [vmem:[#allocation2 + $0x324] sm:$0xf]  ;;  %8266 = vmatprep.mubr.bf16.mxu0 %v11087_v63 }
 0x129   :  { %1850 = vst [vmem:[#allocation2 + $0x2fc] sm:$0x8] %v1849_v2  ;;  %v1258_v7 = vrot.slane %v1257_v59, 4  ;;  %v1268_v8 = vrot.slane %v1267_v60, 4  ;;  %v2165_v10 = vrot.slane %v2163_v56, 7  ;;  %8267 = vmatmul.mubr.bf16.gmra.mxu0 %v11091_v3  ;;  %v2160_v15 = vor.u32 %v2158_v55, %v2157_v9  ;;  %v11981_v59 = vpop.f32.mrf.mxu0  ;;  %v11983_v60 = vpop.f32.mrf.mxu1 }
 0x12a   :  { %v80_v11 = vld [vmem:[#allocation3 + $0x98] sm:$0xf]  ;;  %v81_v12 = vld [vmem:[#allocation3 + $0x9c] sm:$0xf]  ;;  %v2161_v16 = vrot.slane %v2157_v9, 4  ;;  %13621 = vst [vmem:[#allocation15_spill] sm:$0xff] %v11983_v60 }
 0x12b   :  { %v1263_v13 = vsel %vm11765_vm13, %v1258_v7, %v1262_v49  ;;  %v1733_v14 = vsel %vm11771_vm14, %v1268_v8, %v1732_v61  ;;  %v909_v17 = vld [vmem:[#allocation3 + $0x98] sm:$0xf]  ;;  %v2168_v19 = vor.u32 %v2166_v62, %v2165_v10  ;;  %v396_v20 = vshrl.u32 %v80_v11, 16  ;;  %v910_v24 = vld [vmem:[#allocation3 + $0x9c] sm:$0xf]  ;;  %v8126_v9 = vpop.f32.mrf.mxu0  ;;  %v8318_v10 = vpop.f32.mrf.mxu1 }
 0x12c   :  { %1731 = vst [vmem:[#allocation2 + $0x320] sm:$0xf] %v1263_v13  ;;  %1734 = vst [vmem:[#allocation2 + $0x344] sm:$0xf] %v1733_v14  ;;  %v399_v21 = vshll.u32 %v80_v11, 16  ;;  %v404_v23 = vshrl.u32 %v81_v12, 16  ;;  %v2599_v26 = vsel %vm11598_vm7, %v2160_v15, %v2598_v4 }
 0x12d   :  { %969 = vst [vmem:[#allocation2 + $0x5a4] sm:$0xf] %v909_v17  ;;  %v834_v25 = vld [vmem:[#allocation2 + $0x558] sm:$0x1]  ;;  %v407_v27 = vshll.u32 %v81_v12, 16  ;;  %v2169_v31 = vsel %vm11592_vm6, %v2161_v16, %v2168_v19  ;;  %v398_v32 = vrot.slane %v396_v20, 7 }
 0x12e   :  { %v723_v28 = vld [vmem:[#allocation2 + $0x5a0] sm:$0xf]  ;;  %970 = vst [vmem:[#allocation2 + $0x5c8] sm:$0xf] %v910_v24  ;;  %v1019_v29 = vld [vmem:[#allocation3 + $0x58] sm:$0xf]  ;;  %v11995_v24 = vpop.f32.mrf.mxu1 }
 0x12f   :  { %v835_v30 = vsel %vm11580_vm2, 0, %v834_v25  ;;  %2600 = vst [vmem:[#allocation2 + $0x324] sm:$0xf] %v2599_v26  ;;  %v406_v33 = vrot.slane %v404_v23, 7  ;;  %v1020_v35 = vld [vmem:[#allocation3 + $0x5c] sm:$0xf]  ;;  %v401_v42 = vor.u32 %v399_v21, %v398_v32  ;;  %v11993_v23 = vpop.f32.mrf.mxu0 }
 0x130   :  { %836 = vst [vmem:[#allocation2 + $0x558] sm:$0x1] %v835_v30  ;;  %2601 = vst [vmem:[#allocation2 + $0x348] sm:$0xf] %v2169_v31  ;;  %v1270_v36 = vshrl.u32 %v1019_v29, 16  ;;  %v1273_v37 = vshll.u32 %v1019_v29, 16 }
 0x131   :  { %v1279_v38 = vshll.u32 %v1020_v35, 16  ;;  %v1283_v39 = vshrl.u32 %v1020_v35, 16  ;;  %v11089_v40 = vld [vmem:[#allocation2 + $0x2dc] ss:$36 sps:$4 sm:$0xff]   ;;  %v402_v43 = vrot.slane %v398_v32, 4  ;;  %v409_v44 = vor.u32 %v407_v27, %v406_v33  ;;  %v11164_v11 = vld [vmem:[#allocation6 + $0x1e8] sm:$0xff]   ;;  %v8129_v35 = vpop.f32.mrf.mxu0 }
 0x132   :  { %v11092_v41 = vld [vmem:[#allocation2 + $0x2d8] ss:$36 sps:$4 sm:$0xff]   ;;  %v1272_v45 = vrot.slane %v1270_v36, 4  ;;  %v1275_v46 = vrot.slane %v1273_v37, 5  ;;  %8491 = vmatprep.mubr.bf16.mxu1 %v11089_v40  ;;  %v724_v50 = vsel %vm11598_vm7, %v401_v42, %v723_v28  ;;  %v1736_v51 = vld [vmem:[#allocation2 + $0x38c] sm:$0xf]  ;;  %8978 = vmatpush2.bf16.msra.mxu1 %v11164_v11  ;;  %v8321_v36 = vpop.f32.mrf.mxu1 }
 0x133   :  { %v1281_v47 = vrot.slane %v1279_v38, 5  ;;  %v1285_v48 = vrot.slane %v1283_v39, 4  ;;  %v410_v49 = vsel %vm11592_vm6, %v402_v43, %v409_v44  ;;  %v1938_v52 = vld [vmem:[#allocation3 + $0x60] sm:$0xf]  ;;  %v1939_v53 = vld [vmem:[#allocation3 + $0x64] sm:$0xf]  ;;  %8492 = vmatmul.mubr.bf16.gmra.mxu1 %v11092_v41  ;;  %8979 = vmatprep.subr.bf16.mxu1 %v13607_v0  ;;  %v12002_v44 = vpop.f32.mrf.mxu0 }
 0x134   :  { %v1851_v54 = vld [vmem:[#allocation2 + $0x344] sm:$0x8]  ;;  %725 = vst [vmem:[#allocation2 + $0x5a0] sm:$0xf] %v724_v50  ;;  %726 = vst [vmem:[#allocation2 + $0x5c4] sm:$0xf] %v410_v49  ;;  %v1276_v55 = vor.u32 %v1275_v46, %v1272_v45  ;;  %v12004_v45 = vpop.f32.mrf.mxu1 }
 0x135   :  { %v1286_v56 = vor.u32 %v1285_v48, %v1281_v47  ;;  %v2171_v57 = vshrl.u32 %v1938_v52, 16  ;;  %v2174_v58 = vshll.u32 %v1938_v52, 16  ;;  %v1852_v61 = vsel %vm11727_vm10, 0, %v1851_v54  ;;  %v2602_v2 = vld [vmem:[#allocation2 + $0x36c] sm:$0xf]  ;;  %13622 = vst [vmem:[#allocation16_spill] sm:$0xff] %v11995_v24 }
 0x136   :  { %v2179_v62 = vshrl.u32 %v1939_v53, 16  ;;  %v2182_v63 = vshll.u32 %v1939_v53, 16  ;;  %1853 = vst [vmem:[#allocation2 + $0x344] sm:$0x8] %v1852_v61  ;;  %v2715_v3 = vld [vmem:[#allocation2 + $0x324] sm:$0x1] }
 0x137   :  { %v1277_v4 = vrot.slane %v1276_v55, 4  ;;  %v1287_v7 = vrot.slane %v1286_v56, 4  ;;  %v2173_v8 = vrot.slane %v2171_v57, 7  ;;  %v11095_v12 = vld [vmem:[#allocation2 + $0x55c] ss:$36 sps:$4 sm:$0xff]   ;;  %v2716_v13 = vsel %vm11580_vm2, 0, %v2715_v3  ;;  %v8134_v56 = vpop.f32.mrf.mxu0  ;;  %v8326_v57 = vpop.f32.mrf.mxu1 }
 0x138   :  { %v11099_v14 = vld [vmem:[#allocation2 + $0x558] ss:$36 sps:$4 sm:$0xff]   ;;  %2717 = vst [vmem:[#allocation2 + $0x324] sm:$0x1] %v2716_v13  ;;  %v82_v20 = vld [vmem:[#allocation3 + $0xa0] sm:$0xf]  ;;  %8274 = vmatprep.mubr.bf16.mxu0 %v11095_v12 }
 0x139   :  { %v1282_v15 = vsel %vm11765_vm13, %v1277_v4, %v1281_v47  ;;  %v1737_v16 = vsel %vm11771_vm14, %v1287_v7, %v1736_v51  ;;  %v2176_v17 = vor.u32 %v2174_v58, %v2173_v8  ;;  %v2177_v19 = vrot.slane %v2173_v8, 4  ;;  %v83_v21 = vld [vmem:[#allocation3 + $0xa4] sm:$0xf]  ;;  %8275 = vmatmul.mubr.bf16.gmra.mxu0 %v11099_v14  ;;  %v727_v31 = vld [vmem:[#allocation2 + $0x5e8] sm:$0xf]  ;;  %13623 = vst [vmem:[#allocation17_spill] sm:$0xff] %v12004_v45  ;;  %v12012_v10 = vpop.f32.mrf.mxu0  ;;  %v12014_v11 = vpop.f32.mrf.mxu1 }
 0x13a   :  { %1735 = vst [vmem:[#allocation2 + $0x368] sm:$0xf] %v1282_v15  ;;  %1738 = vst [vmem:[#allocation2 + $0x38c] sm:$0xf] %v1737_v16  ;;  %v2181_v25 = vrot.slane %v2179_v62, 7  ;;  %v412_v26 = vshrl.u32 %v82_v20, 16 }
 0x13b   :  { %v415_v27 = vshll.u32 %v82_v20, 16  ;;  %v420_v28 = vshrl.u32 %v83_v21, 16  ;;  %v2603_v29 = vsel %vm11598_vm7, %v2176_v17, %v2602_v2  ;;  %v423_v30 = vshll.u32 %v83_v21, 16  ;;  %v911_v32 = vld [vmem:[#allocation3 + $0xa0] sm:$0xf]  ;;  %13624 = vst [vmem:[#allocation18_spill] sm:$0xff] %v12014_v11 }
 0x13c   :  { %v912_v33 = vld [vmem:[#allocation3 + $0xa4] sm:$0xf]  ;;  %v837_v37 = vld [vmem:[#allocation2 + $0x5a0] sm:$0x1]  ;;  %v2184_v38 = vor.u32 %v2182_v63, %v2181_v25  ;;  %2604 = vst [vmem:[#allocation2 + $0x36c] sm:$0xf] %v2603_v29 }
 0x13d   :  { %v414_v39 = vrot.slane %v412_v26, 7  ;;  %v422_v40 = vrot.slane %v420_v28, 7  ;;  %971 = vst [vmem:[#allocation2 + $0x5ec] sm:$0xf] %v911_v32  ;;  %972 = vst [vmem:[#allocation2 + $0x610] sm:$0xf] %v912_v33  ;;  %v8137_v26 = vpop.f32.mrf.mxu0 }
 0x13e   :  { %v838_v41 = vsel %vm11580_vm2, 0, %v837_v37  ;;  %v1021_v42 = vld [vmem:[#allocation3 + $0x60] sm:$0xf]  ;;  %v1022_v43 = vld [vmem:[#allocation3 + $0x64] sm:$0xf]  ;;  %v2185_v46 = vsel %vm11592_vm6, %v2177_v19, %v2184_v38 }
 0x13f   :  { %839 = vst [vmem:[#allocation2 + $0x5a0] sm:$0x1] %v838_v41  ;;  %v417_v47 = vor.u32 %v415_v27, %v414_v39  ;;  %v418_v48 = vrot.slane %v414_v39, 4  ;;  %v425_v49 = vor.u32 %v423_v30, %v422_v40  ;;  %v1940_v50 = vld [vmem:[#allocation3 + $0x68] sm:$0xf]  ;;  %v1289_v51 = vshrl.u32 %v1021_v42, 16  ;;  %v8329_v27 = vpop.f32.mrf.mxu1  ;;  %v12020_v36 = vpop.f32.mrf.mxu0 }
 0x140   :  { %2605 = vst [vmem:[#allocation2 + $0x390] sm:$0xf] %v2185_v46  ;;  %v1292_v52 = vshll.u32 %v1021_v42, 16  ;;  %v1298_v53 = vshll.u32 %v1022_v43, 16  ;;  %v1302_v54 = vshrl.u32 %v1022_v43, 16  ;;  %v2187_v2 = vshrl.u32 %v1940_v50, 16 }
 0x141   :  { %v1941_v55 = vld [vmem:[#allocation3 + $0x6c] sm:$0xf]  ;;  %v11097_v58 = vld [vmem:[#allocation2 + $0x324] ss:$36 sps:$4 sm:$0xff]   ;;  %v426_v62 = vsel %vm11592_vm6, %v418_v48, %v425_v49  ;;  %v728_v63 = vsel %vm11598_vm7, %v417_v47, %v727_v31  ;;  %v1291_v4 = vrot.slane %v1289_v51, 4  ;;  %v2190_v14 = vshll.u32 %v1940_v50, 16  ;;  %v12022_v37 = vpop.f32.mrf.mxu1  ;;  %v8142_v49 = vpop.f32.mrf.mxu0 }
 0x142   :  { %v11100_v61 = vld [vmem:[#allocation2 + $0x320] ss:$36 sps:$4 sm:$0xff]   ;;  %v1854_v3 = vld [vmem:[#allocation2 + $0x38c] sm:$0x8]  ;;  %729 = vst [vmem:[#allocation2 + $0x5e8] sm:$0xf] %v728_v63  ;;  %8499 = vmatprep.mubr.bf16.mxu1 %v11097_v58 }
 0x143   :  { %730 = vst [vmem:[#allocation2 + $0x60c] sm:$0xf] %v426_v62  ;;  %v1294_v7 = vrot.slane %v1292_v52, 5  ;;  %v1300_v8 = vrot.slane %v1298_v53, 5  ;;  %v1304_v9 = vrot.slane %v1302_v54, 4  ;;  %v1855_v12 = vsel %vm11727_vm10, 0, %v1854_v3  ;;  %8500 = vmatmul.mubr.bf16.gmra.mxu1 %v11100_v61  ;;  %v8334_v50 = vpop.f32.mrf.mxu1  ;;  %v12034_v63 = vpop.f32.mrf.mxu0 }
 0x144   :  { %v2189_v13 = vrot.slane %v2187_v2, 7  ;;  %v2195_v15 = vshrl.u32 %v1941_v55, 16  ;;  %v2606_v16 = vld [vmem:[#allocation2 + $0x3b4] sm:$0xf]  ;;  %1856 = vst [vmem:[#allocation2 + $0x38c] sm:$0x8] %v1855_v12 }
 0x145   :  { %v2718_v17 = vld [vmem:[#allocation2 + $0x36c] sm:$0x1]  ;;  %v1295_v19 = vor.u32 %v1294_v7, %v1291_v4  ;;  %v1305_v20 = vor.u32 %v1304_v9, %v1300_v8  ;;  %v1740_v21 = vld [vmem:[#allocation2 + $0x3d4] sm:$0xf]  ;;  %v2198_v25 = vshll.u32 %v1941_v55, 16  ;;  %13625 = vst [vmem:[#allocation19_spill] sm:$0xff] %v12022_v37  ;;  %v12036_v2 = vpop.f32.mrf.mxu1 }
 0x146   :  { %v2719_v28 = vsel %vm11580_vm2, 0, %v2718_v17  ;;  %v2192_v29 = vor.u32 %v2190_v14, %v2189_v13  ;;  %v2193_v30 = vrot.slane %v2189_v13, 4  ;;  %v2197_v31 = vrot.slane %v2195_v15, 7  ;;  %v11102_v32 = vld [vmem:[#allocation2 + $0x5a4] ss:$36 sps:$4 sm:$0xff]   ;;  %13626 = vst [vmem:[#allocation20_spill] sm:$0xff] %v12036_v2  ;;  %v8145_v14 = vpop.f32.mrf.mxu0 }
 0x147   :  { %2720 = vst [vmem:[#allocation2 + $0x36c] sm:$0x1] %v2719_v28  ;;  %v11106_v33 = vld [vmem:[#allocation2 + $0x5a0] ss:$36 sps:$4 sm:$0xff]   ;;  %v1296_v35 = vrot.slane %v1295_v19, 4  ;;  %v1306_v38 = vrot.slane %v1305_v20, 4  ;;  %8282 = vmatprep.mubr.bf16.mxu0 %v11102_v32  ;;  %v8337_v15 = vpop.f32.mrf.mxu1 }
 0x148   :  { %v2200_v39 = vor.u32 %v2198_v25, %v2197_v31  ;;  %v2607_v40 = vsel %vm11598_vm7, %v2192_v29, %v2606_v16  ;;  %v84_v41 = vld [vmem:[#allocation3 + $0xa8] sm:$0xf]  ;;  %v85_v42 = vld [vmem:[#allocation3 + $0xac] sm:$0xf]  ;;  %8283 = vmatmul.mubr.bf16.gmra.mxu0 %v11106_v33  ;;  %v731_v55 = vld [vmem:[#allocation2 + $0x630] sm:$0xf]  ;;  %v12042_v28 = vpop.f32.mrf.mxu0 }
 0x149   :  { %v1301_v43 = vsel %vm11765_vm13, %v1296_v35, %v1300_v8  ;;  %2608 = vst [vmem:[#allocation2 + $0x3b4] sm:$0xf] %v2607_v40  ;;  %v428_v46 = vshrl.u32 %v84_v41, 16  ;;  %v431_v47 = vshll.u32 %v84_v41, 16  ;;  %v436_v48 = vshrl.u32 %v85_v42, 16  ;;  %v12044_v29 = vpop.f32.mrf.mxu1 }
 0x14a   :  { %v840_v51 = vld [vmem:[#allocation2 + $0x5e8] sm:$0x1]  ;;  %1739 = vst [vmem:[#allocation2 + $0x3b0] sm:$0xf] %v1301_v43  ;;  %v1741_v52 = vsel %vm11771_vm14, %v1306_v38, %v1740_v21  ;;  %v2201_v53 = vsel %vm11592_vm6, %v2193_v30, %v2200_v39  ;;  %v439_v54 = vshll.u32 %v85_v42, 16  ;;  %13627 = vst [vmem:[#allocation21_spill] sm:$0xff] %v12044_v29  ;;  %v8150_v43 = vpop.f32.mrf.mxu0 }
 0x14b   :  { %v913_v56 = vld [vmem:[#allocation3 + $0xa8] sm:$0xf]  ;;  %v841_v57 = vsel %vm11580_vm2, 0, %v840_v51  ;;  %1742 = vst [vmem:[#allocation2 + $0x3d4] sm:$0xf] %v1741_v52  ;;  %v430_v58 = vrot.slane %v428_v46, 7  ;;  %v8342_v46 = vpop.f32.mrf.mxu1 }
 0x14c   :  { %2609 = vst [vmem:[#allocation2 + $0x3d8] sm:$0xf] %v2201_v53  ;;  %v438_v61 = vrot.slane %v436_v48, 7  ;;  %v914_v62 = vld [vmem:[#allocation3 + $0xac] sm:$0xf] }
 0x14d   :  { %973 = vst [vmem:[#allocation2 + $0x634] sm:$0xf] %v913_v56  ;;  %842 = vst [vmem:[#allocation2 + $0x5e8] sm:$0x1] %v841_v57  ;;  %v1023_v3 = vld [vmem:[#allocation3 + $0x68] sm:$0xf]  ;;  %v433_v7 = vor.u32 %v431_v47, %v430_v58  ;;  %v12052_v56 = vpop.f32.mrf.mxu1 }
 0x14e   :  { %974 = vst [vmem:[#allocation2 + $0x658] sm:$0xf] %v914_v62  ;;  %v1024_v4 = vld [vmem:[#allocation3 + $0x6c] sm:$0xf]  ;;  %v434_v8 = vrot.slane %v430_v58, 4  ;;  %v441_v9 = vor.u32 %v439_v54, %v438_v61  ;;  %v1308_v12 = vshrl.u32 %v1023_v3, 16 }
 0x14f   :  { %v1942_v13 = vld [vmem:[#allocation3 + $0x70] sm:$0xf]  ;;  %v11107_v17 = vld [vmem:[#allocation2 + $0x368] ss:$36 sps:$4 sm:$0xff]   ;;  %v1311_v19 = vshll.u32 %v1023_v3, 16  ;;  %v732_v21 = vsel %vm11598_vm7, %v433_v7, %v731_v55  ;;  %v1317_v26 = vshll.u32 %v1024_v4, 16  ;;  %v12050_v55 = vpop.f32.mrf.mxu0 }
 0x150   :  { %v11104_v16 = vld [vmem:[#allocation2 + $0x36c] ss:$36 sps:$4 sm:$0xff]   ;;  %v442_v20 = vsel %vm11592_vm6, %v434_v8, %v441_v9  ;;  %v1310_v25 = vrot.slane %v1308_v12, 4  ;;  %v1943_v27 = vld [vmem:[#allocation3 + $0x74] sm:$0xf]  ;;  %v1321_v32 = vshrl.u32 %v1024_v4, 16  ;;  %v8345_v9 = vpop.f32.mrf.mxu1 }
 0x151   :  { %8507 = vmatprep.mubr.bf16.mxu1 %v11104_v16  ;;  %v2721_v30 = vld [vmem:[#allocation2 + $0x3b4] sm:$0x1]  ;;  %733 = vst [vmem:[#allocation2 + $0x630] sm:$0xf] %v732_v21  ;;  %734 = vst [vmem:[#allocation2 + $0x654] sm:$0xf] %v442_v20  ;;  %v8153_v8 = vpop.f32.mrf.mxu0 }
 0x152   :  { %v1313_v31 = vrot.slane %v1311_v19, 5  ;;  %v2203_v33 = vshrl.u32 %v1942_v13, 16  ;;  %v2206_v35 = vshll.u32 %v1942_v13, 16  ;;  %8508 = vmatmul.mubr.bf16.gmra.mxu1 %v11107_v17  ;;  %v2722_v38 = vsel %vm11580_vm2, 0, %v2721_v30  ;;  %v2610_v42 = vld [vmem:[#allocation2 + $0x3fc] sm:$0xf] }
 0x153   :  { %v1319_v39 = vrot.slane %v1317_v26, 5  ;;  %v2211_v40 = vshrl.u32 %v1943_v27, 16  ;;  %v2214_v41 = vshll.u32 %v1943_v27, 16  ;;  %v1857_v47 = vld [vmem:[#allocation2 + $0x3d4] sm:$0x8]  ;;  %v1323_v49 = vrot.slane %v1321_v32, 4  ;;  %v12058_v30 = vpop.f32.mrf.mxu0 }
 0x154   :  { %2723 = vst [vmem:[#allocation2 + $0x3b4] sm:$0x1] %v2722_v38  ;;  %v1314_v48 = vor.u32 %v1313_v31, %v1310_v25  ;;  %v2205_v50 = vrot.slane %v2203_v33, 7  ;;  %v11109_v51 = vld [vmem:[#allocation2 + $0x5ec] ss:$36 sps:$4 sm:$0xff]   ;;  %v1858_v52 = vsel %vm11727_vm10, 0, %v1857_v47  ;;  %v12060_v31 = vpop.f32.mrf.mxu1 }
 0x155   :  { %v11113_v53 = vld [vmem:[#allocation2 + $0x5e8] ss:$36 sps:$4 sm:$0xff]   ;;  %v1744_v54 = vld [vmem:[#allocation2 + $0x41c] sm:$0xf]  ;;  %13628 = vst [vmem:[#allocation22_spill] sm:$0xff] %v12052_v56  ;;  %v1324_v58 = vor.u32 %v1323_v49, %v1319_v39  ;;  %8290 = vmatprep.mubr.bf16.mxu0 %v11109_v51  ;;  %v2213_v3 = vrot.slane %v2211_v40, 7  ;;  %v8158_v47 = vpop.f32.mrf.mxu0 }
 0x156   :  { %1859 = vst [vmem:[#allocation2 + $0x3d4] sm:$0x8] %v1858_v52  ;;  %v1315_v57 = vrot.slane %v1314_v48, 4  ;;  %v2208_v61 = vor.u32 %v2206_v35, %v2205_v50  ;;  %v2209_v62 = vrot.slane %v2205_v50, 4  ;;  %v86_v4 = vld [vmem:[#allocation3 + $0xb0] sm:$0xf]  ;;  %8291 = vmatmul.mubr.bf16.gmra.mxu0 %v11113_v53  ;;  %v8350_v48 = vpop.f32.mrf.mxu1 }
 0x157   :  { %v87_v7 = vld [vmem:[#allocation3 + $0xb4] sm:$0xf]  ;;  %v11177_v12 = vld [vmem:[#allocation6 + $0x1e0] sm:$0xff]   ;;  %v1325_v14 = vrot.slane %v1324_v58, 4  ;;  %v444_v16 = vshrl.u32 %v86_v4, 16  ;;  %v2216_v20 = vor.u32 %v2214_v41, %v2213_v3  ;;  %v447_v21 = vshll.u32 %v86_v4, 16 }
 0x158   :  { %v1320_v13 = vsel %vm11765_vm13, %v1315_v57, %v1319_v39  ;;  %v2611_v15 = vsel %vm11598_vm7, %v2208_v61, %v2610_v42  ;;  %v915_v17 = vld [vmem:[#allocation3 + $0xb0] sm:$0xf]  ;;  %v452_v25 = vshrl.u32 %v87_v7, 16  ;;  %v455_v26 = vshll.u32 %v87_v7, 16  ;;  %v735_v27 = vld [vmem:[#allocation2 + $0x678] sm:$0xf]  ;;  %8980 = vmatpush2.bf16.msra.mxu1 %v11177_v12  ;;  %v12069_v61 = vpop.f32.mrf.mxu0  ;;  %v12071_v3 = vpop.f32.mrf.mxu1 }
 0x159   :  { %v843_v19 = vld [vmem:[#allocation2 + $0x630] sm:$0x1]  ;;  %1743 = vst [vmem:[#allocation2 + $0x3f8] sm:$0xf] %v1320_v13  ;;  %2612 = vst [vmem:[#allocation2 + $0x3fc] sm:$0xf] %v2611_v15  ;;  %v1745_v33 = vsel %vm11771_vm14, %v1325_v14, %v1744_v54  ;;  %8981 = vmatprep.subr.bf16.mxu1 %v13607_v0  ;;  %v2217_v40 = vsel %vm11592_vm6, %v2209_v62, %v2216_v20 }
 0x15a   :  { %975 = vst [vmem:[#allocation2 + $0x67c] sm:$0xf] %v915_v17  ;;  %13629 = vst [vmem:[#allocation23_spill] sm:$0xff] %v12060_v31  ;;  %v844_v32 = vsel %vm11580_vm2, 0, %v843_v19  ;;  %v446_v35 = vrot.slane %v444_v16, 7  ;;  %v454_v41 = vrot.slane %v452_v25, 7  ;;  %v8161_v16 = vpop.f32.mrf.mxu0  ;;  %v8353_v17 = vpop.f32.mrf.mxu1 }
 0x15b   :  { %v916_v38 = vld [vmem:[#allocation3 + $0xb4] sm:$0xf]  ;;  %v1025_v39 = vld [vmem:[#allocation3 + $0x70] sm:$0xf]  ;;  %845 = vst [vmem:[#allocation2 + $0x630] sm:$0x1] %v844_v32 }
 0x15c   :  { %1746 = vst [vmem:[#allocation2 + $0x41c] sm:$0xf] %v1745_v33  ;;  %976 = vst [vmem:[#allocation2 + $0x6a0] sm:$0xf] %v916_v38  ;;  %v1026_v42 = vld [vmem:[#allocation3 + $0x74] sm:$0xf]  ;;  %v449_v49 = vor.u32 %v447_v21, %v446_v35  ;;  %v457_v57 = vor.u32 %v455_v26, %v454_v41  ;;  %v12081_v41 = vpop.f32.mrf.mxu0 }
 0x15d   :  { %v1327_v43 = vshrl.u32 %v1025_v39, 16  ;;  %v1330_v46 = vshll.u32 %v1025_v39, 16  ;;  %2613 = vst [vmem:[#allocation2 + $0x420] sm:$0xf] %v2217_v40  ;;  %v450_v50 = vrot.slane %v446_v35, 4  ;;  %v1336_v51 = vshll.u32 %v1026_v42, 16 }
 0x15e   :  { %v1340_v52 = vshrl.u32 %v1026_v42, 16  ;;  %v11111_v53 = vld [vmem:[#allocation2 + $0x3b4] ss:$36 sps:$4 sm:$0xff]   ;;  %13630 = vst [vmem:[#allocation24_spill] sm:$0xff] %v12071_v3  ;;  %v736_v62 = vsel %vm11598_vm7, %v449_v49, %v735_v27  ;;  %v1945_v13 = vld [vmem:[#allocation3 + $0x7c] sm:$0xf]  ;;  %v12083_v42 = vpop.f32.mrf.mxu1 }
 0x15f   :  { %v11114_v54 = vld [vmem:[#allocation2 + $0x3b0] ss:$36 sps:$4 sm:$0xff]   ;;  %v1329_v58 = vrot.slane %v1327_v43, 4  ;;  %v1332_v4 = vrot.slane %v1330_v46, 5  ;;  %v1338_v7 = vrot.slane %v1336_v51, 5  ;;  %8515 = vmatprep.mubr.bf16.mxu1 %v11111_v53  ;;  %v458_v12 = vsel %vm11592_vm6, %v450_v50, %v457_v57  ;;  %13631 = vst [vmem:[#allocation25_spill] sm:$0xff] %v12083_v42  ;;  %v8166_v53 = vpop.f32.mrf.mxu0 }
 0x160   :  { %v1342_v8 = vrot.slane %v1340_v52, 4  ;;  %v1944_v9 = vld [vmem:[#allocation3 + $0x78] sm:$0xf]  ;;  %737 = vst [vmem:[#allocation2 + $0x678] sm:$0xf] %v736_v62  ;;  %8516 = vmatmul.mubr.bf16.gmra.mxu1 %v11114_v54  ;;  %v2227_v26 = vshrl.u32 %v1945_v13, 16  ;;  %v8358_v54 = vpop.f32.mrf.mxu1 }
 0x161   :  { %v2219_v14 = vshrl.u32 %v1944_v9, 16  ;;  %v2222_v15 = vshll.u32 %v1944_v9, 16  ;;  %v2724_v19 = vld [vmem:[#allocation2 + $0x3fc] sm:$0x1]  ;;  %738 = vst [vmem:[#allocation2 + $0x69c] sm:$0xf] %v458_v12  ;;  %v1333_v20 = vor.u32 %v1332_v4, %v1329_v58  ;;  %v12093_v17 = vpop.f32.mrf.mxu0 }
 0x162   :  { %v1343_v21 = vor.u32 %v1342_v8, %v1338_v7  ;;  %v1748_v25 = vld [vmem:[#allocation2 + $0x464] sm:$0xf]  ;;  %v1866_v32 = vld [vmem:[#allocation2 + $0x4ac] sm:$0x8]  ;;  %v2725_v33 = vsel %vm11580_vm2, 0, %v2724_v19  ;;  %v2230_v38 = vshll.u32 %v1945_v13, 16  ;;  %v12095_v19 = vpop.f32.mrf.mxu1 }
 0x163   :  { %v2614_v27 = vld [vmem:[#allocation2 + $0x444] sm:$0xf]  ;;  %v2221_v35 = vrot.slane %v2219_v14, 7  ;;  %v1867_v39 = vsel %vm11727_vm10, 0, %v1866_v32  ;;  %v1946_v40 = vld [vmem:[#allocation3 + $0x80] sm:$0xf] }
 0x164   :  { %v11116_v43 = vld [vmem:[#allocation2 + $0x634] ss:$36 sps:$4 sm:$0xff]   ;;  %v1860_v46 = vld [vmem:[#allocation2 + $0x41c] sm:$0x8]  ;;  %2726 = vst [vmem:[#allocation2 + $0x3fc] sm:$0x1] %v2725_v33  ;;  %v8169_v33 = vpop.f32.mrf.mxu0 }
 0x165   :  { %v1334_v47 = vrot.slane %v1333_v20, 4  ;;  %1868 = vst [vmem:[#allocation2 + $0x4ac] sm:$0x8] %v1867_v39  ;;  %v1861_v48 = vsel %vm11727_vm10, 0, %v1860_v46  ;;  %v11120_v49 = vld [vmem:[#allocation2 + $0x630] ss:$36 sps:$4 sm:$0xff]   ;;  %v2224_v51 = vor.u32 %v2222_v15, %v2221_v35  ;;  %8298 = vmatprep.mubr.bf16.mxu0 %v11116_v43 }
 0x166   :  { %v1344_v50 = vrot.slane %v1343_v21, 4  ;;  %v2225_v52 = vrot.slane %v2221_v35, 4  ;;  %1862 = vst [vmem:[#allocation2 + $0x41c] sm:$0x8] %v1861_v48  ;;  %v2229_v58 = vrot.slane %v2227_v26, 7  ;;  %v2235_v4 = vshrl.u32 %v1946_v40, 16  ;;  %8299 = vmatmul.mubr.bf16.gmra.mxu0 %v11120_v49  ;;  %v8361_v35 = vpop.f32.mrf.mxu1 }
 0x167   :  { %v1339_v57 = vsel %vm11765_vm13, %v1334_v47, %v1338_v7  ;;  %v1947_v62 = vld [vmem:[#allocation3 + $0x84] sm:$0xf]  ;;  %v2238_v8 = vshll.u32 %v1946_v40, 16  ;;  %v2615_v12 = vsel %vm11598_vm7, %v2224_v51, %v2614_v27  ;;  %v2618_v15 = vld [vmem:[#allocation2 + $0x48c] sm:$0xf]  ;;  %13632 = vst [vmem:[#allocation26_spill] sm:$0xff] %v12095_v19  ;;  %v12101_v51 = vpop.f32.mrf.mxu0 }
 0x168   :  { %1747 = vst [vmem:[#allocation2 + $0x440] sm:$0xf] %v1339_v57  ;;  %v1749_v9 = vsel %vm11771_vm14, %v1344_v50, %v1748_v25  ;;  %v2243_v13 = vshrl.u32 %v1947_v62, 16  ;;  %v2246_v14 = vshll.u32 %v1947_v62, 16  ;;  %v2778_v16 = vld [vmem:[#allocation3] sm:$0xf]  ;;  %v2232_v20 = vor.u32 %v2230_v38, %v2229_v58  ;;  %v12103_v53 = vpop.f32.mrf.mxu1 }
 0x169   :  { %v846_v7 = vld [vmem:[#allocation2 + $0x678] sm:$0x1]  ;;  %1750 = vst [vmem:[#allocation2 + $0x464] sm:$0xf] %v1749_v9  ;;  %2616 = vst [vmem:[#allocation2 + $0x444] sm:$0xf] %v2615_v12 }
 0x16a   :  { %v2237_v21 = vrot.slane %v2235_v4, 7  ;;  %v2779_v26 = vld [vmem:[#allocation3 + $0x4] sm:$0xf]  ;;  %2842 = vst [vmem:[#allocation2 + $0x10] sm:$0xf] %v2778_v16  ;;  %v847_v25 = vsel %vm11580_vm2, 0, %v846_v7  ;;  %v2233_v39 = vsel %vm11592_vm6, %v2225_v52, %v2232_v20  ;;  %v8366_v9 = vpop.f32.mrf.mxu1 }
 0x16b   :  { %v2245_v32 = vrot.slane %v2243_v13, 7  ;;  %2843 = vst [vmem:[#allocation2 + $0x34] sm:$0xf] %v2779_v26  ;;  %v2906_v27 = vld [vmem:[#allocation3] sm:$0xf]  ;;  %13633 = vst [vmem:[#allocation27_spill] sm:$0xff] %v12103_v53 }
 0x16c   :  { %848 = vst [vmem:[#allocation2 + $0x678] sm:$0x1] %v847_v25  ;;  %v2240_v40 = vor.u32 %v2238_v8, %v2237_v21  ;;  %v2241_v43 = vrot.slane %v2237_v21, 4  ;;  %v2907_v46 = vld [vmem:[#allocation3 + $0x4] sm:$0xf]  ;;  %v2971_v38 = vshrl.u32 %v2906_v27, 16  ;;  %v8174_v8 = vpop.f32.mrf.mxu0  ;;  %v12111_v26 = vpop.f32.mrf.mxu1 }
 0x16d   :  { %2617 = vst [vmem:[#allocation2 + $0x468] sm:$0xf] %v2233_v39  ;;  %v2248_v47 = vor.u32 %v2246_v14, %v2245_v32  ;;  %v2974_v48 = vshll.u32 %v2906_v27, 16  ;;  %v2980_v49 = vshll.u32 %v2907_v46, 16  ;;  %v2984_v50 = vshrl.u32 %v2907_v46, 16  ;;  %13634 = vst [vmem:[#allocation28_spill] sm:$0xff] %v12111_v26 }
 0x16e   :  { %v2619_v54 = vsel %vm11598_vm7, %v2240_v40, %v2618_v15  ;;  %v2973_v57 = vrot.slane %v2971_v38, 4  ;;  %v11118_v58 = vld [vmem:[#allocation2 + $0x3fc] ss:$36 sps:$4 sm:$0xff]   ;;  %v1028_v21 = vld [vmem:[#allocation3 + $0x84] sm:$0xf]  ;;  %v12109_v15 = vpop.f32.mrf.mxu0  ;;  %v8369_v38 = vpop.f32.mrf.mxu1 }
 0x16f   :  { %v11121_v62 = vld [vmem:[#allocation2 + $0x3f8] ss:$36 sps:$4 sm:$0xff]   ;;  %v2249_v52 = vsel %vm11592_vm6, %v2241_v43, %v2248_v47  ;;  %2620 = vst [vmem:[#allocation2 + $0x48c] sm:$0xf] %v2619_v54  ;;  %v2976_v4 = vrot.slane %v2974_v48, 5  ;;  %v2982_v12 = vrot.slane %v2980_v49, 5  ;;  %8523 = vmatprep.mubr.bf16.mxu1 %v11118_v58 }
 0x170   :  { %2621 = vst [vmem:[#allocation2 + $0x4b0] sm:$0xf] %v2249_v52  ;;  %v2986_v13 = vrot.slane %v2984_v50, 4  ;;  %v1027_v14 = vld [vmem:[#allocation3 + $0x80] sm:$0xf]  ;;  %8524 = vmatmul.mubr.bf16.gmra.mxu1 %v11121_v62  ;;  %v8177_v46 = vpop.f32.mrf.mxu0  ;;  %v1355_v50 = vshll.u32 %v1028_v21, 16  ;;  %v12121_v9 = vpop.f32.mrf.mxu1 }
 0x171   :  { %v1863_v16 = vld [vmem:[#allocation2 + $0x464] sm:$0x8]  ;;  %v2727_v7 = vld [vmem:[#allocation2 + $0x444] sm:$0x1]  ;;  %v2977_v20 = vor.u32 %v2976_v4, %v2973_v57  ;;  %v3643_v33 = vld [vmem:[#allocation2 + $0x38] sm:$0xf] }
 0x172   :  { %v1864_v25 = vsel %vm11727_vm10, 0, %v1863_v16  ;;  %v2728_v32 = vsel %vm11580_vm2, 0, %v2727_v7  ;;  %v2987_v27 = vor.u32 %v2986_v13, %v2982_v12  ;;  %v1346_v35 = vshrl.u32 %v1027_v14, 16  ;;  %v11124_v39 = vld [vmem:[#allocation2 + $0x67c] ss:$36 sps:$4 sm:$0xff]   ;;  %v12119_v8 = vpop.f32.mrf.mxu0  ;;  %13635 = vst [vmem:[#allocation29_spill] sm:$0xff] %v12121_v9 }
 0x173   :  { %1865 = vst [vmem:[#allocation2 + $0x464] sm:$0x8] %v1864_v25  ;;  %2729 = vst [vmem:[#allocation2 + $0x444] sm:$0x1] %v2728_v32  ;;  %v11128_v40 = vld [vmem:[#allocation2 + $0x678] ss:$36 sps:$4 sm:$0xff]   ;;  %8306 = vmatprep.mubr.bf16.mxu0 %v11124_v39  ;;  %v8374_v39 = vpop.f32.mrf.mxu1 }
 0x174   :  { %v2978_v43 = vrot.slane %v2977_v20, 4  ;;  %v2988_v47 = vrot.slane %v2987_v27, 4  ;;  %v1348_v48 = vrot.slane %v1346_v35, 4  ;;  %v1349_v49 = vshll.u32 %v1027_v14, 16  ;;  %v1948_v54 = vld [vmem:[#allocation3 + $0x88] sm:$0xf]  ;;  %8307 = vmatmul.mubr.bf16.gmra.mxu0 %v11128_v40  ;;  %v8182_v35 = vpop.f32.mrf.mxu0 }
 0x175   :  { %v1359_v58 = vshrl.u32 %v1028_v21, 16  ;;  %v1949_v62 = vld [vmem:[#allocation3 + $0x8c] sm:$0xf]  ;;  %v2251_v52 = vshrl.u32 %v1948_v54, 16  ;;  %v2254_v4 = vshll.u32 %v1948_v54, 16  ;;  %v11191_v13 = vld [vmem:[#allocation6 + $0x1d8] sm:$0xff]  }
 0x176   :  { %v2983_v57 = vsel %vm11765_vm13, %v2978_v43, %v2982_v12  ;;  %v2730_v16 = vld [vmem:[#allocation2 + $0x48c] sm:$0x1]  ;;  %v3644_v14 = vsel %vm11771_vm14, %v2988_v47, %v3643_v33  ;;  %v1351_v7 = vrot.slane %v1349_v49, 5  ;;  %v1357_v20 = vrot.slane %v1355_v50, 5  ;;  %8982 = vmatpush2.bf16.msra.mxu1 %v11191_v13  ;;  %v1752_v43 = vld [vmem:[#allocation2 + $0x4f4] sm:$0xf] }
 0x177   :  { %3642 = vst [vmem:[#allocation2 + $0x14] sm:$0xf] %v2983_v57  ;;  %v2259_v25 = vshrl.u32 %v1949_v62, 16  ;;  %v2731_v12 = vsel %vm11580_vm2, 0, %v2730_v16  ;;  %3645 = vst [vmem:[#allocation2 + $0x38] sm:$0xf] %v3644_v14  ;;  %8983 = vmatprep.subr.bf16.mxu1 %v13607_v0 }
 0x178   :  { %v1361_v21 = vrot.slane %v1359_v58, 4  ;;  %v2253_v32 = vrot.slane %v2251_v52, 7  ;;  %v2262_v27 = vshll.u32 %v1949_v62, 16  ;;  %2732 = vst [vmem:[#allocation2 + $0x48c] sm:$0x1] %v2731_v12  ;;  %v1352_v40 = vor.u32 %v1351_v7, %v1348_v48  ;;  %v12128_v58 = vpop.f32.mrf.mxu0  ;;  %v12130_v62 = vpop.f32.mrf.mxu1 }
 0x179   :  { %v2261_v46 = vrot.slane %v2259_v25, 7  ;;  %v2622_v38 = vld [vmem:[#allocation2 + $0x4d4] sm:$0xf]  ;;  %v2780_v54 = vld [vmem:[#allocation3 + $0x8] sm:$0xf]  ;;  %13636 = vst [vmem:[#allocation30_spill] sm:$0xff] %v12128_v58 }
 0x17a   :  { %v1362_v33 = vor.u32 %v1361_v21, %v1357_v20  ;;  %v2256_v47 = vor.u32 %v2254_v4, %v2253_v32  ;;  %v2257_v49 = vrot.slane %v2253_v32, 4  ;;  %v2781_v50 = vld [vmem:[#allocation3 + $0xc] sm:$0xf]  ;;  %2844 = vst [vmem:[#allocation2 + $0x58] sm:$0xf] %v2780_v54  ;;  %13637 = vst [vmem:[#allocation31_spill] sm:$0xff] %v12130_v62  ;;  %v8185_v21 = vpop.f32.mrf.mxu0  ;;  %v8377_v32 = vpop.f32.mrf.mxu1 }
 0x17b   :  { %v2908_v57 = vld [vmem:[#allocation3 + $0x8] sm:$0xf]  ;;  %v1353_v13 = vrot.slane %v1352_v40, 4  ;;  %v2264_v16 = vor.u32 %v2262_v27, %v2261_v46  ;;  %2845 = vst [vmem:[#allocation2 + $0x7c] sm:$0xf] %v2781_v50 }
 0x17c   :  { %v11126_v52 = vld [vmem:[#allocation2 + $0x444] ss:$36 sps:$4 sm:$0xff]   ;;  %v2990_v48 = vshrl.u32 %v2908_v57, 16  ;;  %v1363_v7 = vrot.slane %v1362_v33, 4  ;;  %v2623_v25 = vsel %vm11598_vm7, %v2256_v47, %v2622_v38  ;;  %v2909_v12 = vld [vmem:[#allocation3 + $0xc] sm:$0xf] }
 0x17d   :  { %v11129_v14 = vld [vmem:[#allocation2 + $0x440] ss:$36 sps:$4 sm:$0xff]   ;;  %v2993_v4 = vshll.u32 %v2908_v57, 16  ;;  %8531 = vmatprep.mubr.bf16.mxu1 %v11126_v52  ;;  %v1358_v35 = vsel %vm11765_vm13, %v1353_v13, %v1357_v20  ;;  %v2265_v39 = vsel %vm11592_vm6, %v2257_v49, %v2264_v16  ;;  %2624 = vst [vmem:[#allocation2 + $0x4d4] sm:$0xf] %v2623_v25  ;;  %v2999_v40 = vshll.u32 %v2909_v12, 16  ;;  %v12140_v57 = vpop.f32.mrf.mxu0 }
 0x17e   :  { %v2992_v27 = vrot.slane %v2990_v48, 4  ;;  %v1029_v46 = vld [vmem:[#allocation3 + $0x88] sm:$0xf]  ;;  %8532 = vmatmul.mubr.bf16.gmra.mxu1 %v11129_v14  ;;  %1751 = vst [vmem:[#allocation2 + $0x4d0] sm:$0xf] %v1358_v35  ;;  %v1753_v38 = vsel %vm11771_vm14, %v1363_v7, %v1752_v43  ;;  %v3003_v33 = vshrl.u32 %v2909_v12, 16  ;;  %v8413_v48 = vpop.f32.mrf.mxu1 }
 0x17f   :  { %2625 = vst [vmem:[#allocation2 + $0x4f8] sm:$0xf] %v2265_v39  ;;  %v2995_v54 = vrot.slane %v2993_v4, 5  ;;  %v1030_v47 = vld [vmem:[#allocation3 + $0x8c] sm:$0xf]  ;;  %v1365_v50 = vshrl.u32 %v1029_v46, 16  ;;  %v12145_v43 = vadd.f32 %v8413_v48, %v11981_v59  ;;  %v8190_v7 = vpop.f32.mrf.mxu0 }
 0x180   :  { %13638 = vst [vmem:[#allocation32_spill] sm:$0xff] %v12140_v57  ;;  %v3770_v20 = vld [vmem:[#allocation2 + $0x38] sm:$0x8]  ;;  %1754 = vst [vmem:[#allocation2 + $0x4f4] sm:$0xf] %v1753_v38  ;;  %v3001_v52 = vrot.slane %v2999_v40, 5  ;;  %v8415_v40 = vpop.f32.mrf.mxu1 }
 0x181   :  { %v1368_v49 = vshll.u32 %v1029_v46, 16  ;;  %v1374_v13 = vshll.u32 %v1030_v47, 16  ;;  %v1378_v16 = vshrl.u32 %v1030_v47, 16  ;;  %v11130_v25 = vld [vmem:[#allocation2 + $0x48c] ss:$36 sps:$4 sm:$0xff]   ;;  %v3771_v14 = vsel %vm11727_vm10, 0, %v3770_v20  ;;  %v12147_v9 = vpop.f32.mrf.mxu0 }
 0x182   :  { %v2996_v21 = vor.u32 %v2995_v54, %v2992_v27  ;;  %3772 = vst [vmem:[#allocation2 + $0x38] sm:$0x8] %v3771_v14  ;;  %v11135_v12 = vld [vmem:[#allocation2 + $0x488] ss:$36 sps:$4 sm:$0xff]   ;;  %v3005_v4 = vrot.slane %v3003_v33, 4  ;;  %v1367_v32 = vrot.slane %v1365_v50, 4  ;;  %8539 = vmatprep.mubr.bf16.mxu1 %v11130_v25  ;;  %v12149_v7 = vpop.f32.mrf.mxu1 }
 0x183   :  { %v1370_v35 = vrot.slane %v1368_v49, 5  ;;  %v1376_v39 = vrot.slane %v1374_v13, 5  ;;  %v3647_v38 = vld [vmem:[#allocation2 + $0x80] sm:$0xf]  ;;  %v1380_v47 = vrot.slane %v1378_v16, 4  ;;  %13639 = vst [vmem:[#allocation33_spill] sm:$0xff] %v12147_v9  ;;  %v8193_v40 = vpop.f32.mrf.mxu0 }
 0x184   :  { %v2997_v46 = vrot.slane %v2996_v21, 4  ;;  %v1950_v0 = vld [vmem:[#allocation3 + $0x90] sm:$0xf]  ;;  %v1951_v62 = vld [vmem:[#allocation3 + $0x94] sm:$0xf]  ;;  %v3006_v27 = vor.u32 %v3005_v4, %v3001_v52  ;;  %v8418_v53 = vpop.f32.mrf.mxu1 }
 0x185   :  { %v1371_v54 = vor.u32 %v1370_v35, %v1367_v32  ;;  %v1756_v59 = vld [vmem:[#allocation2 + $0x53c] sm:$0xf]  ;;  %v2267_v20 = vshrl.u32 %v1950_v0, 16  ;;  %v2270_v48 = vshll.u32 %v1950_v0, 16  ;;  %v2782_v14 = vld [vmem:[#allocation3 + $0x10] sm:$0xf]  ;;  %v1381_v49 = vor.u32 %v1380_v47, %v1376_v39  ;;  %v12155_v47 = vpop.f32.mrf.mxu0 }
 0x186   :  { %v2733_v33 = vld [vmem:[#allocation2 + $0x4d4] sm:$0x1]  ;;  %v3002_v50 = vsel %vm11765_vm13, %v2997_v46, %v3001_v52  ;;  %v2275_v13 = vshrl.u32 %v1951_v62, 16  ;;  %v2278_v25 = vshll.u32 %v1951_v62, 16  ;;  %v2626_v16 = vld [vmem:[#allocation2 + $0x51c] sm:$0xf]  ;;  %8540 = vmatmul.mubr.bf16.gmra.mxu1 %v11135_v12 }
 0x187   :  { %v2783_v21 = vld [vmem:[#allocation3 + $0x14] sm:$0xf]  ;;  %2846 = vst [vmem:[#allocation2 + $0xa0] sm:$0xf] %v2782_v14  ;;  %v2734_v4 = vsel %vm11580_vm2, 0, %v2733_v33  ;;  %v3007_v32 = vrot.slane %v3006_v27, 4 }
 0x188   :  { %3646 = vst [vmem:[#allocation2 + $0x5c] sm:$0xf] %v3002_v50  ;;  %v1372_v0 = vrot.slane %v1371_v54, 4  ;;  %v2269_v35 = vrot.slane %v2267_v20, 7  ;;  %2847 = vst [vmem:[#allocation2 + $0xc4] sm:$0xf] %v2783_v21 }
 0x189   :  { %v2910_v26 = vld [vmem:[#allocation3 + $0x10] sm:$0xf]  ;;  %v1869_v19 = vld [vmem:[#allocation2 + $0x4f4] sm:$0x8]  ;;  %2735 = vst [vmem:[#allocation2 + $0x4d4] sm:$0x1] %v2734_v4  ;;  %v3648_v27 = vsel %vm11771_vm14, %v3007_v32, %v3647_v38 }
 0x18a   :  { %v1382_v52 = vrot.slane %v1381_v49, 4  ;;  %v2277_v46 = vrot.slane %v2275_v13, 7  ;;  %v2911_v62 = vld [vmem:[#allocation3 + $0x14] sm:$0xf]  ;;  %13640 = vst [vmem:[#allocation34_spill] sm:$0xff] %v12155_v47  ;;  %v1870_v14 = vsel %vm11727_vm10, 0, %v1869_v19  ;;  %v1377_v54 = vsel %vm11765_vm13, %v1372_v0, %v1376_v39  ;;  %v8198_v13 = vpop.f32.mrf.mxu0 }
 0x18b   :  { %v2272_v20 = vor.u32 %v2270_v48, %v2269_v35  ;;  %v11132_v33 = vld [vmem:[#allocation2 + $0x10] ss:$36 sps:$4 sm:$0xff]   ;;  %1871 = vst [vmem:[#allocation2 + $0x4f4] sm:$0x8] %v1870_v14  ;;  %3649 = vst [vmem:[#allocation2 + $0x80] sm:$0xf] %v3648_v27 }
 0x18c   :  { %v11134_v53 = vld [vmem:[#allocation2 + $0x14] ss:$36 sps:$4 sm:$0xff]   ;;  %1755 = vst [vmem:[#allocation2 + $0x518] sm:$0xf] %v1377_v54  ;;  %v1757_v12 = vsel %vm11771_vm14, %v1382_v52, %v1756_v59  ;;  %v2273_v50 = vrot.slane %v2269_v35, 4  ;;  %v2280_v49 = vor.u32 %v2278_v25, %v2277_v46  ;;  %v3009_v38 = vshrl.u32 %v2910_v26, 16  ;;  %v12169_v59 = vpop.f32.mrf.mxu0 }
 0x18d   :  { %1758 = vst [vmem:[#allocation2 + $0x53c] sm:$0xf] %v1757_v12  ;;  %v2627_v19 = vsel %vm11598_vm7, %v2272_v20, %v2626_v16  ;;  %v3012_v21 = vshll.u32 %v2910_v26, 16  ;;  %v3018_v40 = vshll.u32 %v2911_v62, 16  ;;  %v11163_v39 = vld [vmem:[#allocation6 + $0x230] sm:$0xff]   ;;  %8700 = vmatprep.mubr.bf16.mxu0 %v11134_v53  ;;  %v3022_v4 = vshrl.u32 %v2911_v62, 16  ;;  %v12171_v53 = vpop.f32.mrf.mxu1 }
 0x18e   :  { %v2281_v48 = vsel %vm11592_vm6, %v2273_v50, %v2280_v49  ;;  %2628 = vst [vmem:[#allocation2 + $0x51c] sm:$0xf] %v2627_v19  ;;  %v1031_v32 = vld [vmem:[#allocation3 + $0x90] sm:$0xf]  ;;  %v1032_v0 = vld [vmem:[#allocation3 + $0x94] sm:$0xf]  ;;  %8701 = vmatmul.mubr.bf16.vlgmr.msra.gmra.mxu0 %v11132_v33  ;;  %v8201_v62 = vpop.f32.mrf.mxu0 }
 0x18f   :  { %13641 = vst [vmem:[#allocation35_spill] sm:$0xff] %v12169_v59  ;;  %2629 = vst [vmem:[#allocation2 + $0x540] sm:$0xf] %v2281_v48  ;;  %v3011_v25 = vrot.slane %v3009_v38, 4  ;;  %v3014_v35 = vrot.slane %v3012_v21, 5  ;;  %v3020_v52 = vrot.slane %v3018_v40, 5  ;;  %v8423_v48 = vpop.f32.mrf.mxu1 }
 0x190   :  { %v1384_v16 = vshrl.u32 %v1031_v32, 16  ;;  %v11418_v46 = vld [vmem:[#allocation6 + $0x238] sm:$0xff]   ;;  %v3024_v26 = vrot.slane %v3022_v4, 4  ;;  %v1387_v14 = vshll.u32 %v1031_v32, 16  ;;  %v1393_v27 = vshll.u32 %v1032_v0, 16  ;;  %v11190_v20 = vld [vmem:[#allocation6 + $0x228] sm:$0xff]   ;;  %v12175_v3 = vpop.f32.mrf.mxu0 }
 0x191   :  { %10812 = vmatpush3.bf16.msra.mxu0 %v11418_v46  ;;  %v1397_v54 = vshrl.u32 %v1032_v0, 16  ;;  %v3015_v12 = vor.u32 %v3014_v35, %v3011_v25  ;;  %v3651_v50 = vld [vmem:[#allocation2 + $0xc8] sm:$0xf]  ;;  %v1952_v13 = vld [vmem:[#allocation3 + $0x98] sm:$0xf]  ;;  %v11204_v4 = vld [vmem:[#allocation6 + $0x1d0] sm:$0xff]  }
 0x192   :  { %v1386_v49 = vrot.slane %v1384_v16, 4  ;;  %10813 = vmatprep.subr.bf16.mxu0 %v11163_v39  ;;  %v3025_v33 = vor.u32 %v3024_v26, %v3020_v52  ;;  %v1389_v19 = vrot.slane %v1387_v14, 5  ;;  %v1395_v38 = vrot.slane %v1393_v27, 5  ;;  %v12173_v40 = vld [vmem:[#allocation3 + $0x9c] sm:$0xf]  ;;  %13642 = vst [vmem:[#allocation36_spill] sm:$0xff] %v12175_v3  ;;  %v12179_v27 = vpop.f32.mrf.mxu1  ;;  %8984 = vmatpush2.bf16.msra.mxu1 %v11204_v4  ;;  %v8206_v56 = vpop.f32.mrf.mxu0 }
 0x193   :  { %v1399_v21 = vrot.slane %v1397_v54, 4  ;;  %v11138_v32 = vld [vmem:[#allocation2 + $0x4d4] ss:$36 sps:$4 sm:$0xff]   ;;  %v3773_v46 = vld [vmem:[#allocation2 + $0x80] sm:$0x8]  ;;  %v3016_v0 = vrot.slane %v3015_v12, 4 }
 0x194   :  { %v1760_v42 = vld [vmem:[#allocation2 + $0x584] sm:$0xf]  ;;  %v3774_v25 = vsel %vm11727_vm10, 0, %v3773_v46  ;;  %v11142_v35 = vld [vmem:[#allocation2 + $0x4d0] ss:$36 sps:$4 sm:$0xff]   ;;  %v3026_v62 = vrot.slane %v3025_v33, 4  ;;  %v1390_v26 = vor.u32 %v1389_v19, %v1386_v49  ;;  %8547 = vmatprep.mubr.bf16.mxu1 %v11138_v32  ;;  %v8426_v4 = vpop.f32.mrf.mxu1 }
 0x195   :  { %v1872_v16 = vld [vmem:[#allocation2 + $0x53c] sm:$0x8]  ;;  %v1400_v14 = vor.u32 %v1399_v21, %v1395_v38  ;;  %10814 = vmatpush3.bf16.msra.mxu0 %v11163_v39  ;;  %3775 = vst [vmem:[#allocation2 + $0x80] sm:$0x8] %v3774_v25  ;;  %v2736_v12 = vld [vmem:[#allocation2 + $0x51c] sm:$0x1]  ;;  %v3021_v48 = vsel %vm11765_vm13, %v3016_v0, %v3020_v52  ;;  %8548 = vmatmul.mubr.bf16.gmra.mxu1 %v11142_v35  ;;  %v12192_v25 = vpop.f32.mrf.mxu0 }
 0x196   :  { %v1873_v54 = vsel %vm11727_vm10, 0, %v1872_v16  ;;  %v2283_v31 = vshrl.u32 %v1952_v13, 16  ;;  %v2286_v46 = vshll.u32 %v1952_v13, 16  ;;  %10815 = vmatprep.subr.bf16.mxu0 %v11190_v20  ;;  %v2737_v39 = vsel %vm11580_vm2, 0, %v2736_v12  ;;  %3650 = vst [vmem:[#allocation2 + $0xa4] sm:$0xf] %v3021_v48 }
 0x197   :  { %1874 = vst [vmem:[#allocation2 + $0x53c] sm:$0x8] %v1873_v54  ;;  %v3652_v49 = vsel %vm11771_vm14, %v3026_v62, %v3651_v50  ;;  %v1391_v33 = vrot.slane %v1390_v26, 4  ;;  %v1401_v19 = vrot.slane %v1400_v14, 4  ;;  %v2784_v21 = vld [vmem:[#allocation3 + $0x18] sm:$0xf]  ;;  %v8209_v48 = vpop.f32.mrf.mxu0 }
 0x198   :  { %v13643_v32 = vmov 0   ;;  %2738 = vst [vmem:[#allocation2 + $0x51c] sm:$0x1] %v2737_v39  ;;  %3653 = vst [vmem:[#allocation2 + $0xc8] sm:$0xf] %v3652_v49  ;;  %v2285_v52 = vrot.slane %v2283_v31, 7 }
 0x199   :  { %8985 = vmatprep.subr.bf16.mxu1 %v13643_v32  ;;  %v2291_v56 = vshrl.u32 %v12173_v40, 16  ;;  %v2294_v13 = vshll.u32 %v12173_v40, 16  ;;  %v2785_v0 = vld [vmem:[#allocation3 + $0x1c] sm:$0xf]  ;;  %2848 = vst [vmem:[#allocation2 + $0xe8] sm:$0xf] %v2784_v21  ;;  %v1396_v50 = vsel %vm11765_vm13, %v1391_v33, %v1395_v38  ;;  %v1761_v35 = vsel %vm11771_vm14, %v1401_v19, %v1760_v42  ;;  %10816 = vmatpush3.bf16.msra.mxu0 %v11190_v20 }
 0x19a   :  { %13644 = vst [vmem:[#allocation37_spill] sm:$0xff] %v12192_v25  ;;  %v2630_v16 = vld [vmem:[#allocation2 + $0x564] sm:$0xf]  ;;  %2849 = vst [vmem:[#allocation2 + $0x10c] sm:$0xf] %v2785_v0  ;;  %v2288_v31 = vor.u32 %v2286_v46, %v2285_v52  ;;  %v2289_v14 = vrot.slane %v2285_v52, 4 }
 0x19b   :  { %v2912_v62 = vld [vmem:[#allocation3 + $0x18] sm:$0xf]  ;;  %v2913_v26 = vld [vmem:[#allocation3 + $0x1c] sm:$0xf]  ;;  %1759 = vst [vmem:[#allocation2 + $0x560] sm:$0xf] %v1396_v50 }
 0x19c   :  { %1762 = vst [vmem:[#allocation2 + $0x584] sm:$0xf] %v1761_v35  ;;  %v2293_v40 = vrot.slane %v2291_v56, 7  ;;  %v3028_v54 = vshrl.u32 %v2912_v62, 16  ;;  %v1033_v12 = vld [vmem:[#allocation3 + $0x98] sm:$0xf]  ;;  %v2631_v42 = vsel %vm11598_vm7, %v2288_v31, %v2630_v16 }
 0x19d   :  { %v3031_v39 = vshll.u32 %v2912_v62, 16  ;;  %v3037_v49 = vshll.u32 %v2913_v26, 16  ;;  %v3041_v21 = vshrl.u32 %v2913_v26, 16  ;;  %v1403_v38 = vshrl.u32 %v1033_v12, 16  ;;  %v1034_v4 = vld [vmem:[#allocation3 + $0x9c] sm:$0xf]  ;;  %v12202_v26 = vpop.f32.mrf.mxu1 }
 0x19e   :  { %v2296_v33 = vor.u32 %v2294_v13, %v2293_v40  ;;  %v3030_v19 = vrot.slane %v3028_v54, 4  ;;  %v1406_v0 = vshll.u32 %v1033_v12, 16  ;;  %v1954_v20 = vld [vmem:[#allocation3 + $0xa0] sm:$0xf]  ;;  %v11143_v35 = vld [vmem:[#allocation2 + $0x58] ss:$36 sps:$4 sm:$0xff]  }
 0x19f   :  { %v11140_v50 = vld [vmem:[#allocation2 + $0x5c] ss:$36 sps:$4 sm:$0xff]   ;;  %2632 = vst [vmem:[#allocation2 + $0x564] sm:$0xf] %v2631_v42  ;;  %v3033_v46 = vrot.slane %v3031_v39, 5  ;;  %v3039_v56 = vrot.slane %v3037_v49, 5  ;;  %v8431_v49 = vpop.f32.mrf.mxu1 }
 0x1a0   :  { %v2297_v52 = vsel %vm11592_vm6, %v2289_v14, %v2296_v33  ;;  %v3043_v62 = vrot.slane %v3041_v21, 4  ;;  %v1405_v48 = vrot.slane %v1403_v38, 4  ;;  %8708 = vmatprep.mubr.bf16.mxu0 %v11140_v50  ;;  %v11144_v13 = vld [vmem:[#allocation2 + $0x51c] ss:$36 sps:$4 sm:$0xff]   ;;  %v3776_v40 = vld [vmem:[#allocation2 + $0xc8] sm:$0x8] }
 0x1a1   :  { %2633 = vst [vmem:[#allocation2 + $0x588] sm:$0xf] %v2297_v52  ;;  %v3034_v16 = vor.u32 %v3033_v46, %v3030_v19  ;;  %v3655_v31 = vld [vmem:[#allocation2 + $0x110] sm:$0xf]  ;;  %v1408_v54 = vrot.slane %v1406_v0, 5  ;;  %8709 = vmatmul.mubr.bf16.gmra.mxu0 %v11143_v35  ;;  %v3777_v12 = vsel %vm11727_vm10, 0, %v3776_v40  ;;  %8555 = vmatprep.mubr.bf16.mxu1 %v11144_v13  ;;  %v12208_v40 = vpop.f32.mrf.mxu1 }
 0x1a2   :  { %v11148_v39 = vld [vmem:[#allocation2 + $0x518] ss:$36 sps:$4 sm:$0xff]   ;;  %v3044_v42 = vor.u32 %v3043_v62, %v3039_v56  ;;  %v1412_v29 = vshll.u32 %v1034_v4, 16  ;;  %v1416_v14 = vshrl.u32 %v1034_v4, 16  ;;  %3778 = vst [vmem:[#allocation2 + $0xc8] sm:$0x8] %v3777_v12 }
 0x1a3   :  { %v1875_v21 = vld [vmem:[#allocation2 + $0x584] sm:$0x8]  ;;  %v3035_v38 = vrot.slane %v3034_v16, 4  ;;  %v1409_v33 = vor.u32 %v1408_v54, %v1405_v48  ;;  %v2299_v2 = vshrl.u32 %v1954_v20, 16  ;;  %8556 = vmatmul.mubr.bf16.gmra.mxu1 %v11148_v39  ;;  %v2634_v52 = vld [vmem:[#allocation2 + $0x5ac] sm:$0xf] }
 0x1a4   :  { %v1955_v50 = vld [vmem:[#allocation3 + $0xa4] sm:$0xf]  ;;  %v1876_v19 = vsel %vm11727_vm10, 0, %v1875_v21  ;;  %v3045_v0 = vrot.slane %v3044_v42, 4  ;;  %v1414_v35 = vrot.slane %v1412_v29, 5  ;;  %v1418_v46 = vrot.slane %v1416_v14, 4  ;;  %v8434_v21 = vpop.f32.mrf.mxu1 }
 0x1a5   :  { %1877 = vst [vmem:[#allocation2 + $0x584] sm:$0x8] %v1876_v19  ;;  %v3040_v4 = vsel %vm11765_vm13, %v3035_v38, %v3039_v56  ;;  %v1410_v62 = vrot.slane %v1409_v33, 4  ;;  %v1764_v13 = vld [vmem:[#allocation2 + $0x5cc] sm:$0xf]  ;;  %v2301_v16 = vrot.slane %v2299_v2, 7  ;;  %v12214_v19 = vpop.f32.mrf.mxu0 }
 0x1a6   :  { %v2302_v48 = vshll.u32 %v1954_v20, 16  ;;  %v2786_v54 = vld [vmem:[#allocation3 + $0x20] sm:$0xf]  ;;  %v2739_v12 = vld [vmem:[#allocation2 + $0x564] sm:$0x1]  ;;  %v3656_v39 = vsel %vm11771_vm14, %v3045_v0, %v3655_v31  ;;  %v1419_v42 = vor.u32 %v1418_v46, %v1414_v35  ;;  %v2307_v29 = vshrl.u32 %v1955_v50, 16 }
 0x1a7   :  { %3654 = vst [vmem:[#allocation2 + $0xec] sm:$0xf] %v3040_v4  ;;  %v2310_v14 = vshll.u32 %v1955_v50, 16  ;;  %v2787_v49 = vld [vmem:[#allocation3 + $0x24] sm:$0xf]  ;;  %13645 = vst [vmem:[#allocation38_spill] sm:$0xff] %v12214_v19  ;;  %v1415_v2 = vsel %vm11765_vm13, %v1410_v62, %v1414_v35 }
 0x1a8   :  { %2850 = vst [vmem:[#allocation2 + $0x130] sm:$0xf] %v2786_v54  ;;  %v2740_v56 = vsel %vm11580_vm2, 0, %v2739_v12  ;;  %3657 = vst [vmem:[#allocation2 + $0x110] sm:$0xf] %v3656_v39  ;;  %v2304_v20 = vor.u32 %v2302_v48, %v2301_v16  ;;  %v2305_v38 = vrot.slane %v2301_v16, 4  ;;  %v8214_v54 = vpop.f32.mrf.mxu0 }
 0x1a9   :  { %2851 = vst [vmem:[#allocation2 + $0x154] sm:$0xf] %v2787_v49  ;;  %v2914_v33 = vld [vmem:[#allocation3 + $0x20] sm:$0xf]  ;;  %v2915_v31 = vld [vmem:[#allocation3 + $0x24] sm:$0xf] }
 0x1aa   :  { %2741 = vst [vmem:[#allocation2 + $0x564] sm:$0x1] %v2740_v56  ;;  %v1420_v0 = vrot.slane %v1419_v42, 4  ;;  %1763 = vst [vmem:[#allocation2 + $0x5a8] sm:$0xf] %v1415_v2  ;;  %v2309_v50 = vrot.slane %v2307_v29, 7  ;;  %v2635_v21 = vsel %vm11598_vm7, %v2304_v20, %v2634_v52  ;;  %v12224_v48 = vpop.f32.mrf.mxu0 }
 0x1ab   :  { %v3047_v46 = vshrl.u32 %v2914_v33, 16  ;;  %v3050_v4 = vshll.u32 %v2914_v33, 16  ;;  %v3056_v12 = vshll.u32 %v2915_v31, 16  ;;  %v3060_v39 = vshrl.u32 %v2915_v31, 16  ;;  %v11146_v37 = vld [vmem:[#allocation2 + $0xa4] ss:$36 sps:$4 sm:$0xff]  }
 0x1ac   :  { %v11149_v11 = vld [vmem:[#allocation2 + $0xa0] ss:$36 sps:$4 sm:$0xff]   ;;  %v1765_v35 = vsel %vm11771_vm14, %v1420_v0, %v1764_v13  ;;  %v2312_v62 = vor.u32 %v2310_v14, %v2309_v50  ;;  %2636 = vst [vmem:[#allocation2 + $0x5ac] sm:$0xf] %v2635_v21  ;;  %13646 = vst [vmem:[#allocation39_spill] sm:$0xff] %v12224_v48  ;;  %8716 = vmatprep.mubr.bf16.mxu0 %v11146_v37  ;;  %v8217_v2 = vpop.f32.mrf.mxu0  ;;  %v12228_v21 = vpop.f32.mrf.mxu1 }
 0x1ad   :  { %v3049_v16 = vrot.slane %v3047_v46, 4  ;;  %1766 = vst [vmem:[#allocation2 + $0x5cc] sm:$0xf] %v1765_v35  ;;  %v3052_v42 = vrot.slane %v3050_v4, 5  ;;  %v3058_v29 = vrot.slane %v3056_v12, 5  ;;  %v3062_v49 = vrot.slane %v3060_v39, 4  ;;  %8717 = vmatmul.mubr.bf16.gmra.mxu0 %v11149_v11 }
 0x1ae   :  { %v2313_v52 = vsel %vm11592_vm6, %v2305_v38, %v2312_v62  ;;  %v1035_v56 = vld [vmem:[#allocation3 + $0xa0] sm:$0xf]  ;;  %v1036_v13 = vld [vmem:[#allocation3 + $0xa4] sm:$0xf]  ;;  %v3659_v46 = vld [vmem:[#allocation2 + $0x158] sm:$0xf] }
 0x1af   :  { %2637 = vst [vmem:[#allocation2 + $0x5d0] sm:$0xf] %v2313_v52  ;;  %v3053_v20 = vor.u32 %v3052_v42, %v3049_v16  ;;  %v3063_v33 = vor.u32 %v3062_v49, %v3058_v29  ;;  %v1422_v14 = vshrl.u32 %v1035_v56, 16  ;;  %v1425_v31 = vshll.u32 %v1035_v56, 16  ;;  %v11217_v0 = vld [vmem:[#allocation6 + $0x220] sm:$0xff]   ;;  %v8439_v42 = vpop.f32.mrf.mxu1 }
 0x1b0   :  { %v3779_v50 = vld [vmem:[#allocation2 + $0x110] sm:$0x8]  ;;  %v1431_v54 = vshll.u32 %v1036_v13, 16  ;;  %v1435_v4 = vshrl.u32 %v1036_v13, 16  ;;  %v11155_v12 = vld [vmem:[#allocation2 + $0x560] ss:$36 sps:$4 sm:$0xff]   ;;  %10817 = vmatprep.subr.bf16.mxu0 %v11217_v0 }
 0x1b1   :  { %v11151_v37 = vld [vmem:[#allocation2 + $0x564] ss:$36 sps:$4 sm:$0xff]   ;;  %v3780_v38 = vsel %vm11727_vm10, 0, %v3779_v50  ;;  %v3054_v11 = vrot.slane %v3053_v20, 4  ;;  %v3064_v39 = vrot.slane %v3063_v33, 4  ;;  %v1424_v35 = vrot.slane %v1422_v14, 4  ;;  %10818 = vmatpush3.bf16.msra.mxu0 %v11217_v0  ;;  %v12240_v0 = vpop.f32.mrf.mxu0 }
 0x1b2   :  { %3781 = vst [vmem:[#allocation2 + $0x110] sm:$0x8] %v3780_v38  ;;  %v1427_v62 = vrot.slane %v1425_v31, 5  ;;  %v1956_v16 = vld [vmem:[#allocation3 + $0xa8] sm:$0xf]  ;;  %8563 = vmatprep.mubr.bf16.mxu1 %v11151_v37  ;;  %v1433_v52 = vrot.slane %v1431_v54, 5  ;;  %v12238_v31 = vpop.f32.mrf.mxu1 }
 0x1b3   :  { %v2742_v49 = vld [vmem:[#allocation2 + $0x5ac] sm:$0x1]  ;;  %v1437_v56 = vrot.slane %v1435_v4, 4  ;;  %8564 = vmatmul.mubr.bf16.gmra.mxu1 %v11155_v12  ;;  %v3059_v38 = vsel %vm11765_vm13, %v3054_v11, %v3058_v29  ;;  %v3660_v20 = vsel %vm11771_vm14, %v3064_v39, %v3659_v46  ;;  %v1768_v14 = vld [vmem:[#allocation2 + $0x614] sm:$0xf]  ;;  %13647 = vst [vmem:[#allocation40_spill] sm:$0xff] %v12240_v0 }
 0x1b4   :  { %v1957_v2 = vld [vmem:[#allocation3 + $0xac] sm:$0xf]  ;;  %v2743_v50 = vsel %vm11580_vm2, 0, %v2742_v49  ;;  %v1428_v33 = vor.u32 %v1427_v62, %v1424_v35  ;;  %3658 = vst [vmem:[#allocation2 + $0x134] sm:$0xf] %v3059_v38  ;;  %v2315_v12 = vshrl.u32 %v1956_v16, 16  ;;  %v8442_v62 = vpop.f32.mrf.mxu1  ;;  %v8222_v49 = vpop.f32.mrf.mxu0 }
 0x1b5   :  { %v1878_v13 = vld [vmem:[#allocation2 + $0x5cc] sm:$0x8]  ;;  %2744 = vst [vmem:[#allocation2 + $0x5ac] sm:$0x1] %v2743_v50  ;;  %3661 = vst [vmem:[#allocation2 + $0x158] sm:$0xf] %v3660_v20  ;;  %v1438_v37 = vor.u32 %v1437_v56, %v1433_v52 }
 0x1b6   :  { %v11218_v54 = vld [vmem:[#allocation6 + $0x1c8] sm:$0xff]   ;;  %v1879_v4 = vsel %vm11727_vm10, 0, %v1878_v13  ;;  %v2318_v42 = vshll.u32 %v1956_v16, 16  ;;  %v1429_v11 = vrot.slane %v1428_v33, 4  ;;  %v2323_v46 = vshrl.u32 %v1957_v2, 16 }
 0x1b7   :  { %v2788_v29 = vld [vmem:[#allocation3 + $0x28] sm:$0xf]  ;;  %1880 = vst [vmem:[#allocation2 + $0x5cc] sm:$0x8] %v1879_v4  ;;  %v2326_v39 = vshll.u32 %v1957_v2, 16  ;;  %8986 = vmatpush2.bf16.msra.mxu1 %v11218_v54  ;;  %v1439_v45 = vrot.slane %v1438_v37, 4  ;;  %v12247_v2 = vpop.f32.mrf.mxu0 }
 0x1b8   :  { %v2789_v35 = vld [vmem:[#allocation3 + $0x2c] sm:$0xf]  ;;  %2852 = vst [vmem:[#allocation2 + $0x178] sm:$0xf] %v2788_v29  ;;  %v2317_v24 = vrot.slane %v2315_v12, 7  ;;  %8987 = vmatprep.subr.bf16.mxu1 %v13643_v32  ;;  %v1434_v16 = vsel %vm11765_vm13, %v1429_v11, %v1433_v52  ;;  %v2325_v56 = vrot.slane %v2323_v46, 7 }
 0x1b9   :  { %2853 = vst [vmem:[#allocation2 + $0x19c] sm:$0xf] %v2789_v35  ;;  %v2916_v13 = vld [vmem:[#allocation3 + $0x28] sm:$0xf]  ;;  %v2917_v50 = vld [vmem:[#allocation3 + $0x2c] sm:$0xf]  ;;  %v1769_v54 = vsel %vm11771_vm14, %v1439_v45, %v1768_v14  ;;  %v8225_v11 = vpop.f32.mrf.mxu0 }
 0x1ba   :  { %v2638_v38 = vld [vmem:[#allocation2 + $0x5f4] sm:$0xf]  ;;  %v3066_v20 = vshrl.u32 %v2916_v13, 16  ;;  %v3069_v33 = vshll.u32 %v2916_v13, 16  ;;  %13648 = vst [vmem:[#allocation41_spill] sm:$0xff] %v12247_v2  ;;  %v2320_v37 = vor.u32 %v2318_v42, %v2317_v24  ;;  %v2321_v12 = vrot.slane %v2317_v24, 4 }
 0x1bb   :  { %v11153_v4 = vld [vmem:[#allocation2 + $0xec] ss:$36 sps:$4 sm:$0xff]   ;;  %1767 = vst [vmem:[#allocation2 + $0x5f0] sm:$0xf] %v1434_v16  ;;  %1770 = vst [vmem:[#allocation2 + $0x614] sm:$0xf] %v1769_v54  ;;  %v2328_v35 = vor.u32 %v2326_v39, %v2325_v56  ;;  %v12255_v39 = vpop.f32.mrf.mxu1 }
 0x1bc   :  { %v11156_v29 = vld [vmem:[#allocation2 + $0xe8] ss:$36 sps:$4 sm:$0xff]   ;;  %v3068_v32 = vrot.slane %v3066_v20, 4  ;;  %v3071_v62 = vrot.slane %v3069_v33, 5  ;;  %v3075_v49 = vshll.u32 %v2917_v50, 16  ;;  %8724 = vmatprep.mubr.bf16.mxu0 %v11153_v4  ;;  %v2639_v46 = vsel %vm11598_vm7, %v2320_v37, %v2638_v38 }
 0x1bd   :  { %v1037_v52 = vld [vmem:[#allocation3 + $0xa8] sm:$0xf]  ;;  %v3079_v13 = vshrl.u32 %v2917_v50, 16  ;;  %v1038_v60 = vld [vmem:[#allocation3 + $0xac] sm:$0xf]  ;;  %8725 = vmatmul.mubr.bf16.gmra.mxu0 %v11156_v29  ;;  %v2329_v24 = vsel %vm11592_vm6, %v2321_v12, %v2328_v35  ;;  %v8447_v54 = vpop.f32.mrf.mxu1 }
 0x1be   :  { %v1441_v2 = vshrl.u32 %v1037_v52, 16  ;;  %v1444_v16 = vshll.u32 %v1037_v52, 16  ;;  %v3782_v0 = vld [vmem:[#allocation2 + $0x158] sm:$0x8]  ;;  %2640 = vst [vmem:[#allocation2 + $0x5f4] sm:$0xf] %v2639_v46  ;;  %v3072_v45 = vor.u32 %v3071_v62, %v3068_v32 }
 0x1bf   :  { %v3077_v14 = vrot.slane %v3075_v49, 5  ;;  %v1450_v42 = vshll.u32 %v1038_v60, 16  ;;  %v11157_v56 = vld [vmem:[#allocation2 + $0x5a8] ss:$36 sps:$4 sm:$0xff]   ;;  %v3783_v38 = vsel %vm11727_vm10, 0, %v3782_v0  ;;  %v3081_v33 = vrot.slane %v3079_v13, 4 }
 0x1c0   :  { %v11159_v20 = vld [vmem:[#allocation2 + $0x5ac] ss:$36 sps:$4 sm:$0xff]   ;;  %2641 = vst [vmem:[#allocation2 + $0x618] sm:$0xf] %v2329_v24  ;;  %3784 = vst [vmem:[#allocation2 + $0x158] sm:$0x8] %v3783_v38  ;;  %v12261_v24 = vpop.f32.mrf.mxu1 }
 0x1c1   :  { %v3073_v50 = vrot.slane %v3072_v45, 4  ;;  %v1443_v4 = vrot.slane %v1441_v2, 4  ;;  %v1446_v29 = vrot.slane %v1444_v16, 5  ;;  %8571 = vmatprep.mubr.bf16.mxu1 %v11159_v20  ;;  %v1452_v37 = vrot.slane %v1450_v42, 5  ;;  %v1958_v35 = vld [vmem:[#allocation3 + $0xb0] sm:$0xf] }
 0x1c2   :  { %v1454_v12 = vshrl.u32 %v1038_v60, 16  ;;  %v1959_v32 = vld [vmem:[#allocation3 + $0xb4] sm:$0xf]  ;;  %8572 = vmatmul.mubr.bf16.gmra.mxu1 %v11157_v56  ;;  %v3082_v49 = vor.u32 %v3081_v33, %v3077_v14  ;;  %v3663_v52 = vld [vmem:[#allocation2 + $0x1a0] sm:$0xf]  ;;  %v2331_v0 = vshrl.u32 %v1958_v35, 16  ;;  %v8450_v33 = vpop.f32.mrf.mxu1 }
 0x1c3   :  { %v3078_v62 = vsel %vm11765_vm13, %v3073_v50, %v3077_v14  ;;  %v1447_v11 = vor.u32 %v1446_v29, %v1443_v4  ;;  %v2790_v46 = vld [vmem:[#allocation3 + $0x30] sm:$0xf]  ;;  %v1881_v13 = vld [vmem:[#allocation2 + $0x614] sm:$0x8]  ;;  %v2334_v16 = vshll.u32 %v1958_v35, 16  ;;  %v2339_v45 = vshrl.u32 %v1959_v32, 16  ;;  %v12265_v4 = vpop.f32.mrf.mxu0 }
 0x1c4   :  { %3662 = vst [vmem:[#allocation2 + $0x17c] sm:$0xf] %v3078_v62  ;;  %v1456_v2 = vrot.slane %v1454_v12, 4  ;;  %v2342_v42 = vshll.u32 %v1959_v32, 16  ;;  %v2642_v60 = vld [vmem:[#allocation2 + $0x63c] sm:$0xf] }
 0x1c5   :  { %2854 = vst [vmem:[#allocation2 + $0x1c0] sm:$0xf] %v2790_v46  ;;  %v1882_v56 = vsel %vm11727_vm10, 0, %v1881_v13  ;;  %v3083_v20 = vrot.slane %v3082_v49, 4  ;;  %v1448_v38 = vrot.slane %v1447_v11, 4  ;;  %v2333_v14 = vrot.slane %v2331_v0, 7  ;;  %v8230_v13 = vpop.f32.mrf.mxu0 }
 0x1c6   :  { %v2791_v50 = vld [vmem:[#allocation3 + $0x34] sm:$0xf]  ;;  %13649 = vst [vmem:[#allocation42_spill] sm:$0xff] %v12265_v4  ;;  %1883 = vst [vmem:[#allocation2 + $0x614] sm:$0x8] %v1882_v56  ;;  %v1457_v54 = vor.u32 %v1456_v2, %v1452_v37  ;;  %v2341_v62 = vrot.slane %v2339_v45, 7 }
 0x1c7   :  { %v2745_v29 = vld [vmem:[#allocation2 + $0x5f4] sm:$0x1]  ;;  %2855 = vst [vmem:[#allocation2 + $0x1e4] sm:$0xf] %v2791_v50  ;;  %v2918_v12 = vld [vmem:[#allocation3 + $0x30] sm:$0xf]  ;;  %v3664_v32 = vsel %vm11771_vm14, %v3083_v20, %v3663_v52  ;;  %v1453_v49 = vsel %vm11765_vm13, %v1448_v38, %v1452_v37  ;;  %v2336_v0 = vor.u32 %v2334_v16, %v2333_v14  ;;  %v12275_v20 = vpop.f32.mrf.mxu0 }
 0x1c8   :  { %v2746_v35 = vsel %vm11580_vm2, 0, %v2745_v29  ;;  %v1772_v11 = vld [vmem:[#allocation2 + $0x65c] sm:$0xf]  ;;  %v2919_v46 = vld [vmem:[#allocation3 + $0x34] sm:$0xf]  ;;  %v1458_v2 = vrot.slane %v1457_v54, 4  ;;  %v2344_v45 = vor.u32 %v2342_v42, %v2341_v62 }
 0x1c9   :  { %v11160_v33 = vld [vmem:[#allocation2 + $0x130] ss:$36 sps:$4 sm:$0xff]   ;;  %2747 = vst [vmem:[#allocation2 + $0x5f4] sm:$0x1] %v2746_v35  ;;  %3665 = vst [vmem:[#allocation2 + $0x1a0] sm:$0xf] %v3664_v32  ;;  %v2643_v29 = vsel %vm11598_vm7, %v2336_v0, %v2642_v60 }
 0x1ca   :  { %v11162_v56 = vld [vmem:[#allocation2 + $0x134] ss:$36 sps:$4 sm:$0xff]   ;;  %1771 = vst [vmem:[#allocation2 + $0x638] sm:$0xf] %v1453_v49  ;;  %v2337_v50 = vrot.slane %v2333_v14, 4  ;;  %v3085_v4 = vshrl.u32 %v2918_v12, 16  ;;  %v1773_v37 = vsel %vm11771_vm14, %v1458_v2, %v1772_v11 }
 0x1cb   :  { %v3088_v52 = vshll.u32 %v2918_v12, 16  ;;  %13650 = vst [vmem:[#allocation43_spill] sm:$0xff] %v12275_v20  ;;  %8732 = vmatprep.mubr.bf16.mxu0 %v11162_v56  ;;  %2644 = vst [vmem:[#allocation2 + $0x63c] sm:$0xf] %v2643_v29  ;;  %v3094_v16 = vshll.u32 %v2919_v46, 16  ;;  %v3098_v38 = vshrl.u32 %v2919_v46, 16  ;;  %v8233_v12 = vpop.f32.mrf.mxu0 }
 0x1cc   :  { %v1039_v35 = vld [vmem:[#allocation3 + $0xb0] sm:$0xf]  ;;  %8733 = vmatmul.mubr.bf16.gmra.mxu0 %v11160_v33  ;;  %1774 = vst [vmem:[#allocation2 + $0x65c] sm:$0xf] %v1773_v37  ;;  %v2345_v42 = vsel %vm11592_vm6, %v2337_v50, %v2344_v45  ;;  %v3087_v14 = vrot.slane %v3085_v4, 4  ;;  %v12281_v33 = vpop.f32.mrf.mxu1  ;;  %v11231_v37 = vld [vmem:[#allocation6 + $0x1c0] sm:$0xff]  }
 0x1cd   :  { %v3090_v54 = vrot.slane %v3088_v52, 5  ;;  %v1040_v60 = vld [vmem:[#allocation3 + $0xb4] sm:$0xf]  ;;  %v1460_v62 = vshrl.u32 %v1039_v35, 16  ;;  %2645 = vst [vmem:[#allocation2 + $0x660] sm:$0xf] %v2345_v42  ;;  %8988 = vmatpush2.bf16.msra.mxu1 %v11231_v37 }
 0x1ce   :  { %v3096_v32 = vrot.slane %v3094_v16, 5  ;;  %v3100_v49 = vrot.slane %v3098_v38, 4  ;;  %v1463_v0 = vshll.u32 %v1039_v35, 16  ;;  %v1469_v13 = vshll.u32 %v1040_v60, 16  ;;  %v3667_v56 = vld [vmem:[#allocation2 + $0x1e8] sm:$0xf]  ;;  %v8455_v16 = vpop.f32.mrf.mxu1 }
 0x1cf   :  { %v3091_v11 = vor.u32 %v3090_v54, %v3087_v14  ;;  %v1462_v2 = vrot.slane %v1460_v62, 4  ;;  %v1473_v46 = vshrl.u32 %v1040_v60, 16  ;;  %v1960_v29 = vld [vmem:[#allocation3 + $0xb8] sm:$0xf]  ;;  %v1961_v50 = vld [vmem:[#allocation3 + $0xbc] sm:$0xf] }
 0x1d0   :  { %v3101_v20 = vor.u32 %v3100_v49, %v3096_v32  ;;  %v1465_v45 = vrot.slane %v1463_v0, 5  ;;  %v1471_v4 = vrot.slane %v1469_v13, 5  ;;  %v2347_v52 = vshrl.u32 %v1960_v29, 16  ;;  %v11165_v48 = vld [vmem:[#allocation2 + $0x5f0] ss:$36 sps:$4 sm:$0xff]   ;;  %v12287_v3 = vpop.f32.mrf.mxu1 }
 0x1d1   :  { %v11167_v12 = vld [vmem:[#allocation2 + $0x5f4] ss:$36 sps:$4 sm:$0xff]   ;;  %v3092_v42 = vrot.slane %v3091_v11, 4  ;;  %v3785_v38 = vld [vmem:[#allocation2 + $0x1a0] sm:$0x8]  ;;  %v1475_v54 = vrot.slane %v1473_v46, 4 }
 0x1d2   :  { %v3102_v35 = vrot.slane %v3101_v20, 4  ;;  %v1466_v14 = vor.u32 %v1465_v45, %v1462_v2  ;;  %v2349_v62 = vrot.slane %v2347_v52, 7  ;;  %8579 = vmatprep.mubr.bf16.mxu1 %v11167_v12  ;;  %v3786_v60 = vsel %vm11727_vm10, 0, %v3785_v38  ;;  %v2748_v19 = vld [vmem:[#allocation2 + $0x63c] sm:$0x1]  ;;  %v12293_v52 = vpop.f32.mrf.mxu0  ;;  %v8458_v16 = vpop.f32.mrf.mxu1 }
 0x1d3   :  { %v3097_v49 = vsel %vm11765_vm13, %v3092_v42, %v3096_v32  ;;  %v1776_v0 = vld [vmem:[#allocation2 + $0x6a4] sm:$0xf]  ;;  %v2350_v13 = vshll.u32 %v1960_v29, 16  ;;  %v2355_v25 = vshrl.u32 %v1961_v50, 16  ;;  %3787 = vst [vmem:[#allocation2 + $0x1a0] sm:$0x8] %v3786_v60  ;;  %8580 = vmatmul.mubr.bf16.gmra.mxu1 %v11165_v48  ;;  %v1476_v37 = vor.u32 %v1475_v54, %v1471_v4 }
 0x1d4   :  { %v1884_v11 = vld [vmem:[#allocation2 + $0x65c] sm:$0x8]  ;;  %v2749_v20 = vsel %vm11580_vm2, 0, %v2748_v19  ;;  %3666 = vst [vmem:[#allocation2 + $0x1c4] sm:$0xf] %v3097_v49  ;;  %v3668_v2 = vsel %vm11771_vm14, %v3102_v35, %v3667_v56  ;;  %v1467_v46 = vrot.slane %v1466_v14, 4  ;;  %v8238_v54 = vpop.f32.mrf.mxu0 }
 0x1d5   :  { %v2646_v45 = vld [vmem:[#allocation2 + $0x684] sm:$0xf]  ;;  %13651 = vst [vmem:[#allocation44_spill] sm:$0xff] %v12293_v52  ;;  %v1885_v32 = vsel %vm11727_vm10, 0, %v1884_v11  ;;  %2750 = vst [vmem:[#allocation2 + $0x63c] sm:$0x1] %v2749_v20  ;;  %v2352_v29 = vor.u32 %v2350_v13, %v2349_v62 }
 0x1d6   :  { %3669 = vst [vmem:[#allocation2 + $0x1e8] sm:$0xf] %v3668_v2  ;;  %v2353_v48 = vrot.slane %v2349_v62, 4  ;;  %v2357_v12 = vrot.slane %v2355_v25, 7  ;;  %v2792_v42 = vld [vmem:[#allocation3 + $0x38] sm:$0xf]  ;;  %v1472_v19 = vsel %vm11765_vm13, %v1467_v46, %v1471_v4  ;;  %v12303_v46 = vpop.f32.mrf.mxu0 }
 0x1d7   :  { %1886 = vst [vmem:[#allocation2 + $0x65c] sm:$0x8] %v1885_v32  ;;  %v1477_v56 = vrot.slane %v1476_v37, 4  ;;  %v2358_v38 = vshll.u32 %v1961_v50, 16  ;;  %v2793_v35 = vld [vmem:[#allocation3 + $0x3c] sm:$0xf]  ;;  %v2647_v60 = vsel %vm11598_vm7, %v2352_v29, %v2646_v45 }
 0x1d8   :  { %2856 = vst [vmem:[#allocation2 + $0x208] sm:$0xf] %v2792_v42  ;;  %v2920_v14 = vld [vmem:[#allocation3 + $0x38] sm:$0xf]  ;;  %1775 = vst [vmem:[#allocation2 + $0x680] sm:$0xf] %v1472_v19 }
 0x1d9   :  { %2857 = vst [vmem:[#allocation2 + $0x22c] sm:$0xf] %v2793_v35  ;;  %v2921_v49 = vld [vmem:[#allocation3 + $0x3c] sm:$0xf]  ;;  %v3104_v62 = vshrl.u32 %v2920_v14, 16  ;;  %v3107_v25 = vshll.u32 %v2920_v14, 16  ;;  %v1777_v13 = vsel %vm11771_vm14, %v1477_v56, %v1776_v0  ;;  %v2360_v11 = vor.u32 %v2358_v38, %v2357_v12  ;;  %v8241_v12 = vpop.f32.mrf.mxu0 }
 0x1da   :  { %2648 = vst [vmem:[#allocation2 + $0x684] sm:$0xf] %v2647_v60  ;;  %v3113_v4 = vshll.u32 %v2921_v49, 16  ;;  %v3117_v20 = vshrl.u32 %v2921_v49, 16  ;;  %v1041_v50 = vld [vmem:[#allocation3 + $0xb8] sm:$0xf] }
 0x1db   :  { %v1042_v2 = vld [vmem:[#allocation3 + $0xbc] sm:$0xf]  ;;  %13652 = vst [vmem:[#allocation45_spill] sm:$0xff] %v12303_v46  ;;  %1778 = vst [vmem:[#allocation2 + $0x6a4] sm:$0xf] %v1777_v13  ;;  %v3106_v37 = vrot.slane %v3104_v62, 4  ;;  %v2361_v29 = vsel %vm11592_vm6, %v2353_v48, %v2360_v11  ;;  %v12309_v11 = vpop.f32.mrf.mxu1 }
 0x1dc   :  { %v3109_v32 = vrot.slane %v3107_v25, 5  ;;  %v1479_v42 = vshrl.u32 %v1041_v50, 16  ;;  %v1482_v45 = vshll.u32 %v1041_v50, 16  ;;  %v3115_v16 = vrot.slane %v3113_v4, 5  ;;  %v1962_v0 = vld [vmem:[#allocation3 + $0xc0] sm:$0xf] }
 0x1dd   :  { %v3119_v19 = vrot.slane %v3117_v20, 4  ;;  %v1488_v35 = vshll.u32 %v1042_v2, 16  ;;  %v11168_v56 = vld [vmem:[#allocation2 + $0x178] ss:$36 sps:$4 sm:$0xff]   ;;  %2649 = vst [vmem:[#allocation2 + $0x6a8] sm:$0xf] %v2361_v29 }
 0x1de   :  { %v11170_v38 = vld [vmem:[#allocation2 + $0x17c] ss:$36 sps:$4 sm:$0xff]   ;;  %v3110_v14 = vor.u32 %v3109_v32, %v3106_v37  ;;  %v3671_v54 = vld [vmem:[#allocation2 + $0x230] sm:$0xf]  ;;  %v1481_v60 = vrot.slane %v1479_v42, 4  ;;  %v1484_v62 = vrot.slane %v1482_v45, 5 }
 0x1df   :  { %v3788_v49 = vld [vmem:[#allocation2 + $0x1e8] sm:$0x8]  ;;  %v3120_v13 = vor.u32 %v3119_v19, %v3115_v16  ;;  %v1490_v25 = vrot.slane %v1488_v35, 5  ;;  %8740 = vmatprep.mubr.bf16.mxu0 %v11170_v38  ;;  %v11171_v50 = vld [vmem:[#allocation2 + $0x638] ss:$36 sps:$4 sm:$0xff]   ;;  %v1492_v37 = vshrl.u32 %v1042_v2, 16  ;;  %v8463_v38 = vpop.f32.mrf.mxu1 }
 0x1e0   :  { %v11173_v46 = vld [vmem:[#allocation2 + $0x63c] ss:$36 sps:$4 sm:$0xff]   ;;  %v3789_v48 = vsel %vm11727_vm10, 0, %v3788_v49  ;;  %8741 = vmatmul.mubr.bf16.gmra.mxu0 %v11168_v56  ;;  %v3111_v4 = vrot.slane %v3110_v14, 4  ;;  %v1485_v29 = vor.u32 %v1484_v62, %v1481_v60  ;;  %v1963_v32 = vld [vmem:[#allocation3 + $0xc4] sm:$0xf] }
 0x1e1   :  { %3790 = vst [vmem:[#allocation2 + $0x1e8] sm:$0x8] %v3789_v48  ;;  %v3121_v20 = vrot.slane %v3120_v13, 4  ;;  %8587 = vmatprep.mubr.bf16.mxu1 %v11173_v46  ;;  %v2751_v42 = vld [vmem:[#allocation2 + $0x684] sm:$0x1]  ;;  %v2363_v19 = vshrl.u32 %v1962_v0, 16  ;;  %v12319_v48 = vpop.f32.mrf.mxu1 }
 0x1e2   :  { %v2366_v45 = vshll.u32 %v1962_v0, 16  ;;  %v2371_v35 = vshrl.u32 %v1963_v32, 16  ;;  %v2374_v12 = vshll.u32 %v1963_v32, 16  ;;  %8588 = vmatmul.mubr.bf16.gmra.mxu1 %v11171_v50  ;;  %v1887_v52 = vld [vmem:[#allocation2 + $0x6a4] sm:$0x8]  ;;  %v2752_v49 = vsel %vm11580_vm2, 0, %v2751_v42 }
 0x1e3   :  { %v3116_v56 = vsel %vm11765_vm13, %v3111_v4, %v3115_v16  ;;  %v3672_v14 = vsel %vm11771_vm14, %v3121_v20, %v3671_v54  ;;  %v1486_v2 = vrot.slane %v1485_v29, 4  ;;  %v2650_v60 = vld [vmem:[#allocation2 + $0x6cc] sm:$0xf]  ;;  %v1888_v46 = vsel %vm11727_vm10, 0, %v1887_v52  ;;  %2753 = vst [vmem:[#allocation2 + $0x684] sm:$0x1] %v2752_v49  ;;  %v12323_v29 = vpop.f32.mrf.mxu0 }
 0x1e4   :  { %3670 = vst [vmem:[#allocation2 + $0x20c] sm:$0xf] %v3116_v56  ;;  %3673 = vst [vmem:[#allocation2 + $0x230] sm:$0xf] %v3672_v14  ;;  %v1494_v0 = vrot.slane %v1492_v37, 4  ;;  %v2365_v13 = vrot.slane %v2363_v19, 7 }
 0x1e5   :  { %v2373_v62 = vrot.slane %v2371_v35, 7  ;;  %v2794_v50 = vld [vmem:[#allocation3 + $0x40] sm:$0xf]  ;;  %1889 = vst [vmem:[#allocation2 + $0x6a4] sm:$0x8] %v1888_v46  ;;  %v1491_v16 = vsel %vm11765_vm13, %v1486_v2, %v1490_v25  ;;  %13653 = vst [vmem:[#allocation46_spill] sm:$0xff] %v12323_v29  ;;  %v8466_v35 = vpop.f32.mrf.mxu1  ;;  %v8246_v46 = vpop.f32.mrf.mxu0 }
 0x1e6   :  { %v2795_v4 = vld [vmem:[#allocation3 + $0x44] sm:$0xf]  ;;  %2858 = vst [vmem:[#allocation2 + $0x250] sm:$0xf] %v2794_v50  ;;  %v2922_v54 = vld [vmem:[#allocation3 + $0x40] sm:$0xf]  ;;  %v1495_v52 = vor.u32 %v1494_v0, %v1490_v25  ;;  %v2368_v42 = vor.u32 %v2366_v45, %v2365_v13 }
 0x1e7   :  { %v2923_v20 = vld [vmem:[#allocation3 + $0x44] sm:$0xf]  ;;  %1779 = vst [vmem:[#allocation2 + $0x6c8] sm:$0xf] %v1491_v16  ;;  %v1780_v32 = vld [vmem:[#allocation2 + $0x6ec] sm:$0xf]  ;;  %v2376_v19 = vor.u32 %v2374_v12, %v2373_v62  ;;  %v12329_v62 = vpop.f32.mrf.mxu0  ;;  %v12335_v46 = vpop.f32.mrf.mxu1 }
 0x1e8   :  { %v2369_v37 = vrot.slane %v2365_v13, 4  ;;  %2859 = vst [vmem:[#allocation2 + $0x274] sm:$0xf] %v2795_v4  ;;  %v3123_v38 = vshrl.u32 %v2922_v54, 16  ;;  %v3126_v49 = vshll.u32 %v2922_v54, 16  ;;  %v3132_v56 = vshll.u32 %v2923_v20, 16 }
 0x1e9   :  { %v3136_v14 = vshrl.u32 %v2923_v20, 16  ;;  %v11174_v2 = vld [vmem:[#allocation2 + $0x1c0] ss:$36 sps:$4 sm:$0xff]   ;;  %v1496_v50 = vrot.slane %v1495_v52, 4  ;;  %v2651_v25 = vsel %vm11598_vm7, %v2368_v42, %v2650_v60  ;;  %13654 = vst [vmem:[#allocation47_spill] sm:$0xff] %v12329_v62  ;;  %13655 = vst [vmem:[#allocation48_spill] sm:$0xff] %v12335_v46 }
 0x1ea   :  { %v11176_v59 = vld [vmem:[#allocation2 + $0x1c4] ss:$36 sps:$4 sm:$0xff]   ;;  %v2377_v47 = vsel %vm11592_vm6, %v2369_v37, %v2376_v19  ;;  %2652 = vst [vmem:[#allocation2 + $0x6cc] sm:$0xf] %v2651_v25  ;;  %v3125_v45 = vrot.slane %v3123_v38, 4  ;;  %v3128_v12 = vrot.slane %v3126_v49, 5  ;;  %v8249_v19 = vpop.f32.mrf.mxu0 }
 0x1eb   :  { %2653 = vst [vmem:[#allocation2 + $0x6f0] sm:$0xf] %v2377_v47  ;;  %v3134_v0 = vrot.slane %v3132_v56, 5  ;;  %v3138_v13 = vrot.slane %v3136_v14, 4  ;;  %8748 = vmatprep.mubr.bf16.mxu0 %v11176_v59  ;;  %v1781_v16 = vsel %vm11771_vm14, %v1496_v50, %v1780_v32  ;;  %v3675_v4 = vld [vmem:[#allocation2 + $0x278] sm:$0xf] }
 0x1ec   :  { %v1043_v54 = vld [vmem:[#allocation3 + $0xc0] sm:$0xf]  ;;  %v1044_v20 = vld [vmem:[#allocation3 + $0xc4] sm:$0xf]  ;;  %8749 = vmatmul.mubr.bf16.gmra.mxu0 %v11174_v2  ;;  %v3791_v52 = vld [vmem:[#allocation2 + $0x230] sm:$0x8]  ;;  %v3129_v37 = vor.u32 %v3128_v12, %v3125_v45  ;;  %v12337_v2 = vpop.f32.mrf.mxu0 }
 0x1ed   :  { %1782 = vst [vmem:[#allocation2 + $0x6ec] sm:$0xf] %v1781_v16  ;;  %v3139_v60 = vor.u32 %v3138_v13, %v3134_v0  ;;  %v1498_v42 = vshrl.u32 %v1043_v54, 16  ;;  %v1501_v47 = vshll.u32 %v1043_v54, 16  ;;  %v11178_v35 = vld [vmem:[#allocation2 + $0x680] ss:$36 sps:$4 sm:$0xff]  }
 0x1ee   :  { %v11180_v38 = vld [vmem:[#allocation2 + $0x684] ss:$36 sps:$4 sm:$0xff]   ;;  %v3792_v49 = vsel %vm11727_vm10, 0, %v3791_v52  ;;  %v3130_v59 = vrot.slane %v3129_v37, 4  ;;  %13656 = vst [vmem:[#allocation49_spill] sm:$0xff] %v12337_v2  ;;  %v1507_v50 = vshll.u32 %v1044_v20, 16 }
 0x1ef   :  { %3793 = vst [vmem:[#allocation2 + $0x230] sm:$0x8] %v3792_v49  ;;  %v3140_v56 = vrot.slane %v3139_v60, 4  ;;  %v1500_v32 = vrot.slane %v1498_v42, 4  ;;  %v1503_v14 = vrot.slane %v1501_v47, 5  ;;  %8595 = vmatprep.mubr.bf16.mxu1 %v11180_v38  ;;  %v1511_v25 = vshrl.u32 %v1044_v20, 16  ;;  %v8471_v60 = vpop.f32.mrf.mxu1  ;;  %v8254_v47 = vpop.f32.mrf.mxu0 }
 0x1f0   :  { %v1964_v45 = vld [vmem:[#allocation3 + $0xc8] sm:$0xf]  ;;  %v1965_v12 = vld [vmem:[#allocation3 + $0xcc] sm:$0xf]  ;;  %8596 = vmatmul.mubr.bf16.gmra.mxu1 %v11178_v35  ;;  %v3135_v13 = vsel %vm11765_vm13, %v3130_v59, %v3134_v0  ;;  %v11244_v42 = vld [vmem:[#allocation6 + $0x218] sm:$0xff]   ;;  %v1509_v38 = vrot.slane %v1507_v50, 5 }
 0x1f1   :  { %v3676_v16 = vsel %vm11771_vm14, %v3140_v56, %v3675_v4  ;;  %v1504_v54 = vor.u32 %v1503_v14, %v1500_v32  ;;  %v2379_v52 = vshrl.u32 %v1964_v45, 16  ;;  %v2796_v37 = vld [vmem:[#allocation3 + $0x48] sm:$0xf]  ;;  %v2754_v19 = vld [vmem:[#allocation2 + $0x6cc] sm:$0x1]  ;;  %v1513_v20 = vrot.slane %v1511_v25, 4  ;;  %v12345_v14 = vpop.f32.mrf.mxu1  ;;  %10819 = vmatprep.subr.bf16.mxu0 %v11244_v42  ;;  %v12347_v60 = vpop.f32.mrf.mxu0 }
 0x1f2   :  { %3674 = vst [vmem:[#allocation2 + $0x254] sm:$0xf] %v3135_v13  ;;  %3677 = vst [vmem:[#allocation2 + $0x278] sm:$0xf] %v3676_v16  ;;  %v2382_v49 = vshll.u32 %v1964_v45, 16  ;;  %v2387_v2 = vshrl.u32 %v1965_v12, 16  ;;  %10820 = vmatpush3.bf16.msra.mxu0 %v11244_v42 }
 0x1f3   :  { %v2654_v35 = vld [vmem:[#allocation2 + $0x714] sm:$0xf]  ;;  %2860 = vst [vmem:[#allocation2 + $0x298] sm:$0xf] %v2796_v37  ;;  %v2755_v0 = vsel %vm11580_vm2, 0, %v2754_v19  ;;  %v1505_v59 = vrot.slane %v1504_v54, 4  ;;  %v1514_v50 = vor.u32 %v1513_v20, %v1509_v38  ;;  %v8474_v19 = vpop.f32.mrf.mxu1  ;;  %v8257_v62 = vpop.f32.mrf.mxu0 }
 0x1f4   :  { %v2381_v4 = vrot.slane %v2379_v52, 7  ;;  %v2390_v56 = vshll.u32 %v1965_v12, 16  ;;  %v2797_v32 = vld [vmem:[#allocation3 + $0x4c] sm:$0xf]  ;;  %13657 = vst [vmem:[#allocation50_spill] sm:$0xff] %v12345_v14  ;;  %13658 = vst [vmem:[#allocation51_spill] sm:$0xff] %v12347_v60 }
 0x1f5   :  { %v1890_v13 = vld [vmem:[#allocation2 + $0x6ec] sm:$0x8]  ;;  %2756 = vst [vmem:[#allocation2 + $0x6cc] sm:$0x1] %v2755_v0  ;;  %v2389_v25 = vrot.slane %v2387_v2, 7  ;;  %v1510_v54 = vsel %vm11765_vm13, %v1505_v59, %v1509_v38  ;;  %v1515_v20 = vrot.slane %v1514_v50, 4  ;;  %v12355_v38 = vpop.f32.mrf.mxu1 }
 0x1f6   :  { %2861 = vst [vmem:[#allocation2 + $0x2bc] sm:$0xf] %v2797_v32  ;;  %v2924_v45 = vld [vmem:[#allocation3 + $0x48] sm:$0xf]  ;;  %v1891_v16 = vsel %vm11727_vm10, 0, %v1890_v13  ;;  %v2384_v52 = vor.u32 %v2382_v49, %v2381_v4  ;;  %v2385_v37 = vrot.slane %v2381_v4, 4 }
 0x1f7   :  { %v1784_v12 = vld [vmem:[#allocation2 + $0x734] sm:$0xf]  ;;  %v2925_v47 = vld [vmem:[#allocation3 + $0x4c] sm:$0xf]  ;;  %1892 = vst [vmem:[#allocation2 + $0x6ec] sm:$0x8] %v1891_v16  ;;  %v2392_v2 = vor.u32 %v2390_v56, %v2389_v25  ;;  %v8479_v16 = vpop.f32.mrf.mxu1 }
 0x1f8   :  { %v11181_v60 = vld [vmem:[#allocation2 + $0x208] ss:$36 sps:$4 sm:$0xff]   ;;  %1783 = vst [vmem:[#allocation2 + $0x710] sm:$0xf] %v1510_v54  ;;  %v2655_v42 = vsel %vm11598_vm7, %v2384_v52, %v2654_v35  ;;  %v3142_v0 = vshrl.u32 %v2924_v45, 16  ;;  %v3145_v32 = vshll.u32 %v2924_v45, 16  ;;  %v1785_v49 = vsel %vm11771_vm14, %v1515_v20, %v1784_v12 }
 0x1f9   :  { %v11183_v29 = vld [vmem:[#allocation2 + $0x20c] ss:$36 sps:$4 sm:$0xff]   ;;  %v3151_v13 = vshll.u32 %v2925_v47, 16  ;;  %v1045_v9 = vld [vmem:[#allocation3 + $0xc8] sm:$0xf]  ;;  %13659 = vst [vmem:[#allocation52_spill] sm:$0xff] %v12355_v38  ;;  %v2393_v62 = vsel %vm11592_vm6, %v2385_v37, %v2392_v2 }
 0x1fa   :  { %8756 = vmatprep.mubr.bf16.mxu0 %v11183_v29  ;;  %2656 = vst [vmem:[#allocation2 + $0x714] sm:$0xf] %v2655_v42  ;;  %v3155_v59 = vshrl.u32 %v2925_v47, 16  ;;  %v1046_v4 = vld [vmem:[#allocation3 + $0xcc] sm:$0xf]  ;;  %v1517_v56 = vshrl.u32 %v1045_v9, 16  ;;  %v12363_v42 = vpop.f32.mrf.mxu1 }
 0x1fb   :  { %8757 = vmatmul.mubr.bf16.gmra.mxu0 %v11181_v60  ;;  %v3794_v50 = vld [vmem:[#allocation2 + $0x278] sm:$0x8]  ;;  %1786 = vst [vmem:[#allocation2 + $0x734] sm:$0xf] %v1785_v49  ;;  %2657 = vst [vmem:[#allocation2 + $0x738] sm:$0xf] %v2393_v62 }
 0x1fc   :  { %v3144_v35 = vrot.slane %v3142_v0, 4  ;;  %v3147_v25 = vrot.slane %v3145_v32, 5  ;;  %v3153_v45 = vrot.slane %v3151_v13, 5  ;;  %v3795_v29 = vsel %vm11727_vm10, 0, %v3794_v50  ;;  %v1966_v19 = vld [vmem:[#allocation3 + $0xd0] sm:$0xf] }
 0x1fd   :  { %v3157_v54 = vrot.slane %v3155_v59, 4  ;;  %v1519_v12 = vrot.slane %v1517_v56, 4  ;;  %v1520_v52 = vshll.u32 %v1045_v9, 16  ;;  %3796 = vst [vmem:[#allocation2 + $0x278] sm:$0x8] %v3795_v29  ;;  %v1526_v47 = vshll.u32 %v1046_v4, 16  ;;  %v8482_v59 = vpop.f32.mrf.mxu1  ;;  %v12365_v56 = vpop.f32.mrf.mxu0 }
 0x1fe   :  { %v3148_v37 = vor.u32 %v3147_v25, %v3144_v35  ;;  %v1530_v20 = vshrl.u32 %v1046_v4, 16  ;;  %v1967_v2 = vld [vmem:[#allocation3 + $0xd4] sm:$0xf]  ;;  %v2395_v60 = vshrl.u32 %v1966_v19, 16  ;;  %13660 = vst [vmem:[#allocation53_spill] sm:$0xff] %v12363_v42  ;;  %v2398_v13 = vshll.u32 %v1966_v19, 16 }
 0x1ff   :  { %v3158_v49 = vor.u32 %v3157_v54, %v3153_v45  ;;  %v3679_v0 = vld [vmem:[#allocation2 + $0x2c0] sm:$0xf]  ;;  %v1522_v32 = vrot.slane %v1520_v52, 5  ;;  %v2403_v62 = vshrl.u32 %v1967_v2, 16  ;;  %v11184_v16 = vld [vmem:[#allocation2 + $0x6c8] ss:$36 sps:$4 sm:$0xff]  }
 0x200   :  { %v11186_v38 = vld [vmem:[#allocation2 + $0x6cc] ss:$36 sps:$4 sm:$0xff]   ;;  %v3149_v50 = vrot.slane %v3148_v37, 4  ;;  %13661 = vst [vmem:[#allocation54_spill] sm:$0xff] %v12365_v56  ;;  %v1528_v35 = vrot.slane %v1526_v47, 5  ;;  %v1532_v25 = vrot.slane %v1530_v20, 4  ;;  %v8262_v37 = vpop.f32.mrf.mxu0 }
 0x201   :  { %v3159_v9 = vrot.slane %v3158_v49, 4  ;;  %v1523_v29 = vor.u32 %v1522_v32, %v1519_v12  ;;  %v2658_v4 = vld [vmem:[#allocation2 + $0x75c] sm:$0xf]  ;;  %v2798_v57 = vld [vmem:[#allocation3 + $0x50] sm:$0xf]  ;;  %8603 = vmatprep.mubr.bf16.mxu1 %v11186_v38  ;;  %v2397_v19 = vrot.slane %v2395_v60, 7 }
 0x202   :  { %v2757_v14 = vld [vmem:[#allocation2 + $0x714] sm:$0x1]  ;;  %v3154_v54 = vsel %vm11765_vm13, %v3149_v50, %v3153_v45  ;;  %v1788_v52 = vld [vmem:[#allocation2 + $0x77c] sm:$0xf]  ;;  %v2405_v42 = vrot.slane %v2403_v62, 7  ;;  %v2406_v58 = vshll.u32 %v1967_v2, 16  ;;  %8604 = vmatmul.mubr.bf16.gmra.mxu1 %v11184_v16  ;;  %v1533_v20 = vor.u32 %v1532_v25, %v1528_v35  ;;  %v12375_v16 = vpop.f32.mrf.mxu0 }
 0x203   :  { %2862 = vst [vmem:[#allocation2 + $0x2e0] sm:$0xf] %v2798_v57  ;;  %v1893_v59 = vld [vmem:[#allocation2 + $0x734] sm:$0x8]  ;;  %v2758_v12 = vsel %vm11580_vm2, 0, %v2757_v14  ;;  %v3680_v47 = vsel %vm11771_vm14, %v3159_v9, %v3679_v0  ;;  %v1524_v38 = vrot.slane %v1523_v29, 4  ;;  %v2400_v2 = vor.u32 %v2398_v13, %v2397_v19 }
 0x204   :  { %3678 = vst [vmem:[#allocation2 + $0x29c] sm:$0xf] %v3154_v54  ;;  %v2799_v49 = vld [vmem:[#allocation3 + $0x54] sm:$0xf]  ;;  %v1894_v45 = vsel %vm11727_vm10, 0, %v1893_v59  ;;  %v2401_v57 = vrot.slane %v2397_v19, 4  ;;  %v2408_v60 = vor.u32 %v2406_v58, %v2405_v42  ;;  %v8265_v25 = vpop.f32.mrf.mxu0 }
 0x205   :  { %2759 = vst [vmem:[#allocation2 + $0x714] sm:$0x1] %v2758_v12  ;;  %3681 = vst [vmem:[#allocation2 + $0x2c0] sm:$0xf] %v3680_v47  ;;  %v2926_v32 = vld [vmem:[#allocation3 + $0x50] sm:$0xf]  ;;  %v1529_v0 = vsel %vm11765_vm13, %v1524_v38, %v1528_v35  ;;  %v2659_v13 = vsel %vm11598_vm7, %v2400_v2, %v2658_v4  ;;  %v12385_v4 = vpop.f32.mrf.mxu1 }
 0x206   :  { %2863 = vst [vmem:[#allocation2 + $0x304] sm:$0xf] %v2799_v49  ;;  %v2927_v62 = vld [vmem:[#allocation3 + $0x54] sm:$0xf]  ;;  %13662 = vst [vmem:[#allocation55_spill] sm:$0xff] %v12375_v16  ;;  %v1534_v9 = vrot.slane %v1533_v20, 4  ;;  %v2409_v29 = vsel %vm11592_vm6, %v2401_v57, %v2408_v60 }
 0x207   :  { %v11187_v14 = vld [vmem:[#allocation2 + $0x250] ss:$36 sps:$4 sm:$0xff]   ;;  %1895 = vst [vmem:[#allocation2 + $0x734] sm:$0x8] %v1894_v45  ;;  %1787 = vst [vmem:[#allocation2 + $0x758] sm:$0xf] %v1529_v0 }
 0x208   :  { %v11189_v50 = vld [vmem:[#allocation2 + $0x254] ss:$36 sps:$4 sm:$0xff]   ;;  %v3161_v58 = vshrl.u32 %v2926_v32, 16  ;;  %v3164_v42 = vshll.u32 %v2926_v32, 16  ;;  %v1789_v54 = vsel %vm11771_vm14, %v1534_v9, %v1788_v52  ;;  %2660 = vst [vmem:[#allocation2 + $0x75c] sm:$0xf] %v2659_v13 }
 0x209   :  { %8764 = vmatprep.mubr.bf16.mxu0 %v11189_v50  ;;  %2661 = vst [vmem:[#allocation2 + $0x780] sm:$0xf] %v2409_v29  ;;  %v3170_v19 = vshll.u32 %v2927_v62, 16  ;;  %v3174_v37 = vshrl.u32 %v2927_v62, 16  ;;  %v1047_v35 = vld [vmem:[#allocation3 + $0xd0] sm:$0xf]  ;;  %v8487_v62 = vpop.f32.mrf.mxu1 }
 0x20a   :  { %8765 = vmatmul.mubr.bf16.gmra.mxu0 %v11187_v14  ;;  %1790 = vst [vmem:[#allocation2 + $0x77c] sm:$0xf] %v1789_v54  ;;  %v3163_v59 = vrot.slane %v3161_v58, 4  ;;  %v3166_v12 = vrot.slane %v3164_v42, 5  ;;  %v1048_v47 = vld [vmem:[#allocation3 + $0xd4] sm:$0xf] }
 0x20b   :  { %v1536_v38 = vshrl.u32 %v1047_v35, 16  ;;  %v1539_v20 = vshll.u32 %v1047_v35, 16  ;;  %13663 = vst [vmem:[#allocation56_spill] sm:$0xff] %v12385_v4  ;;  %v3172_v49 = vrot.slane %v3170_v19, 5  ;;  %v3176_v45 = vrot.slane %v3174_v37, 4  ;;  %v12389_v35 = vpop.f32.mrf.mxu1 }
 0x20c   :  { %v1545_v2 = vshll.u32 %v1048_v47, 16  ;;  %v1549_v57 = vshrl.u32 %v1048_v47, 16  ;;  %v3167_v60 = vor.u32 %v3166_v12, %v3163_v59  ;;  %v3683_v52 = vld [vmem:[#allocation2 + $0x308] sm:$0xf]  ;;  %v1968_v0 = vld [vmem:[#allocation3 + $0xd8] sm:$0xf]  ;;  %v12391_v59 = vpop.f32.mrf.mxu0 }
 0x20d   :  { %v1538_v32 = vrot.slane %v1536_v38, 4  ;;  %v1541_v50 = vrot.slane %v1539_v20, 5  ;;  %v3797_v9 = vld [vmem:[#allocation2 + $0x2c0] sm:$0x8]  ;;  %v3177_v14 = vor.u32 %v3176_v45, %v3172_v49  ;;  %v2411_v58 = vshrl.u32 %v1968_v0, 16  ;;  %13664 = vst [vmem:[#allocation57_spill] sm:$0xff] %v12389_v35  ;;  %v8490_v4 = vpop.f32.mrf.mxu1 }
 0x20e   :  { %v1547_v29 = vrot.slane %v1545_v2, 5  ;;  %v1551_v13 = vrot.slane %v1549_v57, 4  ;;  %v11192_v42 = vld [vmem:[#allocation2 + $0x710] ss:$36 sps:$4 sm:$0xff]   ;;  %v3798_v54 = vsel %vm11727_vm10, 0, %v3797_v9  ;;  %13665 = vst [vmem:[#allocation58_spill] sm:$0xff] %v12391_v59  ;;  %v8270_v9 = vpop.f32.mrf.mxu0 }
 0x20f   :  { %v11194_v25 = vld [vmem:[#allocation2 + $0x714] ss:$36 sps:$4 sm:$0xff]   ;;  %v1542_v19 = vor.u32 %v1541_v50, %v1538_v32  ;;  %v1792_v37 = vld [vmem:[#allocation2 + $0x7c4] sm:$0xf]  ;;  %3799 = vst [vmem:[#allocation2 + $0x2c0] sm:$0x8] %v3798_v54 }
 0x210   :  { %v3168_v12 = vrot.slane %v3167_v60, 4  ;;  %v3178_v47 = vrot.slane %v3177_v14, 4  ;;  %v1552_v38 = vor.u32 %v1551_v13, %v1547_v29  ;;  %v1969_v20 = vld [vmem:[#allocation3 + $0xdc] sm:$0xf]  ;;  %v2413_v45 = vrot.slane %v2411_v58, 7  ;;  %8611 = vmatprep.mubr.bf16.mxu1 %v11194_v25 }
 0x211   :  { %v2760_v2 = vld [vmem:[#allocation2 + $0x75c] sm:$0x1]  ;;  %v1543_v57 = vrot.slane %v1542_v19, 4  ;;  %v2414_v62 = vshll.u32 %v1968_v0, 16  ;;  %v2419_v16 = vshrl.u32 %v1969_v20, 16  ;;  %v2422_v56 = vshll.u32 %v1969_v20, 16  ;;  %8612 = vmatmul.mubr.bf16.gmra.mxu1 %v11192_v42  ;;  %v12403_v20 = vpop.f32.mrf.mxu0 }
 0x212   :  { %v1896_v32 = vld [vmem:[#allocation2 + $0x77c] sm:$0x8]  ;;  %v2761_v50 = vsel %vm11580_vm2, 0, %v2760_v2  ;;  %v3173_v60 = vsel %vm11765_vm13, %v3168_v12, %v3172_v49  ;;  %v3684_v14 = vsel %vm11771_vm14, %v3178_v47, %v3683_v52  ;;  %v1553_v13 = vrot.slane %v1552_v38, 4  ;;  %v2662_v58 = vld [vmem:[#allocation2 + $0x7a4] sm:$0xf] }
 0x213   :  { %v1897_v0 = vsel %vm11727_vm10, 0, %v1896_v32  ;;  %2762 = vst [vmem:[#allocation2 + $0x75c] sm:$0x1] %v2761_v50  ;;  %3682 = vst [vmem:[#allocation2 + $0x2e4] sm:$0xf] %v3173_v60  ;;  %v1548_v4 = vsel %vm11765_vm13, %v1543_v57, %v1547_v29  ;;  %v2416_v42 = vor.u32 %v2414_v62, %v2413_v45  ;;  %v2417_v25 = vrot.slane %v2413_v45, 4  ;;  %v8273_v62 = vpop.f32.mrf.mxu0 }
 0x214   :  { %3685 = vst [vmem:[#allocation2 + $0x308] sm:$0xf] %v3684_v14  ;;  %v2800_v54 = vld [vmem:[#allocation3 + $0x58] sm:$0xf]  ;;  %v2801_v19 = vld [vmem:[#allocation3 + $0x5c] sm:$0xf]  ;;  %v1793_v49 = vsel %vm11771_vm14, %v1553_v13, %v1792_v37  ;;  %v12409_v13 = vpop.f32.mrf.mxu1 }
 0x215   :  { %13666 = vst [vmem:[#allocation59_spill] sm:$0xff] %v12403_v20  ;;  %1898 = vst [vmem:[#allocation2 + $0x77c] sm:$0x8] %v1897_v0  ;;  %v2421_v52 = vrot.slane %v2419_v16, 7  ;;  %v2928_v12 = vld [vmem:[#allocation3 + $0x58] sm:$0xf]  ;;  %v2663_v29 = vsel %vm11598_vm7, %v2416_v42, %v2662_v58 }
 0x216   :  { %1791 = vst [vmem:[#allocation2 + $0x7a0] sm:$0xf] %v1548_v4  ;;  %2864 = vst [vmem:[#allocation2 + $0x328] sm:$0xf] %v2800_v54  ;;  %v2929_v47 = vld [vmem:[#allocation3 + $0x5c] sm:$0xf] }
 0x217   :  { %2865 = vst [vmem:[#allocation2 + $0x34c] sm:$0xf] %v2801_v19  ;;  %v11269_v38 = vld [vmem:[#allocation6 + $0x210] sm:$0xff]   ;;  %1794 = vst [vmem:[#allocation2 + $0x7c4] sm:$0xf] %v1793_v49  ;;  %v3180_v45 = vshrl.u32 %v2928_v12, 16  ;;  %v2424_v9 = vor.u32 %v2422_v56, %v2421_v52 }
 0x218   :  { %v3183_v2 = vshll.u32 %v2928_v12, 16  ;;  %v3189_v57 = vshll.u32 %v2929_v47, 16  ;;  %2664 = vst [vmem:[#allocation2 + $0x7a4] sm:$0xf] %v2663_v29  ;;  %v3193_v32 = vshrl.u32 %v2929_v47, 16  ;;  %10821 = vmatprep.subr.bf16.mxu0 %v11269_v38  ;;  %13667 = vst [vmem:[#allocation60_spill] sm:$0xff] %v12409_v13  ;;  %v8495_v47 = vpop.f32.mrf.mxu1 }
 0x219   :  { %v1049_v50 = vld [vmem:[#allocation3 + $0xd8] sm:$0xf]  ;;  %v1050_v60 = vld [vmem:[#allocation3 + $0xdc] sm:$0xf]  ;;  %v3182_v14 = vrot.slane %v3180_v45, 4  ;;  %10822 = vmatpush3.bf16.msra.mxu0 %v11269_v38  ;;  %v2425_v0 = vsel %vm11592_vm6, %v2417_v25, %v2424_v9  ;;  %v12419_v47 = vpop.f32.mrf.mxu0 }
 0x21a   :  { %v11195_v16 = vld [vmem:[#allocation2 + $0x298] ss:$36 sps:$4 sm:$0xff]   ;;  %v3185_v58 = vrot.slane %v3183_v2, 5  ;;  %v3191_v4 = vrot.slane %v3189_v57, 5  ;;  %v3195_v42 = vrot.slane %v3193_v32, 4  ;;  %v1555_v54 = vshrl.u32 %v1049_v50, 16  ;;  %v12415_v57 = vpop.f32.mrf.mxu1 }
 0x21b   :  { %v11197_v37 = vld [vmem:[#allocation2 + $0x29c] ss:$36 sps:$4 sm:$0xff]   ;;  %2665 = vst [vmem:[#allocation2 + $0x7c8] sm:$0xf] %v2425_v0  ;;  %v3687_v56 = vld [vmem:[#allocation2 + $0x350] sm:$0xf] }
 0x21c   :  { %8772 = vmatprep.mubr.bf16.mxu0 %v11197_v37  ;;  %v1558_v19 = vshll.u32 %v1049_v50, 16  ;;  %v1564_v49 = vshll.u32 %v1050_v60, 16  ;;  %v1568_v52 = vshrl.u32 %v1050_v60, 16  ;;  %v1970_v12 = vld [vmem:[#allocation3 + $0xe0] sm:$0xf]  ;;  %v3186_v45 = vor.u32 %v3185_v58, %v3182_v14  ;;  %13668 = vst [vmem:[#allocation61_spill] sm:$0xff] %v12415_v57 }
 0x21d   :  { %8773 = vmatmul.mubr.bf16.gmra.mxu0 %v11195_v16  ;;  %v3800_v29 = vld [vmem:[#allocation2 + $0x308] sm:$0x8]  ;;  %v3196_v62 = vor.u32 %v3195_v42, %v3191_v4  ;;  %v2427_v38 = vshrl.u32 %v1970_v12, 16  ;;  %v2430_v20 = vshll.u32 %v1970_v12, 16  ;;  %v11198_v59 = vld [vmem:[#allocation2 + $0x758] ss:$36 sps:$4 sm:$0xff]   ;;  %v8498_v12 = vpop.f32.mrf.mxu1 }
 0x21e   :  { %v11200_v25 = vld [vmem:[#allocation2 + $0x75c] ss:$36 sps:$4 sm:$0xff]   ;;  %v3801_v2 = vsel %vm11727_vm10, 0, %v3800_v29  ;;  %v1899_v9 = vld [vmem:[#allocation2 + $0x7c4] sm:$0x8]  ;;  %v3187_v32 = vrot.slane %v3186_v45, 4 }
 0x21f   :  { %3802 = vst [vmem:[#allocation2 + $0x308] sm:$0x8] %v3801_v2  ;;  %v3197_v50 = vrot.slane %v3196_v62, 4  ;;  %v1557_v60 = vrot.slane %v1555_v54, 4  ;;  %v1560_v37 = vrot.slane %v1558_v19, 5  ;;  %8619 = vmatprep.mubr.bf16.mxu1 %v11200_v25  ;;  %v1900_v16 = vsel %vm11727_vm10, 0, %v1899_v9 }
 0x220   :  { %v2763_v14 = vld [vmem:[#allocation2 + $0x7a4] sm:$0x1]  ;;  %v1566_v0 = vrot.slane %v1564_v49, 5  ;;  %v1570_v58 = vrot.slane %v1568_v52, 4  ;;  %v2429_v42 = vrot.slane %v2427_v38, 7  ;;  %13669 = vst [vmem:[#allocation62_spill] sm:$0xff] %v12419_v47  ;;  %8620 = vmatmul.mubr.bf16.gmra.mxu1 %v11198_v59  ;;  %v3192_v54 = vsel %vm11765_vm13, %v3187_v32, %v3191_v4 }
 0x221   :  { %1901 = vst [vmem:[#allocation2 + $0x7c4] sm:$0x8] %v1900_v16  ;;  %v2764_v29 = vsel %vm11580_vm2, 0, %v2763_v14  ;;  %v3688_v19 = vsel %vm11771_vm14, %v3197_v50, %v3687_v56  ;;  %v1561_v45 = vor.u32 %v1560_v37, %v1557_v60  ;;  %v1796_v62 = vld [vmem:[#allocation2 + $0x80c] sm:$0xf]  ;;  %v8278_v14 = vpop.f32.mrf.mxu0 }
 0x222   :  { %v1971_v25 = vld [vmem:[#allocation3 + $0xe4] sm:$0xf]  ;;  %v2666_v49 = vld [vmem:[#allocation2 + $0x7ec] sm:$0xf]  ;;  %2765 = vst [vmem:[#allocation2 + $0x7a4] sm:$0x1] %v2764_v29  ;;  %v1571_v52 = vor.u32 %v1570_v58, %v1566_v0  ;;  %v2432_v38 = vor.u32 %v2430_v20, %v2429_v42 }
 0x223   :  { %3686 = vst [vmem:[#allocation2 + $0x32c] sm:$0xf] %v3192_v54  ;;  %3689 = vst [vmem:[#allocation2 + $0x350] sm:$0xf] %v3688_v19  ;;  %v2433_v59 = vrot.slane %v2429_v42, 4  ;;  %v2435_v2 = vshrl.u32 %v1971_v25, 16  ;;  %v12429_v29 = vpop.f32.mrf.mxu0 }
 0x224   :  { %v2802_v9 = vld [vmem:[#allocation3 + $0x60] sm:$0xf]  ;;  %v2803_v16 = vld [vmem:[#allocation3 + $0x64] sm:$0xf]  ;;  %v1562_v12 = vrot.slane %v1561_v45, 4  ;;  %v2438_v47 = vshll.u32 %v1971_v25, 16  ;;  %v2667_v60 = vsel %vm11598_vm7, %v2432_v38, %v2666_v49 }
 0x225   :  { %2866 = vst [vmem:[#allocation2 + $0x370] sm:$0xf] %v2802_v9  ;;  %2867 = vst [vmem:[#allocation2 + $0x394] sm:$0xf] %v2803_v16  ;;  %v2930_v4 = vld [vmem:[#allocation3 + $0x60] sm:$0xf]  ;;  %v8281_v9 = vpop.f32.mrf.mxu0 }
 0x226   :  { %v2931_v56 = vld [vmem:[#allocation3 + $0x64] sm:$0xf]  ;;  %v1572_v32 = vrot.slane %v1571_v52, 4  ;;  %v2437_v50 = vrot.slane %v2435_v2, 7  ;;  %v3199_v37 = vshrl.u32 %v2930_v4, 16  ;;  %13670 = vst [vmem:[#allocation63_spill] sm:$0xff] %v12429_v29  ;;  %v1567_v20 = vsel %vm11765_vm13, %v1562_v12, %v1566_v0  ;;  %v12437_v12 = vpop.f32.mrf.mxu1 }
 0x227   :  { %2668 = vst [vmem:[#allocation2 + $0x7ec] sm:$0xf] %v2667_v60  ;;  %v3202_v58 = vshll.u32 %v2930_v4, 16  ;;  %v3208_v42 = vshll.u32 %v2931_v56, 16  ;;  %v3212_v54 = vshrl.u32 %v2931_v56, 16  ;;  %13671 = vst [vmem:[#allocation64_spill] sm:$0xff] %v12437_v12 }
 0x228   :  { %v11201_v19 = vld [vmem:[#allocation2 + $0x2e0] ss:$36 sps:$4 sm:$0xff]   ;;  %1795 = vst [vmem:[#allocation2 + $0x7e8] sm:$0xf] %v1567_v20  ;;  %v1797_v25 = vsel %vm11771_vm14, %v1572_v32, %v1796_v62  ;;  %v2440_v52 = vor.u32 %v2438_v47, %v2437_v50  ;;  %v3201_v2 = vrot.slane %v3199_v37, 4  ;;  %v8503_v50 = vpop.f32.mrf.mxu1 }
 0x229   :  { %v11203_v45 = vld [vmem:[#allocation2 + $0x2e4] ss:$36 sps:$4 sm:$0xff]   ;;  %1798 = vst [vmem:[#allocation2 + $0x80c] sm:$0xf] %v1797_v25  ;;  %v3204_v49 = vrot.slane %v3202_v58, 5  ;;  %v3210_v38 = vrot.slane %v3208_v42, 5 }
 0x22a   :  { %v3214_v16 = vrot.slane %v3212_v54, 4  ;;  %8780 = vmatprep.mubr.bf16.mxu0 %v11203_v45  ;;  %v2441_v0 = vsel %vm11592_vm6, %v2433_v59, %v2440_v52  ;;  %v3691_v14 = vld [vmem:[#allocation2 + $0x398] sm:$0xf]  ;;  %v11205_v4 = vld [vmem:[#allocation2 + $0x7a0] ss:$36 sps:$4 sm:$0xff]   ;;  %v12441_v52 = vpop.f32.mrf.mxu1 }
 0x22b   :  { %8781 = vmatmul.mubr.bf16.gmra.mxu0 %v11201_v19  ;;  %v11207_v56 = vld [vmem:[#allocation2 + $0x7a4] ss:$36 sps:$4 sm:$0xff]   ;;  %2669 = vst [vmem:[#allocation2 + $0x810] sm:$0xf] %v2441_v0  ;;  %v3205_v60 = vor.u32 %v3204_v49, %v3201_v2  ;;  %v3803_v47 = vld [vmem:[#allocation2 + $0x350] sm:$0x8] }
 0x22c   :  { %v3215_v62 = vor.u32 %v3214_v16, %v3210_v38  ;;  %v1051_v32 = vld [vmem:[#allocation3 + $0xe0] sm:$0xf]  ;;  %8627 = vmatprep.mubr.bf16.mxu1 %v11207_v56  ;;  %v3804_v37 = vsel %vm11727_vm10, 0, %v3803_v47  ;;  %v1052_v42 = vld [vmem:[#allocation3 + $0xe4] sm:$0xf]  ;;  %13672 = vst [vmem:[#allocation65_spill] sm:$0xff] %v12441_v52  ;;  %v12449_v56 = vpop.f32.mrf.mxu0  ;;  %v8506_v50 = vpop.f32.mrf.mxu1 }
 0x22d   :  { %v3206_v20 = vrot.slane %v3205_v60, 4  ;;  %v1574_v59 = vshrl.u32 %v1051_v32, 16  ;;  %3805 = vst [vmem:[#allocation2 + $0x350] sm:$0x8] %v3804_v37  ;;  %8628 = vmatmul.mubr.bf16.gmra.mxu1 %v11205_v4  ;;  %v1577_v19 = vshll.u32 %v1051_v32, 16  ;;  %v1583_v45 = vshll.u32 %v1052_v42, 16 }
 0x22e   :  { %v3216_v58 = vrot.slane %v3215_v62, 4  ;;  %v2766_v54 = vld [vmem:[#allocation2 + $0x7ec] sm:$0x1]  ;;  %v1587_v25 = vshrl.u32 %v1052_v42, 16  ;;  %v1972_v0 = vld [vmem:[#allocation3 + $0xe8] sm:$0xf] }
 0x22f   :  { %v2767_v2 = vsel %vm11580_vm2, 0, %v2766_v54  ;;  %v3211_v9 = vsel %vm11765_vm13, %v3206_v20, %v3210_v38  ;;  %v1576_v16 = vrot.slane %v1574_v59, 4  ;;  %13673 = vst [vmem:[#allocation66_spill] sm:$0xff] %v12449_v56  ;;  %v1579_v60 = vrot.slane %v1577_v19, 5  ;;  %v1800_v38 = vld [vmem:[#allocation2 + $0x854] sm:$0xf] }
 0x230   :  { %v3692_v49 = vsel %vm11771_vm14, %v3216_v58, %v3691_v14  ;;  %v1902_v4 = vld [vmem:[#allocation2 + $0x80c] sm:$0x8]  ;;  %2768 = vst [vmem:[#allocation2 + $0x7ec] sm:$0x1] %v2767_v2  ;;  %3690 = vst [vmem:[#allocation2 + $0x374] sm:$0xf] %v3211_v9  ;;  %v8286_v14 = vpop.f32.mrf.mxu0 }
 0x231   :  { %3693 = vst [vmem:[#allocation2 + $0x398] sm:$0xf] %v3692_v49  ;;  %v1585_v62 = vrot.slane %v1583_v45, 5  ;;  %v1589_v47 = vrot.slane %v1587_v25, 4  ;;  %v2443_v32 = vshrl.u32 %v1972_v0, 16  ;;  %v1903_v37 = vsel %vm11727_vm10, 0, %v1902_v4 }
 0x232   :  { %v1973_v20 = vld [vmem:[#allocation3 + $0xec] sm:$0xf]  ;;  %v2446_v42 = vshll.u32 %v1972_v0, 16  ;;  %1904 = vst [vmem:[#allocation2 + $0x80c] sm:$0x8] %v1903_v37  ;;  %v1580_v58 = vor.u32 %v1579_v60, %v1576_v16  ;;  %v12453_v25 = vpop.f32.mrf.mxu0 }
 0x233   :  { %v1590_v59 = vor.u32 %v1589_v47, %v1585_v62  ;;  %v2445_v54 = vrot.slane %v2443_v32, 7  ;;  %v2451_v56 = vshrl.u32 %v1973_v20, 16  ;;  %v2804_v2 = vld [vmem:[#allocation3 + $0x68] sm:$0xf]  ;;  %v2805_v9 = vld [vmem:[#allocation3 + $0x6c] sm:$0xf] }
 0x234   :  { %v2454_v49 = vshll.u32 %v1973_v20, 16  ;;  %v2670_v19 = vld [vmem:[#allocation2 + $0x834] sm:$0xf]  ;;  %2868 = vst [vmem:[#allocation2 + $0x3b8] sm:$0xf] %v2804_v2  ;;  %13674 = vst [vmem:[#allocation67_spill] sm:$0xff] %v12453_v25  ;;  %v8289_v60 = vpop.f32.mrf.mxu0 }
 0x235   :  { %2869 = vst [vmem:[#allocation2 + $0x3dc] sm:$0xf] %v2805_v9  ;;  %v2932_v45 = vld [vmem:[#allocation3 + $0x68] sm:$0xf]  ;;  %v1581_v50 = vrot.slane %v1580_v58, 4  ;;  %v1591_v4 = vrot.slane %v1590_v59, 4  ;;  %v2448_v29 = vor.u32 %v2446_v42, %v2445_v54  ;;  %v12461_v58 = vpop.f32.mrf.mxu1 }
 0x236   :  { %v2449_v52 = vrot.slane %v2445_v54, 4  ;;  %v2933_v0 = vld [vmem:[#allocation3 + $0x6c] sm:$0xf]  ;;  %v2453_v16 = vrot.slane %v2451_v56, 7  ;;  %v3218_v2 = vshrl.u32 %v2932_v45, 16  ;;  %13675 = vst [vmem:[#allocation68_spill] sm:$0xff] %v12461_v58  ;;  %v12469_v12 = vpop.f32.mrf.mxu0 }
 0x237   :  { %v11208_v14 = vld [vmem:[#allocation2 + $0x328] ss:$36 sps:$4 sm:$0xff]   ;;  %v1586_v47 = vsel %vm11765_vm13, %v1581_v50, %v1585_v62  ;;  %v1801_v32 = vsel %vm11771_vm14, %v1591_v4, %v1800_v38  ;;  %v2671_v20 = vsel %vm11598_vm7, %v2448_v29, %v2670_v19  ;;  %v3221_v56 = vshll.u32 %v2932_v45, 16  ;;  %v8511_v19 = vpop.f32.mrf.mxu1  ;;  %13677 = vst [vmem:[#allocation70_spill] sm:$0xff] %v12469_v12  ;;  %v1804_v46 = vld [vmem:[#allocation2 + $0x89c] sm:$0xf] }
 0x238   :  { %v11210_v37 = vld [vmem:[#allocation2 + $0x32c] ss:$36 sps:$4 sm:$0xff]   ;;  %v1053_v9 = vld [vmem:[#allocation3 + $0xe8] sm:$0xf]  ;;  %v3806_v42 = vld [vmem:[#allocation2 + $0x398] sm:$0x8]  ;;  %v2456_v59 = vor.u32 %v2454_v49, %v2453_v16 }
 0x239   :  { %8788 = vmatprep.mubr.bf16.mxu0 %v11210_v37  ;;  %1799 = vst [vmem:[#allocation2 + $0x830] sm:$0xf] %v1586_v47  ;;  %1802 = vst [vmem:[#allocation2 + $0x854] sm:$0xf] %v1801_v32  ;;  %v3227_v54 = vshll.u32 %v2933_v0, 16  ;;  %v3807_v62 = vsel %vm11727_vm10, 0, %v3806_v42 }
 0x23a   :  { %2672 = vst [vmem:[#allocation2 + $0x834] sm:$0xf] %v2671_v20  ;;  %8789 = vmatmul.mubr.bf16.gmra.mxu0 %v11208_v14  ;;  %v3220_v38 = vrot.slane %v3218_v2, 4  ;;  %v3231_v50 = vshrl.u32 %v2933_v0, 16  ;;  %v1054_v4 = vld [vmem:[#allocation3 + $0xec] sm:$0xf]  ;;  %v2457_v37 = vsel %vm11592_vm6, %v2449_v52, %v2456_v59  ;;  %v12467_v20 = vpop.f32.mrf.mxu1 }
 0x23b   :  { %v1593_v29 = vshrl.u32 %v1053_v9, 16  ;;  %v11211_v60 = vld [vmem:[#allocation2 + $0x7e8] ss:$36 sps:$4 sm:$0xff]   ;;  %3808 = vst [vmem:[#allocation2 + $0x398] sm:$0x8] %v3807_v62  ;;  %v3223_v47 = vrot.slane %v3221_v56, 5 }
 0x23c   :  { %v11213_v25 = vld [vmem:[#allocation2 + $0x7ec] ss:$36 sps:$4 sm:$0xff]   ;;  %2673 = vst [vmem:[#allocation2 + $0x858] sm:$0xf] %v2457_v37  ;;  %v3229_v49 = vrot.slane %v3227_v54, 5  ;;  %v3233_v45 = vrot.slane %v3231_v50, 4  ;;  %v8514_v50 = vpop.f32.mrf.mxu1 }
 0x23d   :  { %v1595_v16 = vrot.slane %v1593_v29, 4  ;;  %v1596_v14 = vshll.u32 %v1053_v9, 16  ;;  %v1974_v32 = vld [vmem:[#allocation3 + $0xf0] sm:$0xf]  ;;  %13676 = vst [vmem:[#allocation69_spill] sm:$0xff] %v12467_v20  ;;  %8635 = vmatprep.mubr.bf16.mxu1 %v11213_v25  ;;  %v3224_v0 = vor.u32 %v3223_v47, %v3220_v38  ;;  %v1602_v2 = vshll.u32 %v1054_v4, 16  ;;  %v8294_v38 = vpop.f32.mrf.mxu0 }
 0x23e   :  { %v1606_v42 = vshrl.u32 %v1054_v4, 16  ;;  %v1975_v19 = vld [vmem:[#allocation3 + $0xf4] sm:$0xf]  ;;  %v2459_v58 = vshrl.u32 %v1974_v32, 16  ;;  %8636 = vmatmul.mubr.bf16.gmra.mxu1 %v11211_v60  ;;  %v3234_v62 = vor.u32 %v3233_v45, %v3229_v49  ;;  %v3695_v52 = vld [vmem:[#allocation2 + $0x3e0] sm:$0xf] }
 0x23f   :  { %v1598_v59 = vrot.slane %v1596_v14, 5  ;;  %v2462_v56 = vshll.u32 %v1974_v32, 16  ;;  %v2467_v54 = vshrl.u32 %v1975_v19, 16  ;;  %v3225_v29 = vrot.slane %v3224_v0, 4  ;;  %v2674_v20 = vld [vmem:[#allocation2 + $0x87c] sm:$0xf] }
 0x240   :  { %v1604_v9 = vrot.slane %v1602_v2, 5  ;;  %v1608_v37 = vrot.slane %v1606_v42, 4  ;;  %v2461_v57 = vrot.slane %v2459_v58, 7  ;;  %v2806_v25 = vld [vmem:[#allocation3 + $0x70] sm:$0xf]  ;;  %v3235_v13 = vrot.slane %v3234_v62, 4  ;;  %v12477_v2 = vpop.f32.mrf.mxu0 }
 0x241   :  { %v1905_v47 = vld [vmem:[#allocation2 + $0x854] sm:$0x8]  ;;  %v2769_v4 = vld [vmem:[#allocation2 + $0x834] sm:$0x1]  ;;  %v1599_v35 = vor.u32 %v1598_v59, %v1595_v16  ;;  %v2469_v12 = vrot.slane %v2467_v54, 7  ;;  %v3230_v14 = vsel %vm11765_vm13, %v3225_v29, %v3229_v49  ;;  %13678 = vst [vmem:[#allocation71_spill] sm:$0xff] %v12477_v2 }
 0x242   :  { %2870 = vst [vmem:[#allocation2 + $0x400] sm:$0xf] %v2806_v25  ;;  %v1906_v60 = vsel %vm11727_vm10, 0, %v1905_v47  ;;  %v2770_v45 = vsel %vm11580_vm2, 0, %v2769_v4  ;;  %v1609_v58 = vor.u32 %v1608_v37, %v1604_v9  ;;  %v2807_v32 = vld [vmem:[#allocation3 + $0x74] sm:$0xf]  ;;  %v3696_v16 = vsel %vm11771_vm14, %v3235_v13, %v3695_v52  ;;  %v8297_v38 = vpop.f32.mrf.mxu0 }
 0x243   :  { %v2934_v0 = vld [vmem:[#allocation3 + $0x70] sm:$0xf]  ;;  %v11216_v62 = vld [vmem:[#allocation2 + $0x374] ss:$36 sps:$4 sm:$0xff]   ;;  %1907 = vst [vmem:[#allocation2 + $0x854] sm:$0x8] %v1906_v60  ;;  %v2464_v54 = vor.u32 %v2462_v56, %v2461_v57  ;;  %v12487_v56 = vpop.f32.mrf.mxu1 }
 0x244   :  { %v11214_v42 = vld [vmem:[#allocation2 + $0x370] ss:$36 sps:$4 sm:$0xff]   ;;  %2771 = vst [vmem:[#allocation2 + $0x834] sm:$0x1] %v2770_v45  ;;  %3694 = vst [vmem:[#allocation2 + $0x3bc] sm:$0xf] %v3230_v14  ;;  %8796 = vmatprep.mubr.bf16.mxu0 %v11216_v62 }
 0x245   :  { %v1600_v59 = vrot.slane %v1599_v35, 4  ;;  %2871 = vst [vmem:[#allocation2 + $0x424] sm:$0xf] %v2807_v32  ;;  %3697 = vst [vmem:[#allocation2 + $0x3e0] sm:$0xf] %v3696_v16  ;;  %v1610_v50 = vrot.slane %v1609_v58, 4  ;;  %v2675_v4 = vsel %vm11598_vm7, %v2464_v54, %v2674_v20  ;;  %8797 = vmatmul.mubr.bf16.gmra.mxu0 %v11214_v42 }
 0x246   :  { %v2465_v25 = vrot.slane %v2461_v57, 4  ;;  %v2470_v49 = vshll.u32 %v1975_v19, 16  ;;  %v2935_v29 = vld [vmem:[#allocation3 + $0x74] sm:$0xf]  ;;  %v3237_v37 = vshrl.u32 %v2934_v0, 16  ;;  %v3240_v60 = vshll.u32 %v2934_v0, 16 }
 0x247   :  { %v1605_v47 = vsel %vm11765_vm13, %v1600_v59, %v1604_v9  ;;  %v3246_v45 = vshll.u32 %v2935_v29, 16  ;;  %v1805_v35 = vsel %vm11771_vm14, %v1610_v50, %v1804_v46  ;;  %2676 = vst [vmem:[#allocation2 + $0x87c] sm:$0xf] %v2675_v4  ;;  %v3250_v19 = vshrl.u32 %v2935_v29, 16  ;;  %v1055_v52 = vld [vmem:[#allocation3 + $0xf0] sm:$0xf]  ;;  %v8519_v46 = vpop.f32.mrf.mxu1 }
 0x248   :  { %1803 = vst [vmem:[#allocation2 + $0x878] sm:$0xf] %v1605_v47  ;;  %v2472_v13 = vor.u32 %v2470_v49, %v2469_v12  ;;  %v3239_v57 = vrot.slane %v3237_v37, 4  ;;  %1806 = vst [vmem:[#allocation2 + $0x89c] sm:$0xf] %v1805_v35  ;;  %v3242_v14 = vrot.slane %v3240_v60, 5 }
 0x249   :  { %v3248_v9 = vrot.slane %v3246_v45, 5  ;;  %v1056_v58 = vld [vmem:[#allocation3 + $0xf4] sm:$0xf]  ;;  %v1612_v32 = vshrl.u32 %v1055_v52, 16  ;;  %v1615_v20 = vshll.u32 %v1055_v52, 16  ;;  %v3252_v42 = vrot.slane %v3250_v19, 4  ;;  %v12491_v45 = vpop.f32.mrf.mxu1  ;;  %v12493_v52 = vpop.f32.mrf.mxu0 }
 0x24a   :  { %v2473_v0 = vsel %vm11592_vm6, %v2465_v25, %v2472_v13  ;;  %v1621_v62 = vshll.u32 %v1056_v58, 16  ;;  %v1625_v16 = vshrl.u32 %v1056_v58, 16  ;;  %v11294_v12 = vld [vmem:[#allocation6 + $0x208] sm:$0xff]   ;;  %v3243_v59 = vor.u32 %v3242_v14, %v3239_v57  ;;  %v1976_v29 = vld [vmem:[#allocation3 + $0xf8] sm:$0xf]  ;;  %13679 = vst [vmem:[#allocation72_spill] sm:$0xff] %v12493_v52 }
 0x24b   :  { %2677 = vst [vmem:[#allocation2 + $0x8a0] sm:$0xf] %v2473_v0  ;;  %v3699_v54 = vld [vmem:[#allocation2 + $0x428] sm:$0xf]  ;;  %v1614_v50 = vrot.slane %v1612_v32, 4  ;;  %v1617_v49 = vrot.slane %v1615_v20, 5  ;;  %v3253_v47 = vor.u32 %v3252_v42, %v3248_v9  ;;  %10823 = vmatprep.subr.bf16.mxu0 %v11294_v12  ;;  %v8522_v0 = vpop.f32.mrf.mxu1 }
 0x24c   :  { %v1977_v37 = vld [vmem:[#allocation3 + $0xfc] sm:$0xf]  ;;  %v11219_v38 = vld [vmem:[#allocation2 + $0x830] ss:$36 sps:$4 sm:$0xff]   ;;  %v1623_v4 = vrot.slane %v1621_v62, 5  ;;  %v1627_v60 = vrot.slane %v1625_v16, 4  ;;  %10824 = vmatpush3.bf16.msra.mxu0 %v11294_v12 }
 0x24d   :  { %v11221_v25 = vld [vmem:[#allocation2 + $0x834] ss:$36 sps:$4 sm:$0xff]   ;;  %v3809_v35 = vld [vmem:[#allocation2 + $0x3e0] sm:$0x8]  ;;  %v3244_v13 = vrot.slane %v3243_v59, 4  ;;  %v1618_v19 = vor.u32 %v1617_v49, %v1614_v50  ;;  %v3254_v14 = vrot.slane %v3253_v47, 4  ;;  %v8302_v49 = vpop.f32.mrf.mxu0 }
 0x24e   :  { %v3810_v57 = vsel %vm11727_vm10, 0, %v3809_v35  ;;  %v1628_v58 = vor.u32 %v1627_v60, %v1623_v4  ;;  %v1808_v32 = vld [vmem:[#allocation2 + $0x8e4] sm:$0xf]  ;;  %v2475_v20 = vshrl.u32 %v1976_v29, 16  ;;  %8643 = vmatprep.mubr.bf16.mxu1 %v11221_v25  ;;  %v2772_v42 = vld [vmem:[#allocation2 + $0x87c] sm:$0x1] }
 0x24f   :  { %3811 = vst [vmem:[#allocation2 + $0x3e0] sm:$0x8] %v3810_v57  ;;  %v3249_v62 = vsel %vm11765_vm13, %v3244_v13, %v3248_v9  ;;  %v1619_v16 = vrot.slane %v1618_v19, 4  ;;  %v2478_v46 = vshll.u32 %v1976_v29, 16  ;;  %v2483_v59 = vshrl.u32 %v1977_v37, 16  ;;  %8644 = vmatmul.mubr.bf16.gmra.mxu1 %v11219_v38  ;;  %v12507_v19 = vpop.f32.mrf.mxu0 }
 0x250   :  { %v2678_v50 = vld [vmem:[#allocation2 + $0x8c4] sm:$0xf]  ;;  %v1908_v12 = vld [vmem:[#allocation2 + $0x89c] sm:$0x8]  ;;  %v2773_v47 = vsel %vm11580_vm2, 0, %v2772_v42  ;;  %v3700_v60 = vsel %vm11771_vm14, %v3254_v14, %v3699_v54  ;;  %v1629_v25 = vrot.slane %v1628_v58, 4 }
 0x251   :  { %3698 = vst [vmem:[#allocation2 + $0x404] sm:$0xf] %v3249_v62  ;;  %v2477_v35 = vrot.slane %v2475_v20, 7  ;;  %v1909_v57 = vsel %vm11727_vm10, 0, %v1908_v12  ;;  %2774 = vst [vmem:[#allocation2 + $0x87c] sm:$0x1] %v2773_v47  ;;  %v1624_v9 = vsel %vm11765_vm13, %v1619_v16, %v1623_v4 }
 0x252   :  { %3701 = vst [vmem:[#allocation2 + $0x428] sm:$0xf] %v3700_v60  ;;  %v2485_v29 = vrot.slane %v2483_v59, 7  ;;  %v2486_v38 = vshll.u32 %v1977_v37, 16  ;;  %v2808_v13 = vld [vmem:[#allocation3 + $0x78] sm:$0xf]  ;;  %v1809_v54 = vsel %vm11771_vm14, %v1629_v25, %v1808_v32  ;;  %v8305_v37 = vpop.f32.mrf.mxu0 }
 0x253   :  { %13680 = vst [vmem:[#allocation73_spill] sm:$0xff] %v12507_v19  ;;  %1910 = vst [vmem:[#allocation2 + $0x89c] sm:$0x8] %v1909_v57  ;;  %v2480_v14 = vor.u32 %v2478_v46, %v2477_v35  ;;  %v2481_v58 = vrot.slane %v2477_v35, 4  ;;  %v2809_v20 = vld [vmem:[#allocation3 + $0x7c] sm:$0xf] }
 0x254   :  { %1807 = vst [vmem:[#allocation2 + $0x8c0] sm:$0xf] %v1624_v9  ;;  %2872 = vst [vmem:[#allocation2 + $0x448] sm:$0xf] %v2808_v13  ;;  %v2936_v0 = vld [vmem:[#allocation3 + $0x78] sm:$0xf]  ;;  %v2488_v42 = vor.u32 %v2486_v38, %v2485_v29  ;;  %v12515_v13 = vpop.f32.mrf.mxu1 }
 0x255   :  { %1810 = vst [vmem:[#allocation2 + $0x8e4] sm:$0xf] %v1809_v54  ;;  %2873 = vst [vmem:[#allocation2 + $0x46c] sm:$0xf] %v2809_v20  ;;  %v2937_v62 = vld [vmem:[#allocation3 + $0x7c] sm:$0xf]  ;;  %v2679_v59 = vsel %vm11598_vm7, %v2480_v14, %v2678_v50 }
 0x256   :  { %v3256_v4 = vshrl.u32 %v2936_v0, 16  ;;  %v3259_v16 = vshll.u32 %v2936_v0, 16  ;;  %v3265_v49 = vshll.u32 %v2937_v62, 16  ;;  %v3269_v12 = vshrl.u32 %v2937_v62, 16  ;;  %v2810_v47 = vld [vmem:[#allocation3 + $0x80] sm:$0xf] }
 0x257   :  { %v2811_v60 = vld [vmem:[#allocation3 + $0x84] sm:$0xf]  ;;  %v2489_v32 = vsel %vm11592_vm6, %v2481_v58, %v2488_v42  ;;  %2680 = vst [vmem:[#allocation2 + $0x8c4] sm:$0xf] %v2679_v59  ;;  %2874 = vst [vmem:[#allocation2 + $0x490] sm:$0xf] %v2810_v47 }
 0x258   :  { %v3258_v46 = vrot.slane %v3256_v4, 4  ;;  %v3261_v25 = vrot.slane %v3259_v16, 5  ;;  %2875 = vst [vmem:[#allocation2 + $0x4b4] sm:$0xf] %v2811_v60  ;;  %v2938_v35 = vld [vmem:[#allocation3 + $0x80] sm:$0xf]  ;;  %v8527_v4 = vpop.f32.mrf.mxu1 }
 0x259   :  { %v2939_v57 = vld [vmem:[#allocation3 + $0x84] sm:$0xf]  ;;  %v11222_v9 = vld [vmem:[#allocation2 + $0x3b8] ss:$36 sps:$4 sm:$0xff]   ;;  %2681 = vst [vmem:[#allocation2 + $0x8e8] sm:$0xf] %v2489_v32 }
 0x25a   :  { %v11224_v29 = vld [vmem:[#allocation2 + $0x3bc] ss:$36 sps:$4 sm:$0xff]   ;;  %v3267_v38 = vrot.slane %v3265_v49, 5  ;;  %v3262_v50 = vor.u32 %v3261_v25, %v3258_v46  ;;  %v3271_v54 = vrot.slane %v3269_v12, 4  ;;  %v3275_v14 = vshrl.u32 %v2938_v35, 16  ;;  %v12519_v25 = vpop.f32.mrf.mxu1 }
 0x25b   :  { %v3278_v20 = vshll.u32 %v2938_v35, 16  ;;  %8804 = vmatprep.mubr.bf16.mxu0 %v11224_v29  ;;  %v3812_v0 = vld [vmem:[#allocation2 + $0x428] sm:$0x8]  ;;  %v3703_v58 = vld [vmem:[#allocation2 + $0x470] sm:$0xf]  ;;  %v3284_v42 = vshll.u32 %v2939_v57, 16  ;;  %v12521_v35 = vpop.f32.mrf.mxu0 }
 0x25c   :  { %v3288_v62 = vshrl.u32 %v2939_v57, 16  ;;  %8805 = vmatmul.mubr.bf16.gmra.mxu0 %v11222_v9  ;;  %v11225_v16 = vld [vmem:[#allocation2 + $0x878] ss:$36 sps:$4 sm:$0xff]   ;;  %v3813_v59 = vsel %vm11727_vm10, 0, %v3812_v0  ;;  %v3272_v47 = vor.u32 %v3271_v54, %v3267_v38  ;;  %v1911_v49 = vld [vmem:[#allocation2 + $0x8e4] sm:$0x8]  ;;  %v8530_v19 = vpop.f32.mrf.mxu1 }
 0x25d   :  { %v11227_v37 = vld [vmem:[#allocation2 + $0x87c] ss:$36 sps:$4 sm:$0xff]   ;;  %3814 = vst [vmem:[#allocation2 + $0x428] sm:$0x8] %v3813_v59  ;;  %v3263_v60 = vrot.slane %v3262_v50, 4  ;;  %v3277_v32 = vrot.slane %v3275_v14, 4 }
 0x25e   :  { %v3280_v12 = vrot.slane %v3278_v20, 5  ;;  %v3286_v46 = vrot.slane %v3284_v42, 5  ;;  %13681 = vst [vmem:[#allocation74_spill] sm:$0xff] %v12521_v35  ;;  %8651 = vmatprep.mubr.bf16.mxu1 %v11227_v37  ;;  %v1912_v57 = vsel %vm11727_vm10, 0, %v1911_v49  ;;  %v3273_v9 = vrot.slane %v3272_v47, 4  ;;  %v8310_v35 = vpop.f32.mrf.mxu0 }
 0x25f   :  { %v3290_v29 = vrot.slane %v3288_v62, 4  ;;  %v3867_v4 = vld [vmem:[#allocation3 + $0x8] sm:$0xf]  ;;  %8652 = vmatmul.mubr.bf16.gmra.mxu1 %v11225_v16  ;;  %1913 = vst [vmem:[#allocation2 + $0x8e4] sm:$0x8] %v1912_v57  ;;  %v3268_v50 = vsel %vm11765_vm13, %v3263_v60, %v3267_v38 }
 0x260   :  { %v2775_v54 = vld [vmem:[#allocation2 + $0x8c4] sm:$0x1]  ;;  %v3281_v14 = vor.u32 %v3280_v12, %v3277_v32  ;;  %v3707_v20 = vld [vmem:[#allocation2 + $0x4b8] sm:$0xf]  ;;  %v3868_v0 = vld [vmem:[#allocation3 + $0xc] sm:$0xf]  ;;  %v3704_v62 = vsel %vm11771_vm14, %v3273_v9, %v3703_v58  ;;  %v12531_v19 = vpop.f32.mrf.mxu0 }
 0x261   :  { %v3928_v42 = vshrl.u32 %v3867_v4, 16  ;;  %v3931_v59 = vshll.u32 %v3867_v4, 16  ;;  %v2776_v37 = vsel %vm11580_vm2, 0, %v2775_v54  ;;  %3702 = vst [vmem:[#allocation2 + $0x44c] sm:$0xf] %v3268_v50  ;;  %v3291_v16 = vor.u32 %v3290_v29, %v3286_v46  ;;  %13682 = vst [vmem:[#allocation75_spill] sm:$0xff] %v12531_v19 }
 0x262   :  { %v3936_v47 = vshrl.u32 %v3868_v0, 16  ;;  %v4467_v49 = vld [vmem:[#allocation2 + $0x18] sm:$0xf]  ;;  %v4688_v57 = vld [vmem:[#allocation3 + $0x8] sm:$0xf]  ;;  %v3282_v38 = vrot.slane %v3281_v14, 4  ;;  %v8313_v52 = vpop.f32.mrf.mxu0 }
 0x263   :  { %2777 = vst [vmem:[#allocation2 + $0x8c4] sm:$0x1] %v2776_v37  ;;  %3705 = vst [vmem:[#allocation2 + $0x470] sm:$0xf] %v3704_v62  ;;  %v3930_v60 = vrot.slane %v3928_v42, 7  ;;  %v3939_v32 = vshll.u32 %v3868_v0, 16  ;;  %v12537_v42 = vpop.f32.mrf.mxu1 }
 0x264   :  { %v4689_v12 = vld [vmem:[#allocation3 + $0xc] sm:$0xf]  ;;  %4748 = vst [vmem:[#allocation2 + $0x1c] sm:$0xf] %v4688_v57  ;;  %v3292_v35 = vrot.slane %v3291_v16, 4  ;;  %v3938_v4 = vrot.slane %v3936_v47, 7  ;;  %v3287_v54 = vsel %vm11765_vm13, %v3282_v38, %v3286_v46 }
 0x265   :  { %4749 = vst [vmem:[#allocation2 + $0x40] sm:$0xf] %v4689_v12  ;;  %v3933_v58 = vor.u32 %v3931_v59, %v3930_v60  ;;  %v3934_v9 = vrot.slane %v3930_v60, 4  ;;  %v2812_v29 = vld [vmem:[#allocation3 + $0x88] sm:$0xf]  ;;  %v8535_v60 = vpop.f32.mrf.mxu1 }
 0x266   :  { %v2813_v50 = vld [vmem:[#allocation3 + $0x8c] sm:$0xf]  ;;  %v11228_v37 = vld [vmem:[#allocation2 + $0x400] ss:$36 sps:$4 sm:$0xff]   ;;  %3706 = vst [vmem:[#allocation2 + $0x494] sm:$0xf] %v3287_v54  ;;  %v3708_v14 = vsel %vm11771_vm14, %v3292_v35, %v3707_v20  ;;  %v3941_v0 = vor.u32 %v3939_v32, %v3938_v4 }
 0x267   :  { %v11230_v62 = vld [vmem:[#allocation2 + $0x404] ss:$36 sps:$4 sm:$0xff]   ;;  %2876 = vst [vmem:[#allocation2 + $0x4d8] sm:$0xf] %v2812_v29  ;;  %2877 = vst [vmem:[#allocation2 + $0x4fc] sm:$0xf] %v2813_v50  ;;  %v4468_v46 = vsel %vm11598_vm7, %v3933_v58, %v4467_v49  ;;  %v12543_v29 = vpop.f32.mrf.mxu1 }
 0x268   :  { %3709 = vst [vmem:[#allocation2 + $0x4b8] sm:$0xf] %v3708_v14  ;;  %v2940_v59 = vld [vmem:[#allocation3 + $0x88] sm:$0xf]  ;;  %v2941_v16 = vld [vmem:[#allocation3 + $0x8c] sm:$0xf]  ;;  %8812 = vmatprep.mubr.bf16.mxu0 %v11230_v62  ;;  %v3942_v52 = vsel %vm11592_vm6, %v3934_v9, %v3941_v0 }
 0x269   :  { %4469 = vst [vmem:[#allocation2 + $0x18] sm:$0xf] %v4468_v46  ;;  %v3294_v47 = vshrl.u32 %v2940_v59, 16  ;;  %v3297_v57 = vshll.u32 %v2940_v59, 16  ;;  %v3303_v38 = vshll.u32 %v2941_v16, 16  ;;  %8813 = vmatmul.mubr.bf16.gmra.mxu0 %v11228_v37  ;;  %v3307_v32 = vshrl.u32 %v2941_v16, 16  ;;  %v8538_v60 = vpop.f32.mrf.mxu1 }
 0x26a   :  { %v3869_v20 = vld [vmem:[#allocation3 + $0x10] sm:$0xf]  ;;  %4470 = vst [vmem:[#allocation2 + $0x3c] sm:$0xf] %v3942_v52  ;;  %v3870_v12 = vld [vmem:[#allocation3 + $0x14] sm:$0xf] }
 0x26b   :  { %v3944_v35 = vshrl.u32 %v3869_v20, 16  ;;  %v3947_v4 = vshll.u32 %v3869_v20, 16  ;;  %v11232_v54 = vld [vmem:[#allocation2 + $0x8c0] ss:$36 sps:$4 sm:$0xff]   ;;  %v3296_v58 = vrot.slane %v3294_v47, 4  ;;  %13683 = vst [vmem:[#allocation76_spill] sm:$0xff] %v12543_v29 }
 0x26c   :  { %v11234_v49 = vld [vmem:[#allocation2 + $0x8c4] ss:$36 sps:$4 sm:$0xff]   ;;  %v3815_v50 = vld [vmem:[#allocation2 + $0x470] sm:$0x8]  ;;  %v3299_v62 = vrot.slane %v3297_v57, 5  ;;  %v3305_v9 = vrot.slane %v3303_v38, 5 }
 0x26d   :  { %v3309_v14 = vrot.slane %v3307_v32, 4  ;;  %v3946_v0 = vrot.slane %v3944_v35, 7  ;;  %8659 = vmatprep.mubr.bf16.mxu1 %v11234_v49  ;;  %v3816_v46 = vsel %vm11727_vm10, 0, %v3815_v50  ;;  %v3711_v37 = vld [vmem:[#allocation2 + $0x500] sm:$0xf]  ;;  %v3952_v59 = vshrl.u32 %v3870_v12, 16  ;;  %v12547_v49 = vpop.f32.mrf.mxu1 }
 0x26e   :  { %v3955_v16 = vshll.u32 %v3870_v12, 16  ;;  %v4471_v52 = vld [vmem:[#allocation2 + $0x60] sm:$0xf]  ;;  %3817 = vst [vmem:[#allocation2 + $0x470] sm:$0x8] %v3816_v46  ;;  %8660 = vmatmul.mubr.bf16.gmra.mxu1 %v11232_v54  ;;  %v3300_v20 = vor.u32 %v3299_v62, %v3296_v58 }
 0x26f   :  { %v3310_v47 = vor.u32 %v3309_v14, %v3305_v9  ;;  %v3949_v19 = vor.u32 %v3947_v4, %v3946_v0  ;;  %v4690_v2 = vld [vmem:[#allocation3 + $0x10] sm:$0xf]  ;;  %v4691_v29 = vld [vmem:[#allocation3 + $0x14] sm:$0xf]  ;;  %v3818_v57 = vld [vmem:[#allocation2 + $0x4b8] sm:$0x8]  ;;  %v8543_v62 = vpop.f32.mrf.mxu1 }
 0x270   :  { %v3950_v38 = vrot.slane %v3946_v0, 4  ;;  %v3954_v32 = vrot.slane %v3952_v59, 7  ;;  %4750 = vst [vmem:[#allocation2 + $0x64] sm:$0xf] %v4690_v2  ;;  %4751 = vst [vmem:[#allocation2 + $0x88] sm:$0xf] %v4691_v29 }
 0x271   :  { %v2814_v35 = vld [vmem:[#allocation3 + $0x90] sm:$0xf]  ;;  %v3819_v12 = vsel %vm11727_vm10, 0, %v3818_v57  ;;  %v4592_v50 = vld [vmem:[#allocation2 + $0x18] sm:$0x1]  ;;  %v3301_v60 = vrot.slane %v3300_v20, 4  ;;  %v4472_v54 = vsel %vm11598_vm7, %v3949_v19, %v4471_v52 }
 0x272   :  { %v3311_v46 = vrot.slane %v3310_v47, 4  ;;  %2878 = vst [vmem:[#allocation2 + $0x520] sm:$0xf] %v2814_v35  ;;  %3820 = vst [vmem:[#allocation2 + $0x4b8] sm:$0x8] %v3819_v12  ;;  %v4593_v4 = vsel %vm11580_vm2, 0, %v4592_v50  ;;  %v3957_v58 = vor.u32 %v3955_v16, %v3954_v32  ;;  %v12561_v32 = vpop.f32.mrf.mxu1 }
 0x273   :  { %4473 = vst [vmem:[#allocation2 + $0x60] sm:$0xf] %v4472_v54  ;;  %v2815_v2 = vld [vmem:[#allocation3 + $0x94] sm:$0xf]  ;;  %v2942_v29 = vld [vmem:[#allocation3 + $0x90] sm:$0xf]  ;;  %v3306_v14 = vsel %vm11765_vm13, %v3301_v60, %v3305_v9  ;;  %v8702_v60 = vpop.f32.mrf.mxu0 }
 0x274   :  { %4594 = vst [vmem:[#allocation2 + $0x18] sm:$0x1] %v4593_v4  ;;  %v3712_v0 = vsel %vm11771_vm14, %v3311_v46, %v3711_v37  ;;  %2879 = vst [vmem:[#allocation2 + $0x544] sm:$0xf] %v2815_v2  ;;  %v2943_v59 = vld [vmem:[#allocation3 + $0x94] sm:$0xf]  ;;  %v3958_v16 = vsel %vm11592_vm6, %v3950_v38, %v3957_v58  ;;  %v8546_v38 = vpop.f32.mrf.mxu1 }
 0x275   :  { %v3313_v19 = vshrl.u32 %v2942_v29, 16  ;;  %v3316_v52 = vshll.u32 %v2942_v29, 16  ;;  %3710 = vst [vmem:[#allocation2 + $0x4dc] sm:$0xf] %v3306_v14  ;;  %3713 = vst [vmem:[#allocation2 + $0x500] sm:$0xf] %v3712_v0  ;;  %v12566_v29 = vadd.f32 %v8702_v60, %v12145_v43 }
 0x276   :  { %v3322_v20 = vshll.u32 %v2943_v59, 16  ;;  %v3326_v47 = vshrl.u32 %v2943_v59, 16  ;;  %v3871_v57 = vld [vmem:[#allocation3 + $0x18] sm:$0xf]  ;;  %13684 = vst [vmem:[#allocation77_spill] sm:$0xff] %v12561_v32  ;;  %v8704_v59 = vpop.f32.mrf.mxu0 }
 0x277   :  { %4474 = vst [vmem:[#allocation2 + $0x84] sm:$0xf] %v3958_v16  ;;  %v3315_v35 = vrot.slane %v3313_v19, 4  ;;  %v3318_v9 = vrot.slane %v3316_v52, 5  ;;  %v12563_v12 = vld [vmem:[#allocation3 + $0x1c] sm:$0xf]  ;;  %v8417_v52 = vadd.f32 %v12149_v7, %v11993_v23 }
 0x278   :  { %v3960_v37 = vshrl.u32 %v3871_v57, 16  ;;  %v3963_v50 = vshll.u32 %v3871_v57, 16  ;;  %v11235_v46 = vld [vmem:[#allocation2 + $0x448] ss:$36 sps:$4 sm:$0xff]   ;;  %v3324_v4 = vrot.slane %v3322_v20, 5  ;;  %13685 = vst [vmem:[#allocation78_spill] sm:$0xff] %v12566_v29 }
 0x279   :  { %v11237_v54 = vld [vmem:[#allocation2 + $0x44c] ss:$36 sps:$4 sm:$0xff]   ;;  %v4475_v2 = vld [vmem:[#allocation2 + $0xa8] sm:$0xf]  ;;  %v3319_v58 = vor.u32 %v3318_v9, %v3315_v35  ;;  %v3328_v62 = vrot.slane %v3326_v47, 4  ;;  %v11319_v19 = vld [vmem:[#allocation6 + $0x200] sm:$0xff]   ;;  %v8705_v9 = vpop.f32.mrf.mxu0 }
 0x27a   :  { %v3962_v14 = vrot.slane %v3960_v37, 7  ;;  %v4692_v0 = vld [vmem:[#allocation3 + $0x18] sm:$0xf]  ;;  %8820 = vmatprep.mubr.bf16.mxu0 %v11237_v54  ;;  %v3715_v16 = vld [vmem:[#allocation2 + $0x548] sm:$0xf]  ;;  %v3968_v57 = vshrl.u32 %v12563_v12, 16  ;;  %10825 = vmatprep.subr.bf16.mxu0 %v11319_v19  ;;  %v12572_v54 = vadd.f32 %v8705_v9, %v8417_v52  ;;  %v12582_v52 = vpop.f32.mrf.mxu1 }
 0x27b   :  { %v4693_v32 = vld [vmem:[#allocation3 + $0x1c] sm:$0xf]  ;;  %4752 = vst [vmem:[#allocation2 + $0xac] sm:$0xf] %v4692_v0  ;;  %v2816_v20 = vld [vmem:[#allocation3 + $0x98] sm:$0xf]  ;;  %8821 = vmatmul.mubr.bf16.gmra.mxu0 %v11235_v46  ;;  %v3329_v38 = vor.u32 %v3328_v62, %v3324_v4 }
 0x27c   :  { %v11240_v43 = vld [vmem:[#allocation2 + $0x494] ss:$36 sps:$4 sm:$0xff]   ;;  %v3320_v60 = vrot.slane %v3319_v58, 4  ;;  %v3965_v35 = vor.u32 %v3963_v50, %v3962_v14  ;;  %v3971_v47 = vshll.u32 %v12563_v12, 16  ;;  %4753 = vst [vmem:[#allocation2 + $0xd0] sm:$0xf] %v4693_v32  ;;  %10826 = vmatpush3.bf16.msra.mxu0 %v11319_v19  ;;  %v8707_v32 = vpop.f32.mrf.mxu0 }
 0x27d   :  { %2880 = vst [vmem:[#allocation2 + $0x568] sm:$0xf] %v2816_v20  ;;  %v11241_v37 = vld [vmem:[#allocation2 + $0x18] ss:$36 sps:$4 sm:$0xff]   ;;  %v3966_v7 = vrot.slane %v3962_v14, 4  ;;  %13686 = vst [vmem:[#allocation79_spill] sm:$0xff] %v12572_v54  ;;  %8828 = vmatprep.mubr.bf16.mxu0 %v11240_v43 }
 0x27e   :  { %v11243_v23 = vld [vmem:[#allocation2 + $0x1c] ss:$36 sps:$4 sm:$0xff]   ;;  %v3325_v46 = vsel %vm11765_vm13, %v3320_v60, %v3324_v4  ;;  %v3330_v58 = vrot.slane %v3329_v38, 4  ;;  %v4476_v12 = vsel %vm11598_vm7, %v3965_v35, %v4475_v2  ;;  %v3970_v14 = vrot.slane %v3968_v57, 7  ;;  %13687 = vst [vmem:[#allocation80_spill] sm:$0xff] %v12582_v52 }
 0x27f   :  { %v3821_v0 = vld [vmem:[#allocation2 + $0x500] sm:$0x8]  ;;  %v4595_v59 = vld [vmem:[#allocation2 + $0x60] sm:$0x1]  ;;  %8989 = vmatprep.mubr.bf16.mxu1 %v11243_v23  ;;  %3714 = vst [vmem:[#allocation2 + $0x524] sm:$0xf] %v3325_v46  ;;  %v8551_v23 = vpop.f32.mrf.mxu1 }
 0x280   :  { %v3822_v50 = vsel %vm11727_vm10, 0, %v3821_v0  ;;  %v4596_v62 = vsel %vm11580_vm2, 0, %v4595_v59  ;;  %4477 = vst [vmem:[#allocation2 + $0xa8] sm:$0xf] %v4476_v12  ;;  %v2817_v19 = vld [vmem:[#allocation3 + $0x9c] sm:$0xf]  ;;  %8990 = vmatmul.mubr.bf16.vlgmr.msra.gmra.mxu1 %v11241_v37  ;;  %v3716_v4 = vsel %vm11771_vm14, %v3330_v58, %v3715_v16  ;;  %v3973_v60 = vor.u32 %v3971_v47, %v3970_v14 }
 0x281   :  { %v11238_v20 = vld [vmem:[#allocation2 + $0x490] ss:$36 sps:$4 sm:$0xff]   ;;  %3823 = vst [vmem:[#allocation2 + $0x500] sm:$0x8] %v3822_v50  ;;  %4597 = vst [vmem:[#allocation2 + $0x60] sm:$0x1] %v4596_v62  ;;  %v12588_v62 = vpop.f32.mrf.mxu1 }
 0x282   :  { %2881 = vst [vmem:[#allocation2 + $0x58c] sm:$0xf] %v2817_v19  ;;  %v2944_v2 = vld [vmem:[#allocation3 + $0x98] sm:$0xf]  ;;  %v2945_v43 = vld [vmem:[#allocation3 + $0x9c] sm:$0xf]  ;;  %v3974_v37 = vsel %vm11592_vm6, %v3966_v7, %v3973_v60 }
 0x283   :  { %3717 = vst [vmem:[#allocation2 + $0x548] sm:$0xf] %v3716_v4  ;;  %v3332_v38 = vshrl.u32 %v2944_v2, 16  ;;  %v3335_v35 = vshll.u32 %v2944_v2, 16  ;;  %v3341_v9 = vshll.u32 %v2945_v43, 16  ;;  %v3345_v0 = vshrl.u32 %v2945_v43, 16  ;;  %8829 = vmatmul.mubr.bf16.gmra.mxu0 %v11238_v20  ;;  %v8554_v54 = vpop.f32.mrf.mxu1 }
 0x284   :  { %v3873_v57 = vld [vmem:[#allocation3 + $0x20] sm:$0xf]  ;;  %v3874_v59 = vld [vmem:[#allocation3 + $0x24] sm:$0xf]  ;;  %v4479_v58 = vld [vmem:[#allocation2 + $0xf0] sm:$0xf]  ;;  %v8422_v20 = vadd.f32 %v12171_v53, %v12002_v44 }
 0x285   :  { %v3976_v46 = vshrl.u32 %v3873_v57, 16  ;;  %v3979_v12 = vshll.u32 %v3873_v57, 16  ;;  %v3334_v32 = vrot.slane %v3332_v38, 4  ;;  %v3337_v50 = vrot.slane %v3335_v35, 5  ;;  %4478 = vst [vmem:[#allocation2 + $0xcc] sm:$0xf] %v3974_v37 }
 0x286   :  { %v3343_v16 = vrot.slane %v3341_v9, 5  ;;  %v3347_v47 = vrot.slane %v3345_v0, 4  ;;  %v3984_v19 = vshrl.u32 %v3874_v59, 16  ;;  %v3987_v4 = vshll.u32 %v3874_v59, 16  ;;  %v4694_v2 = vld [vmem:[#allocation3 + $0x20] sm:$0xf] }
 0x287   :  { %v3978_v14 = vrot.slane %v3976_v46, 7  ;;  %v3338_v43 = vor.u32 %v3337_v50, %v3334_v32  ;;  %v4695_v23 = vld [vmem:[#allocation3 + $0x24] sm:$0xf]  ;;  %4754 = vst [vmem:[#allocation2 + $0xf4] sm:$0xf] %v4694_v2 }
 0x288   :  { %v2818_v57 = vld [vmem:[#allocation3 + $0xa0] sm:$0xf]  ;;  %v2819_v52 = vld [vmem:[#allocation3 + $0xa4] sm:$0xf]  ;;  %v4598_v7 = vld [vmem:[#allocation2 + $0xa8] sm:$0x1]  ;;  %v3348_v60 = vor.u32 %v3347_v47, %v3343_v16  ;;  %v8710_v47 = vpop.f32.mrf.mxu0 }
 0x289   :  { %v3719_v38 = vld [vmem:[#allocation2 + $0x590] sm:$0xf]  ;;  %v3981_v35 = vor.u32 %v3979_v12, %v3978_v14  ;;  %v3982_v9 = vrot.slane %v3978_v14, 4  ;;  %v3986_v29 = vrot.slane %v3984_v19, 7  ;;  %4755 = vst [vmem:[#allocation2 + $0x118] sm:$0xf] %v4695_v23  ;;  %v12596_v44 = vadd.f32 %v8710_v47, %v8422_v20  ;;  %v12604_v23 = vpop.f32.mrf.mxu1 }
 0x28a   :  { %2882 = vst [vmem:[#allocation2 + $0x5b0] sm:$0xf] %v2818_v57  ;;  %2883 = vst [vmem:[#allocation2 + $0x5d4] sm:$0xf] %v2819_v52  ;;  %v11245_v0 = vld [vmem:[#allocation2 + $0x4d8] ss:$36 sps:$4 sm:$0xff]  }
 0x28b   :  { %v11247_v59 = vld [vmem:[#allocation2 + $0x4dc] ss:$36 sps:$4 sm:$0xff]   ;;  %v4599_v46 = vsel %vm11580_vm2, 0, %v4598_v7  ;;  %v11250_v32 = vld [vmem:[#allocation2 + $0x64] ss:$36 sps:$4 sm:$0xff]   ;;  %v3339_v54 = vrot.slane %v3338_v43, 4  ;;  %v3989_v50 = vor.u32 %v3987_v4, %v3986_v29  ;;  %v4480_v12 = vsel %vm11598_vm7, %v3981_v35, %v4479_v58  ;;  %v8712_v43 = vpop.f32.mrf.mxu0 }
 0x28c   :  { %v11248_v37 = vld [vmem:[#allocation2 + $0x60] ss:$36 sps:$4 sm:$0xff]   ;;  %4600 = vst [vmem:[#allocation2 + $0xa8] sm:$0x1] %v4599_v46  ;;  %8836 = vmatprep.mubr.bf16.mxu0 %v11247_v59  ;;  %v3824_v14 = vld [vmem:[#allocation2 + $0x548] sm:$0x8]  ;;  %8997 = vmatprep.mubr.bf16.mxu1 %v11250_v32 }
 0x28d   :  { %v3349_v52 = vrot.slane %v3348_v60, 4  ;;  %4481 = vst [vmem:[#allocation2 + $0xf0] sm:$0xf] %v4480_v12  ;;  %v2946_v19 = vld [vmem:[#allocation3 + $0xa0] sm:$0xf]  ;;  %v3825_v53 = vsel %vm11727_vm10, 0, %v3824_v14  ;;  %v3344_v2 = vsel %vm11765_vm13, %v3339_v54, %v3343_v16  ;;  %v3990_v29 = vsel %vm11592_vm6, %v3982_v9, %v3989_v50  ;;  %8998 = vmatmul.mubr.bf16.gmra.mxu1 %v11248_v37  ;;  %8837 = vmatmul.mubr.bf16.gmra.mxu0 %v11245_v0  ;;  %v8713_v37 = vpop.f32.mrf.mxu0  ;;  %v8559_v54 = vpop.f32.mrf.mxu1 }
 0x28e   :  { %v2947_v4 = vld [vmem:[#allocation3 + $0xa4] sm:$0xf]  ;;  %v3351_v58 = vshrl.u32 %v2946_v19, 16  ;;  %3826 = vst [vmem:[#allocation2 + $0x548] sm:$0x8] %v3825_v53  ;;  %v3354_v7 = vshll.u32 %v2946_v19, 16  ;;  %v8425_v16 = vadd.f32 %v12179_v27, %v12012_v10 }
 0x28f   :  { %3718 = vst [vmem:[#allocation2 + $0x56c] sm:$0xf] %v3344_v2  ;;  %v3720_v57 = vsel %vm11771_vm14, %v3349_v52, %v3719_v38  ;;  %4482 = vst [vmem:[#allocation2 + $0x114] sm:$0xf] %v3990_v29  ;;  %v3360_v60 = vshll.u32 %v2947_v4, 16  ;;  %v3364_v35 = vshrl.u32 %v2947_v4, 16  ;;  %v8715_v10 = vpop.f32.mrf.mxu0  ;;  %v12612_v27 = vpop.f32.mrf.mxu1 }
 0x290   :  { %v3875_v20 = vld [vmem:[#allocation3 + $0x28] sm:$0xf]  ;;  %3721 = vst [vmem:[#allocation2 + $0x590] sm:$0xf] %v3720_v57  ;;  %v3353_v9 = vrot.slane %v3351_v58, 4  ;;  %v3356_v50 = vrot.slane %v3354_v7, 5  ;;  %v12610_v4 = vadd.f32 %v8713_v37, %v8425_v16  ;;  %v8430_v10 = vadd.f32 %v12202_v26, %v12020_v36 }
 0x291   :  { %v3876_v59 = vld [vmem:[#allocation3 + $0x2c] sm:$0xf]  ;;  %v3992_v46 = vshrl.u32 %v3875_v20, 16  ;;  %v3995_v32 = vshll.u32 %v3875_v20, 16  ;;  %v3362_v12 = vrot.slane %v3360_v60, 5  ;;  %v3366_v47 = vrot.slane %v3364_v35, 4  ;;  %v8562_v54 = vpop.f32.mrf.mxu1 }
 0x292   :  { %v4000_v38 = vshrl.u32 %v3876_v59, 16  ;;  %v4483_v14 = vld [vmem:[#allocation2 + $0x138] sm:$0xf]  ;;  %v4003_v53 = vshll.u32 %v3876_v59, 16  ;;  %v4696_v2 = vld [vmem:[#allocation3 + $0x28] sm:$0xf]  ;;  %v3357_v43 = vor.u32 %v3356_v50, %v3353_v9 }
 0x293   :  { %v3723_v52 = vld [vmem:[#allocation2 + $0x5d8] sm:$0xf]  ;;  %v3994_v19 = vrot.slane %v3992_v46, 7  ;;  %v4697_v29 = vld [vmem:[#allocation3 + $0x2c] sm:$0xf]  ;;  %13688 = vst [vmem:[#allocation81_spill] sm:$0xff] %v12612_v27  ;;  %v3367_v57 = vor.u32 %v3366_v47, %v3362_v12 }
 0x294   :  { %v11254_v0 = vld [vmem:[#allocation2 + $0xa8] ss:$36 sps:$4 sm:$0xff]   ;;  %v4002_v20 = vrot.slane %v4000_v38, 7  ;;  %4756 = vst [vmem:[#allocation2 + $0x13c] sm:$0xf] %v4696_v2  ;;  %v3358_v16 = vrot.slane %v3357_v43, 4 }
 0x295   :  { %v11256_v58 = vld [vmem:[#allocation2 + $0xac] ss:$36 sps:$4 sm:$0xff]   ;;  %4757 = vst [vmem:[#allocation2 + $0x160] sm:$0xf] %v4697_v29  ;;  %v3997_v60 = vor.u32 %v3995_v32, %v3994_v19  ;;  %v3998_v35 = vrot.slane %v3994_v19, 4  ;;  %v3368_v46 = vrot.slane %v3367_v57, 4 }
 0x296   :  { %v4601_v7 = vld [vmem:[#allocation2 + $0xf0] sm:$0x1]  ;;  %9005 = vmatprep.mubr.bf16.mxu1 %v11256_v58  ;;  %v4005_v37 = vor.u32 %v4003_v53, %v4002_v20  ;;  %v11251_v27 = vld [vmem:[#allocation2 + $0x520] ss:$36 sps:$4 sm:$0xff]   ;;  %v3363_v47 = vsel %vm11765_vm13, %v3358_v16, %v3362_v12  ;;  %v8718_v53 = vpop.f32.mrf.mxu0  ;;  %v2820_v26 = vld [vmem:[#allocation3 + $0xa8] sm:$0xf] }
 0x297   :  { %v4602_v59 = vsel %vm11580_vm2, 0, %v4601_v7  ;;  %v11253_v9 = vld [vmem:[#allocation2 + $0x524] ss:$36 sps:$4 sm:$0xff]   ;;  %v4484_v50 = vsel %vm11598_vm7, %v3997_v60, %v4483_v14  ;;  %9006 = vmatmul.mubr.bf16.gmra.mxu1 %v11254_v0  ;;  %v3827_v32 = vld [vmem:[#allocation2 + $0x590] sm:$0x8]  ;;  %v3724_v38 = vsel %vm11771_vm14, %v3368_v46, %v3723_v52  ;;  %v12628_v2 = vadd.f32 %v8718_v53, %v8430_v10 }
 0x298   :  { %4603 = vst [vmem:[#allocation2 + $0xf0] sm:$0x1] %v4602_v59  ;;  %v4006_v19 = vsel %vm11592_vm6, %v3998_v35, %v4005_v37  ;;  %4485 = vst [vmem:[#allocation2 + $0x138] sm:$0xf] %v4484_v50  ;;  %8844 = vmatprep.mubr.bf16.mxu0 %v11253_v9  ;;  %v3828_v36 = vsel %vm11727_vm10, 0, %v3827_v32  ;;  %v8720_v29 = vpop.f32.mrf.mxu0  ;;  %v8433_v7 = vadd.f32 %v12208_v40, %v12034_v63  ;;  %v12632_v50 = vpop.f32.mrf.mxu1 }
 0x299   :  { %3722 = vst [vmem:[#allocation2 + $0x5b4] sm:$0xf] %v3363_v47  ;;  %3725 = vst [vmem:[#allocation2 + $0x5d8] sm:$0xf] %v3724_v38  ;;  %v2821_v14 = vld [vmem:[#allocation3 + $0xac] sm:$0xf]  ;;  %8845 = vmatmul.mubr.bf16.gmra.mxu0 %v11251_v27 }
 0x29a   :  { %4486 = vst [vmem:[#allocation2 + $0x15c] sm:$0xf] %v4006_v19  ;;  %3829 = vst [vmem:[#allocation2 + $0x590] sm:$0x8] %v3828_v36  ;;  %v2948_v12 = vld [vmem:[#allocation3 + $0xa8] sm:$0xf]  ;;  %v8721_v59 = vpop.f32.mrf.mxu0  ;;  %v8567_v29 = vpop.f32.mrf.mxu1 }
 0x29b   :  { %2884 = vst [vmem:[#allocation2 + $0x5f8] sm:$0xf] %v2820_v26  ;;  %2885 = vst [vmem:[#allocation2 + $0x61c] sm:$0xf] %v2821_v14  ;;  %v2949_v52 = vld [vmem:[#allocation3 + $0xac] sm:$0xf]  ;;  %v12634_v19 = vadd.f32 %v8721_v59, %v8433_v7 }
 0x29c   :  { %v3370_v0 = vshrl.u32 %v2948_v12, 16  ;;  %v3373_v58 = vshll.u32 %v2948_v12, 16  ;;  %v3379_v43 = vshll.u32 %v2949_v52, 16  ;;  %v3383_v57 = vshrl.u32 %v2949_v52, 16  ;;  %v3877_v20 = vld [vmem:[#allocation3 + $0x30] sm:$0xf]  ;;  %v8723_v53 = vpop.f32.mrf.mxu0  ;;  %v12640_v59 = vpop.f32.mrf.mxu1 }
 0x29d   :  { %v3878_v60 = vld [vmem:[#allocation3 + $0x34] sm:$0xf]  ;;  %v4008_v35 = vshrl.u32 %v3877_v20, 16  ;;  %v4011_v54 = vshll.u32 %v3877_v20, 16  ;;  %v4487_v10 = vld [vmem:[#allocation2 + $0x180] sm:$0xf] }
 0x29e   :  { %v3372_v16 = vrot.slane %v3370_v0, 4  ;;  %v3375_v27 = vrot.slane %v3373_v58, 5  ;;  %v3381_v46 = vrot.slane %v3379_v43, 5  ;;  %v3385_v37 = vrot.slane %v3383_v57, 4  ;;  %v4698_v9 = vld [vmem:[#allocation3 + $0x30] sm:$0xf]  ;;  %v8570_v53 = vpop.f32.mrf.mxu1 }
 0x29f   :  { %v11260_v32 = vld [vmem:[#allocation2 + $0xf0] ss:$36 sps:$4 sm:$0xff]   ;;  %v4010_v38 = vrot.slane %v4008_v35, 7  ;;  %4758 = vst [vmem:[#allocation2 + $0x184] sm:$0xf] %v4698_v9  ;;  %v4016_v14 = vshrl.u32 %v3878_v60, 16 }
 0x2a0   :  { %v11262_v47 = vld [vmem:[#allocation2 + $0xf4] ss:$36 sps:$4 sm:$0xff]   ;;  %v3376_v40 = vor.u32 %v3375_v27, %v3372_v16  ;;  %v3386_v36 = vor.u32 %v3385_v37, %v3381_v46  ;;  %v3727_v26 = vld [vmem:[#allocation2 + $0x620] sm:$0xf]  ;;  %v4019_v12 = vshll.u32 %v3878_v60, 16 }
 0x2a1   :  { %v4604_v63 = vld [vmem:[#allocation2 + $0x138] sm:$0x1]  ;;  %v4699_v52 = vld [vmem:[#allocation3 + $0x34] sm:$0xf]  ;;  %9013 = vmatprep.mubr.bf16.mxu1 %v11262_v47  ;;  %v3830_v0 = vld [vmem:[#allocation2 + $0x5d8] sm:$0x8]  ;;  %v4013_v43 = vor.u32 %v4011_v54, %v4010_v38  ;;  %v8438_v54 = vadd.f32 %v12228_v21, %v12042_v28 }
 0x2a2   :  { %v4605_v58 = vsel %vm11580_vm2, 0, %v4604_v63  ;;  %v4014_v57 = vrot.slane %v4010_v38, 4  ;;  %4759 = vst [vmem:[#allocation2 + $0x1a8] sm:$0xf] %v4699_v52  ;;  %v11257_v20 = vld [vmem:[#allocation2 + $0x568] ss:$36 sps:$4 sm:$0xff]   ;;  %9014 = vmatmul.mubr.bf16.gmra.mxu1 %v11260_v32 }
 0x2a3   :  { %v11259_v7 = vld [vmem:[#allocation2 + $0x56c] ss:$36 sps:$4 sm:$0xff]   ;;  %v3831_v35 = vsel %vm11727_vm10, 0, %v3830_v0  ;;  %4606 = vst [vmem:[#allocation2 + $0x138] sm:$0x1] %v4605_v58  ;;  %v3377_v60 = vrot.slane %v3376_v40, 4  ;;  %v4488_v37 = vsel %vm11598_vm7, %v4013_v43, %v4487_v10  ;;  %v8726_v58 = vpop.f32.mrf.mxu0 }
 0x2a4   :  { %3832 = vst [vmem:[#allocation2 + $0x5d8] sm:$0x8] %v3831_v35  ;;  %v3387_v16 = vrot.slane %v3386_v36, 4  ;;  %v4018_v27 = vrot.slane %v4016_v14, 7  ;;  %v2822_v9 = vld [vmem:[#allocation3 + $0xb0] sm:$0xf]  ;;  %8852 = vmatprep.mubr.bf16.mxu0 %v11259_v7 }
 0x2a5   :  { %4489 = vst [vmem:[#allocation2 + $0x180] sm:$0xf] %v4488_v37  ;;  %v2823_v32 = vld [vmem:[#allocation3 + $0xb4] sm:$0xf]  ;;  %2886 = vst [vmem:[#allocation2 + $0x640] sm:$0xf] %v2822_v9  ;;  %8853 = vmatmul.mubr.bf16.gmra.mxu0 %v11257_v20  ;;  %v3382_v63 = vsel %vm11765_vm13, %v3377_v60, %v3381_v46  ;;  %v8728_v37 = vpop.f32.mrf.mxu0  ;;  %v8441_v9 = vadd.f32 %v12238_v31, %v12050_v55 }
 0x2a6   :  { %v2950_v47 = vld [vmem:[#allocation3 + $0xb0] sm:$0xf]  ;;  %v2951_v38 = vld [vmem:[#allocation3 + $0xb4] sm:$0xf]  ;;  %v3728_v40 = vsel %vm11771_vm14, %v3387_v16, %v3727_v26  ;;  %v4021_v36 = vor.u32 %v4019_v12, %v4018_v27  ;;  %2887 = vst [vmem:[#allocation2 + $0x664] sm:$0xf] %v2823_v32 }
 0x2a7   :  { %v3389_v10 = vshrl.u32 %v2950_v47, 16  ;;  %v3879_v14 = vld [vmem:[#allocation3 + $0x38] sm:$0xf]  ;;  %3726 = vst [vmem:[#allocation2 + $0x5fc] sm:$0xf] %v3382_v63  ;;  %v3392_v28 = vshll.u32 %v2950_v47, 16 }
 0x2a8   :  { %3729 = vst [vmem:[#allocation2 + $0x620] sm:$0xf] %v3728_v40  ;;  %v3398_v21 = vshll.u32 %v2951_v38, 16  ;;  %v3402_v52 = vshrl.u32 %v2951_v38, 16  ;;  %v3880_v29 = vld [vmem:[#allocation3 + $0x3c] sm:$0xf]  ;;  %v4022_v43 = vsel %vm11592_vm6, %v4014_v57, %v4021_v36  ;;  %v12654_v57 = vadd.f32 %v8726_v58, %v8438_v54 }
 0x2a9   :  { %v4024_v0 = vshrl.u32 %v3879_v14, 16  ;;  %v3391_v20 = vrot.slane %v3389_v10, 4  ;;  %v4027_v46 = vshll.u32 %v3879_v14, 16  ;;  %v4032_v7 = vshrl.u32 %v3880_v29, 16  ;;  %v4491_v35 = vld [vmem:[#allocation2 + $0x1c8] sm:$0xf] }
 0x2aa   :  { %4490 = vst [vmem:[#allocation2 + $0x1a4] sm:$0xf] %v4022_v43  ;;  %v3394_v26 = vrot.slane %v3392_v28, 5  ;;  %v3400_v12 = vrot.slane %v3398_v21, 5  ;;  %v3404_v60 = vrot.slane %v3402_v52, 4  ;;  %v8729_v28 = vpop.f32.mrf.mxu0  ;;  %v12656_v21 = vpop.f32.mrf.mxu1  ;;  %v4035_v43 = vshll.u32 %v3880_v29, 16 }
 0x2ab   :  { %v4026_v16 = vrot.slane %v4024_v0, 7  ;;  %v4700_v27 = vld [vmem:[#allocation3 + $0x38] sm:$0xf]  ;;  %v11268_v47 = vld [vmem:[#allocation2 + $0x13c] ss:$36 sps:$4 sm:$0xff]   ;;  %v4034_v53 = vrot.slane %v4032_v7, 7  ;;  %v12658_v31 = vadd.f32 %v8729_v28, %v8441_v9 }
 0x2ac   :  { %v11266_v32 = vld [vmem:[#allocation2 + $0x138] ss:$36 sps:$4 sm:$0xff]   ;;  %v3731_v38 = vld [vmem:[#allocation2 + $0x668] sm:$0xf]  ;;  %4760 = vst [vmem:[#allocation2 + $0x1cc] sm:$0xf] %v4700_v27  ;;  %v3395_v36 = vor.u32 %v3394_v26, %v3391_v20  ;;  %v3405_v10 = vor.u32 %v3404_v60, %v3400_v12  ;;  %9021 = vmatprep.mubr.bf16.mxu1 %v11268_v47  ;;  %v8731_v26 = vpop.f32.mrf.mxu0  ;;  %v8575_v60 = vpop.f32.mrf.mxu1 }
 0x2ad   :  { %v11263_v63 = vld [vmem:[#allocation2 + $0x5b0] ss:$36 sps:$4 sm:$0xff]   ;;  %v4029_v14 = vor.u32 %v4027_v46, %v4026_v16  ;;  %v4607_v52 = vld [vmem:[#allocation2 + $0x180] sm:$0x1]  ;;  %v4030_v0 = vrot.slane %v4026_v16, 4  ;;  %9022 = vmatmul.mubr.bf16.gmra.mxu1 %v11266_v32  ;;  %v4037_v29 = vor.u32 %v4035_v43, %v4034_v53 }
 0x2ae   :  { %v11265_v40 = vld [vmem:[#allocation2 + $0x5b4] ss:$36 sps:$4 sm:$0xff]   ;;  %v4701_v55 = vld [vmem:[#allocation3 + $0x3c] sm:$0xf]  ;;  %v4608_v54 = vsel %vm11580_vm2, 0, %v4607_v52  ;;  %v3396_v58 = vrot.slane %v3395_v36, 4 }
 0x2af   :  { %8860 = vmatprep.mubr.bf16.mxu0 %v11265_v40  ;;  %v3406_v7 = vrot.slane %v3405_v10, 4  ;;  %v4492_v20 = vsel %vm11598_vm7, %v4029_v14, %v4491_v35  ;;  %4761 = vst [vmem:[#allocation2 + $0x1f0] sm:$0xf] %v4701_v55  ;;  %v2824_v46 = vld [vmem:[#allocation3 + $0xb8] sm:$0xf]  ;;  %v12670_v40 = vpop.f32.mrf.mxu1  ;;  %v4038_v53 = vsel %vm11592_vm6, %v4030_v0, %v4037_v29 }
 0x2b0   :  { %8861 = vmatmul.mubr.bf16.gmra.mxu0 %v11263_v63  ;;  %v3833_v16 = vld [vmem:[#allocation2 + $0x620] sm:$0x8]  ;;  %4609 = vst [vmem:[#allocation2 + $0x180] sm:$0x1] %v4608_v54  ;;  %4493 = vst [vmem:[#allocation2 + $0x1c8] sm:$0xf] %v4492_v20  ;;  %v3401_v9 = vsel %vm11765_vm13, %v3396_v58, %v3400_v12  ;;  %v8446_v12 = vadd.f32 %v12255_v39, %v12058_v30 }
 0x2b1   :  { %v2825_v27 = vld [vmem:[#allocation3 + $0xbc] sm:$0xf]  ;;  %2888 = vst [vmem:[#allocation2 + $0x688] sm:$0xf] %v2824_v46  ;;  %v3834_v37 = vsel %vm11727_vm10, 0, %v3833_v16  ;;  %v3732_v35 = vsel %vm11771_vm14, %v3406_v7, %v3731_v38  ;;  %v8578_v52 = vpop.f32.mrf.mxu1  ;;  %v8734_v16 = vpop.f32.mrf.mxu0 }
 0x2b2   :  { %2889 = vst [vmem:[#allocation2 + $0x6ac] sm:$0xf] %v2825_v27  ;;  %v2952_v32 = vld [vmem:[#allocation3 + $0xb8] sm:$0xf]  ;;  %v2953_v47 = vld [vmem:[#allocation3 + $0xbc] sm:$0xf]  ;;  %v12676_v39 = vadd.f32 %v8734_v16, %v8446_v12 }
 0x2b3   :  { %3835 = vst [vmem:[#allocation2 + $0x620] sm:$0x8] %v3834_v37  ;;  %3730 = vst [vmem:[#allocation2 + $0x644] sm:$0xf] %v3401_v9  ;;  %v3408_v63 = vshrl.u32 %v2952_v32, 16  ;;  %v3411_v36 = vshll.u32 %v2952_v32, 16 }
 0x2b4   :  { %3733 = vst [vmem:[#allocation2 + $0x668] sm:$0xf] %v3732_v35  ;;  %v3417_v10 = vshll.u32 %v2953_v47, 16  ;;  %4494 = vst [vmem:[#allocation2 + $0x1ec] sm:$0xf] %v4038_v53  ;;  %v3421_v14 = vshrl.u32 %v2953_v47, 16 }
 0x2b5   :  { %v3881_v38 = vld [vmem:[#allocation3 + $0x40] sm:$0xf]  ;;  %v3882_v28 = vld [vmem:[#allocation3 + $0x44] sm:$0xf]  ;;  %v3410_v43 = vrot.slane %v3408_v63, 4  ;;  %v3413_v55 = vrot.slane %v3411_v36, 5  ;;  %v8736_v63 = vpop.f32.mrf.mxu0  ;;  %v8449_v36 = vadd.f32 %v12261_v24, %v12069_v61 }
 0x2b6   :  { %v3419_v54 = vrot.slane %v3417_v10, 5  ;;  %v4040_v58 = vshrl.u32 %v3881_v38, 16  ;;  %v3423_v7 = vrot.slane %v3421_v14, 4  ;;  %v4043_v20 = vshll.u32 %v3881_v38, 16  ;;  %v4495_v0 = vld [vmem:[#allocation2 + $0x210] sm:$0xf] }
 0x2b7   :  { %v4048_v46 = vshrl.u32 %v3882_v28, 16  ;;  %v4051_v26 = vshll.u32 %v3882_v28, 16  ;;  %v4702_v60 = vld [vmem:[#allocation3 + $0x40] sm:$0xf]  ;;  %v3414_v29 = vor.u32 %v3413_v55, %v3410_v43  ;;  %v4703_v37 = vld [vmem:[#allocation3 + $0x44] sm:$0xf] }
 0x2b8   :  { %v4042_v27 = vrot.slane %v4040_v58, 7  ;;  %4762 = vst [vmem:[#allocation2 + $0x214] sm:$0xf] %v4702_v60  ;;  %v2826_v30 = vld [vmem:[#allocation3 + $0xc0] sm:$0xf]  ;;  %v3424_v32 = vor.u32 %v3423_v7, %v3419_v54  ;;  %v8737_v7 = vpop.f32.mrf.mxu0 }
 0x2b9   :  { %v11273_v9 = vld [vmem:[#allocation2 + $0x180] ss:$36 sps:$4 sm:$0xff]   ;;  %v3735_v47 = vld [vmem:[#allocation2 + $0x6b0] sm:$0xf]  ;;  %v4050_v53 = vrot.slane %v4048_v46, 7  ;;  %v3415_v14 = vrot.slane %v3414_v29, 4  ;;  %v12686_v60 = vadd.f32 %v8737_v7, %v8449_v36 }
 0x2ba   :  { %v11275_v35 = vld [vmem:[#allocation2 + $0x184] ss:$36 sps:$4 sm:$0xff]   ;;  %4763 = vst [vmem:[#allocation2 + $0x238] sm:$0xf] %v4703_v37  ;;  %2890 = vst [vmem:[#allocation2 + $0x6d0] sm:$0xf] %v2826_v30  ;;  %v4045_v38 = vor.u32 %v4043_v20, %v4042_v27  ;;  %v8739_v37 = vpop.f32.mrf.mxu0 }
 0x2bb   :  { %v4610_v10 = vld [vmem:[#allocation2 + $0x1c8] sm:$0x1]  ;;  %v4046_v28 = vrot.slane %v4042_v27, 4  ;;  %v2827_v52 = vld [vmem:[#allocation3 + $0xc4] sm:$0xf]  ;;  %9029 = vmatprep.mubr.bf16.mxu1 %v11275_v35  ;;  %v4053_v58 = vor.u32 %v4051_v26, %v4050_v53  ;;  %v3420_v61 = vsel %vm11765_vm13, %v3415_v14, %v3419_v54  ;;  %v3425_v24 = vrot.slane %v3424_v32, 4  ;;  %v12694_v35 = vpop.f32.mrf.mxu1 }
 0x2bc   :  { %v11270_v43 = vld [vmem:[#allocation2 + $0x5f8] ss:$36 sps:$4 sm:$0xff]   ;;  %v4611_v12 = vsel %vm11580_vm2, 0, %v4610_v10  ;;  %2891 = vst [vmem:[#allocation2 + $0x6f4] sm:$0xf] %v2827_v52  ;;  %9030 = vmatmul.mubr.bf16.gmra.mxu1 %v11273_v9  ;;  %v4496_v20 = vsel %vm11598_vm7, %v4045_v38, %v4495_v0 }
 0x2bd   :  { %v11272_v55 = vld [vmem:[#allocation2 + $0x5fc] ss:$36 sps:$4 sm:$0xff]   ;;  %v3836_v46 = vld [vmem:[#allocation2 + $0x668] sm:$0x8]  ;;  %4612 = vst [vmem:[#allocation2 + $0x1c8] sm:$0x1] %v4611_v12  ;;  %v4054_v26 = vsel %vm11592_vm6, %v4046_v28, %v4053_v58  ;;  %v3736_v54 = vsel %vm11771_vm14, %v3425_v24, %v3735_v47  ;;  %v8583_v28 = vpop.f32.mrf.mxu1 }
 0x2be   :  { %8868 = vmatprep.mubr.bf16.mxu0 %v11272_v55  ;;  %v3837_v16 = vsel %vm11727_vm10, 0, %v3836_v46  ;;  %3734 = vst [vmem:[#allocation2 + $0x68c] sm:$0xf] %v3420_v61  ;;  %4497 = vst [vmem:[#allocation2 + $0x210] sm:$0xf] %v4496_v20 }
 0x2bf   :  { %v2954_v29 = vld [vmem:[#allocation3 + $0xc0] sm:$0xf]  ;;  %v2955_v27 = vld [vmem:[#allocation3 + $0xc4] sm:$0xf]  ;;  %8869 = vmatmul.mubr.bf16.gmra.mxu0 %v11270_v43  ;;  %3838 = vst [vmem:[#allocation2 + $0x668] sm:$0x8] %v3837_v16  ;;  %v12696_v24 = vpop.f32.mrf.mxu1 }
 0x2c0   :  { %4498 = vst [vmem:[#allocation2 + $0x234] sm:$0xf] %v4054_v26  ;;  %v3427_v0 = vshrl.u32 %v2954_v29, 16  ;;  %v3430_v30 = vshll.u32 %v2954_v29, 16  ;;  %v3436_v9 = vshll.u32 %v2955_v27, 16  ;;  %v3440_v32 = vshrl.u32 %v2955_v27, 16 }
 0x2c1   :  { %3737 = vst [vmem:[#allocation2 + $0x6b0] sm:$0xf] %v3736_v54  ;;  %v3883_v53 = vld [vmem:[#allocation3 + $0x48] sm:$0xf]  ;;  %v3884_v63 = vld [vmem:[#allocation3 + $0x4c] sm:$0xf] }
 0x2c2   :  { %v3429_v36 = vrot.slane %v3427_v0, 4  ;;  %v3432_v10 = vrot.slane %v3430_v30, 5  ;;  %v3438_v14 = vrot.slane %v3436_v9, 5  ;;  %v4056_v38 = vshrl.u32 %v3883_v53, 16  ;;  %v4499_v47 = vld [vmem:[#allocation2 + $0x258] sm:$0xf]  ;;  %v8586_v9 = vpop.f32.mrf.mxu1 }
 0x2c3   :  { %v3442_v52 = vrot.slane %v3440_v32, 4  ;;  %v4059_v43 = vshll.u32 %v3883_v53, 16  ;;  %v4064_v55 = vshrl.u32 %v3884_v63, 16  ;;  %v4067_v12 = vshll.u32 %v3884_v63, 16  ;;  %v4704_v58 = vld [vmem:[#allocation3 + $0x48] sm:$0xf] }
 0x2c4   :  { %v3433_v7 = vor.u32 %v3432_v10, %v3429_v36  ;;  %v4058_v46 = vrot.slane %v4056_v38, 7  ;;  %v4705_v61 = vld [vmem:[#allocation3 + $0x4c] sm:$0xf]  ;;  %4764 = vst [vmem:[#allocation2 + $0x25c] sm:$0xf] %v4704_v58  ;;  %v12716_v9 = vpop.f32.mrf.mxu1 }
 0x2c5   :  { %v11279_v20 = vld [vmem:[#allocation2 + $0x1c8] ss:$36 sps:$4 sm:$0xff]   ;;  %v3443_v26 = vor.u32 %v3442_v52, %v3438_v14  ;;  %v3739_v29 = vld [vmem:[#allocation2 + $0x6f8] sm:$0xf]  ;;  %v4066_v27 = vrot.slane %v4064_v55, 7 }
 0x2c6   :  { %v11281_v16 = vld [vmem:[#allocation2 + $0x1cc] ss:$36 sps:$4 sm:$0xff]   ;;  %4765 = vst [vmem:[#allocation2 + $0x280] sm:$0xf] %v4705_v61  ;;  %v3434_v54 = vrot.slane %v3433_v7, 4  ;;  %v4061_v0 = vor.u32 %v4059_v43, %v4058_v46  ;;  %v4062_v30 = vrot.slane %v4058_v46, 4  ;;  %v8454_v7 = vadd.f32 %v12281_v33, %v12081_v41  ;;  %v8742_v61 = vpop.f32.mrf.mxu0 }
 0x2c7   :  { %v4613_v37 = vld [vmem:[#allocation2 + $0x210] sm:$0x1]  ;;  %v11276_v32 = vld [vmem:[#allocation2 + $0x640] ss:$36 sps:$4 sm:$0xff]   ;;  %9037 = vmatprep.mubr.bf16.mxu1 %v11281_v16  ;;  %v4069_v36 = vor.u32 %v4067_v12, %v4066_v27  ;;  %v3444_v28 = vrot.slane %v3443_v26, 4  ;;  %v8457_v41 = vadd.f32 %v12287_v3, %v12093_v17  ;;  %v8591_v17 = vpop.f32.mrf.mxu1 }
 0x2c8   :  { %v11278_v53 = vld [vmem:[#allocation2 + $0x644] ss:$36 sps:$4 sm:$0xff]   ;;  %v4614_v63 = vsel %vm11580_vm2, 0, %v4613_v37  ;;  %9038 = vmatmul.mubr.bf16.gmra.mxu1 %v11279_v20  ;;  %v3839_v10 = vld [vmem:[#allocation2 + $0x6b0] sm:$0x8]  ;;  %v3439_v38 = vsel %vm11765_vm13, %v3434_v54, %v3438_v14  ;;  %v4500_v52 = vsel %vm11598_vm7, %v4061_v0, %v4499_v47 }
 0x2c9   :  { %4615 = vst [vmem:[#allocation2 + $0x210] sm:$0x1] %v4614_v63  ;;  %8876 = vmatprep.mubr.bf16.mxu0 %v11278_v53  ;;  %v3840_v43 = vsel %vm11727_vm10, 0, %v3839_v10  ;;  %3738 = vst [vmem:[#allocation2 + $0x6d4] sm:$0xf] %v3439_v38  ;;  %v4070_v55 = vsel %vm11592_vm6, %v4062_v30, %v4069_v36  ;;  %v3740_v14 = vsel %vm11771_vm14, %v3444_v28, %v3739_v29  ;;  %v8744_v29 = vpop.f32.mrf.mxu0 }
 0x2ca   :  { %4501 = vst [vmem:[#allocation2 + $0x258] sm:$0xf] %v4500_v52  ;;  %v2828_v12 = vld [vmem:[#allocation3 + $0xc8] sm:$0xf]  ;;  %v2829_v58 = vld [vmem:[#allocation3 + $0xcc] sm:$0xf]  ;;  %8877 = vmatmul.mubr.bf16.gmra.mxu0 %v11276_v32  ;;  %v12714_v30 = vadd.f32 %v8742_v61, %v8454_v7 }
 0x2cb   :  { %3841 = vst [vmem:[#allocation2 + $0x6b0] sm:$0x8] %v3840_v43  ;;  %4502 = vst [vmem:[#allocation2 + $0x27c] sm:$0xf] %v4070_v55  ;;  %v2956_v47 = vld [vmem:[#allocation3 + $0xc8] sm:$0xf]  ;;  %v8745_v3 = vpop.f32.mrf.mxu0 }
 0x2cc   :  { %2892 = vst [vmem:[#allocation2 + $0x718] sm:$0xf] %v2828_v12  ;;  %2893 = vst [vmem:[#allocation2 + $0x73c] sm:$0xf] %v2829_v58  ;;  %v2957_v46 = vld [vmem:[#allocation3 + $0xcc] sm:$0xf] }
 0x2cd   :  { %3741 = vst [vmem:[#allocation2 + $0x6f8] sm:$0xf] %v3740_v14  ;;  %v3446_v20 = vshrl.u32 %v2956_v47, 16  ;;  %v3449_v16 = vshll.u32 %v2956_v47, 16  ;;  %v3455_v26 = vshll.u32 %v2957_v46, 16  ;;  %v3459_v27 = vshrl.u32 %v2957_v46, 16 }
 0x2ce   :  { %v3885_v37 = vld [vmem:[#allocation3 + $0x50] sm:$0xf]  ;;  %v3886_v33 = vld [vmem:[#allocation3 + $0x54] sm:$0xf]  ;;  %v4503_v10 = vld [vmem:[#allocation2 + $0x2a0] sm:$0xf]  ;;  %v12718_v46 = vadd.f32 %v8745_v3, %v8457_v41  ;;  %v8462_v3 = vadd.f32 %v12309_v11, %v12101_v51 }
 0x2cf   :  { %v4072_v54 = vshrl.u32 %v3885_v37, 16  ;;  %v4075_v0 = vshll.u32 %v3885_v37, 16  ;;  %v3448_v32 = vrot.slane %v3446_v20, 4  ;;  %v3451_v53 = vrot.slane %v3449_v16, 5  ;;  %v4706_v38 = vld [vmem:[#allocation3 + $0x50] sm:$0xf]  ;;  %v12720_v37 = vpop.f32.mrf.mxu1 }
 0x2d0   :  { %v3457_v63 = vrot.slane %v3455_v26, 5  ;;  %v3461_v36 = vrot.slane %v3459_v27, 4  ;;  %v4080_v52 = vshrl.u32 %v3886_v33, 16  ;;  %v4083_v43 = vshll.u32 %v3886_v33, 16  ;;  %v4707_v55 = vld [vmem:[#allocation3 + $0x54] sm:$0xf]  ;;  %v8747_v27 = vpop.f32.mrf.mxu0 }
 0x2d1   :  { %v4074_v28 = vrot.slane %v4072_v54, 7  ;;  %4766 = vst [vmem:[#allocation2 + $0x2a4] sm:$0xf] %v4706_v38  ;;  %v11285_v12 = vld [vmem:[#allocation2 + $0x210] ss:$36 sps:$4 sm:$0xff]   ;;  %v3452_v7 = vor.u32 %v3451_v53, %v3448_v32  ;;  %v8594_v38 = vpop.f32.mrf.mxu1 }
 0x2d2   :  { %v11287_v58 = vld [vmem:[#allocation2 + $0x214] ss:$36 sps:$4 sm:$0xff]   ;;  %v3462_v14 = vor.u32 %v3461_v36, %v3457_v63  ;;  %v3743_v47 = vld [vmem:[#allocation2 + $0x740] sm:$0xf]  ;;  %4767 = vst [vmem:[#allocation2 + $0x2c8] sm:$0xf] %v4707_v55 }
 0x2d3   :  { %v4616_v61 = vld [vmem:[#allocation2 + $0x258] sm:$0x1]  ;;  %v4077_v20 = vor.u32 %v4075_v0, %v4074_v28  ;;  %v4078_v16 = vrot.slane %v4074_v28, 4  ;;  %v4082_v26 = vrot.slane %v4080_v52, 7  ;;  %v11282_v33 = vld [vmem:[#allocation2 + $0x688] ss:$36 sps:$4 sm:$0xff]   ;;  %9045 = vmatprep.mubr.bf16.mxu1 %v11287_v58 }
 0x2d4   :  { %v11284_v54 = vld [vmem:[#allocation2 + $0x68c] ss:$36 sps:$4 sm:$0xff]   ;;  %v4617_v29 = vsel %vm11580_vm2, 0, %v4616_v61  ;;  %9046 = vmatmul.mubr.bf16.gmra.mxu1 %v11285_v12  ;;  %v3842_v32 = vld [vmem:[#allocation2 + $0x6f8] sm:$0x8]  ;;  %v3453_v53 = vrot.slane %v3452_v7, 4  ;;  %v8750_v7 = vpop.f32.mrf.mxu0 }
 0x2d5   :  { %4618 = vst [vmem:[#allocation2 + $0x258] sm:$0x1] %v4617_v29  ;;  %v3463_v36 = vrot.slane %v3462_v14, 4  ;;  %v4085_v41 = vor.u32 %v4083_v43, %v4082_v26  ;;  %v4504_v0 = vsel %vm11598_vm7, %v4077_v20, %v4503_v10  ;;  %8884 = vmatprep.mubr.bf16.mxu0 %v11284_v54  ;;  %v3843_v28 = vsel %vm11727_vm10, 0, %v3842_v32  ;;  %v2830_v52 = vld [vmem:[#allocation3 + $0xd0] sm:$0xf] }
 0x2d6   :  { %4505 = vst [vmem:[#allocation2 + $0x2a0] sm:$0xf] %v4504_v0  ;;  %v2831_v55 = vld [vmem:[#allocation3 + $0xd4] sm:$0xf]  ;;  %8885 = vmatmul.mubr.bf16.gmra.mxu0 %v11282_v33  ;;  %3844 = vst [vmem:[#allocation2 + $0x6f8] sm:$0x8] %v3843_v28  ;;  %v3458_v17 = vsel %vm11765_vm13, %v3453_v53, %v3457_v63  ;;  %v8465_v63 = vadd.f32 %v12319_v48, %v12109_v15  ;;  %v8752_v33 = vpop.f32.mrf.mxu0 }
 0x2d7   :  { %v3744_v43 = vsel %vm11771_vm14, %v3463_v36, %v3743_v47  ;;  %v4086_v10 = vsel %vm11592_vm6, %v4078_v16, %v4085_v41  ;;  %2894 = vst [vmem:[#allocation2 + $0x760] sm:$0xf] %v2830_v52  ;;  %2895 = vst [vmem:[#allocation2 + $0x784] sm:$0xf] %v2831_v55  ;;  %v2958_v12 = vld [vmem:[#allocation3 + $0xd0] sm:$0xf]  ;;  %v12738_v16 = vadd.f32 %v8750_v7, %v8462_v3 }
 0x2d8   :  { %v2959_v58 = vld [vmem:[#allocation3 + $0xd4] sm:$0xf]  ;;  %3742 = vst [vmem:[#allocation2 + $0x71c] sm:$0xf] %v3458_v17  ;;  %3745 = vst [vmem:[#allocation2 + $0x740] sm:$0xf] %v3744_v43  ;;  %v8753_v55 = vpop.f32.mrf.mxu0  ;;  %v12740_v17 = vpop.f32.mrf.mxu1 }
 0x2d9   :  { %4506 = vst [vmem:[#allocation2 + $0x2c4] sm:$0xf] %v4086_v10  ;;  %v3465_v51 = vshrl.u32 %v2958_v12, 16  ;;  %v3468_v11 = vshll.u32 %v2958_v12, 16  ;;  %v3474_v14 = vshll.u32 %v2959_v58, 16  ;;  %v3478_v61 = vshrl.u32 %v2959_v58, 16 }
 0x2da   :  { %v3887_v20 = vld [vmem:[#allocation3 + $0x58] sm:$0xf]  ;;  %v3888_v47 = vld [vmem:[#allocation3 + $0x5c] sm:$0xf]  ;;  %v4507_v36 = vld [vmem:[#allocation2 + $0x2e8] sm:$0xf]  ;;  %v12742_v12 = vadd.f32 %v8753_v55, %v8465_v63 }
 0x2db   :  { %v4088_v26 = vshrl.u32 %v3887_v20, 16  ;;  %v4091_v27 = vshll.u32 %v3887_v20, 16  ;;  %v3467_v54 = vrot.slane %v3465_v51, 4  ;;  %v3470_v29 = vrot.slane %v3468_v11, 5  ;;  %v4708_v41 = vld [vmem:[#allocation3 + $0x58] sm:$0xf]  ;;  %v8599_v20 = vpop.f32.mrf.mxu1 }
 0x2dc   :  { %v3476_v32 = vrot.slane %v3474_v14, 5  ;;  %v3480_v53 = vrot.slane %v3478_v61, 4  ;;  %v4096_v38 = vshrl.u32 %v3888_v47, 16  ;;  %v4099_v28 = vshll.u32 %v3888_v47, 16  ;;  %v4709_v52 = vld [vmem:[#allocation3 + $0x5c] sm:$0xf]  ;;  %v8755_v61 = vpop.f32.mrf.mxu0 }
 0x2dd   :  { %v4090_v0 = vrot.slane %v4088_v26, 7  ;;  %4768 = vst [vmem:[#allocation2 + $0x2ec] sm:$0xf] %v4708_v41  ;;  %13689 = vst [vmem:[#allocation82_spill] sm:$0xff] %v12740_v17  ;;  %v11291_v15 = vld [vmem:[#allocation2 + $0x258] ss:$36 sps:$4 sm:$0xff]   ;;  %v3471_v43 = vor.u32 %v3470_v29, %v3467_v54  ;;  %v12748_v41 = vpop.f32.mrf.mxu1 }
 0x2de   :  { %v11293_v48 = vld [vmem:[#allocation2 + $0x25c] ss:$36 sps:$4 sm:$0xff]   ;;  %v3481_v3 = vor.u32 %v3480_v53, %v3476_v32  ;;  %v3747_v10 = vld [vmem:[#allocation2 + $0x788] sm:$0xf]  ;;  %4769 = vst [vmem:[#allocation2 + $0x310] sm:$0xf] %v4709_v52 }
 0x2df   :  { %13690 = vst [vmem:[#allocation83_spill] sm:$0xff] %v12742_v12  ;;  %v4619_v58 = vld [vmem:[#allocation2 + $0x2a0] sm:$0x1]  ;;  %v4093_v7 = vor.u32 %v4091_v27, %v4090_v0  ;;  %v4094_v51 = vrot.slane %v4090_v0, 4  ;;  %v4098_v11 = vrot.slane %v4096_v38, 7  ;;  %9053 = vmatprep.mubr.bf16.mxu1 %v11293_v48  ;;  %v3472_v29 = vrot.slane %v3471_v43, 4  ;;  %v8602_v43 = vpop.f32.mrf.mxu1 }
 0x2e0   :  { %v2832_v14 = vld [vmem:[#allocation3 + $0xd8] sm:$0xf]  ;;  %v11288_v47 = vld [vmem:[#allocation2 + $0x6d0] ss:$36 sps:$4 sm:$0xff]   ;;  %v4620_v33 = vsel %vm11580_vm2, 0, %v4619_v58  ;;  %9054 = vmatmul.mubr.bf16.gmra.mxu1 %v11291_v15  ;;  %v3482_v63 = vrot.slane %v3481_v3, 4 }
 0x2e1   :  { %v11290_v26 = vld [vmem:[#allocation2 + $0x6d4] ss:$36 sps:$4 sm:$0xff]   ;;  %2896 = vst [vmem:[#allocation2 + $0x7a8] sm:$0xf] %v2832_v14  ;;  %v3845_v54 = vld [vmem:[#allocation2 + $0x740] sm:$0x8]  ;;  %v4101_v53 = vor.u32 %v4099_v28, %v4098_v11  ;;  %v4508_v27 = vsel %vm11598_vm7, %v4093_v7, %v4507_v36  ;;  %v3477_v55 = vsel %vm11765_vm13, %v3472_v29, %v3476_v32 }
 0x2e2   :  { %4621 = vst [vmem:[#allocation2 + $0x2a0] sm:$0x1] %v4620_v33  ;;  %13691 = vst [vmem:[#allocation84_spill] sm:$0xff] %v12748_v41  ;;  %8892 = vmatprep.mubr.bf16.mxu0 %v11290_v26  ;;  %v3846_v0 = vsel %vm11727_vm10, 0, %v3845_v54  ;;  %v2833_v38 = vld [vmem:[#allocation3 + $0xdc] sm:$0xf]  ;;  %v3748_v28 = vsel %vm11771_vm14, %v3482_v63, %v3747_v10  ;;  %v8758_v26 = vpop.f32.mrf.mxu0 }
 0x2e3   :  { %4509 = vst [vmem:[#allocation2 + $0x2e8] sm:$0xf] %v4508_v27  ;;  %v2960_v52 = vld [vmem:[#allocation3 + $0xd8] sm:$0xf]  ;;  %8893 = vmatmul.mubr.bf16.gmra.mxu0 %v11288_v47  ;;  %3847 = vst [vmem:[#allocation2 + $0x740] sm:$0x8] %v3846_v0  ;;  %v4102_v36 = vsel %vm11592_vm6, %v4094_v51, %v4101_v53 }
 0x2e4   :  { %2897 = vst [vmem:[#allocation2 + $0x7cc] sm:$0xf] %v2833_v38  ;;  %v2961_v15 = vld [vmem:[#allocation3 + $0xdc] sm:$0xf]  ;;  %v3484_v48 = vshrl.u32 %v2960_v52, 16  ;;  %v3487_v3 = vshll.u32 %v2960_v52, 16 }
 0x2e5   :  { %3746 = vst [vmem:[#allocation2 + $0x764] sm:$0xf] %v3477_v55  ;;  %3749 = vst [vmem:[#allocation2 + $0x788] sm:$0xf] %v3748_v28  ;;  %v3493_v58 = vshll.u32 %v2961_v15, 16  ;;  %v3497_v7 = vshrl.u32 %v2961_v15, 16  ;;  %v8760_v55 = vpop.f32.mrf.mxu0 }
 0x2e6   :  { %4510 = vst [vmem:[#allocation2 + $0x30c] sm:$0xf] %v4102_v36  ;;  %v3889_v11 = vld [vmem:[#allocation3 + $0x60] sm:$0xf]  ;;  %v13692_v14 = vld [vmem:[#allocation48_spill] sm:$0xff]  ;;  %v3486_v61 = vrot.slane %v3484_v48, 4 }
 0x2e7   :  { %v8470_v32 = vadd.f32 %v13692_v14, %v12119_v8  ;;  %v3890_v20 = vld [vmem:[#allocation3 + $0x64] sm:$0xf]  ;;  %v4104_v10 = vshrl.u32 %v3889_v11, 16  ;;  %v4107_v47 = vshll.u32 %v3889_v11, 16  ;;  %v3489_v51 = vrot.slane %v3487_v3, 5  ;;  %v13694_v28 = vld [vmem:[#allocation30_spill] sm:$0xff]  ;;  %v8761_v41 = vpop.f32.mrf.mxu0 }
 0x2e8   :  { %v3495_v33 = vrot.slane %v3493_v58, 5  ;;  %v3499_v54 = vrot.slane %v3497_v7, 4  ;;  %v4112_v29 = vshrl.u32 %v3890_v20, 16  ;;  %v4511_v63 = vld [vmem:[#allocation2 + $0x330] sm:$0xf]  ;;  %v4115_v27 = vshll.u32 %v3890_v20, 16 }
 0x2e9   :  { %v4106_v53 = vrot.slane %v4104_v10, 7  ;;  %v4710_v0 = vld [vmem:[#allocation3 + $0x60] sm:$0xf]  ;;  %v4711_v38 = vld [vmem:[#allocation3 + $0x64] sm:$0xf]  ;;  %v12760_v52 = vadd.f32 %v8758_v26, %v8470_v32  ;;  %v3490_v43 = vor.u32 %v3489_v51, %v3486_v61 }
 0x2ea   :  { %v13695_v36 = vld [vmem:[#allocation50_spill] sm:$0xff]  ;;  %v11300_v48 = vld [vmem:[#allocation2 + $0x2a4] ss:$36 sps:$4 sm:$0xff]   ;;  %v3500_v11 = vor.u32 %v3499_v54, %v3495_v33  ;;  %v3751_v14 = vld [vmem:[#allocation2 + $0x7d0] sm:$0xf]  ;;  %v4114_v3 = vrot.slane %v4112_v29, 7  ;;  %v8763_v29 = vpop.f32.mrf.mxu0 }
 0x2eb   :  { %13693 = vst [vmem:[#allocation48_spill] sm:$0xff] %v12760_v52  ;;  %v8473_v8 = vadd.f32 %v13695_v36, %v13694_v28  ;;  %v11298_v15 = vld [vmem:[#allocation2 + $0x2a0] ss:$36 sps:$4 sm:$0xff]   ;;  %4770 = vst [vmem:[#allocation2 + $0x334] sm:$0xf] %v4710_v0  ;;  %v4109_v7 = vor.u32 %v4107_v47, %v4106_v53  ;;  %v4110_v10 = vrot.slane %v4106_v53, 4  ;;  %9061 = vmatprep.mubr.bf16.mxu1 %v11300_v48 }
 0x2ec   :  { %4771 = vst [vmem:[#allocation2 + $0x358] sm:$0xf] %v4711_v38  ;;  %v4622_v58 = vld [vmem:[#allocation2 + $0x2e8] sm:$0x1]  ;;  %v2834_v20 = vld [vmem:[#allocation3 + $0xe0] sm:$0xf]  ;;  %v4117_v55 = vor.u32 %v4115_v27, %v4114_v3  ;;  %9062 = vmatmul.mubr.bf16.gmra.mxu1 %v11298_v15  ;;  %v12774_v38 = vpop.f32.mrf.mxu1 }
 0x2ed   :  { %v11295_v12 = vld [vmem:[#allocation2 + $0x718] ss:$36 sps:$4 sm:$0xff]   ;;  %v4623_v26 = vsel %vm11580_vm2, 0, %v4622_v58  ;;  %2898 = vst [vmem:[#allocation2 + $0x7f0] sm:$0xf] %v2834_v20  ;;  %v12766_v28 = vadd.f32 %v8761_v41, %v8473_v8  ;;  %v3491_v51 = vrot.slane %v3490_v43, 4  ;;  %v4512_v47 = vsel %vm11598_vm7, %v4109_v7, %v4511_v63 }
 0x2ee   :  { %v11297_v32 = vld [vmem:[#allocation2 + $0x71c] ss:$36 sps:$4 sm:$0xff]   ;;  %v3848_v61 = vld [vmem:[#allocation2 + $0x788] sm:$0x8]  ;;  %4624 = vst [vmem:[#allocation2 + $0x2e8] sm:$0x1] %v4623_v26  ;;  %v4118_v0 = vsel %vm11592_vm6, %v4110_v10, %v4117_v55  ;;  %v8607_v20 = vpop.f32.mrf.mxu1 }
 0x2ef   :  { %13696 = vst [vmem:[#allocation30_spill] sm:$0xff] %v12766_v28  ;;  %v3501_v54 = vrot.slane %v3500_v11, 4  ;;  %8900 = vmatprep.mubr.bf16.mxu0 %v11297_v32  ;;  %v3849_v53 = vsel %vm11727_vm10, 0, %v3848_v61  ;;  %4513 = vst [vmem:[#allocation2 + $0x330] sm:$0xf] %v4512_v47  ;;  %v3496_v36 = vsel %vm11765_vm13, %v3491_v51, %v3495_v33  ;;  %v13698_v43 = vld [vmem:[#allocation32_spill] sm:$0xff] }
 0x2f0   :  { %v2835_v27 = vld [vmem:[#allocation3 + $0xe4] sm:$0xf]  ;;  %v2962_v41 = vld [vmem:[#allocation3 + $0xe0] sm:$0xf]  ;;  %13697 = vst [vmem:[#allocation50_spill] sm:$0xff] %v12774_v38  ;;  %8901 = vmatmul.mubr.bf16.gmra.mxu0 %v11295_v12  ;;  %v13699_v11 = vld [vmem:[#allocation52_spill] sm:$0xff] }
 0x2f1   :  { %3850 = vst [vmem:[#allocation2 + $0x788] sm:$0x8] %v3849_v53  ;;  %v3752_v63 = vsel %vm11771_vm14, %v3501_v54, %v3751_v14  ;;  %4514 = vst [vmem:[#allocation2 + $0x354] sm:$0xf] %v4118_v0  ;;  %v2963_v8 = vld [vmem:[#allocation3 + $0xe4] sm:$0xf]  ;;  %v8478_v3 = vadd.f32 %v13699_v11, %v13698_v43  ;;  %v12782_v53 = vpop.f32.mrf.mxu1 }
 0x2f2   :  { %2899 = vst [vmem:[#allocation2 + $0x814] sm:$0xf] %v2835_v27  ;;  %v3503_v15 = vshrl.u32 %v2962_v41, 16  ;;  %v3506_v48 = vshll.u32 %v2962_v41, 16  ;;  %3750 = vst [vmem:[#allocation2 + $0x7ac] sm:$0xf] %v3496_v36  ;;  %v8766_v36 = vpop.f32.mrf.mxu0 }
 0x2f3   :  { %3753 = vst [vmem:[#allocation2 + $0x7d0] sm:$0xf] %v3752_v63  ;;  %v3512_v58 = vshll.u32 %v2963_v8, 16  ;;  %v3516_v7 = vshrl.u32 %v2963_v8, 16  ;;  %v3891_v12 = vld [vmem:[#allocation3 + $0x68] sm:$0xf]  ;;  %v12784_v11 = vadd.f32 %v8766_v36, %v8478_v3 }
 0x2f4   :  { %v3892_v10 = vld [vmem:[#allocation3 + $0x6c] sm:$0xf]  ;;  %v3505_v32 = vrot.slane %v3503_v15, 4  ;;  %v3508_v33 = vrot.slane %v3506_v48, 5  ;;  %v4120_v26 = vshrl.u32 %v3891_v12, 16  ;;  %v4123_v55 = vshll.u32 %v3891_v12, 16  ;;  %v8768_v38 = vpop.f32.mrf.mxu0 }
 0x2f5   :  { %v3514_v14 = vrot.slane %v3512_v58, 5  ;;  %v3518_v61 = vrot.slane %v3516_v7, 4  ;;  %v4128_v51 = vshrl.u32 %v3892_v10, 16  ;;  %v4131_v54 = vshll.u32 %v3892_v10, 16  ;;  %v4515_v47 = vld [vmem:[#allocation2 + $0x378] sm:$0xf]  ;;  %v8610_v58 = vpop.f32.mrf.mxu1 }
 0x2f6   :  { %v4712_v29 = vld [vmem:[#allocation3 + $0x68] sm:$0xf]  ;;  %13700 = vst [vmem:[#allocation32_spill] sm:$0xff] %v12782_v53  ;;  %v3509_v0 = vor.u32 %v3508_v33, %v3505_v32  ;;  %v4122_v27 = vrot.slane %v4120_v26, 7  ;;  %v4713_v41 = vld [vmem:[#allocation3 + $0x6c] sm:$0xf] }
 0x2f7   :  { %4772 = vst [vmem:[#allocation2 + $0x37c] sm:$0xf] %v4712_v29  ;;  %v11304_v63 = vld [vmem:[#allocation2 + $0x2e8] ss:$36 sps:$4 sm:$0xff]   ;;  %v3519_v43 = vor.u32 %v3518_v61, %v3514_v14  ;;  %v3755_v15 = vld [vmem:[#allocation2 + $0x818] sm:$0xf] }
 0x2f8   :  { %v11306_v8 = vld [vmem:[#allocation2 + $0x2ec] ss:$36 sps:$4 sm:$0xff]   ;;  %v4130_v48 = vrot.slane %v4128_v51, 7  ;;  %4773 = vst [vmem:[#allocation2 + $0x3a0] sm:$0xf] %v4713_v41  ;;  %13701 = vst [vmem:[#allocation52_spill] sm:$0xff] %v12784_v11  ;;  %v4125_v10 = vor.u32 %v4123_v55, %v4122_v27  ;;  %v8769_v55 = vpop.f32.mrf.mxu0 }
 0x2f9   :  { %v4625_v7 = vld [vmem:[#allocation2 + $0x330] sm:$0x1]  ;;  %v3510_v12 = vrot.slane %v3509_v0, 4  ;;  %v4126_v20 = vrot.slane %v4122_v27, 4  ;;  %v13702_v53 = vld [vmem:[#allocation33_spill] sm:$0xff]  ;;  %9069 = vmatprep.mubr.bf16.mxu1 %v11306_v8  ;;  %v3520_v0 = vrot.slane %v3519_v43, 4 }
 0x2fa   :  { %v13703_v32 = vld [vmem:[#allocation53_spill] sm:$0xff]  ;;  %v11301_v26 = vld [vmem:[#allocation2 + $0x760] ss:$36 sps:$4 sm:$0xff]   ;;  %v4626_v61 = vsel %vm11580_vm2, 0, %v4625_v7  ;;  %v4133_v28 = vor.u32 %v4131_v54, %v4130_v48  ;;  %9070 = vmatmul.mubr.bf16.gmra.mxu1 %v11304_v63  ;;  %v4516_v38 = vsel %vm11598_vm7, %v4125_v10, %v4515_v47  ;;  %v2836_v54 = vld [vmem:[#allocation3 + $0xe8] sm:$0xf]  ;;  %v8771_v8 = vpop.f32.mrf.mxu0 }
 0x2fb   :  { %v8481_v33 = vadd.f32 %v13703_v32, %v13702_v53  ;;  %v11303_v29 = vld [vmem:[#allocation2 + $0x764] ss:$36 sps:$4 sm:$0xff]   ;;  %v3851_v51 = vld [vmem:[#allocation2 + $0x7d0] sm:$0x8]  ;;  %4627 = vst [vmem:[#allocation2 + $0x330] sm:$0x1] %v4626_v61  ;;  %v3515_v3 = vsel %vm11765_vm13, %v3510_v12, %v3514_v14  ;;  %v3756_v14 = vsel %vm11771_vm14, %v3520_v0, %v3755_v15  ;;  %v12802_v12 = vpop.f32.mrf.mxu1 }
 0x2fc   :  { %8908 = vmatprep.mubr.bf16.mxu0 %v11303_v29  ;;  %v3852_v53 = vsel %vm11727_vm10, 0, %v3851_v51  ;;  %3754 = vst [vmem:[#allocation2 + $0x7f4] sm:$0xf] %v3515_v3  ;;  %v4134_v27 = vsel %vm11592_vm6, %v4126_v20, %v4133_v28  ;;  %4517 = vst [vmem:[#allocation2 + $0x378] sm:$0xf] %v4516_v38  ;;  %v13727_v52 = vld [vmem:[#allocation65_spill] sm:$0xff] }
 0x2fd   :  { %v2837_v41 = vld [vmem:[#allocation3 + $0xec] sm:$0xf]  ;;  %v12798_v36 = vadd.f32 %v8769_v55, %v8481_v33  ;;  %8909 = vmatmul.mubr.bf16.gmra.mxu0 %v11301_v26  ;;  %3853 = vst [vmem:[#allocation2 + $0x7d0] sm:$0x8] %v3852_v53  ;;  %4518 = vst [vmem:[#allocation2 + $0x39c] sm:$0xf] %v4134_v27  ;;  %v8615_v3 = vpop.f32.mrf.mxu1 }
 0x2fe   :  { %2900 = vst [vmem:[#allocation2 + $0x838] sm:$0xf] %v2836_v54  ;;  %2901 = vst [vmem:[#allocation2 + $0x85c] sm:$0xf] %v2837_v41  ;;  %v2964_v47 = vld [vmem:[#allocation3 + $0xe8] sm:$0xf] }
 0x2ff   :  { %13704 = vst [vmem:[#allocation33_spill] sm:$0xff] %v12798_v36  ;;  %v2965_v63 = vld [vmem:[#allocation3 + $0xec] sm:$0xf]  ;;  %3757 = vst [vmem:[#allocation2 + $0x818] sm:$0xf] %v3756_v14  ;;  %v3522_v43 = vshrl.u32 %v2964_v47, 16 }
 0x300   :  { %v3525_v48 = vshll.u32 %v2964_v47, 16  ;;  %v3531_v28 = vshll.u32 %v2965_v63, 16  ;;  %v3535_v58 = vshrl.u32 %v2965_v63, 16  ;;  %v3893_v7 = vld [vmem:[#allocation3 + $0x70] sm:$0xf]  ;;  %13705 = vst [vmem:[#allocation53_spill] sm:$0xff] %v12802_v12  ;;  %v12804_v63 = vpop.f32.mrf.mxu1 }
 0x301   :  { %v3894_v10 = vld [vmem:[#allocation3 + $0x74] sm:$0xf]  ;;  %v4136_v20 = vshrl.u32 %v3893_v7, 16  ;;  %v4139_v32 = vshll.u32 %v3893_v7, 16  ;;  %v3524_v33 = vrot.slane %v3522_v43, 4  ;;  %13706 = vst [vmem:[#allocation85_spill] sm:$0xff] %v12804_v63 }
 0x302   :  { %v3527_v26 = vrot.slane %v3525_v48, 5  ;;  %v3533_v15 = vrot.slane %v3531_v28, 5  ;;  %v3537_v29 = vrot.slane %v3535_v58, 4  ;;  %v4519_v61 = vld [vmem:[#allocation2 + $0x3c0] sm:$0xf]  ;;  %v4144_v38 = vshrl.u32 %v3894_v10, 16 }
 0x303   :  { %v4714_v51 = vld [vmem:[#allocation3 + $0x70] sm:$0xf]  ;;  %v4138_v0 = vrot.slane %v4136_v20, 7  ;;  %v4147_v55 = vshll.u32 %v3894_v10, 16  ;;  %v4715_v53 = vld [vmem:[#allocation3 + $0x74] sm:$0xf] }
 0x304   :  { %4774 = vst [vmem:[#allocation2 + $0x3c4] sm:$0xf] %v4714_v51  ;;  %v11310_v27 = vld [vmem:[#allocation2 + $0x330] ss:$36 sps:$4 sm:$0xff]   ;;  %v3528_v41 = vor.u32 %v3527_v26, %v3524_v33  ;;  %v3538_v14 = vor.u32 %v3537_v29, %v3533_v15  ;;  %v3759_v47 = vld [vmem:[#allocation2 + $0x860] sm:$0xf]  ;;  %v8618_v51 = vpop.f32.mrf.mxu1 }
 0x305   :  { %v11312_v54 = vld [vmem:[#allocation2 + $0x334] ss:$36 sps:$4 sm:$0xff]   ;;  %4775 = vst [vmem:[#allocation2 + $0x3e8] sm:$0xf] %v4715_v53  ;;  %v4141_v43 = vor.u32 %v4139_v32, %v4138_v0  ;;  %v4142_v48 = vrot.slane %v4138_v0, 4  ;;  %v4146_v28 = vrot.slane %v4144_v38, 7 }
 0x306   :  { %v4628_v8 = vld [vmem:[#allocation2 + $0x378] sm:$0x1]  ;;  %v13707_v58 = vld [vmem:[#allocation34_spill] sm:$0xff]  ;;  %v13708_v7 = vld [vmem:[#allocation56_spill] sm:$0xff]  ;;  %9077 = vmatprep.mubr.bf16.mxu1 %v11312_v54  ;;  %v3529_v26 = vrot.slane %v3528_v41, 4  ;;  %v3539_v29 = vrot.slane %v3538_v14, 4 }
 0x307   :  { %v8486_v3 = vadd.f32 %v13708_v7, %v13707_v58  ;;  %v11307_v20 = vld [vmem:[#allocation2 + $0x7a8] ss:$36 sps:$4 sm:$0xff]   ;;  %v4629_v10 = vsel %vm11580_vm2, 0, %v4628_v8  ;;  %9078 = vmatmul.mubr.bf16.gmra.mxu1 %v11310_v27  ;;  %v3854_v33 = vld [vmem:[#allocation2 + $0x818] sm:$0x8]  ;;  %v4149_v53 = vor.u32 %v4147_v55, %v4146_v28  ;;  %v4520_v32 = vsel %vm11598_vm7, %v4141_v43, %v4519_v61  ;;  %v8774_v58 = vpop.f32.mrf.mxu0 }
 0x308   :  { %v11309_v12 = vld [vmem:[#allocation2 + $0x7ac] ss:$36 sps:$4 sm:$0xff]   ;;  %4630 = vst [vmem:[#allocation2 + $0x378] sm:$0x1] %v4629_v10  ;;  %v3855_v0 = vsel %vm11727_vm10, 0, %v3854_v33  ;;  %v3534_v27 = vsel %vm11765_vm13, %v3529_v26, %v3533_v15  ;;  %v3760_v41 = vsel %vm11771_vm14, %v3539_v29, %v3759_v47  ;;  %v13710_v10 = vld [vmem:[#allocation35_spill] sm:$0xff] }
 0x309   :  { %8916 = vmatprep.mubr.bf16.mxu0 %v11309_v12  ;;  %4521 = vst [vmem:[#allocation2 + $0x3c0] sm:$0xf] %v4520_v32  ;;  %v2838_v38 = vld [vmem:[#allocation3 + $0xf0] sm:$0xf]  ;;  %v2839_v54 = vld [vmem:[#allocation3 + $0xf4] sm:$0xf]  ;;  %v4150_v55 = vsel %vm11592_vm6, %v4142_v48, %v4149_v53  ;;  %v12820_v14 = vadd.f32 %v8774_v58, %v8486_v3  ;;  %v12824_v58 = vpop.f32.mrf.mxu1 }
 0x30a   :  { %8917 = vmatmul.mubr.bf16.gmra.mxu0 %v11307_v20  ;;  %3856 = vst [vmem:[#allocation2 + $0x818] sm:$0x8] %v3855_v0  ;;  %2902 = vst [vmem:[#allocation2 + $0x880] sm:$0xf] %v2838_v38  ;;  %v2966_v12 = vld [vmem:[#allocation3 + $0xf0] sm:$0xf]  ;;  %v8776_v20 = vpop.f32.mrf.mxu0 }
 0x30b   :  { %2903 = vst [vmem:[#allocation2 + $0x8a4] sm:$0xf] %v2839_v54  ;;  %v2967_v61 = vld [vmem:[#allocation3 + $0xf4] sm:$0xf]  ;;  %13709 = vst [vmem:[#allocation34_spill] sm:$0xff] %v12820_v14  ;;  %v3541_v8 = vshrl.u32 %v2966_v12, 16 }
 0x30c   :  { %3758 = vst [vmem:[#allocation2 + $0x83c] sm:$0xf] %v3534_v27  ;;  %3761 = vst [vmem:[#allocation2 + $0x860] sm:$0xf] %v3760_v41  ;;  %v3544_v43 = vshll.u32 %v2966_v12, 16  ;;  %v3550_v28 = vshll.u32 %v2967_v61, 16  ;;  %v8777_v54 = vpop.f32.mrf.mxu0 }
 0x30d   :  { %4522 = vst [vmem:[#allocation2 + $0x3e4] sm:$0xf] %v4150_v55  ;;  %v3554_v7 = vshrl.u32 %v2967_v61, 16  ;;  %v3895_v15 = vld [vmem:[#allocation3 + $0x78] sm:$0xf]  ;;  %v3543_v29 = vrot.slane %v3541_v8, 4 }
 0x30e   :  { %v13711_v47 = vld [vmem:[#allocation57_spill] sm:$0xff]  ;;  %v3896_v33 = vld [vmem:[#allocation3 + $0x7c] sm:$0xf]  ;;  %v4152_v48 = vshrl.u32 %v3895_v15, 16  ;;  %v4155_v26 = vshll.u32 %v3895_v15, 16  ;;  %v3546_v53 = vrot.slane %v3544_v43, 5  ;;  %v8779_v43 = vpop.f32.mrf.mxu0 }
 0x30f   :  { %v8489_v51 = vadd.f32 %v13711_v47, %v13710_v10  ;;  %v3552_v32 = vrot.slane %v3550_v28, 5  ;;  %v3556_v3 = vrot.slane %v3554_v7, 4  ;;  %v4523_v0 = vld [vmem:[#allocation2 + $0x408] sm:$0xf]  ;;  %v4716_v38 = vld [vmem:[#allocation3 + $0x78] sm:$0xf]  ;;  %v8623_v28 = vpop.f32.mrf.mxu1 }
 0x310   :  { %13712 = vst [vmem:[#allocation56_spill] sm:$0xff] %v12824_v58  ;;  %v4154_v27 = vrot.slane %v4152_v48, 7  ;;  %v4160_v41 = vshrl.u32 %v3896_v33, 16  ;;  %v4163_v55 = vshll.u32 %v3896_v33, 16  ;;  %v4717_v12 = vld [vmem:[#allocation3 + $0x7c] sm:$0xf]  ;;  %v3547_v47 = vor.u32 %v3546_v53, %v3543_v29 }
 0x311   :  { %4776 = vst [vmem:[#allocation2 + $0x40c] sm:$0xf] %v4716_v38  ;;  %v12826_v61 = vadd.f32 %v8777_v54, %v8489_v51  ;;  %v11316_v20 = vld [vmem:[#allocation2 + $0x378] ss:$36 sps:$4 sm:$0xff]   ;;  %v3557_v15 = vor.u32 %v3556_v3, %v3552_v32  ;;  %v3763_v8 = vld [vmem:[#allocation2 + $0x8a8] sm:$0xf]  ;;  %v12830_v33 = vpop.f32.mrf.mxu1 }
 0x312   :  { %v11318_v10 = vld [vmem:[#allocation2 + $0x37c] ss:$36 sps:$4 sm:$0xff]   ;;  %4777 = vst [vmem:[#allocation2 + $0x430] sm:$0xf] %v4717_v12  ;;  %v4157_v63 = vor.u32 %v4155_v26, %v4154_v27  ;;  %v4158_v14 = vrot.slane %v4154_v27, 4  ;;  %v4162_v36 = vrot.slane %v4160_v41, 7 }
 0x313   :  { %13713 = vst [vmem:[#allocation35_spill] sm:$0xff] %v12826_v61  ;;  %v4631_v7 = vld [vmem:[#allocation2 + $0x3c0] sm:$0x1]  ;;  %v2840_v58 = vld [vmem:[#allocation3 + $0xf8] sm:$0xf]  ;;  %9085 = vmatprep.mubr.bf16.mxu1 %v11318_v10  ;;  %13714 = vst [vmem:[#allocation57_spill] sm:$0xff] %v12830_v33  ;;  %v8626_v43 = vpop.f32.mrf.mxu1 }
 0x314   :  { %v11313_v48 = vld [vmem:[#allocation2 + $0x7f0] ss:$36 sps:$4 sm:$0xff]   ;;  %v4632_v51 = vsel %vm11580_vm2, 0, %v4631_v7  ;;  %2904 = vst [vmem:[#allocation2 + $0x8c8] sm:$0xf] %v2840_v58  ;;  %9086 = vmatmul.mubr.bf16.gmra.mxu1 %v11316_v20  ;;  %v3548_v53 = vrot.slane %v3547_v47, 4  ;;  %v4165_v38 = vor.u32 %v4163_v55, %v4162_v36  ;;  %v4524_v26 = vsel %vm11598_vm7, %v4157_v63, %v4523_v0  ;;  %v8782_v7 = vpop.f32.mrf.mxu0 }
 0x315   :  { %v11315_v11 = vld [vmem:[#allocation2 + $0x7f4] ss:$36 sps:$4 sm:$0xff]   ;;  %v3857_v29 = vld [vmem:[#allocation2 + $0x860] sm:$0x8]  ;;  %4633 = vst [vmem:[#allocation2 + $0x3c0] sm:$0x1] %v4632_v51 }
 0x316   :  { %v3558_v3 = vrot.slane %v3557_v15, 4  ;;  %v13715_v54 = vld [vmem:[#allocation36_spill] sm:$0xff]  ;;  %8924 = vmatprep.mubr.bf16.mxu0 %v11315_v11  ;;  %v3858_v12 = vsel %vm11727_vm10, 0, %v3857_v29  ;;  %4525 = vst [vmem:[#allocation2 + $0x408] sm:$0xf] %v4524_v26  ;;  %v3553_v20 = vsel %vm11765_vm13, %v3548_v53, %v3552_v32  ;;  %v4166_v63 = vsel %vm11592_vm6, %v4158_v14, %v4165_v38  ;;  %v8784_v26 = vpop.f32.mrf.mxu0  ;;  %v13726_v61 = vld [vmem:[#allocation39_spill] sm:$0xff] }
 0x317   :  { %v13716_v27 = vld [vmem:[#allocation60_spill] sm:$0xff]  ;;  %v2841_v58 = vld [vmem:[#allocation3 + $0xfc] sm:$0xf]  ;;  %v2968_v10 = vld [vmem:[#allocation3 + $0xf8] sm:$0xf]  ;;  %8925 = vmatmul.mubr.bf16.gmra.mxu0 %v11313_v48  ;;  %v8505_v17 = vadd.f32 %v13727_v52, %v13726_v61 }
 0x318   :  { %v8494_v41 = vadd.f32 %v13716_v27, %v13715_v54  ;;  %3859 = vst [vmem:[#allocation2 + $0x860] sm:$0x8] %v3858_v12  ;;  %v3764_v36 = vsel %vm11771_vm14, %v3558_v3, %v3763_v8  ;;  %2905 = vst [vmem:[#allocation2 + $0x8ec] sm:$0xf] %v2841_v58  ;;  %v2969_v11 = vld [vmem:[#allocation3 + $0xfc] sm:$0xf] }
 0x319   :  { %v3560_v0 = vshrl.u32 %v2968_v10, 16  ;;  %3762 = vst [vmem:[#allocation2 + $0x884] sm:$0xf] %v3553_v20  ;;  %3765 = vst [vmem:[#allocation2 + $0x8a8] sm:$0xf] %v3764_v36  ;;  %v3563_v55 = vshll.u32 %v2968_v10, 16 }
 0x31a   :  { %4526 = vst [vmem:[#allocation2 + $0x42c] sm:$0xf] %v4166_v63  ;;  %v3569_v47 = vshll.u32 %v2969_v11, 16  ;;  %v3573_v15 = vshrl.u32 %v2969_v11, 16  ;;  %v4637_v28 = vld [vmem:[#allocation2 + $0x450] sm:$0x1]  ;;  %v12846_v29 = vadd.f32 %v8782_v7, %v8494_v41  ;;  %v12850_v63 = vpop.f32.mrf.mxu1 }
 0x31b   :  { %v3562_v48 = vrot.slane %v3560_v0, 4  ;;  %v4638_v32 = vsel %vm11580_vm2, 0, %v4637_v28  ;;  %v3897_v51 = vld [vmem:[#allocation3 + $0x88] sm:$0xf]  ;;  %v3898_v8 = vld [vmem:[#allocation3 + $0x8c] sm:$0xf] }
 0x31c   :  { %13717 = vst [vmem:[#allocation36_spill] sm:$0xff] %v12846_v29  ;;  %v3565_v14 = vrot.slane %v3563_v55, 5  ;;  %v3571_v53 = vrot.slane %v3569_v47, 5  ;;  %v3575_v3 = vrot.slane %v3573_v15, 4  ;;  %4639 = vst [vmem:[#allocation2 + $0x450] sm:$0x1] %v4638_v32  ;;  %v8785_v15 = vpop.f32.mrf.mxu0 }
 0x31d   :  { %v4168_v38 = vshrl.u32 %v3897_v51, 16  ;;  %v13718_v54 = vld [vmem:[#allocation37_spill] sm:$0xff]  ;;  %v4171_v58 = vshll.u32 %v3897_v51, 16  ;;  %v4176_v10 = vshrl.u32 %v3898_v8, 16  ;;  %v4179_v43 = vshll.u32 %v3898_v8, 16  ;;  %13720 = vst [vmem:[#allocation60_spill] sm:$0xff] %v12850_v63  ;;  %v8631_v51 = vpop.f32.mrf.mxu1 }
 0x31e   :  { %v13719_v27 = vld [vmem:[#allocation61_spill] sm:$0xff]  ;;  %v4718_v36 = vld [vmem:[#allocation3 + $0x88] sm:$0xf]  ;;  %v11323_v11 = vld [vmem:[#allocation2 + $0x3c0] ss:$36 sps:$4 sm:$0xff]   ;;  %v3566_v41 = vor.u32 %v3565_v14, %v3562_v48  ;;  %v3576_v28 = vor.u32 %v3575_v3, %v3571_v53  ;;  %v8787_v48 = vpop.f32.mrf.mxu0 }
 0x31f   :  { %v8497_v12 = vadd.f32 %v13719_v27, %v13718_v54  ;;  %v4527_v20 = vld [vmem:[#allocation2 + $0x498] sm:$0xf]  ;;  %v11325_v0 = vld [vmem:[#allocation2 + $0x3c4] ss:$36 sps:$4 sm:$0xff]   ;;  %v3767_v55 = vld [vmem:[#allocation2 + $0x8f0] sm:$0xf] }
 0x320   :  { %v4170_v47 = vrot.slane %v4168_v38, 7  ;;  %4778 = vst [vmem:[#allocation2 + $0x49c] sm:$0xf] %v4718_v36  ;;  %v4634_v7 = vld [vmem:[#allocation2 + $0x408] sm:$0x1]  ;;  %v4178_v32 = vrot.slane %v4176_v10, 7  ;;  %9093 = vmatprep.mubr.bf16.mxu1 %v11325_v0  ;;  %v12856_v10 = vpop.f32.mrf.mxu1 }
 0x321   :  { %v4719_v26 = vld [vmem:[#allocation3 + $0x8c] sm:$0xf]  ;;  %v12852_v33 = vadd.f32 %v8785_v15, %v8497_v12  ;;  %v11320_v54 = vld [vmem:[#allocation2 + $0x838] ss:$36 sps:$4 sm:$0xff]   ;;  %v4635_v27 = vsel %vm11580_vm2, 0, %v4634_v7  ;;  %9094 = vmatmul.mubr.bf16.gmra.mxu1 %v11323_v11  ;;  %v3567_v3 = vrot.slane %v3566_v41, 4 }
 0x322   :  { %v11322_v8 = vld [vmem:[#allocation2 + $0x83c] ss:$36 sps:$4 sm:$0xff]   ;;  %v4173_v63 = vor.u32 %v4171_v58, %v4170_v47  ;;  %4779 = vst [vmem:[#allocation2 + $0x4c0] sm:$0xf] %v4719_v26  ;;  %v3860_v14 = vld [vmem:[#allocation2 + $0x8a8] sm:$0x8]  ;;  %v4181_v36 = vor.u32 %v4179_v43, %v4178_v32 }
 0x323   :  { %13721 = vst [vmem:[#allocation37_spill] sm:$0xff] %v12852_v33  ;;  %4636 = vst [vmem:[#allocation2 + $0x408] sm:$0x1] %v4635_v27  ;;  %v3577_v38 = vrot.slane %v3576_v28, 4  ;;  %8932 = vmatprep.mubr.bf16.mxu0 %v11322_v8  ;;  %v3861_v12 = vsel %vm11727_vm10, 0, %v3860_v14  ;;  %v4174_v15 = vrot.slane %v4170_v47, 4  ;;  %v3572_v11 = vsel %vm11765_vm13, %v3567_v3, %v3571_v53  ;;  %v8634_v28 = vpop.f32.mrf.mxu1 }
 0x324   :  { %13722 = vst [vmem:[#allocation61_spill] sm:$0xff] %v12856_v10  ;;  %v4528_v0 = vsel %vm11598_vm7, %v4173_v63, %v4527_v20  ;;  %v4812_v7 = vld [vmem:[#allocation3 + $0x8] sm:$0xf]  ;;  %v4813_v58 = vld [vmem:[#allocation3 + $0xc] sm:$0xf]  ;;  %8933 = vmatmul.mubr.bf16.gmra.mxu0 %v11320_v54  ;;  %v13723_v26 = vld [vmem:[#allocation38_spill] sm:$0xff] }
 0x325   :  { %3862 = vst [vmem:[#allocation2 + $0x8a8] sm:$0x8] %v3861_v12  ;;  %v3768_v43 = vsel %vm11771_vm14, %v3577_v38, %v3767_v55  ;;  %4529 = vst [vmem:[#allocation2 + $0x498] sm:$0xf] %v4528_v0  ;;  %v4873_v41 = vshrl.u32 %v4812_v7, 16  ;;  %v4182_v47 = vsel %vm11592_vm6, %v4174_v15, %v4181_v36  ;;  %v4876_v32 = vshll.u32 %v4812_v7, 16  ;;  %v8790_v36 = vpop.f32.mrf.mxu0 }
 0x326   :  { %3766 = vst [vmem:[#allocation2 + $0x8cc] sm:$0xf] %v3572_v11  ;;  %3769 = vst [vmem:[#allocation2 + $0x8f0] sm:$0xf] %v3768_v43  ;;  %v4882_v20 = vshll.u32 %v4813_v58, 16  ;;  %v4886_v63 = vshrl.u32 %v4813_v58, 16 }
 0x327   :  { %v13724_v51 = vld [vmem:[#allocation64_spill] sm:$0xff]  ;;  %4530 = vst [vmem:[#allocation2 + $0x4bc] sm:$0xf] %v4182_v47  ;;  %v4875_v8 = vrot.slane %v4873_v41, 4  ;;  %v4815_v27 = vld [vmem:[#allocation3 + $0x14] sm:$0xf] }
 0x328   :  { %v8502_v54 = vadd.f32 %v13724_v51, %v13723_v26  ;;  %v4814_v53 = vld [vmem:[#allocation3 + $0x10] sm:$0xf]  ;;  %v11337_v48 = vld [vmem:[#allocation2 + $0x454] ss:$36 sps:$4 sm:$0xff]   ;;  %v4878_v55 = vrot.slane %v4876_v32, 5  ;;  %v4884_v14 = vrot.slane %v4882_v20, 5 }
 0x329   :  { %v4888_v3 = vrot.slane %v4886_v63, 4  ;;  %v4892_v38 = vshrl.u32 %v4814_v53, 16  ;;  %v4895_v12 = vshll.u32 %v4814_v53, 16  ;;  %v4901_v0 = vshll.u32 %v4815_v27, 16  ;;  %v3899_v43 = vld [vmem:[#allocation3 + $0x90] sm:$0xf]  ;;  %v8792_v63 = vpop.f32.mrf.mxu0 }
 0x32a   :  { %v4905_v11 = vshrl.u32 %v4815_v27, 16  ;;  %v11329_v15 = vld [vmem:[#allocation2 + $0x408] ss:$36 sps:$4 sm:$0xff]   ;;  %v4879_v58 = vor.u32 %v4878_v55, %v4875_v8  ;;  %v5503_v10 = vld [vmem:[#allocation2 + $0x44] sm:$0xf]  ;;  %v12870_v47 = vadd.f32 %v8790_v36, %v8502_v54  ;;  %v4184_v20 = vshrl.u32 %v3899_v43, 16 }
 0x32b   :  { %v11331_v7 = vld [vmem:[#allocation2 + $0x40c] ss:$36 sps:$4 sm:$0xff]   ;;  %v4889_v28 = vor.u32 %v4888_v3, %v4884_v14  ;;  %v4894_v26 = vrot.slane %v4892_v38, 4  ;;  %v4897_v41 = vrot.slane %v4895_v12, 5  ;;  %v4903_v51 = vrot.slane %v4901_v0, 5  ;;  %v8793_v12 = vpop.f32.mrf.mxu0  ;;  %v12876_v0 = vpop.f32.mrf.mxu1 }
 0x32c   :  { %13725 = vst [vmem:[#allocation38_spill] sm:$0xff] %v12870_v47  ;;  %v4907_v33 = vrot.slane %v4905_v11, 4  ;;  %v12872_v32 = vld [vmem:[#allocation3 + $0x94] sm:$0xf]  ;;  %v11326_v53 = vld [vmem:[#allocation2 + $0x880] ss:$36 sps:$4 sm:$0xff]   ;;  %9101 = vmatprep.mubr.bf16.mxu1 %v11331_v7 }
 0x32d   :  { %v11328_v29 = vld [vmem:[#allocation2 + $0x884] ss:$36 sps:$4 sm:$0xff]   ;;  %v4880_v27 = vrot.slane %v4879_v58, 4  ;;  %9102 = vmatmul.mubr.bf16.gmra.mxu1 %v11329_v15  ;;  %v3863_v8 = vld [vmem:[#allocation2 + $0x8f0] sm:$0x8]  ;;  %v4890_v3 = vrot.slane %v4889_v28, 4  ;;  %v4898_v54 = vor.u32 %v4897_v41, %v4894_v26  ;;  %v8795_v26 = vpop.f32.mrf.mxu0  ;;  %v8639_v41 = vpop.f32.mrf.mxu1 }
 0x32e   :  { %v4640_v55 = vld [vmem:[#allocation2 + $0x498] sm:$0x1]  ;;  %v4908_v38 = vor.u32 %v4907_v33, %v4903_v51  ;;  %13728 = vst [vmem:[#allocation64_spill] sm:$0xff] %v12876_v0  ;;  %8940 = vmatprep.mubr.bf16.mxu0 %v11328_v29  ;;  %v3864_v11 = vsel %vm11727_vm10, 0, %v3863_v8  ;;  %9109 = vmatprep.mubr.bf16.mxu1 %v11337_v48  ;;  %v5507_v61 = vld [vmem:[#allocation2 + $0x8c] sm:$0xf] }
 0x32f   :  { %v4641_v36 = vsel %vm11580_vm2, 0, %v4640_v55  ;;  %v4885_v52 = vsel %vm11765_vm13, %v4880_v27, %v4884_v14  ;;  %v4186_v15 = vrot.slane %v4184_v20, 7  ;;  %8941 = vmatmul.mubr.bf16.gmra.mxu0 %v11326_v53  ;;  %3865 = vst [vmem:[#allocation2 + $0x8f0] sm:$0x8] %v3864_v11  ;;  %v11335_v7 = vld [vmem:[#allocation2 + $0x450] ss:$36 sps:$4 sm:$0xff]   ;;  %v5504_v33 = vsel %vm11771_vm14, %v4890_v3, %v5503_v10 }
 0x330   :  { %4642 = vst [vmem:[#allocation2 + $0x498] sm:$0x1] %v4641_v36  ;;  %5502 = vst [vmem:[#allocation2 + $0x20] sm:$0xf] %v4885_v52  ;;  %v4899_v29 = vrot.slane %v4898_v54, 4  ;;  %v4909_v58 = vrot.slane %v4908_v38, 4  ;;  %v12890_v11 = vadd.f32 %v8793_v12, %v8505_v17  ;;  %v12896_v52 = vpop.f32.mrf.mxu1 }
 0x331   :  { %v4187_v28 = vshll.u32 %v3899_v43, 16  ;;  %v4720_v48 = vld [vmem:[#allocation3 + $0x90] sm:$0xf]  ;;  %5505 = vst [vmem:[#allocation2 + $0x44] sm:$0xf] %v5504_v33  ;;  %v4192_v14 = vshrl.u32 %v12872_v32, 16 }
 0x332   :  { %v13729_v63 = vld [vmem:[#allocation40_spill] sm:$0xff]  ;;  %v4195_v20 = vshll.u32 %v12872_v32, 16  ;;  %v4531_v53 = vld [vmem:[#allocation2 + $0x4e0] sm:$0xf]  ;;  %v4721_v27 = vld [vmem:[#allocation3 + $0x94] sm:$0xf]  ;;  %v4904_v10 = vsel %vm11765_vm13, %v4899_v29, %v4903_v51  ;;  %v5508_v43 = vsel %vm11771_vm14, %v4909_v58, %v5507_v61 }
 0x333   :  { %v13730_v8 = vld [vmem:[#allocation68_spill] sm:$0xff]  ;;  %4780 = vst [vmem:[#allocation2 + $0x4e4] sm:$0xf] %v4720_v48  ;;  %13731 = vst [vmem:[#allocation39_spill] sm:$0xff] %v12890_v11  ;;  %v4189_v3 = vor.u32 %v4187_v28, %v4186_v15  ;;  %v4190_v54 = vrot.slane %v4186_v15, 4  ;;  %v4194_v32 = vrot.slane %v4192_v14, 7  ;;  %v8642_v15 = vpop.f32.mrf.mxu1 }
 0x334   :  { %v8510_v55 = vadd.f32 %v13730_v8, %v13729_v63  ;;  %4781 = vst [vmem:[#allocation2 + $0x508] sm:$0xf] %v4721_v27  ;;  %v4816_v38 = vld [vmem:[#allocation3 + $0x18] sm:$0xf]  ;;  %v4817_v36 = vld [vmem:[#allocation3 + $0x1c] sm:$0xf]  ;;  %v8798_v27 = vpop.f32.mrf.mxu0 }
 0x335   :  { %13732 = vst [vmem:[#allocation65_spill] sm:$0xff] %v12896_v52  ;;  %5506 = vst [vmem:[#allocation2 + $0x68] sm:$0xf] %v4904_v10  ;;  %v4911_v33 = vshrl.u32 %v4816_v38, 16  ;;  %v4914_v48 = vshll.u32 %v4816_v38, 16  ;;  %v4920_v17 = vshll.u32 %v4817_v36, 16  ;;  %v4532_v51 = vsel %vm11598_vm7, %v4189_v3, %v4531_v53  ;;  %9110 = vmatmul.mubr.bf16.gmra.mxu1 %v11335_v7 }
 0x336   :  { %5509 = vst [vmem:[#allocation2 + $0x8c] sm:$0xf] %v5508_v43  ;;  %v4818_v12 = vld [vmem:[#allocation3 + $0x20] sm:$0xf]  ;;  %v4924_v29 = vshrl.u32 %v4817_v36, 16  ;;  %v4197_v28 = vor.u32 %v4195_v20, %v4194_v32  ;;  %v12902_v20 = vadd.f32 %v8798_v27, %v8510_v55  ;;  %v8800_v32 = vpop.f32.mrf.mxu0 }
 0x337   :  { %v4819_v26 = vld [vmem:[#allocation3 + $0x24] sm:$0xf]  ;;  %v4930_v61 = vshrl.u32 %v4818_v12, 16  ;;  %v4933_v58 = vshll.u32 %v4818_v12, 16  ;;  %4533 = vst [vmem:[#allocation2 + $0x4e0] sm:$0xf] %v4532_v51 }
 0x338   :  { %v4913_v41 = vrot.slane %v4911_v33, 4  ;;  %v4916_v63 = vrot.slane %v4914_v48, 5  ;;  %v4922_v8 = vrot.slane %v4920_v17, 5  ;;  %v4926_v14 = vrot.slane %v4924_v29, 4  ;;  %v11332_v52 = vld [vmem:[#allocation2 + $0x8c8] ss:$36 sps:$4 sm:$0xff]  }
 0x339   :  { %v4932_v10 = vrot.slane %v4930_v61, 4  ;;  %v4935_v43 = vrot.slane %v4933_v58, 5  ;;  %v4939_v38 = vshll.u32 %v4819_v26, 16  ;;  %v11334_v11 = vld [vmem:[#allocation2 + $0x8cc] ss:$36 sps:$4 sm:$0xff]   ;;  %v4198_v53 = vsel %vm11592_vm6, %v4190_v54, %v4197_v28  ;;  %v8801_v28 = vpop.f32.mrf.mxu0 }
 0x33a   :  { %v4917_v3 = vor.u32 %v4916_v63, %v4913_v41  ;;  %v5511_v36 = vld [vmem:[#allocation2 + $0xd4] sm:$0xf]  ;;  %v4943_v12 = vshrl.u32 %v4819_v26, 16  ;;  %v3901_v15 = vld [vmem:[#allocation3 + $0x98] sm:$0xf]  ;;  %v4927_v29 = vor.u32 %v4926_v14, %v4922_v8  ;;  %8948 = vmatprep.mubr.bf16.mxu0 %v11334_v11 }
 0x33b   :  { %v13733_v33 = vld [vmem:[#allocation41_spill] sm:$0xff]  ;;  %v11340_v51 = vld [vmem:[#allocation2 + $0x49c] ss:$36 sps:$4 sm:$0xff]   ;;  %4534 = vst [vmem:[#allocation2 + $0x504] sm:$0xf] %v4198_v53  ;;  %v4936_v61 = vor.u32 %v4935_v43, %v4932_v10  ;;  %v4941_v58 = vrot.slane %v4939_v38, 5  ;;  %8949 = vmatmul.mubr.bf16.gmra.mxu0 %v11332_v52  ;;  %v8803_v52 = vpop.f32.mrf.mxu0 }
 0x33c   :  { %v13734_v48 = vld [vmem:[#allocation69_spill] sm:$0xff]  ;;  %v5626_v0 = vld [vmem:[#allocation2 + $0x44] sm:$0x8]  ;;  %v4918_v47 = vrot.slane %v4917_v3, 4  ;;  %v4945_v54 = vrot.slane %v4943_v12, 4  ;;  %9117 = vmatprep.mubr.bf16.mxu1 %v11340_v51  ;;  %v4928_v41 = vrot.slane %v4927_v29, 4  ;;  %v12920_v29 = vpop.f32.mrf.mxu1 }
 0x33d   :  { %v8513_v17 = vadd.f32 %v13734_v48, %v13733_v33  ;;  %v11338_v7 = vld [vmem:[#allocation2 + $0x498] ss:$36 sps:$4 sm:$0xff]   ;;  %v5627_v55 = vsel %vm11727_vm10, 0, %v5626_v0  ;;  %v5629_v26 = vld [vmem:[#allocation2 + $0x8c] sm:$0x8]  ;;  %v4937_v14 = vrot.slane %v4936_v61, 4 }
 0x33e   :  { %5628 = vst [vmem:[#allocation2 + $0x44] sm:$0x8] %v5627_v55  ;;  %v5630_v27 = vsel %vm11727_vm10, 0, %v5629_v26  ;;  %v4923_v11 = vsel %vm11765_vm13, %v4918_v47, %v4922_v8  ;;  %v4946_v10 = vor.u32 %v4945_v54, %v4941_v58  ;;  %v5515_v43 = vld [vmem:[#allocation2 + $0x11c] sm:$0xf]  ;;  %v5512_v0 = vsel %vm11771_vm14, %v4928_v41, %v5511_v36  ;;  %9118 = vmatmul.mubr.bf16.gmra.mxu1 %v11338_v7  ;;  %v8647_v41 = vpop.f32.mrf.mxu1 }
 0x33f   :  { %v12908_v63 = vadd.f32 %v8801_v28, %v8513_v17  ;;  %v3902_v38 = vld [vmem:[#allocation3 + $0x9c] sm:$0xf]  ;;  %5631 = vst [vmem:[#allocation2 + $0x8c] sm:$0x8] %v5630_v27  ;;  %v4643_v53 = vld [vmem:[#allocation2 + $0x4e0] sm:$0x1]  ;;  %v4942_v47 = vsel %vm11765_vm13, %v4937_v14, %v4941_v58 }
 0x340   :  { %5510 = vst [vmem:[#allocation2 + $0xb0] sm:$0xf] %v4923_v11  ;;  %v4200_v3 = vshrl.u32 %v3901_v15, 16  ;;  %v4203_v12 = vshll.u32 %v3901_v15, 16  ;;  %v4208_v32 = vshrl.u32 %v3902_v38, 16  ;;  %v4644_v33 = vsel %vm11580_vm2, 0, %v4643_v53 }
 0x341   :  { %5513 = vst [vmem:[#allocation2 + $0xd4] sm:$0xf] %v5512_v0  ;;  %v4947_v8 = vrot.slane %v4946_v10, 4  ;;  %v4211_v48 = vshll.u32 %v3902_v38, 16  ;;  %v4535_v17 = vld [vmem:[#allocation2 + $0x528] sm:$0xf] }
 0x342   :  { %v4722_v51 = vld [vmem:[#allocation3 + $0x98] sm:$0xf]  ;;  %4645 = vst [vmem:[#allocation2 + $0x4e0] sm:$0x1] %v4644_v33  ;;  %5514 = vst [vmem:[#allocation2 + $0xf8] sm:$0xf] %v4942_v47 }
 0x343   :  { %v4202_v36 = vrot.slane %v4200_v3, 7  ;;  %v4210_v61 = vrot.slane %v4208_v32, 7  ;;  %v4723_v15 = vld [vmem:[#allocation3 + $0x9c] sm:$0xf]  ;;  %4782 = vst [vmem:[#allocation2 + $0x52c] sm:$0xf] %v4722_v51  ;;  %v5516_v28 = vsel %vm11771_vm14, %v4947_v8, %v5515_v43  ;;  %v12924_v32 = vpop.f32.mrf.mxu1 }
 0x344   :  { %v4820_v54 = vld [vmem:[#allocation3 + $0x28] sm:$0xf]  ;;  %4783 = vst [vmem:[#allocation2 + $0x550] sm:$0xf] %v4723_v15  ;;  %v4821_v55 = vld [vmem:[#allocation3 + $0x2c] sm:$0xf] }
 0x345   :  { %v4949_v58 = vshrl.u32 %v4820_v54, 16  ;;  %v4952_v26 = vshll.u32 %v4820_v54, 16  ;;  %5517 = vst [vmem:[#allocation2 + $0x11c] sm:$0xf] %v5516_v28  ;;  %v4205_v27 = vor.u32 %v4203_v12, %v4202_v36  ;;  %v4206_v11 = vrot.slane %v4202_v36, 4  ;;  %v8650_v36 = vpop.f32.mrf.mxu1 }
 0x346   :  { %v4213_v14 = vor.u32 %v4211_v48, %v4210_v61  ;;  %v4958_v7 = vshll.u32 %v4821_v55, 16  ;;  %v4822_v10 = vld [vmem:[#allocation3 + $0x30] sm:$0xf]  ;;  %v4962_v53 = vshrl.u32 %v4821_v55, 16  ;;  %v4823_v0 = vld [vmem:[#allocation3 + $0x34] sm:$0xf] }
 0x347   :  { %v4951_v38 = vrot.slane %v4949_v58, 4  ;;  %v4954_v52 = vrot.slane %v4952_v26, 5  ;;  %v4968_v3 = vshrl.u32 %v4822_v10, 16  ;;  %v11341_v33 = vld [vmem:[#allocation2 + $0x20] ss:$36 sps:$4 sm:$0xff]   ;;  %v4536_v47 = vsel %vm11598_vm7, %v4205_v27, %v4535_v17 }
 0x348   :  { %v4214_v43 = vsel %vm11592_vm6, %v4206_v11, %v4213_v14  ;;  %v4960_v8 = vrot.slane %v4958_v7, 5  ;;  %v4971_v12 = vshll.u32 %v4822_v10, 16  ;;  %v11342_v51 = vld [vmem:[#allocation2 + $0x68] ss:$36 sps:$4 sm:$0xff]   ;;  %4537 = vst [vmem:[#allocation2 + $0x528] sm:$0xf] %v4536_v47  ;;  %10827 = vmatprep.mubr.bf16.mxu0 %v11341_v33 }
 0x349   :  { %4538 = vst [vmem:[#allocation2 + $0x54c] sm:$0xf] %v4214_v43  ;;  %v4955_v48 = vor.u32 %v4954_v52, %v4951_v38  ;;  %v5632_v61 = vld [vmem:[#allocation2 + $0xd4] sm:$0x8]  ;;  %v4964_v15 = vrot.slane %v4962_v53, 4  ;;  %v4970_v54 = vrot.slane %v4968_v3, 4  ;;  %10828 = vmatmul.mubr.bf16.vlgmr.msra.gmra.mxu0 %v11342_v51  ;;  %v8806_v38 = vpop.f32.mrf.mxu0 }
 0x34a   :  { %v4973_v28 = vrot.slane %v4971_v12, 5  ;;  %v4977_v55 = vshll.u32 %v4823_v0, 16  ;;  %v13735_v58 = vld [vmem:[#allocation42_spill] sm:$0xff]  ;;  %v11345_v11 = vld [vmem:[#allocation2 + $0x4e4] ss:$36 sps:$4 sm:$0xff]   ;;  %v5633_v17 = vsel %vm11727_vm10, 0, %v5632_v61 }
 0x34b   :  { %v8518_v26 = vadd.f32 %v12487_v56, %v13735_v58  ;;  %v11343_v41 = vld [vmem:[#allocation2 + $0x4e0] ss:$36 sps:$4 sm:$0xff]   ;;  %5634 = vst [vmem:[#allocation2 + $0xd4] sm:$0x8] %v5633_v17  ;;  %v4956_v27 = vrot.slane %v4955_v48, 4  ;;  %v4965_v14 = vor.u32 %v4964_v15, %v4960_v8  ;;  %9125 = vmatprep.mubr.bf16.mxu1 %v11345_v11  ;;  %v4981_v3 = vshrl.u32 %v4823_v0, 16  ;;  %v8808_v36 = vpop.f32.mrf.mxu0 }
 0x34c   :  { %v5519_v7 = vld [vmem:[#allocation2 + $0x164] sm:$0xf]  ;;  %v4974_v10 = vor.u32 %v4973_v28, %v4970_v54  ;;  %v5635_v52 = vld [vmem:[#allocation2 + $0x11c] sm:$0x8]  ;;  %v4979_v53 = vrot.slane %v4977_v55, 5  ;;  %9126 = vmatmul.mubr.bf16.gmra.mxu1 %v11343_v41  ;;  %v12940_v28 = vpop.f32.mrf.mxu1 }
 0x34d   :  { %v3903_v33 = vld [vmem:[#allocation3 + $0xa0] sm:$0xf]  ;;  %v12934_v43 = vadd.f32 %v8806_v38, %v8518_v26  ;;  %v5636_v56 = vsel %vm11727_vm10, 0, %v5635_v52  ;;  %v4961_v47 = vsel %vm11765_vm13, %v4956_v27, %v4960_v8  ;;  %v4966_v12 = vrot.slane %v4965_v14, 4  ;;  %v3904_v48 = vld [vmem:[#allocation3 + $0xa4] sm:$0xf]  ;;  %v8809_v14 = vpop.f32.mrf.mxu0 }
 0x34e   :  { %v4975_v51 = vrot.slane %v4974_v10, 4  ;;  %5637 = vst [vmem:[#allocation2 + $0x11c] sm:$0x8] %v5636_v56  ;;  %5518 = vst [vmem:[#allocation2 + $0x140] sm:$0xf] %v4961_v47  ;;  %v4983_v61 = vrot.slane %v4981_v3, 4 }
 0x34f   :  { %v4216_v15 = vshrl.u32 %v3903_v33, 16  ;;  %v4219_v54 = vshll.u32 %v3903_v33, 16  ;;  %v4224_v0 = vshrl.u32 %v3904_v48, 16  ;;  %13736 = vst [vmem:[#allocation40_spill] sm:$0xff] %v12940_v28  ;;  %v13737_v55 = vld [vmem:[#allocation43_spill] sm:$0xff]  ;;  %v5520_v41 = vsel %vm11771_vm14, %v4966_v12, %v5519_v7  ;;  %v8655_v33 = vpop.f32.mrf.mxu1 }
 0x350   :  { %v8521_v58 = vadd.f32 %v12491_v45, %v13737_v55  ;;  %v4646_v26 = vld [vmem:[#allocation2 + $0x528] sm:$0x1]  ;;  %v4980_v8 = vsel %vm11765_vm13, %v4975_v51, %v4979_v53  ;;  %v5523_v11 = vld [vmem:[#allocation2 + $0x1ac] sm:$0xf]  ;;  %v4227_v17 = vshll.u32 %v3904_v48, 16  ;;  %v4984_v38 = vor.u32 %v4983_v61, %v4979_v53  ;;  %v8811_v51 = vpop.f32.mrf.mxu0 }
 0x351   :  { %v4724_v27 = vld [vmem:[#allocation3 + $0xa0] sm:$0xf]  ;;  %v4647_v10 = vsel %vm11580_vm2, 0, %v4646_v26  ;;  %5521 = vst [vmem:[#allocation2 + $0x164] sm:$0xf] %v5520_v41  ;;  %v4218_v52 = vrot.slane %v4216_v15, 7  ;;  %v12952_v53 = vpop.f32.mrf.mxu1 }
 0x352   :  { %5522 = vst [vmem:[#allocation2 + $0x188] sm:$0xf] %v4980_v8  ;;  %v4226_v3 = vrot.slane %v4224_v0, 7  ;;  %v4725_v45 = vld [vmem:[#allocation3 + $0xa4] sm:$0xf]  ;;  %v12950_v12 = vadd.f32 %v8809_v14, %v8521_v58  ;;  %v4985_v36 = vrot.slane %v4984_v38, 4 }
 0x353   :  { %4784 = vst [vmem:[#allocation2 + $0x574] sm:$0xf] %v4724_v27  ;;  %4648 = vst [vmem:[#allocation2 + $0x528] sm:$0x1] %v4647_v10  ;;  %v4539_v7 = vld [vmem:[#allocation2 + $0x570] sm:$0xf]  ;;  %v4221_v55 = vor.u32 %v4219_v54, %v4218_v52 }
 0x354   :  { %4785 = vst [vmem:[#allocation2 + $0x598] sm:$0xf] %v4725_v45  ;;  %v4824_v56 = vld [vmem:[#allocation3 + $0x38] sm:$0xf]  ;;  %v4825_v47 = vld [vmem:[#allocation3 + $0x3c] sm:$0xf]  ;;  %v4229_v41 = vor.u32 %v4227_v17, %v4226_v3  ;;  %v5524_v10 = vsel %vm11771_vm14, %v4985_v36, %v5523_v11  ;;  %v8658_v17 = vpop.f32.mrf.mxu1 }
 0x355   :  { %v11346_v48 = vld [vmem:[#allocation2 + $0xb0] ss:$36 sps:$4 sm:$0xff]   ;;  %v4222_v26 = vrot.slane %v4218_v52, 4  ;;  %13738 = vst [vmem:[#allocation68_spill] sm:$0xff] %v12952_v53  ;;  %v4987_v61 = vshrl.u32 %v4824_v56, 16  ;;  %v4990_v15 = vshll.u32 %v4824_v56, 16  ;;  %v4540_v14 = vsel %vm11598_vm7, %v4221_v55, %v4539_v7 }
 0x356   :  { %v4996_v0 = vshll.u32 %v4825_v47, 16  ;;  %v5000_v8 = vshrl.u32 %v4825_v47, 16  ;;  %v4826_v27 = vld [vmem:[#allocation3 + $0x40] sm:$0xf]  ;;  %10831 = vmatprep.mubr.bf16.mxu0 %v11346_v48  ;;  %v4827_v54 = vld [vmem:[#allocation3 + $0x44] sm:$0xf]  ;;  %v8814_v48 = vpop.f32.mrf.mxu0 }
 0x357   :  { %v4230_v58 = vsel %vm11592_vm6, %v4222_v26, %v4229_v41  ;;  %v5006_v38 = vshrl.u32 %v4826_v27, 16  ;;  %v13739_v52 = vld [vmem:[#allocation44_spill] sm:$0xff]  ;;  %v11347_v45 = vld [vmem:[#allocation2 + $0xf8] ss:$36 sps:$4 sm:$0xff]   ;;  %5525 = vst [vmem:[#allocation2 + $0x1ac] sm:$0xf] %v5524_v10 }
 0x358   :  { %v8526_v3 = vadd.f32 %v12515_v13, %v13739_v52  ;;  %4541 = vst [vmem:[#allocation2 + $0x570] sm:$0xf] %v4540_v14  ;;  %4542 = vst [vmem:[#allocation2 + $0x594] sm:$0xf] %v4230_v58  ;;  %v4989_v33 = vrot.slane %v4987_v61, 4  ;;  %v4992_v56 = vrot.slane %v4990_v15, 5  ;;  %10832 = vmatmul.mubr.bf16.gmra.mxu0 %v11347_v45 }
 0x359   :  { %v4998_v47 = vrot.slane %v4996_v0, 5  ;;  %v5002_v11 = vrot.slane %v5000_v8, 4  ;;  %v3905_v51 = vld [vmem:[#allocation3 + $0xa8] sm:$0xf]  ;;  %v5638_v36 = vld [vmem:[#allocation2 + $0x164] sm:$0x8]  ;;  %v8816_v8 = vpop.f32.mrf.mxu0 }
 0x35a   :  { %v5527_v26 = vld [vmem:[#allocation2 + $0x1f4] sm:$0xf]  ;;  %v5008_v7 = vrot.slane %v5006_v38, 4  ;;  %v5009_v55 = vshll.u32 %v4826_v27, 16  ;;  %v12962_v41 = vadd.f32 %v8814_v48, %v8526_v3  ;;  %v11348_v52 = vld [vmem:[#allocation2 + $0x528] ss:$36 sps:$4 sm:$0xff]   ;;  %v4993_v15 = vor.u32 %v4992_v56, %v4989_v33 }
 0x35b   :  { %v13741_v17 = vld [vmem:[#allocation45_spill] sm:$0xff]  ;;  %v5639_v61 = vsel %vm11727_vm10, 0, %v5638_v36  ;;  %v5003_v0 = vor.u32 %v5002_v11, %v4998_v47  ;;  %v5015_v14 = vshll.u32 %v4827_v54, 16  ;;  %v5019_v45 = vshrl.u32 %v4827_v54, 16  ;;  %v3906_v53 = vld [vmem:[#allocation3 + $0xac] sm:$0xf] }
 0x35c   :  { %13740 = vst [vmem:[#allocation41_spill] sm:$0xff] %v12962_v41  ;;  %v8529_v13 = vadd.f32 %v12519_v25, %v13741_v17  ;;  %v11350_v10 = vld [vmem:[#allocation2 + $0x52c] ss:$36 sps:$4 sm:$0xff]   ;;  %5640 = vst [vmem:[#allocation2 + $0x164] sm:$0x8] %v5639_v61  ;;  %v5011_v58 = vrot.slane %v5009_v55, 5  ;;  %v8817_v25 = vpop.f32.mrf.mxu0  ;;  %v12968_v17 = vpop.f32.mrf.mxu1 }
 0x35d   :  { %v4232_v38 = vshrl.u32 %v3905_v51, 16  ;;  %9133 = vmatprep.mubr.bf16.mxu1 %v11350_v10  ;;  %v4994_v27 = vrot.slane %v4993_v15, 4  ;;  %v5004_v3 = vrot.slane %v5003_v0, 4  ;;  %v4235_v48 = vshll.u32 %v3905_v51, 16  ;;  %13742 = vst [vmem:[#allocation69_spill] sm:$0xff] %v12968_v17 }
 0x35e   :  { %v4240_v41 = vshrl.u32 %v3906_v53, 16  ;;  %9134 = vmatmul.mubr.bf16.gmra.mxu1 %v11348_v52  ;;  %v5012_v28 = vor.u32 %v5011_v58, %v5008_v7  ;;  %v5017_v36 = vrot.slane %v5015_v14, 5  ;;  %v5021_v33 = vrot.slane %v5019_v45, 4  ;;  %v4543_v11 = vld [vmem:[#allocation2 + $0x5b8] sm:$0xf]  ;;  %v8819_v52 = vpop.f32.mrf.mxu0  ;;  %v8663_v7 = vpop.f32.mrf.mxu1 }
 0x35f   :  { %v4234_v56 = vrot.slane %v4232_v38, 7  ;;  %v4726_v61 = vld [vmem:[#allocation3 + $0xa8] sm:$0xf]  ;;  %v5641_v55 = vld [vmem:[#allocation2 + $0x1ac] sm:$0x8]  ;;  %v4999_v54 = vsel %vm11765_vm13, %v4994_v27, %v4998_v47  ;;  %v5528_v10 = vsel %vm11771_vm14, %v5004_v3, %v5527_v26  ;;  %v12974_v0 = vadd.f32 %v8817_v25, %v8529_v13  ;;  %v13744_v52 = vld [vmem:[#allocation46_spill] sm:$0xff] }
 0x360   :  { %v4649_v8 = vld [vmem:[#allocation2 + $0x570] sm:$0x1]  ;;  %v5531_v51 = vld [vmem:[#allocation2 + $0x23c] sm:$0xf]  ;;  %v4242_v15 = vrot.slane %v4240_v41, 7  ;;  %v5642_v58 = vsel %vm11727_vm10, 0, %v5641_v55  ;;  %v5022_v47 = vor.u32 %v5021_v33, %v5017_v36  ;;  %v12980_v25 = vpop.f32.mrf.mxu1  ;;  %v8534_v7 = vadd.f32 %v12537_v42, %v13744_v52 }
 0x361   :  { %4786 = vst [vmem:[#allocation2 + $0x5bc] sm:$0xf] %v4726_v61  ;;  %v4650_v14 = vsel %vm11580_vm2, 0, %v4649_v8  ;;  %5526 = vst [vmem:[#allocation2 + $0x1d0] sm:$0xf] %v4999_v54  ;;  %v5013_v45 = vrot.slane %v5012_v28, 4  ;;  %v4237_v26 = vor.u32 %v4235_v48, %v4234_v56 }
 0x362   :  { %5529 = vst [vmem:[#allocation2 + $0x1f4] sm:$0xf] %v5528_v10  ;;  %v4727_v38 = vld [vmem:[#allocation3 + $0xac] sm:$0xf]  ;;  %5643 = vst [vmem:[#allocation2 + $0x1ac] sm:$0x8] %v5642_v58 }
 0x363   :  { %4651 = vst [vmem:[#allocation2 + $0x570] sm:$0x1] %v4650_v14  ;;  %v4238_v41 = vrot.slane %v4234_v56, 4  ;;  %v4243_v27 = vshll.u32 %v3906_v53, 16  ;;  %4787 = vst [vmem:[#allocation2 + $0x5e0] sm:$0xf] %v4727_v38  ;;  %v5018_v61 = vsel %vm11765_vm13, %v5013_v45, %v5017_v36  ;;  %v4544_v33 = vsel %vm11598_vm7, %v4237_v26, %v4543_v11  ;;  %v8666_v53 = vpop.f32.mrf.mxu1 }
 0x364   :  { %v4828_v13 = vld [vmem:[#allocation3 + $0x48] sm:$0xf]  ;;  %v4829_v3 = vld [vmem:[#allocation3 + $0x4c] sm:$0xf]  ;;  %13743 = vst [vmem:[#allocation42_spill] sm:$0xff] %v12980_v25  ;;  %v5023_v55 = vrot.slane %v5022_v47, 4  ;;  %v8822_v53 = vpop.f32.mrf.mxu0 }
 0x365   :  { %v5025_v8 = vshrl.u32 %v4828_v13, 16  ;;  %v5028_v54 = vshll.u32 %v4828_v13, 16  ;;  %v11351_v10 = vld [vmem:[#allocation2 + $0x140] ss:$36 sps:$4 sm:$0xff]   ;;  %5530 = vst [vmem:[#allocation2 + $0x218] sm:$0xf] %v5018_v61  ;;  %v4245_v28 = vor.u32 %v4243_v27, %v4242_v15 }
 0x366   :  { %v5034_v48 = vshll.u32 %v4829_v3, 16  ;;  %v5038_v56 = vshrl.u32 %v4829_v3, 16  ;;  %v5532_v58 = vsel %vm11771_vm14, %v5023_v55, %v5531_v51  ;;  %4545 = vst [vmem:[#allocation2 + $0x5b8] sm:$0xf] %v4544_v33  ;;  %v4830_v45 = vld [vmem:[#allocation3 + $0x50] sm:$0xf]  ;;  %10835 = vmatprep.mubr.bf16.mxu0 %v11351_v10 }
 0x367   :  { %v5027_v36 = vrot.slane %v5025_v8, 4  ;;  %v5030_v14 = vrot.slane %v5028_v54, 5  ;;  %v4831_v47 = vld [vmem:[#allocation3 + $0x54] sm:$0xf]  ;;  %5533 = vst [vmem:[#allocation2 + $0x23c] sm:$0xf] %v5532_v58  ;;  %v4246_v15 = vsel %vm11592_vm6, %v4238_v41, %v4245_v28  ;;  %v12994_v41 = vadd.f32 %v8822_v53, %v8534_v7 }
 0x368   :  { %v5036_v11 = vrot.slane %v5034_v48, 5  ;;  %v5040_v38 = vrot.slane %v5038_v56, 4  ;;  %v5044_v26 = vshrl.u32 %v4830_v45, 16  ;;  %4546 = vst [vmem:[#allocation2 + $0x5dc] sm:$0xf] %v4246_v15  ;;  %v5047_v42 = vshll.u32 %v4830_v45, 16 }
 0x369   :  { %v5031_v27 = vor.u32 %v5030_v14, %v5027_v36  ;;  %v5535_v13 = vld [vmem:[#allocation2 + $0x284] sm:$0xf]  ;;  %v5053_v3 = vshll.u32 %v4831_v47, 16  ;;  %v5057_v61 = vshrl.u32 %v4831_v47, 16  ;;  %v3907_v51 = vld [vmem:[#allocation3 + $0xb0] sm:$0xf] }
 0x36a   :  { %v5644_v55 = vld [vmem:[#allocation2 + $0x1f4] sm:$0x8]  ;;  %v5041_v8 = vor.u32 %v5040_v38, %v5036_v11  ;;  %v5046_v54 = vrot.slane %v5044_v26, 4  ;;  %v4248_v33 = vshrl.u32 %v3907_v51, 16  ;;  %v11352_v10 = vld [vmem:[#allocation2 + $0x188] ss:$36 sps:$4 sm:$0xff]   ;;  %v8824_v38 = vpop.f32.mrf.mxu0 }
 0x36b   :  { %v5645_v52 = vsel %vm11727_vm10, 0, %v5644_v55  ;;  %13745 = vst [vmem:[#allocation43_spill] sm:$0xff] %v12994_v41  ;;  %v13746_v28 = vld [vmem:[#allocation47_spill] sm:$0xff]  ;;  %v13747_v48 = vld [vmem:[#allocation76_spill] sm:$0xff]  ;;  %v13748_v58 = vld [vmem:[#allocation49_spill] sm:$0xff]  ;;  %v5032_v47 = vrot.slane %v5031_v27, 4  ;;  %10836 = vmatmul.mubr.bf16.gmra.mxu0 %v11352_v10 }
 0x36c   :  { %v8537_v56 = vadd.f32 %v13747_v48, %v13746_v28  ;;  %v13000_v36 = vadd.f32 %v12547_v49, %v13748_v58  ;;  %v11353_v14 = vld [vmem:[#allocation2 + $0x570] ss:$36 sps:$4 sm:$0xff]   ;;  %5646 = vst [vmem:[#allocation2 + $0x1f4] sm:$0x8] %v5645_v52  ;;  %v5042_v15 = vrot.slane %v5041_v8, 4  ;;  %v5049_v26 = vrot.slane %v5047_v42, 5  ;;  %v8825_v42 = vpop.f32.mrf.mxu0 }
 0x36d   :  { %v11355_v45 = vld [vmem:[#allocation2 + $0x574] ss:$36 sps:$4 sm:$0xff]   ;;  %v5055_v25 = vrot.slane %v5053_v3, 5  ;;  %v5059_v17 = vrot.slane %v5057_v61, 4  ;;  %v13002_v55 = vrot.slane %v4248_v33, 7  ;;  %v13749_v7 = vld [vmem:[#allocation51_spill] sm:$0xff]  ;;  %v5037_v49 = vsel %vm11765_vm13, %v5032_v47, %v5036_v11  ;;  %v8991_v3 = vpop.f32.mrf.mxu1 }
 0x36e   :  { %v13750_v53 = vld [vmem:[#allocation77_spill] sm:$0xff]  ;;  %9141 = vmatprep.mubr.bf16.mxu1 %v11355_v45  ;;  %v5536_v27 = vsel %vm11771_vm14, %v5042_v15, %v5535_v13  ;;  %v5539_v8 = vld [vmem:[#allocation2 + $0x2cc] sm:$0xf]  ;;  %v4251_v10 = vshll.u32 %v3907_v51, 16  ;;  %v5647_v61 = vld [vmem:[#allocation2 + $0x23c] sm:$0x8]  ;;  %v5050_v48 = vor.u32 %v5049_v26, %v5046_v54  ;;  %v8827_v38 = vpop.f32.mrf.mxu0  ;;  %v13018_v54 = vadd.f32 %v8825_v42, %v8537_v56 }
 0x36f   :  { %v13006_v41 = vadd.f32 %v13750_v53, %v13749_v7  ;;  %v4652_v28 = vld [vmem:[#allocation2 + $0x5b8] sm:$0x1]  ;;  %v3908_v52 = vld [vmem:[#allocation3 + $0xb4] sm:$0xf]  ;;  %9142 = vmatmul.mubr.bf16.gmra.mxu1 %v11353_v14  ;;  %5534 = vst [vmem:[#allocation2 + $0x260] sm:$0xf] %v5037_v49  ;;  %v5060_v58 = vor.u32 %v5059_v17, %v5055_v25  ;;  %v8993_v7 = vpop.f32.mrf.mxu1 }
 0x370   :  { %v4653_v33 = vsel %vm11580_vm2, 0, %v4652_v28  ;;  %5537 = vst [vmem:[#allocation2 + $0x284] sm:$0xf] %v5536_v27  ;;  %v4254_v45 = vrot.slane %v13002_v55, 4  ;;  %v4547_v11 = vld [vmem:[#allocation2 + $0x600] sm:$0xf]  ;;  %v4253_v51 = vor.u32 %v4251_v10, %v13002_v55  ;;  %v8830_v38 = vpop.f32.mrf.mxu0 }
 0x371   :  { %v5648_v13 = vsel %vm11727_vm10, 0, %v5647_v61  ;;  %4654 = vst [vmem:[#allocation2 + $0x5b8] sm:$0x1] %v4653_v33  ;;  %v4256_v47 = vshrl.u32 %v3908_v52, 16  ;;  %v4259_v15 = vshll.u32 %v3908_v52, 16  ;;  %v5051_v53 = vrot.slane %v5050_v48, 4 }
 0x372   :  { %v4728_v14 = vld [vmem:[#allocation3 + $0xb0] sm:$0xf]  ;;  %5649 = vst [vmem:[#allocation2 + $0x23c] sm:$0x8] %v5648_v13  ;;  %v5061_v28 = vrot.slane %v5060_v58, 4  ;;  %13751 = vst [vmem:[#allocation44_spill] sm:$0xff] %v13018_v54  ;;  %v4548_v55 = vsel %vm11598_vm7, %v4253_v51, %v4547_v11  ;;  %v8994_v13 = vpop.f32.mrf.mxu1  ;;  %v13030_v7 = vadd.f32 %v8830_v38, %v13000_v36 }
 0x373   :  { %v4729_v49 = vld [vmem:[#allocation3 + $0xb4] sm:$0xf]  ;;  %4788 = vst [vmem:[#allocation2 + $0x604] sm:$0xf] %v4728_v14  ;;  %v4832_v17 = vld [vmem:[#allocation3 + $0x58] sm:$0xf]  ;;  %v5056_v58 = vsel %vm11765_vm13, %v5051_v53, %v5055_v25 }
 0x374   :  { %v13752_v26 = vld [vmem:[#allocation78_spill] sm:$0xff]  ;;  %v4258_v61 = vrot.slane %v4256_v47, 7  ;;  %4789 = vst [vmem:[#allocation2 + $0x628] sm:$0xf] %v4729_v49  ;;  %v5063_v10 = vshrl.u32 %v4832_v17, 16  ;;  %v5066_v33 = vshll.u32 %v4832_v17, 16  ;;  %v5540_v56 = vsel %vm11771_vm14, %v5061_v28, %v5539_v8  ;;  %v8832_v49 = vpop.f32.mrf.mxu0  ;;  %v8996_v17 = vpop.f32.mrf.mxu1 }
 0x375   :  { %v13021_v27 = vadd.f32 %v8991_v3, %v13752_v26  ;;  %v4833_v52 = vld [vmem:[#allocation3 + $0x5c] sm:$0xf]  ;;  %v11356_v48 = vld [vmem:[#allocation2 + $0x1d0] ss:$36 sps:$4 sm:$0xff]   ;;  %4549 = vst [vmem:[#allocation2 + $0x600] sm:$0xf] %v4548_v55 }
 0x376   :  { %v5072_v42 = vshll.u32 %v4833_v52, 16  ;;  %v5076_v3 = vshrl.u32 %v4833_v52, 16  ;;  %5538 = vst [vmem:[#allocation2 + $0x2a8] sm:$0xf] %v5056_v58  ;;  %5541 = vst [vmem:[#allocation2 + $0x2cc] sm:$0xf] %v5540_v56  ;;  %v4261_v47 = vor.u32 %v4259_v15, %v4258_v61  ;;  %10839 = vmatprep.mubr.bf16.mxu0 %v11356_v48 }
 0x377   :  { %13753 = vst [vmem:[#allocation45_spill] sm:$0xff] %v13021_v27  ;;  %v5065_v11 = vrot.slane %v5063_v10, 4  ;;  %v5068_v51 = vrot.slane %v5066_v33, 5  ;;  %v4834_v14 = vld [vmem:[#allocation3 + $0x60] sm:$0xf]  ;;  %13754 = vst [vmem:[#allocation46_spill] sm:$0xff] %v13030_v7  ;;  %v8833_v33 = vpop.f32.mrf.mxu0 }
 0x378   :  { %v5074_v26 = vrot.slane %v5072_v42, 5  ;;  %v5078_v25 = vrot.slane %v5076_v3, 4  ;;  %v4835_v53 = vld [vmem:[#allocation3 + $0x64] sm:$0xf]  ;;  %v5082_v27 = vshrl.u32 %v4834_v14, 16  ;;  %v5085_v8 = vshll.u32 %v4834_v14, 16 }
 0x379   :  { %v5650_v28 = vld [vmem:[#allocation2 + $0x284] sm:$0x8]  ;;  %v4262_v55 = vsel %vm11592_vm6, %v4254_v45, %v4261_v47  ;;  %v5069_v52 = vor.u32 %v5068_v51, %v5065_v11  ;;  %v5543_v15 = vld [vmem:[#allocation2 + $0x314] sm:$0xf]  ;;  %v5091_v61 = vshll.u32 %v4835_v53, 16  ;;  %v5095_v10 = vshrl.u32 %v4835_v53, 16  ;;  %v8835_v17 = vpop.f32.mrf.mxu0 }
 0x37a   :  { %v11358_v58 = vld [vmem:[#allocation2 + $0x5b8] ss:$36 sps:$4 sm:$0xff]   ;;  %v5651_v38 = vsel %vm11727_vm10, 0, %v5650_v28  ;;  %4550 = vst [vmem:[#allocation2 + $0x624] sm:$0xf] %v4262_v55  ;;  %v5079_v48 = vor.u32 %v5078_v25, %v5074_v26  ;;  %v13037_v56 = vadd.f32 %v8833_v33, %v13006_v41  ;;  %v13755_v42 = vld [vmem:[#allocation79_spill] sm:$0xff]  ;;  %v8999_v25 = vpop.f32.mrf.mxu1 }
 0x37b   :  { %v11360_v36 = vld [vmem:[#allocation2 + $0x5bc] ss:$36 sps:$4 sm:$0xff]   ;;  %v13040_v3 = vadd.f32 %v8994_v13, %v13755_v42  ;;  %v13757_v45 = vld [vmem:[#allocation80_spill] sm:$0xff]  ;;  %5652 = vst [vmem:[#allocation2 + $0x284] sm:$0x8] %v5651_v38  ;;  %v5070_v51 = vrot.slane %v5069_v52, 4  ;;  %v8838_v52 = vpop.f32.mrf.mxu0 }
 0x37c   :  { %v13756_v14 = vld [vmem:[#allocation54_spill] sm:$0xff]  ;;  %v5084_v49 = vrot.slane %v5082_v27, 4  ;;  %9149 = vmatprep.mubr.bf16.mxu1 %v11360_v36  ;;  %v5080_v53 = vrot.slane %v5079_v48, 4  ;;  %v5087_v7 = vrot.slane %v5085_v8, 5  ;;  %v5093_v28 = vrot.slane %v5091_v61, 5  ;;  %v13758_v54 = vld [vmem:[#allocation55_spill] sm:$0xff] }
 0x37d   :  { %v8550_v47 = vadd.f32 %v13757_v45, %v13756_v14  ;;  %v11357_v11 = vld [vmem:[#allocation2 + $0x218] ss:$36 sps:$4 sm:$0xff]   ;;  %v5097_v55 = vrot.slane %v5095_v10, 4  ;;  %v8553_v41 = vadd.f32 %v12588_v62, %v13758_v54  ;;  %9150 = vmatmul.mubr.bf16.gmra.mxu1 %v11358_v58  ;;  %v4655_v13 = vld [vmem:[#allocation2 + $0x600] sm:$0x1]  ;;  %v5075_v33 = vsel %vm11765_vm13, %v5070_v51, %v5074_v26  ;;  %v9001_v10 = vpop.f32.mrf.mxu1  ;;  %v8840_v45 = vpop.f32.mrf.mxu0 }
 0x37e   :  { %10840 = vmatmul.mubr.bf16.gmra.mxu0 %v11357_v11  ;;  %v3909_v42 = vld [vmem:[#allocation3 + $0xb8] sm:$0xf]  ;;  %v3910_v38 = vld [vmem:[#allocation3 + $0xbc] sm:$0xf]  ;;  %v13049_v27 = vadd.f32 %v8999_v25, %v12596_v44  ;;  %v5653_v36 = vld [vmem:[#allocation2 + $0x2cc] sm:$0x8]  ;;  %v5544_v62 = vsel %vm11771_vm14, %v5080_v53, %v5543_v15  ;;  %v5088_v54 = vor.u32 %v5087_v7, %v5084_v49 }
 0x37f   :  { %v4656_v8 = vsel %vm11580_vm2, 0, %v4655_v13  ;;  %5542 = vst [vmem:[#allocation2 + $0x2f0] sm:$0xf] %v5075_v33  ;;  %v5098_v61 = vor.u32 %v5097_v55, %v5093_v28  ;;  %v5654_v26 = vsel %vm11727_vm10, 0, %v5653_v36  ;;  %5545 = vst [vmem:[#allocation2 + $0x314] sm:$0xf] %v5544_v62  ;;  %v13057_v15 = vadd.f32 %v8838_v52, %v8550_v47  ;;  %v9002_v7 = vpop.f32.mrf.mxu1  ;;  %v8841_v33 = vpop.f32.mrf.mxu0 }
 0x380   :  { %4657 = vst [vmem:[#allocation2 + $0x600] sm:$0x1] %v4656_v8  ;;  %v5547_v58 = vld [vmem:[#allocation2 + $0x35c] sm:$0xf]  ;;  %v4264_v48 = vshrl.u32 %v3909_v42, 16  ;;  %v4267_v44 = vshll.u32 %v3909_v42, 16  ;;  %v13060_v36 = vadd.f32 %v9002_v7, %v12610_v4  ;;  %v13066_v47 = vadd.f32 %v8841_v33, %v8553_v41 }
 0x381   :  { %v4272_v14 = vshrl.u32 %v3910_v38, 16  ;;  %5655 = vst [vmem:[#allocation2 + $0x2cc] sm:$0x8] %v5654_v26  ;;  %v5089_v11 = vrot.slane %v5088_v54, 4  ;;  %v5099_v51 = vrot.slane %v5098_v61, 4  ;;  %v4275_v17 = vshll.u32 %v3910_v38, 16  ;;  %v9004_v52 = vpop.f32.mrf.mxu1 }
 0x382   :  { %v4551_v25 = vld [vmem:[#allocation2 + $0x648] sm:$0xf]  ;;  %v4730_v13 = vld [vmem:[#allocation3 + $0xb8] sm:$0xf]  ;;  %v4266_v49 = vrot.slane %v4264_v48, 7  ;;  %v8843_v48 = vpop.f32.mrf.mxu0 }
 0x383   :  { %v4274_v53 = vrot.slane %v4272_v14, 7  ;;  %v4731_v55 = vld [vmem:[#allocation3 + $0xbc] sm:$0xf]  ;;  %4790 = vst [vmem:[#allocation2 + $0x64c] sm:$0xf] %v4730_v13  ;;  %v5094_v8 = vsel %vm11765_vm13, %v5089_v11, %v5093_v28  ;;  %v5548_v38 = vsel %vm11771_vm14, %v5099_v51, %v5547_v58  ;;  %v9007_v13 = vpop.f32.mrf.mxu1 }
 0x384   :  { %v11361_v42 = vld [vmem:[#allocation2 + $0x260] ss:$36 sps:$4 sm:$0xff]   ;;  %4791 = vst [vmem:[#allocation2 + $0x670] sm:$0xf] %v4731_v55  ;;  %v4836_v62 = vld [vmem:[#allocation3 + $0x68] sm:$0xf]  ;;  %v4269_v54 = vor.u32 %v4267_v44, %v4266_v49  ;;  %v8846_v33 = vpop.f32.mrf.mxu0 }
 0x385   :  { %5546 = vst [vmem:[#allocation2 + $0x338] sm:$0xf] %v5094_v8  ;;  %5549 = vst [vmem:[#allocation2 + $0x35c] sm:$0xf] %v5548_v38  ;;  %v4270_v61 = vrot.slane %v4266_v49, 4  ;;  %v4277_v10 = vor.u32 %v4275_v17, %v4274_v53  ;;  %v5101_v4 = vshrl.u32 %v4836_v62, 16  ;;  %10843 = vmatprep.mubr.bf16.mxu0 %v11361_v42  ;;  %v13075_v42 = vadd.f32 %v9007_v13, %v12628_v2  ;;  %v9009_v8 = vpop.f32.mrf.mxu1 }
 0x386   :  { %v4837_v26 = vld [vmem:[#allocation3 + $0x6c] sm:$0xf]  ;;  %v13759_v14 = vld [vmem:[#allocation58_spill] sm:$0xff]  ;;  %v5104_v28 = vshll.u32 %v4836_v62, 16  ;;  %v4838_v51 = vld [vmem:[#allocation3 + $0x70] sm:$0xf]  ;;  %v4552_v44 = vsel %vm11598_vm7, %v4269_v54, %v4551_v25 }
 0x387   :  { %v8558_v45 = vadd.f32 %v12604_v23, %v13759_v14  ;;  %v5110_v11 = vshll.u32 %v4837_v26, 16  ;;  %v5114_v58 = vshrl.u32 %v4837_v26, 16  ;;  %v4278_v41 = vsel %vm11592_vm6, %v4270_v61, %v4277_v10  ;;  %v4839_v17 = vld [vmem:[#allocation3 + $0x74] sm:$0xf]  ;;  %v11363_v53 = vld [vmem:[#allocation2 + $0x600] ss:$36 sps:$4 sm:$0xff]   ;;  %v8848_v14 = vpop.f32.mrf.mxu0 }
 0x388   :  { %v5103_v7 = vrot.slane %v5101_v4, 4  ;;  %v5120_v49 = vshrl.u32 %v4838_v51, 16  ;;  %v11365_v55 = vld [vmem:[#allocation2 + $0x604] ss:$36 sps:$4 sm:$0xff]   ;;  %4553 = vst [vmem:[#allocation2 + $0x648] sm:$0xf] %v4552_v44 }
 0x389   :  { %4554 = vst [vmem:[#allocation2 + $0x66c] sm:$0xf] %v4278_v41  ;;  %v5106_v23 = vrot.slane %v5104_v28, 5  ;;  %v13760_v38 = vld [vmem:[#allocation59_spill] sm:$0xff]  ;;  %v13761_v62 = vld [vmem:[#allocation81_spill] sm:$0xff]  ;;  %v13079_v26 = vadd.f32 %v8846_v33, %v8558_v45  ;;  %9157 = vmatprep.mubr.bf16.mxu1 %v11365_v55  ;;  %v5112_v4 = vrot.slane %v5110_v11, 5  ;;  %v9010_v28 = vpop.f32.mrf.mxu1 }
 0x38a   :  { %v8561_v52 = vadd.f32 %v13761_v62, %v13760_v38  ;;  %v11362_v61 = vld [vmem:[#allocation2 + $0x2a8] ss:$36 sps:$4 sm:$0xff]   ;;  %v5656_v10 = vld [vmem:[#allocation2 + $0x314] sm:$0x8]  ;;  %v5116_v48 = vrot.slane %v5114_v58, 4  ;;  %9158 = vmatmul.mubr.bf16.gmra.mxu1 %v11363_v53  ;;  %v5122_v13 = vrot.slane %v5120_v49, 4 }
 0x38b   :  { %13762 = vst [vmem:[#allocation47_spill] sm:$0xff] %v13079_v26  ;;  %v5657_v25 = vsel %vm11727_vm10, 0, %v5656_v10  ;;  %v5107_v54 = vor.u32 %v5106_v23, %v5103_v7  ;;  %10844 = vmatmul.mubr.bf16.gmra.mxu0 %v11362_v61  ;;  %v5551_v2 = vld [vmem:[#allocation2 + $0x3a4] sm:$0xf]  ;;  %v5123_v41 = vshll.u32 %v4838_v51, 16  ;;  %v5129_v44 = vshll.u32 %v4839_v17, 16  ;;  %v8849_v26 = vpop.f32.mrf.mxu0  ;;  %v9012_v11 = vpop.f32.mrf.mxu1 }
 0x38c   :  { %5658 = vst [vmem:[#allocation2 + $0x314] sm:$0x8] %v5657_v25  ;;  %v5133_v8 = vshrl.u32 %v4839_v17, 16  ;;  %v3911_v38 = vld [vmem:[#allocation3 + $0xc0] sm:$0xf]  ;;  %v5117_v55 = vor.u32 %v5116_v48, %v5112_v4  ;;  %v13084_v7 = vadd.f32 %v9010_v28, %v12634_v19 }
 0x38d   :  { %v5659_v45 = vld [vmem:[#allocation2 + $0x35c] sm:$0x8]  ;;  %v5108_v33 = vrot.slane %v5107_v54, 4  ;;  %v4280_v62 = vshrl.u32 %v3911_v38, 16  ;;  %v5125_v23 = vrot.slane %v5123_v41, 5  ;;  %v5131_v53 = vrot.slane %v5129_v44, 5  ;;  %v8851_v14 = vpop.f32.mrf.mxu0  ;;  %v9015_v41 = vpop.f32.mrf.mxu1 }
 0x38e   :  { %13763 = vst [vmem:[#allocation76_spill] sm:$0xff] %v13084_v7  ;;  %v5660_v58 = vsel %vm11727_vm10, 0, %v5659_v45  ;;  %v5135_v61 = vrot.slane %v5133_v8, 4  ;;  %v3912_v49 = vld [vmem:[#allocation3 + $0xc4] sm:$0xf]  ;;  %v5118_v17 = vrot.slane %v5117_v55, 4 }
 0x38f   :  { %5661 = vst [vmem:[#allocation2 + $0x35c] sm:$0x8] %v5660_v58  ;;  %v5113_v51 = vsel %vm11765_vm13, %v5108_v33, %v5112_v4  ;;  %v5555_v10 = vld [vmem:[#allocation2 + $0x3ec] sm:$0xf]  ;;  %v4282_v25 = vrot.slane %v4280_v62, 7  ;;  %v4283_v54 = vshll.u32 %v3911_v38, 16  ;;  %v5126_v28 = vor.u32 %v5125_v23, %v5122_v13 }
 0x390   :  { %v4555_v48 = vld [vmem:[#allocation2 + $0x690] sm:$0xf]  ;;  %v4658_v19 = vld [vmem:[#allocation2 + $0x648] sm:$0x1]  ;;  %5550 = vst [vmem:[#allocation2 + $0x380] sm:$0xf] %v5113_v51  ;;  %v5136_v11 = vor.u32 %v5135_v61, %v5131_v53  ;;  %v5552_v8 = vsel %vm11771_vm14, %v5118_v17, %v5551_v2  ;;  %v13094_v23 = vadd.f32 %v8849_v26, %v8561_v52  ;;  %v9017_v61 = vpop.f32.mrf.mxu1 }
 0x391   :  { %v4288_v7 = vshrl.u32 %v3912_v49, 16  ;;  %v4291_v45 = vshll.u32 %v3912_v49, 16  ;;  %v4659_v44 = vsel %vm11580_vm2, 0, %v4658_v19  ;;  %v4285_v4 = vor.u32 %v4283_v54, %v4282_v25  ;;  %v4732_v55 = vld [vmem:[#allocation3 + $0xc0] sm:$0xf] }
 0x392   :  { %v4286_v33 = vrot.slane %v4282_v25, 4  ;;  %v4733_v62 = vld [vmem:[#allocation3 + $0xc4] sm:$0xf]  ;;  %4660 = vst [vmem:[#allocation2 + $0x648] sm:$0x1] %v4659_v44  ;;  %v5127_v38 = vrot.slane %v5126_v28, 4  ;;  %v8854_v28 = vpop.f32.mrf.mxu0 }
 0x393   :  { %5553 = vst [vmem:[#allocation2 + $0x3a4] sm:$0xf] %v5552_v8  ;;  %v5137_v58 = vrot.slane %v5136_v11, 4  ;;  %v4290_v51 = vrot.slane %v4288_v7, 7  ;;  %4792 = vst [vmem:[#allocation2 + $0x694] sm:$0xf] %v4732_v55  ;;  %v4556_v25 = vsel %vm11598_vm7, %v4285_v4, %v4555_v48  ;;  %v13103_v7 = vadd.f32 %v9015_v41, %v12654_v57 }
 0x394   :  { %4793 = vst [vmem:[#allocation2 + $0x6b8] sm:$0xf] %v4733_v62  ;;  %v4840_v13 = vld [vmem:[#allocation3 + $0x78] sm:$0xf]  ;;  %v13765_v19 = vld [vmem:[#allocation63_spill] sm:$0xff]  ;;  %v5132_v52 = vsel %vm11765_vm13, %v5127_v38, %v5131_v53  ;;  %v8856_v41 = vpop.f32.mrf.mxu0 }
 0x395   :  { %v13764_v49 = vld [vmem:[#allocation62_spill] sm:$0xff]  ;;  %v8569_v2 = vadd.f32 %v12640_v59, %v13765_v19  ;;  %v11366_v17 = vld [vmem:[#allocation2 + $0x2f0] ss:$36 sps:$4 sm:$0xff]   ;;  %v5556_v26 = vsel %vm11771_vm14, %v5137_v58, %v5555_v10  ;;  %v4293_v11 = vor.u32 %v4291_v45, %v4290_v51  ;;  %4557 = vst [vmem:[#allocation2 + $0x690] sm:$0xf] %v4556_v25  ;;  %v9018_v59 = vpop.f32.mrf.mxu1  ;;  %v5142_v48 = vshll.u32 %v4840_v13, 16 }
 0x396   :  { %v8566_v14 = vadd.f32 %v12632_v50, %v13764_v49  ;;  %v4841_v54 = vld [vmem:[#allocation3 + $0x7c] sm:$0xf]  ;;  %v5139_v50 = vshrl.u32 %v4840_v13, 16  ;;  %10847 = vmatprep.mubr.bf16.mxu0 %v11366_v17  ;;  %5554 = vst [vmem:[#allocation2 + $0x3c8] sm:$0xf] %v5132_v52  ;;  %v13116_v62 = vadd.f32 %v9018_v59, %v12658_v31  ;;  %v8857_v61 = vpop.f32.mrf.mxu0 }
 0x397   :  { %v5671_v44 = vld [vmem:[#allocation2 + $0x47c] sm:$0x8]  ;;  %5557 = vst [vmem:[#allocation2 + $0x3ec] sm:$0xf] %v5556_v26  ;;  %v5148_v8 = vshll.u32 %v4841_v54, 16  ;;  %v5152_v4 = vshrl.u32 %v4841_v54, 16  ;;  %v4294_v53 = vsel %vm11592_vm6, %v4286_v33, %v4293_v11  ;;  %v9020_v38 = vpop.f32.mrf.mxu1  ;;  %v13118_v25 = vadd.f32 %v8857_v61, %v8569_v2 }
 0x398   :  { %v5672_v57 = vsel %vm11727_vm10, 0, %v5671_v44  ;;  %v11367_v55 = vld [vmem:[#allocation2 + $0x338] ss:$36 sps:$4 sm:$0xff]   ;;  %v5141_v10 = vrot.slane %v5139_v50, 4  ;;  %v13113_v45 = vadd.f32 %v8854_v28, %v8566_v14  ;;  %4558 = vst [vmem:[#allocation2 + $0x6b4] sm:$0xf] %v4294_v53  ;;  %v8859_v26 = vpop.f32.mrf.mxu0 }
 0x399   :  { %5673 = vst [vmem:[#allocation2 + $0x47c] sm:$0x8] %v5672_v57  ;;  %v5144_v58 = vrot.slane %v5142_v48, 5  ;;  %v5150_v51 = vrot.slane %v5148_v8, 5  ;;  %v5154_v13 = vrot.slane %v5152_v4, 4  ;;  %10848 = vmatmul.mubr.bf16.gmra.mxu0 %v11367_v55  ;;  %v13766_v31 = vld [vmem:[#allocation66_spill] sm:$0xff]  ;;  %v9023_v4 = vpop.f32.mrf.mxu1 }
 0x39a   :  { %v5559_v49 = vld [vmem:[#allocation2 + $0x434] sm:$0xf]  ;;  %v3913_v19 = vld [vmem:[#allocation3 + $0xc8] sm:$0xf]  ;;  %v3914_v17 = vld [vmem:[#allocation3 + $0xcc] sm:$0xf]  ;;  %v8574_v11 = vadd.f32 %v12656_v21, %v13766_v31  ;;  %v13129_v61 = vadd.f32 %v9023_v4, %v12676_v39 }
 0x39b   :  { %v11368_v33 = vld [vmem:[#allocation2 + $0x648] ss:$36 sps:$4 sm:$0xff]   ;;  %v5145_v52 = vor.u32 %v5144_v58, %v5141_v10  ;;  %v5155_v14 = vor.u32 %v5154_v13, %v5150_v51  ;;  %v4296_v28 = vshrl.u32 %v3913_v19, 16  ;;  %v5662_v50 = vld [vmem:[#allocation2 + $0x3a4] sm:$0x8]  ;;  %v4299_v44 = vshll.u32 %v3913_v19, 16  ;;  %v8862_v10 = vpop.f32.mrf.mxu0  ;;  %v9025_v19 = vpop.f32.mrf.mxu1 }
 0x39c   :  { %v11370_v54 = vld [vmem:[#allocation2 + $0x64c] ss:$36 sps:$4 sm:$0xff]   ;;  %v4304_v59 = vshrl.u32 %v3914_v17, 16  ;;  %v4307_v48 = vshll.u32 %v3914_v17, 16  ;;  %v4559_v8 = vld [vmem:[#allocation2 + $0x6d8] sm:$0xf]  ;;  %v13126_v13 = vadd.f32 %v8862_v10, %v8574_v11 }
 0x39d   :  { %9165 = vmatprep.mubr.bf16.mxu1 %v11370_v54  ;;  %v5663_v2 = vsel %vm11727_vm10, 0, %v5662_v50  ;;  %v4661_v57 = vld [vmem:[#allocation2 + $0x690] sm:$0x1]  ;;  %v5146_v41 = vrot.slane %v5145_v52, 4  ;;  %v5156_v55 = vrot.slane %v5155_v14, 4  ;;  %v4298_v53 = vrot.slane %v4296_v28, 7  ;;  %v8864_v14 = vpop.f32.mrf.mxu0  ;;  %v9026_v11 = vpop.f32.mrf.mxu1 }
 0x39e   :  { %5664 = vst [vmem:[#allocation2 + $0x3a4] sm:$0x8] %v5663_v2  ;;  %9166 = vmatmul.mubr.bf16.gmra.mxu1 %v11368_v33  ;;  %v5665_v38 = vld [vmem:[#allocation2 + $0x3ec] sm:$0x8]  ;;  %v4662_v21 = vsel %vm11580_vm2, 0, %v4661_v57  ;;  %v4306_v58 = vrot.slane %v4304_v59, 7  ;;  %v13142_v2 = vadd.f32 %v9026_v11, %v12686_v60 }
 0x39f   :  { %v5666_v17 = vsel %vm11727_vm10, 0, %v5665_v38  ;;  %4663 = vst [vmem:[#allocation2 + $0x690] sm:$0x1] %v4662_v21  ;;  %v5151_v54 = vsel %vm11765_vm13, %v5146_v41, %v5150_v51  ;;  %v5560_v33 = vsel %vm11771_vm14, %v5156_v55, %v5559_v49  ;;  %v4301_v52 = vor.u32 %v4299_v44, %v4298_v53  ;;  %v4734_v39 = vld [vmem:[#allocation3 + $0xc8] sm:$0xf]  ;;  %v8865_v44 = vpop.f32.mrf.mxu0 }
 0x3a0   :  { %5667 = vst [vmem:[#allocation2 + $0x3ec] sm:$0x8] %v5666_v17  ;;  %5558 = vst [vmem:[#allocation2 + $0x410] sm:$0xf] %v5151_v54  ;;  %v4302_v28 = vrot.slane %v4298_v53, 4  ;;  %v4309_v26 = vor.u32 %v4307_v48, %v4306_v58  ;;  %v13767_v50 = vld [vmem:[#allocation67_spill] sm:$0xff] }
 0x3a1   :  { %5561 = vst [vmem:[#allocation2 + $0x434] sm:$0xf] %v5560_v33  ;;  %v4735_v31 = vld [vmem:[#allocation3 + $0xcc] sm:$0xf]  ;;  %v8577_v59 = vadd.f32 %v12670_v40, %v13767_v50  ;;  %v4560_v4 = vsel %vm11598_vm7, %v4301_v52, %v4559_v8  ;;  %4794 = vst [vmem:[#allocation2 + $0x6dc] sm:$0xf] %v4734_v39  ;;  %v9028_v40 = vpop.f32.mrf.mxu1  ;;  %v8867_v19 = vpop.f32.mrf.mxu0 }
 0x3a2   :  { %4795 = vst [vmem:[#allocation2 + $0x700] sm:$0xf] %v4735_v31  ;;  %v4842_v51 = vld [vmem:[#allocation3 + $0x88] sm:$0xf]  ;;  %v4843_v49 = vld [vmem:[#allocation3 + $0x8c] sm:$0xf]  ;;  %v4310_v48 = vsel %vm11592_vm6, %v4302_v28, %v4309_v26 }
 0x3a3   :  { %4561 = vst [vmem:[#allocation2 + $0x6d8] sm:$0xf] %v4560_v4  ;;  %v5158_v57 = vshrl.u32 %v4842_v51, 16  ;;  %v5161_v41 = vshll.u32 %v4842_v51, 16  ;;  %v5167_v55 = vshll.u32 %v4843_v49, 16  ;;  %v5171_v10 = vshrl.u32 %v4843_v49, 16 }
 0x3a4   :  { %v4844_v53 = vld [vmem:[#allocation3 + $0x90] sm:$0xf]  ;;  %4562 = vst [vmem:[#allocation2 + $0x6fc] sm:$0xf] %v4310_v48  ;;  %v4845_v8 = vld [vmem:[#allocation3 + $0x94] sm:$0xf]  ;;  %v13146_v58 = vadd.f32 %v8865_v44, %v8577_v59  ;;  %v9031_v48 = vpop.f32.mrf.mxu1 }
 0x3a5   :  { %v5177_v38 = vshrl.u32 %v4844_v53, 16  ;;  %v5180_v21 = vshll.u32 %v4844_v53, 16  ;;  %v5160_v17 = vrot.slane %v5158_v57, 4  ;;  %v5163_v60 = vrot.slane %v5161_v41, 5  ;;  %v11371_v52 = vld [vmem:[#allocation2 + $0x380] ss:$36 sps:$4 sm:$0xff]  }
 0x3a6   :  { %13768 = vst [vmem:[#allocation49_spill] sm:$0xff] %v13146_v58  ;;  %v5169_v54 = vrot.slane %v5167_v55, 5  ;;  %v5186_v33 = vshll.u32 %v4845_v8, 16  ;;  %v5173_v14 = vrot.slane %v5171_v10, 4  ;;  %v11373_v26 = vld [vmem:[#allocation2 + $0x690] ss:$36 sps:$4 sm:$0xff]   ;;  %10851 = vmatprep.mubr.bf16.mxu0 %v11371_v52  ;;  %v9033_v52 = vpop.f32.mrf.mxu1 }
 0x3a7   :  { %v5179_v28 = vrot.slane %v5177_v38, 4  ;;  %v11375_v39 = vld [vmem:[#allocation2 + $0x694] ss:$36 sps:$4 sm:$0xff]   ;;  %v5164_v31 = vor.u32 %v5163_v60, %v5160_v17  ;;  %v5563_v11 = vld [vmem:[#allocation2 + $0x4c4] sm:$0xf]  ;;  %v5182_v50 = vrot.slane %v5180_v21, 5  ;;  %v8870_v17 = vpop.f32.mrf.mxu0  ;;  %v13155_v60 = vadd.f32 %v9031_v48, %v12714_v30 }
 0x3a8   :  { %v13769_v4 = vld [vmem:[#allocation70_spill] sm:$0xff]  ;;  %v11372_v49 = vld [vmem:[#allocation2 + $0x3c8] ss:$36 sps:$4 sm:$0xff]   ;;  %v5668_v59 = vld [vmem:[#allocation2 + $0x434] sm:$0x8]  ;;  %v5174_v44 = vor.u32 %v5173_v14, %v5169_v54  ;;  %9173 = vmatprep.mubr.bf16.mxu1 %v11375_v39  ;;  %v5188_v53 = vrot.slane %v5186_v33, 5 }
 0x3a9   :  { %v8582_v51 = vadd.f32 %v12694_v35, %v13769_v4  ;;  %v5669_v57 = vsel %vm11727_vm10, 0, %v5668_v59  ;;  %v5165_v41 = vrot.slane %v5164_v31, 4  ;;  %v5183_v55 = vor.u32 %v5182_v50, %v5179_v28  ;;  %v13770_v40 = vld [vmem:[#allocation71_spill] sm:$0xff]  ;;  %10852 = vmatmul.mubr.bf16.gmra.mxu0 %v11372_v49  ;;  %9174 = vmatmul.mubr.bf16.gmra.mxu1 %v11373_v26  ;;  %v3915_v19 = vld [vmem:[#allocation3 + $0xd0] sm:$0xf]  ;;  %v8872_v4 = vpop.f32.mrf.mxu0  ;;  %v9034_v49 = vpop.f32.mrf.mxu1 }
 0x3aa   :  { %v8585_v10 = vadd.f32 %v12696_v24, %v13770_v40  ;;  %5670 = vst [vmem:[#allocation2 + $0x434] sm:$0x8] %v5669_v57  ;;  %v4664_v38 = vld [vmem:[#allocation2 + $0x6d8] sm:$0x1]  ;;  %v5175_v35 = vrot.slane %v5174_v44, 4  ;;  %v5190_v21 = vshrl.u32 %v4845_v8, 16 }
 0x3ab   :  { %v4665_v14 = vsel %vm11580_vm2, 0, %v4664_v38  ;;  %v5170_v33 = vsel %vm11765_vm13, %v5165_v41, %v5169_v54  ;;  %v5184_v28 = vrot.slane %v5183_v55, 4  ;;  %v3916_v24 = vld [vmem:[#allocation3 + $0xd4] sm:$0xf]  ;;  %v4312_v39 = vshrl.u32 %v3915_v19, 16  ;;  %v13772_v55 = vld [vmem:[#allocation72_spill] sm:$0xff]  ;;  %v8873_v52 = vpop.f32.mrf.mxu0 }
 0x3ac   :  { %4666 = vst [vmem:[#allocation2 + $0x6d8] sm:$0x1] %v4665_v14  ;;  %5562 = vst [vmem:[#allocation2 + $0x4a0] sm:$0xf] %v5170_v33  ;;  %v5564_v8 = vsel %vm11771_vm14, %v5175_v35, %v5563_v11  ;;  %v5192_v26 = vrot.slane %v5190_v21, 4  ;;  %v4315_v31 = vshll.u32 %v3915_v19, 16  ;;  %v13165_v41 = vadd.f32 %v8870_v17, %v8582_v51  ;;  %v9036_v33 = vpop.f32.mrf.mxu1 }
 0x3ad   :  { %v4320_v50 = vshrl.u32 %v3916_v24, 16  ;;  %v4563_v30 = vld [vmem:[#allocation2 + $0x720] sm:$0xf]  ;;  %5565 = vst [vmem:[#allocation2 + $0x4c4] sm:$0xf] %v5564_v8  ;;  %v5189_v59 = vsel %vm11765_vm13, %v5184_v28, %v5188_v53  ;;  %v4314_v44 = vrot.slane %v4312_v39, 7  ;;  %v13169_v40 = vadd.f32 %v12716_v9, %v13772_v55 }
 0x3ae   :  { %v4323_v54 = vshll.u32 %v3916_v24, 16  ;;  %v4736_v48 = vld [vmem:[#allocation3 + $0xd0] sm:$0xf]  ;;  %v4737_v57 = vld [vmem:[#allocation3 + $0xd4] sm:$0xf]  ;;  %13771 = vst [vmem:[#allocation51_spill] sm:$0xff] %v13165_v41  ;;  %v5193_v38 = vor.u32 %v5192_v26, %v5188_v53  ;;  %v13172_v14 = vadd.f32 %v9034_v49, %v12718_v46  ;;  %v13176_v46 = vadd.f32 %v8873_v52, %v8585_v10 }
 0x3af   :  { %v11377_v11 = vld [vmem:[#allocation2 + $0x458] ss:$36 sps:$4 sm:$0xff]   ;;  %5566 = vst [vmem:[#allocation2 + $0x4e8] sm:$0xf] %v5189_v59  ;;  %v4322_v35 = vrot.slane %v4320_v50, 7  ;;  %v4317_v51 = vor.u32 %v4315_v31, %v4314_v44  ;;  %v4318_v17 = vrot.slane %v4314_v44, 4  ;;  %v8875_v50 = vpop.f32.mrf.mxu0 }
 0x3b0   :  { %4796 = vst [vmem:[#allocation2 + $0x724] sm:$0xf] %v4736_v48  ;;  %4797 = vst [vmem:[#allocation2 + $0x748] sm:$0xf] %v4737_v57  ;;  %v4846_v21 = vld [vmem:[#allocation3 + $0x98] sm:$0xf] }
 0x3b1   :  { %v4847_v19 = vld [vmem:[#allocation3 + $0x9c] sm:$0xf]  ;;  %v5567_v28 = vld [vmem:[#allocation2 + $0x50c] sm:$0xf]  ;;  %v5196_v24 = vshrl.u32 %v4846_v21, 16  ;;  %v5199_v39 = vshll.u32 %v4846_v21, 16  ;;  %v4325_v8 = vor.u32 %v4323_v54, %v4322_v35  ;;  %v4564_v48 = vsel %vm11598_vm7, %v4317_v51, %v4563_v30  ;;  %v9039_v35 = vpop.f32.mrf.mxu1 }
 0x3b2   :  { %v5194_v9 = vrot.slane %v5193_v38, 4  ;;  %v5205_v4 = vshll.u32 %v4847_v19, 16  ;;  %v5209_v53 = vshrl.u32 %v4847_v19, 16  ;;  %v4848_v26 = vld [vmem:[#allocation3 + $0xa0] sm:$0xf]  ;;  %13773 = vst [vmem:[#allocation77_spill] sm:$0xff] %v13176_v46 }
 0x3b3   :  { %v11376_v59 = vld [vmem:[#allocation2 + $0x410] ss:$36 sps:$4 sm:$0xff]   ;;  %v5198_v57 = vrot.slane %v5196_v24, 4  ;;  %v5201_v55 = vrot.slane %v5199_v39, 5  ;;  %v4326_v49 = vsel %vm11592_vm6, %v4318_v17, %v4325_v8  ;;  %4565 = vst [vmem:[#allocation2 + $0x720] sm:$0xf] %v4564_v48  ;;  %v9041_v50 = vpop.f32.mrf.mxu1 }
 0x3b4   :  { %v5568_v31 = vsel %vm11771_vm14, %v5194_v9, %v5567_v28  ;;  %v5207_v44 = vrot.slane %v5205_v4, 5  ;;  %v5211_v54 = vrot.slane %v5209_v53, 4  ;;  %v4849_v38 = vld [vmem:[#allocation3 + $0xa4] sm:$0xf]  ;;  %v13774_v21 = vld [vmem:[#allocation73_spill] sm:$0xff]  ;;  %10855 = vmatprep.mubr.bf16.mxu0 %v11376_v59  ;;  %v5215_v51 = vshrl.u32 %v4848_v26, 16  ;;  %v8878_v53 = vpop.f32.mrf.mxu0 }
 0x3b5   :  { %v8593_v19 = vadd.f32 %v12720_v37, %v13774_v21  ;;  %v11378_v30 = vld [vmem:[#allocation2 + $0x6d8] ss:$36 sps:$4 sm:$0xff]   ;;  %5569 = vst [vmem:[#allocation2 + $0x50c] sm:$0xf] %v5568_v31  ;;  %4566 = vst [vmem:[#allocation2 + $0x744] sm:$0xf] %v4326_v49  ;;  %v5202_v10 = vor.u32 %v5201_v55, %v5198_v57  ;;  %v13185_v28 = vadd.f32 %v9039_v35, %v12738_v16  ;;  %10856 = vmatmul.mubr.bf16.gmra.mxu0 %v11377_v11 }
 0x3b6   :  { %v11380_v33 = vld [vmem:[#allocation2 + $0x6dc] ss:$36 sps:$4 sm:$0xff]   ;;  %v5571_v52 = vld [vmem:[#allocation2 + $0x554] sm:$0xf]  ;;  %v5674_v9 = vld [vmem:[#allocation2 + $0x4c4] sm:$0x8]  ;;  %v5212_v8 = vor.u32 %v5211_v54, %v5207_v44  ;;  %v13194_v11 = vadd.f32 %v8878_v53, %v13169_v40  ;;  %v9042_v54 = vpop.f32.mrf.mxu1 }
 0x3b7   :  { %v13775_v17 = vld [vmem:[#allocation74_spill] sm:$0xff]  ;;  %v5218_v4 = vshll.u32 %v4848_v26, 16  ;;  %v5224_v37 = vshll.u32 %v4849_v38, 16  ;;  %9181 = vmatprep.mubr.bf16.mxu1 %v11380_v33  ;;  %v5675_v59 = vsel %vm11727_vm10, 0, %v5674_v9  ;;  %v5203_v48 = vrot.slane %v5202_v10, 4  ;;  %v8880_v26 = vpop.f32.mrf.mxu0 }
 0x3b8   :  { %v13776_v24 = vld [vmem:[#allocation82_spill] sm:$0xff]  ;;  %v5217_v57 = vrot.slane %v5215_v51, 4  ;;  %v5228_v55 = vshrl.u32 %v4849_v38, 16  ;;  %5676 = vst [vmem:[#allocation2 + $0x4c4] sm:$0x8] %v5675_v59  ;;  %9182 = vmatmul.mubr.bf16.gmra.mxu1 %v11378_v30  ;;  %v5213_v16 = vrot.slane %v5212_v8, 4  ;;  %v9044_v53 = vpop.f32.mrf.mxu1 }
 0x3b9   :  { %v13189_v39 = vadd.f32 %v13776_v24, %v13775_v17  ;;  %v5220_v31 = vrot.slane %v5218_v4, 5  ;;  %v5226_v49 = vrot.slane %v5224_v37, 5  ;;  %v3917_v35 = vld [vmem:[#allocation3 + $0xd8] sm:$0xf]  ;;  %13777 = vst [vmem:[#allocation78_spill] sm:$0xff] %v13194_v11  ;;  %v5208_v21 = vsel %vm11765_vm13, %v5203_v48, %v5207_v44  ;;  %v8881_v37 = vpop.f32.mrf.mxu0 }
 0x3ba   :  { %v5230_v33 = vrot.slane %v5228_v55, 4  ;;  %v3918_v17 = vld [vmem:[#allocation3 + $0xdc] sm:$0xf]  ;;  %v4328_v24 = vshrl.u32 %v3917_v35, 16  ;;  %v4331_v10 = vshll.u32 %v3917_v35, 16  ;;  %v5572_v38 = vsel %vm11771_vm14, %v5213_v16, %v5571_v52  ;;  %v13779_v35 = vld [vmem:[#allocation83_spill] sm:$0xff] }
 0x3bb   :  { %5570 = vst [vmem:[#allocation2 + $0x530] sm:$0xf] %v5208_v21  ;;  %v5221_v30 = vor.u32 %v5220_v31, %v5217_v57  ;;  %v5575_v51 = vld [vmem:[#allocation2 + $0x59c] sm:$0xf]  ;;  %v4336_v9 = vshrl.u32 %v3918_v17, 16  ;;  %v4339_v8 = vshll.u32 %v3918_v17, 16  ;;  %v13200_v55 = vadd.f32 %v8881_v37, %v8593_v19 }
 0x3bc   :  { %v4567_v4 = vld [vmem:[#allocation2 + $0x768] sm:$0xf]  ;;  %v4738_v40 = vld [vmem:[#allocation3 + $0xd8] sm:$0xf]  ;;  %v4667_v50 = vld [vmem:[#allocation2 + $0x720] sm:$0x1]  ;;  %v5231_v59 = vor.u32 %v5230_v33, %v5226_v49  ;;  %v13203_v26 = vadd.f32 %v9042_v54, %v13779_v35  ;;  %v8883_v33 = vpop.f32.mrf.mxu0 }
 0x3bd   :  { %5573 = vst [vmem:[#allocation2 + $0x554] sm:$0xf] %v5572_v38  ;;  %v4330_v44 = vrot.slane %v4328_v24, 7  ;;  %v4739_v48 = vld [vmem:[#allocation3 + $0xdc] sm:$0xf]  ;;  %13778 = vst [vmem:[#allocation79_spill] sm:$0xff] %v13200_v55 }
 0x3be   :  { %4798 = vst [vmem:[#allocation2 + $0x76c] sm:$0xf] %v4738_v40  ;;  %13780 = vst [vmem:[#allocation54_spill] sm:$0xff] %v13203_v26  ;;  %v13781_v52 = vld [vmem:[#allocation75_spill] sm:$0xff]  ;;  %v13782_v57 = vld [vmem:[#allocation84_spill] sm:$0xff]  ;;  %v4668_v21 = vsel %vm11580_vm2, 0, %v4667_v50 }
 0x3bf   :  { %v13207_v16 = vadd.f32 %v13782_v57, %v13781_v52  ;;  %v5677_v31 = vld [vmem:[#allocation2 + $0x50c] sm:$0x8]  ;;  %v5222_v17 = vrot.slane %v5221_v30, 4  ;;  %v4338_v53 = vrot.slane %v4336_v9, 7  ;;  %4799 = vst [vmem:[#allocation2 + $0x790] sm:$0xf] %v4739_v48  ;;  %v4333_v38 = vor.u32 %v4331_v10, %v4330_v44  ;;  %v9047_v30 = vpop.f32.mrf.mxu1 }
 0x3c0   :  { %v5678_v24 = vsel %vm11727_vm10, 0, %v5677_v31  ;;  %4669 = vst [vmem:[#allocation2 + $0x720] sm:$0x1] %v4668_v21  ;;  %v5232_v19 = vrot.slane %v5231_v59, 4  ;;  %v4334_v54 = vrot.slane %v4330_v44, 4  ;;  %v13783_v33 = vld [vmem:[#allocation48_spill] sm:$0xff] }
 0x3c1   :  { %v4850_v40 = vld [vmem:[#allocation3 + $0xa8] sm:$0xf]  ;;  %5679 = vst [vmem:[#allocation2 + $0x50c] sm:$0x8] %v5678_v24  ;;  %v5227_v37 = vsel %vm11765_vm13, %v5222_v17, %v5226_v49  ;;  %v4341_v35 = vor.u32 %v4339_v8, %v4338_v53  ;;  %v4851_v52 = vld [vmem:[#allocation3 + $0xac] sm:$0xf]  ;;  %v4568_v59 = vsel %vm11598_vm7, %v4333_v38, %v4567_v4  ;;  %v8886_v53 = vpop.f32.mrf.mxu0  ;;  %v13222_v24 = vadd.f32 %v9047_v30, %v13783_v33 }
 0x3c2   :  { %v5234_v57 = vshrl.u32 %v4850_v40, 16  ;;  %v5237_v50 = vshll.u32 %v4850_v40, 16  ;;  %v11381_v9 = vld [vmem:[#allocation2 + $0x4a0] ss:$36 sps:$4 sm:$0xff]   ;;  %5574 = vst [vmem:[#allocation2 + $0x578] sm:$0xf] %v5227_v37  ;;  %v5576_v48 = vsel %vm11771_vm14, %v5232_v19, %v5575_v51  ;;  %v9049_v40 = vpop.f32.mrf.mxu1 }
 0x3c3   :  { %v5243_v10 = vshll.u32 %v4851_v52, 16  ;;  %v5247_v44 = vshrl.u32 %v4851_v52, 16  ;;  %5577 = vst [vmem:[#allocation2 + $0x59c] sm:$0xf] %v5576_v48  ;;  %v4342_v31 = vsel %vm11592_vm6, %v4334_v54, %v4341_v35  ;;  %4569 = vst [vmem:[#allocation2 + $0x768] sm:$0xf] %v4568_v59  ;;  %10859 = vmatprep.mubr.bf16.mxu0 %v11381_v9 }
 0x3c4   :  { %v5236_v49 = vrot.slane %v5234_v57, 4  ;;  %v5239_v8 = vrot.slane %v5237_v50, 5  ;;  %v4852_v21 = vld [vmem:[#allocation3 + $0xb0] sm:$0xf]  ;;  %v4853_v17 = vld [vmem:[#allocation3 + $0xb4] sm:$0xf]  ;;  %v13225_v57 = vadd.f32 %v8886_v53, %v13189_v39  ;;  %v8888_v50 = vpop.f32.mrf.mxu0  ;;  %v9050_v59 = vpop.f32.mrf.mxu1 }
 0x3c5   :  { %4570 = vst [vmem:[#allocation2 + $0x78c] sm:$0xf] %v4342_v31  ;;  %v5245_v51 = vrot.slane %v5243_v10, 5  ;;  %v5249_v4 = vrot.slane %v5247_v44, 4  ;;  %v5253_v19 = vshrl.u32 %v4852_v21, 16  ;;  %v5256_v38 = vshll.u32 %v4852_v21, 16 }
 0x3c6   :  { %v5680_v37 = vld [vmem:[#allocation2 + $0x554] sm:$0x8]  ;;  %v5240_v52 = vor.u32 %v5239_v8, %v5236_v49  ;;  %v5579_v48 = vld [vmem:[#allocation2 + $0x5e4] sm:$0xf]  ;;  %v5262_v54 = vshll.u32 %v4853_v17, 16  ;;  %v5266_v35 = vshrl.u32 %v4853_v17, 16  ;;  %v8889_v49 = vpop.f32.mrf.mxu0  ;;  %v9052_v17 = vpop.f32.mrf.mxu1 }
 0x3c7   :  { %13784 = vst [vmem:[#allocation80_spill] sm:$0xff] %v13225_v57  ;;  %v5681_v30 = vsel %vm11727_vm10, 0, %v5680_v37  ;;  %v5250_v33 = vor.u32 %v5249_v4, %v5245_v51  ;;  %v5255_v9 = vrot.slane %v5253_v19, 4  ;;  %v5258_v31 = vrot.slane %v5256_v38, 5  ;;  %v3919_v10 = vld [vmem:[#allocation3 + $0xe0] sm:$0xf] }
 0x3c8   :  { %v11383_v44 = vld [vmem:[#allocation2 + $0x720] ss:$36 sps:$4 sm:$0xff]   ;;  %5682 = vst [vmem:[#allocation2 + $0x554] sm:$0x8] %v5681_v30  ;;  %v5241_v21 = vrot.slane %v5240_v52, 4  ;;  %v5264_v57 = vrot.slane %v5262_v54, 5  ;;  %v13233_v11 = vadd.f32 %v8889_v49, %v13207_v16  ;;  %v8891_v52 = vpop.f32.mrf.mxu0 }
 0x3c9   :  { %v11385_v40 = vld [vmem:[#allocation2 + $0x724] ss:$36 sps:$4 sm:$0xff]   ;;  %v13785_v8 = vld [vmem:[#allocation30_spill] sm:$0xff]  ;;  %v5251_v53 = vrot.slane %v5250_v33, 4  ;;  %v5259_v50 = vor.u32 %v5258_v31, %v5255_v9  ;;  %v5268_v19 = vrot.slane %v5266_v35, 4  ;;  %v4344_v37 = vshrl.u32 %v3919_v10, 16 }
 0x3ca   :  { %v13230_v55 = vadd.f32 %v9050_v59, %v13785_v8  ;;  %v11382_v39 = vld [vmem:[#allocation2 + $0x4e8] ss:$36 sps:$4 sm:$0xff]   ;;  %13786 = vst [vmem:[#allocation55_spill] sm:$0xff] %v13233_v11  ;;  %9189 = vmatprep.mubr.bf16.mxu1 %v11385_v40  ;;  %v5246_v4 = vsel %vm11765_vm13, %v5241_v21, %v5245_v51  ;;  %v3920_v38 = vld [vmem:[#allocation3 + $0xe4] sm:$0xf]  ;;  %v13788_v46 = vld [vmem:[#allocation50_spill] sm:$0xff] }
 0x3cb   :  { %v13787_v30 = vld [vmem:[#allocation15_spill] sm:$0xff]  ;;  %10860 = vmatmul.mubr.bf16.gmra.mxu0 %v11382_v39  ;;  %9190 = vmatmul.mubr.bf16.gmra.mxu1 %v11383_v44  ;;  %v5683_v8 = vld [vmem:[#allocation2 + $0x59c] sm:$0x8]  ;;  %5578 = vst [vmem:[#allocation2 + $0x5c0] sm:$0xf] %v5246_v4  ;;  %v5580_v16 = vsel %vm11771_vm14, %v5251_v53, %v5579_v48  ;;  %v5260_v54 = vrot.slane %v5259_v50, 4  ;;  %v5269_v40 = vor.u32 %v5268_v19, %v5264_v57  ;;  %v9055_v44 = vpop.f32.mrf.mxu1 }
 0x3cc   :  { %v8606_v59 = vadd.f32 %v13788_v46, %v13787_v30  ;;  %v4670_v33 = vld [vmem:[#allocation2 + $0x768] sm:$0x1]  ;;  %v5583_v9 = vld [vmem:[#allocation2 + $0x62c] sm:$0xf]  ;;  %v4347_v31 = vshll.u32 %v3919_v10, 16  ;;  %v5684_v51 = vsel %vm11727_vm10, 0, %v5683_v8  ;;  %v8894_v8 = vpop.f32.mrf.mxu0 }
 0x3cd   :  { %v4671_v35 = vsel %vm11580_vm2, 0, %v4670_v33  ;;  %5581 = vst [vmem:[#allocation2 + $0x5e4] sm:$0xf] %v5580_v16  ;;  %v4346_v46 = vrot.slane %v4344_v37, 7  ;;  %v4571_v21 = vld [vmem:[#allocation2 + $0x7b0] sm:$0xf]  ;;  %v5265_v49 = vsel %vm11765_vm13, %v5260_v54, %v5264_v57  ;;  %v9057_v33 = vpop.f32.mrf.mxu1 }
 0x3ce   :  { %5685 = vst [vmem:[#allocation2 + $0x59c] sm:$0x8] %v5684_v51  ;;  %4672 = vst [vmem:[#allocation2 + $0x768] sm:$0x1] %v4671_v35  ;;  %v4352_v48 = vshrl.u32 %v3920_v38, 16  ;;  %v4355_v17 = vshll.u32 %v3920_v38, 16  ;;  %v13252_v11 = vadd.f32 %v8894_v8, %v8606_v59 }
 0x3cf   :  { %v4740_v39 = vld [vmem:[#allocation3 + $0xe0] sm:$0xf]  ;;  %v4741_v10 = vld [vmem:[#allocation3 + $0xe4] sm:$0xf]  ;;  %v13789_v53 = vld [vmem:[#allocation52_spill] sm:$0xff]  ;;  %v5270_v4 = vrot.slane %v5269_v40, 4  ;;  %v4349_v52 = vor.u32 %v4347_v31, %v4346_v46 }
 0x3d0   :  { %v13248_v50 = vadd.f32 %v9055_v44, %v13789_v53  ;;  %5582 = vst [vmem:[#allocation2 + $0x608] sm:$0xf] %v5265_v49  ;;  %v4350_v30 = vrot.slane %v4346_v46, 4  ;;  %4800 = vst [vmem:[#allocation2 + $0x7b4] sm:$0xf] %v4740_v39  ;;  %v13791_v16 = vld [vmem:[#allocation16_spill] sm:$0xff]  ;;  %v8896_v39 = vpop.f32.mrf.mxu0 }
 0x3d1   :  { %4801 = vst [vmem:[#allocation2 + $0x7d8] sm:$0xf] %v4741_v10  ;;  %v4854_v19 = vld [vmem:[#allocation3 + $0xb8] sm:$0xf]  ;;  %v4855_v37 = vld [vmem:[#allocation3 + $0xbc] sm:$0xf]  ;;  %v5584_v40 = vsel %vm11771_vm14, %v5270_v4, %v5583_v9  ;;  %v4572_v31 = vsel %vm11598_vm7, %v4349_v52, %v4571_v21  ;;  %v9058_v10 = vpop.f32.mrf.mxu1 }
 0x3d2   :  { %13790 = vst [vmem:[#allocation58_spill] sm:$0xff] %v13248_v50  ;;  %v13792_v51 = vld [vmem:[#allocation32_spill] sm:$0xff]  ;;  %v4354_v38 = vrot.slane %v4352_v48, 7  ;;  %v5272_v35 = vshrl.u32 %v4854_v19, 16  ;;  %13793 = vst [vmem:[#allocation59_spill] sm:$0xff] %v13252_v11  ;;  %v5275_v46 = vshll.u32 %v4854_v19, 16  ;;  %v8897_v4 = vpop.f32.mrf.mxu0 }
 0x3d3   :  { %v8609_v57 = vadd.f32 %v13792_v51, %v13791_v16  ;;  %v11386_v54 = vld [vmem:[#allocation2 + $0x530] ss:$36 sps:$4 sm:$0xff]   ;;  %v5281_v44 = vshll.u32 %v4855_v37, 16  ;;  %v4856_v49 = vld [vmem:[#allocation3 + $0xc0] sm:$0xf]  ;;  %v5285_v48 = vshrl.u32 %v4855_v37, 16  ;;  %v9060_v50 = vpop.f32.mrf.mxu1 }
 0x3d4   :  { %10863 = vmatprep.mubr.bf16.mxu0 %v11386_v54  ;;  %5585 = vst [vmem:[#allocation2 + $0x62c] sm:$0xf] %v5584_v40  ;;  %v4357_v53 = vor.u32 %v4355_v17, %v4354_v38  ;;  %4573 = vst [vmem:[#allocation2 + $0x7b0] sm:$0xf] %v4572_v31  ;;  %v5274_v33 = vrot.slane %v5272_v35, 4  ;;  %v5291_v59 = vshrl.u32 %v4856_v49, 16 }
 0x3d5   :  { %v4857_v16 = vld [vmem:[#allocation3 + $0xc4] sm:$0xf]  ;;  %v5277_v8 = vrot.slane %v5275_v46, 5  ;;  %v5283_v51 = vrot.slane %v5281_v44, 5  ;;  %v5294_v11 = vshll.u32 %v4856_v49, 16  ;;  %v5287_v19 = vrot.slane %v5285_v48, 4  ;;  %v8899_v46 = vpop.f32.mrf.mxu0  ;;  %v9063_v41 = vpop.f32.mrf.mxu1 }
 0x3d6   :  { %v5300_v9 = vshll.u32 %v4857_v16, 16  ;;  %v5686_v21 = vld [vmem:[#allocation2 + $0x5e4] sm:$0x8]  ;;  %v4358_v52 = vsel %vm11592_vm6, %v4350_v30, %v4357_v53  ;;  %v5293_v39 = vrot.slane %v5291_v59, 4  ;;  %v5304_v54 = vshrl.u32 %v4857_v16, 16  ;;  %v13795_v35 = vld [vmem:[#allocation33_spill] sm:$0xff] }
 0x3d7   :  { %v11387_v40 = vld [vmem:[#allocation2 + $0x578] ss:$36 sps:$4 sm:$0xff]   ;;  %v5687_v17 = vsel %vm11727_vm10, 0, %v5686_v21  ;;  %4574 = vst [vmem:[#allocation2 + $0x7d4] sm:$0xf] %v4358_v52  ;;  %v5278_v37 = vor.u32 %v5277_v8, %v5274_v33  ;;  %v13262_v38 = vadd.f32 %v8897_v4, %v8609_v57  ;;  %v13265_v31 = vadd.f32 %v9058_v10, %v13795_v35 }
 0x3d8   :  { %v11388_v50 = vld [vmem:[#allocation2 + $0x768] ss:$36 sps:$4 sm:$0xff]   ;;  %5688 = vst [vmem:[#allocation2 + $0x5e4] sm:$0x8] %v5687_v17  ;;  %v5288_v49 = vor.u32 %v5287_v19, %v5283_v51  ;;  %10864 = vmatmul.mubr.bf16.gmra.mxu0 %v11387_v40  ;;  %v5587_v53 = vld [vmem:[#allocation2 + $0x674] sm:$0xf] }
 0x3d9   :  { %13794 = vst [vmem:[#allocation81_spill] sm:$0xff] %v13262_v38  ;;  %13796 = vst [vmem:[#allocation62_spill] sm:$0xff] %v13265_v31  ;;  %v11390_v44 = vld [vmem:[#allocation2 + $0x76c] ss:$36 sps:$4 sm:$0xff]   ;;  %v5279_v30 = vrot.slane %v5278_v37, 4  ;;  %v5296_v48 = vrot.slane %v5294_v11, 5  ;;  %v8902_v37 = vpop.f32.mrf.mxu0  ;;  %v9065_v38 = vpop.f32.mrf.mxu1 }
 0x3da   :  { %v5302_v16 = vrot.slane %v5300_v9, 5  ;;  %v5306_v59 = vrot.slane %v5304_v54, 4  ;;  %v13797_v21 = vld [vmem:[#allocation17_spill] sm:$0xff]  ;;  %9197 = vmatprep.mubr.bf16.mxu1 %v11390_v44  ;;  %v5289_v57 = vrot.slane %v5288_v49, 4  ;;  %v5591_v8 = vld [vmem:[#allocation2 + $0x6bc] sm:$0xf] }
 0x3db   :  { %v13798_v52 = vld [vmem:[#allocation53_spill] sm:$0xff]  ;;  %v3921_v10 = vld [vmem:[#allocation3 + $0xe8] sm:$0xf]  ;;  %v3922_v4 = vld [vmem:[#allocation3 + $0xec] sm:$0xf]  ;;  %9198 = vmatmul.mubr.bf16.gmra.mxu1 %v11388_v50  ;;  %v5284_v11 = vsel %vm11765_vm13, %v5279_v30, %v5283_v51  ;;  %v5297_v9 = vor.u32 %v5296_v48, %v5293_v39 }
 0x3dc   :  { %v8614_v33 = vadd.f32 %v13798_v52, %v13797_v21  ;;  %v13799_v35 = vld [vmem:[#allocation34_spill] sm:$0xff]  ;;  %v5689_v19 = vld [vmem:[#allocation2 + $0x62c] sm:$0x8]  ;;  %v4673_v40 = vld [vmem:[#allocation2 + $0x7b0] sm:$0x1]  ;;  %v5307_v54 = vor.u32 %v5306_v59, %v5302_v16  ;;  %v4360_v17 = vshrl.u32 %v3921_v10, 16  ;;  %v8904_v59 = vpop.f32.mrf.mxu0  ;;  %v9066_v52 = vpop.f32.mrf.mxu1 }
 0x3dd   :  { %v13270_v46 = vadd.f32 %v9063_v41, %v13799_v35  ;;  %v5690_v44 = vsel %vm11727_vm10, 0, %v5689_v19  ;;  %v4674_v49 = vsel %vm11580_vm2, 0, %v4673_v40  ;;  %5586 = vst [vmem:[#allocation2 + $0x650] sm:$0xf] %v5284_v11  ;;  %v5588_v41 = vsel %vm11771_vm14, %v5289_v57, %v5587_v53  ;;  %v4575_v21 = vld [vmem:[#allocation2 + $0x7f8] sm:$0xf] }
 0x3de   :  { %v4363_v50 = vshll.u32 %v3921_v10, 16  ;;  %5691 = vst [vmem:[#allocation2 + $0x62c] sm:$0x8] %v5690_v44  ;;  %4675 = vst [vmem:[#allocation2 + $0x7b0] sm:$0x1] %v4674_v49  ;;  %v5298_v51 = vrot.slane %v5297_v9, 4  ;;  %v13282_v53 = vadd.f32 %v8902_v37, %v8614_v33 }
 0x3df   :  { %13800 = vst [vmem:[#allocation63_spill] sm:$0xff] %v13270_v46  ;;  %5589 = vst [vmem:[#allocation2 + $0x674] sm:$0xf] %v5588_v41  ;;  %v5308_v39 = vrot.slane %v5307_v54, 4  ;;  %v4362_v30 = vrot.slane %v4360_v17, 7  ;;  %v4368_v48 = vshrl.u32 %v3922_v4, 16  ;;  %v8905_v41 = vpop.f32.mrf.mxu0 }
 0x3e0   :  { %v4742_v38 = vld [vmem:[#allocation3 + $0xe8] sm:$0xf]  ;;  %v13801_v35 = vld [vmem:[#allocation18_spill] sm:$0xff]  ;;  %v13802_v19 = vld [vmem:[#allocation85_spill] sm:$0xff]  ;;  %v4371_v40 = vshll.u32 %v3922_v4, 16  ;;  %13803 = vst [vmem:[#allocation66_spill] sm:$0xff] %v13282_v53  ;;  %v5303_v9 = vsel %vm11765_vm13, %v5298_v51, %v5302_v16  ;;  %v9068_v4 = vpop.f32.mrf.mxu1 }
 0x3e1   :  { %v8617_v31 = vadd.f32 %v13802_v19, %v13801_v35  ;;  %v4743_v11 = vld [vmem:[#allocation3 + $0xec] sm:$0xf]  ;;  %4802 = vst [vmem:[#allocation2 + $0x7fc] sm:$0xf] %v4742_v38  ;;  %v4858_v46 = vld [vmem:[#allocation3 + $0xc8] sm:$0xf]  ;;  %v5592_v54 = vsel %vm11771_vm14, %v5308_v39, %v5591_v8  ;;  %v4365_v17 = vor.u32 %v4363_v50, %v4362_v30  ;;  %v8907_v50 = vpop.f32.mrf.mxu0 }
 0x3e2   :  { %v13804_v57 = vld [vmem:[#allocation35_spill] sm:$0xff]  ;;  %v4366_v49 = vrot.slane %v4362_v30, 4  ;;  %4803 = vst [vmem:[#allocation2 + $0x820] sm:$0xf] %v4743_v11  ;;  %5590 = vst [vmem:[#allocation2 + $0x698] sm:$0xf] %v5303_v9 }
 0x3e3   :  { %v13285_v10 = vadd.f32 %v9066_v52, %v13804_v57  ;;  %v11391_v44 = vld [vmem:[#allocation2 + $0x5c0] ss:$36 sps:$4 sm:$0xff]   ;;  %5593 = vst [vmem:[#allocation2 + $0x6bc] sm:$0xf] %v5592_v54  ;;  %v4370_v38 = vrot.slane %v4368_v48, 7  ;;  %v5310_v37 = vshrl.u32 %v4858_v46, 16  ;;  %v13291_v52 = vadd.f32 %v8905_v41, %v8617_v31  ;;  %v9071_v31 = vpop.f32.mrf.mxu1 }
 0x3e4   :  { %v4859_v33 = vld [vmem:[#allocation3 + $0xcc] sm:$0xf]  ;;  %v5313_v59 = vshll.u32 %v4858_v46, 16  ;;  %10867 = vmatprep.mubr.bf16.mxu0 %v11391_v44  ;;  %v4576_v16 = vsel %vm11598_vm7, %v4365_v17, %v4575_v21  ;;  %v4860_v8 = vld [vmem:[#allocation3 + $0xd0] sm:$0xf] }
 0x3e5   :  { %13805 = vst [vmem:[#allocation67_spill] sm:$0xff] %v13285_v10  ;;  %13806 = vst [vmem:[#allocation70_spill] sm:$0xff] %v13291_v52  ;;  %v5319_v51 = vshll.u32 %v4859_v33, 16  ;;  %v5323_v35 = vshrl.u32 %v4859_v33, 16  ;;  %v4373_v39 = vor.u32 %v4371_v40, %v4370_v38  ;;  %v5312_v30 = vrot.slane %v5310_v37, 4  ;;  %v13807_v4 = vld [vmem:[#allocation36_spill] sm:$0xff] }
 0x3e6   :  { %4577 = vst [vmem:[#allocation2 + $0x7f8] sm:$0xf] %v4576_v16  ;;  %v5315_v19 = vrot.slane %v5313_v59, 5  ;;  %v4861_v11 = vld [vmem:[#allocation3 + $0xd4] sm:$0xf]  ;;  %v5329_v57 = vshrl.u32 %v4860_v8, 16  ;;  %v13298_v33 = vadd.f32 %v9071_v31, %v13807_v4 }
 0x3e7   :  { %v5321_v48 = vrot.slane %v5319_v51, 5  ;;  %v5325_v9 = vrot.slane %v5323_v35, 4  ;;  %v5332_v54 = vshll.u32 %v4860_v8, 16  ;;  %v5338_v46 = vshll.u32 %v4861_v11, 16  ;;  %v11392_v41 = vld [vmem:[#allocation2 + $0x608] ss:$36 sps:$4 sm:$0xff]   ;;  %v8910_v35 = vpop.f32.mrf.mxu0  ;;  %v9073_v8 = vpop.f32.mrf.mxu1 }
 0x3e8   :  { %v4374_v44 = vsel %vm11592_vm6, %v4366_v49, %v4373_v39  ;;  %v5316_v21 = vor.u32 %v5315_v19, %v5312_v30  ;;  %v5331_v17 = vrot.slane %v5329_v57, 4  ;;  %13808 = vst [vmem:[#allocation71_spill] sm:$0xff] %v13298_v33  ;;  %v13809_v40 = vld [vmem:[#allocation19_spill] sm:$0xff]  ;;  %v13810_v38 = vld [vmem:[#allocation56_spill] sm:$0xff]  ;;  %v11395_v16 = vld [vmem:[#allocation2 + $0x7b4] ss:$36 sps:$4 sm:$0xff]   ;;  %10868 = vmatmul.mubr.bf16.gmra.mxu0 %v11392_v41 }
 0x3e9   :  { %v8622_v37 = vadd.f32 %v13810_v38, %v13809_v40  ;;  %v11393_v59 = vld [vmem:[#allocation2 + $0x7b0] ss:$36 sps:$4 sm:$0xff]   ;;  %4578 = vst [vmem:[#allocation2 + $0x81c] sm:$0xf] %v4374_v44  ;;  %v5326_v51 = vor.u32 %v5325_v9, %v5321_v48  ;;  %v5595_v39 = vld [vmem:[#allocation2 + $0x704] sm:$0xf]  ;;  %9205 = vmatprep.mubr.bf16.mxu1 %v11395_v16  ;;  %v8912_v9 = vpop.f32.mrf.mxu0  ;;  %v9074_v8 = vpop.f32.mrf.mxu1 }
 0x3ea   :  { %v5692_v50 = vld [vmem:[#allocation2 + $0x674] sm:$0x8]  ;;  %v5317_v49 = vrot.slane %v5316_v21, 4  ;;  %v5334_v30 = vrot.slane %v5332_v54, 5  ;;  %v5340_v19 = vrot.slane %v5338_v46, 5  ;;  %v13811_v57 = vld [vmem:[#allocation20_spill] sm:$0xff]  ;;  %9206 = vmatmul.mubr.bf16.gmra.mxu1 %v11393_v59 }
 0x3eb   :  { %v5693_v52 = vsel %vm11727_vm10, 0, %v5692_v50  ;;  %v13812_v31 = vld [vmem:[#allocation57_spill] sm:$0xff]  ;;  %v5695_v40 = vld [vmem:[#allocation2 + $0x6bc] sm:$0x8]  ;;  %v5327_v38 = vrot.slane %v5326_v51, 4  ;;  %v5342_v53 = vshrl.u32 %v4861_v11, 16  ;;  %v13306_v44 = vadd.f32 %v8910_v35, %v8622_v37  ;;  %v8913_v35 = vpop.f32.mrf.mxu0 }
 0x3ec   :  { %v8625_v4 = vadd.f32 %v13812_v31, %v13811_v57  ;;  %5694 = vst [vmem:[#allocation2 + $0x674] sm:$0x8] %v5693_v52  ;;  %v5696_v41 = vsel %vm11727_vm10, 0, %v5695_v40  ;;  %v5322_v54 = vsel %vm11765_vm13, %v5317_v49, %v5321_v48  ;;  %v5335_v46 = vor.u32 %v5334_v30, %v5331_v17  ;;  %v3923_v21 = vld [vmem:[#allocation3 + $0xf0] sm:$0xf]  ;;  %v9076_v31 = vpop.f32.mrf.mxu1  ;;  %v13819_v33 = vld [vmem:[#allocation38_spill] sm:$0xff] }
 0x3ed   :  { %13813 = vst [vmem:[#allocation72_spill] sm:$0xff] %v13306_v44  ;;  %v3924_v50 = vld [vmem:[#allocation3 + $0xf4] sm:$0xf]  ;;  %5697 = vst [vmem:[#allocation2 + $0x6bc] sm:$0x8] %v5696_v41  ;;  %v5596_v11 = vsel %vm11771_vm14, %v5327_v38, %v5595_v39  ;;  %v5344_v37 = vrot.slane %v5342_v53, 4  ;;  %v8915_v53 = vpop.f32.mrf.mxu0 }
 0x3ee   :  { %v13814_v57 = vld [vmem:[#allocation37_spill] sm:$0xff]  ;;  %5594 = vst [vmem:[#allocation2 + $0x6e0] sm:$0xf] %v5322_v54  ;;  %v4376_v59 = vshrl.u32 %v3923_v21, 16  ;;  %v4379_v51 = vshll.u32 %v3923_v21, 16  ;;  %v5336_v17 = vrot.slane %v5335_v46, 4  ;;  %v13319_v39 = vadd.f32 %v8913_v35, %v8625_v4 }
 0x3ef   :  { %v13313_v16 = vadd.f32 %v9074_v8, %v13814_v57  ;;  %v4676_v52 = vld [vmem:[#allocation2 + $0x7f8] sm:$0x1]  ;;  %5597 = vst [vmem:[#allocation2 + $0x704] sm:$0xf] %v5596_v11  ;;  %v5599_v49 = vld [vmem:[#allocation2 + $0x74c] sm:$0xf]  ;;  %v5345_v8 = vor.u32 %v5344_v37, %v5340_v19 }
 0x3f0   :  { %v4677_v48 = vsel %vm11580_vm2, 0, %v4676_v52  ;;  %v4384_v30 = vshrl.u32 %v3924_v50, 16  ;;  %v4387_v40 = vshll.u32 %v3924_v50, 16  ;;  %v4579_v9 = vld [vmem:[#allocation2 + $0x840] sm:$0xf]  ;;  %v4378_v41 = vrot.slane %v4376_v59, 7 }
 0x3f1   :  { %13815 = vst [vmem:[#allocation73_spill] sm:$0xff] %v13313_v16  ;;  %4678 = vst [vmem:[#allocation2 + $0x7f8] sm:$0x1] %v4677_v48  ;;  %v4744_v54 = vld [vmem:[#allocation3 + $0xf0] sm:$0xf]  ;;  %v5341_v52 = vsel %vm11765_vm13, %v5336_v17, %v5340_v19  ;;  %v5346_v44 = vrot.slane %v5345_v8, 4  ;;  %v9079_v16 = vpop.f32.mrf.mxu1 }
 0x3f2   :  { %v4745_v57 = vld [vmem:[#allocation3 + $0xf4] sm:$0xf]  ;;  %13816 = vst [vmem:[#allocation74_spill] sm:$0xff] %v13319_v39  ;;  %v13818_v21 = vld [vmem:[#allocation60_spill] sm:$0xff]  ;;  %v4386_v11 = vrot.slane %v4384_v30, 7  ;;  %v4381_v37 = vor.u32 %v4379_v51, %v4378_v41  ;;  %v4382_v59 = vrot.slane %v4378_v41, 4  ;;  %v8918_v41 = vpop.f32.mrf.mxu0 }
 0x3f3   :  { %v13817_v38 = vld [vmem:[#allocation21_spill] sm:$0xff]  ;;  %4804 = vst [vmem:[#allocation2 + $0x844] sm:$0xf] %v4744_v54  ;;  %4805 = vst [vmem:[#allocation2 + $0x868] sm:$0xf] %v4745_v57  ;;  %v5600_v19 = vsel %vm11771_vm14, %v5346_v44, %v5599_v49  ;;  %v9081_v57 = vpop.f32.mrf.mxu1 }
 0x3f4   :  { %v8630_v31 = vadd.f32 %v13818_v21, %v13817_v38  ;;  %v4862_v46 = vld [vmem:[#allocation3 + $0xd8] sm:$0xf]  ;;  %v4863_v50 = vld [vmem:[#allocation3 + $0xdc] sm:$0xf]  ;;  %5598 = vst [vmem:[#allocation2 + $0x728] sm:$0xf] %v5341_v52  ;;  %v4389_v35 = vor.u32 %v4387_v40, %v4386_v11  ;;  %v13326_v38 = vadd.f32 %v9079_v16, %v13819_v33  ;;  %v4580_v17 = vsel %vm11598_vm7, %v4381_v37, %v4579_v9  ;;  %v8920_v11 = vpop.f32.mrf.mxu0 }
 0x3f5   :  { %v5348_v48 = vshrl.u32 %v4862_v46, 16  ;;  %v11396_v4 = vld [vmem:[#allocation2 + $0x650] ss:$36 sps:$4 sm:$0xff]   ;;  %v5351_v53 = vshll.u32 %v4862_v46, 16  ;;  %v5357_v39 = vshll.u32 %v4863_v50, 16  ;;  %v5361_v8 = vshrl.u32 %v4863_v50, 16  ;;  %v9082_v46 = vpop.f32.mrf.mxu1 }
 0x3f6   :  { %13820 = vst [vmem:[#allocation82_spill] sm:$0xff] %v13326_v38  ;;  %v4864_v54 = vld [vmem:[#allocation3 + $0xe0] sm:$0xf]  ;;  %v4865_v51 = vld [vmem:[#allocation3 + $0xe4] sm:$0xf]  ;;  %10871 = vmatprep.mubr.bf16.mxu0 %v11396_v4  ;;  %v4390_v40 = vsel %vm11592_vm6, %v4382_v59, %v4389_v35  ;;  %v13334_v33 = vadd.f32 %v8918_v41, %v8630_v31  ;;  %v13823_v37 = vld [vmem:[#allocation61_spill] sm:$0xff] }
 0x3f7   :  { %v5350_v30 = vrot.slane %v5348_v48, 4  ;;  %v11397_v21 = vld [vmem:[#allocation2 + $0x698] ss:$36 sps:$4 sm:$0xff]   ;;  %5601 = vst [vmem:[#allocation2 + $0x74c] sm:$0xf] %v5600_v19  ;;  %v5353_v44 = vrot.slane %v5351_v53, 5 }
 0x3f8   :  { %4581 = vst [vmem:[#allocation2 + $0x840] sm:$0xf] %v4580_v17  ;;  %13821 = vst [vmem:[#allocation83_spill] sm:$0xff] %v13334_v33  ;;  %v5698_v16 = vld [vmem:[#allocation2 + $0x704] sm:$0x8]  ;;  %v5359_v49 = vrot.slane %v5357_v39, 5  ;;  %10872 = vmatmul.mubr.bf16.gmra.mxu0 %v11397_v21 }
 0x3f9   :  { %4582 = vst [vmem:[#allocation2 + $0x864] sm:$0xf] %v4390_v40  ;;  %v5363_v9 = vrot.slane %v5361_v8, 4  ;;  %v5367_v52 = vshrl.u32 %v4864_v54, 16  ;;  %v13822_v50 = vld [vmem:[#allocation22_spill] sm:$0xff]  ;;  %v13824_v4 = vld [vmem:[#allocation23_spill] sm:$0xff]  ;;  %v5354_v39 = vor.u32 %v5353_v44, %v5350_v30 }
 0x3fa   :  { %v8633_v48 = vadd.f32 %v13823_v37, %v13822_v50  ;;  %v13825_v57 = vld [vmem:[#allocation64_spill] sm:$0xff]  ;;  %v11398_v38 = vld [vmem:[#allocation2 + $0x7f8] ss:$36 sps:$4 sm:$0xff]   ;;  %v5699_v31 = vsel %vm11727_vm10, 0, %v5698_v16  ;;  %v13826_v35 = vld [vmem:[#allocation39_spill] sm:$0xff]  ;;  %v5370_v40 = vshll.u32 %v4864_v54, 16  ;;  %v8921_v50 = vpop.f32.mrf.mxu0  ;;  %v9084_v37 = vpop.f32.mrf.mxu1 }
 0x3fb   :  { %v8638_v19 = vadd.f32 %v13825_v57, %v13824_v4  ;;  %v11400_v59 = vld [vmem:[#allocation2 + $0x7fc] ss:$36 sps:$4 sm:$0xff]   ;;  %v13343_v17 = vadd.f32 %v9082_v46, %v13826_v35  ;;  %5700 = vst [vmem:[#allocation2 + $0x704] sm:$0x8] %v5699_v31  ;;  %v5364_v53 = vor.u32 %v5363_v9, %v5359_v49  ;;  %v5603_v8 = vld [vmem:[#allocation2 + $0x794] sm:$0xf] }
 0x3fc   :  { %v5369_v41 = vrot.slane %v5367_v52, 4  ;;  %v3925_v11 = vld [vmem:[#allocation3 + $0xf8] sm:$0xf]  ;;  %v13828_v33 = vld [vmem:[#allocation24_spill] sm:$0xff]  ;;  %9213 = vmatprep.mubr.bf16.mxu1 %v11400_v59  ;;  %v5376_v57 = vshll.u32 %v4865_v51, 16  ;;  %v5380_v10 = vshrl.u32 %v4865_v51, 16  ;;  %v13349_v26 = vadd.f32 %v8921_v50, %v8633_v48  ;;  %v8923_v52 = vpop.f32.mrf.mxu0 }
 0x3fd   :  { %13827 = vst [vmem:[#allocation75_spill] sm:$0xff] %v13343_v17  ;;  %v13829_v4 = vld [vmem:[#allocation65_spill] sm:$0xff]  ;;  %v3926_v16 = vld [vmem:[#allocation3 + $0xfc] sm:$0xf]  ;;  %9214 = vmatmul.mubr.bf16.gmra.mxu1 %v11398_v38  ;;  %v5355_v46 = vrot.slane %v5354_v39, 4  ;;  %v5365_v30 = vrot.slane %v5364_v53, 4  ;;  %v9087_v53 = vpop.f32.mrf.mxu1 }
 0x3fe   :  { %v13347_v21 = vadd.f32 %v13829_v4, %v13828_v33  ;;  %13830 = vst [vmem:[#allocation84_spill] sm:$0xff] %v13349_v26  ;;  %v5372_v44 = vrot.slane %v5370_v40, 5  ;;  %v4392_v9 = vshrl.u32 %v3925_v11, 16  ;;  %v5378_v54 = vrot.slane %v5376_v57, 5  ;;  %v4583_v17 = vld [vmem:[#allocation2 + $0x888] sm:$0xf] }
 0x3ff   :  { %v5382_v31 = vrot.slane %v5380_v10, 4  ;;  %v4395_v35 = vshll.u32 %v3925_v11, 16  ;;  %v4400_v37 = vshrl.u32 %v3926_v16, 16  ;;  %v4746_v58 = vld [vmem:[#allocation3 + $0xf8] sm:$0xf]  ;;  %v5360_v51 = vsel %vm11765_vm13, %v5355_v46, %v5359_v49 }
 0x400   :  { %v5701_v33 = vld [vmem:[#allocation2 + $0x74c] sm:$0x8]  ;;  %v4679_v4 = vld [vmem:[#allocation2 + $0x840] sm:$0x1]  ;;  %v5604_v48 = vsel %vm11771_vm14, %v5365_v30, %v5603_v8  ;;  %v5373_v38 = vor.u32 %v5372_v44, %v5369_v41  ;;  %v5607_v59 = vld [vmem:[#allocation2 + $0x7dc] sm:$0xf]  ;;  %v8926_v30 = vpop.f32.mrf.mxu0  ;;  %v9089_v44 = vpop.f32.mrf.mxu1 }
 0x401   :  { %v4394_v39 = vrot.slane %v4392_v9, 7  ;;  %4806 = vst [vmem:[#allocation2 + $0x88c] sm:$0xf] %v4746_v58  ;;  %v5702_v10 = vsel %vm11727_vm10, 0, %v5701_v33  ;;  %v4680_v40 = vsel %vm11580_vm2, 0, %v4679_v4  ;;  %v5383_v11 = vor.u32 %v5382_v31, %v5378_v54 }
 0x402   :  { %5602 = vst [vmem:[#allocation2 + $0x770] sm:$0xf] %v5360_v51  ;;  %5605 = vst [vmem:[#allocation2 + $0x794] sm:$0xf] %v5604_v48  ;;  %v4402_v50 = vrot.slane %v4400_v37, 7  ;;  %v5374_v49 = vrot.slane %v5373_v38, 4  ;;  %v13359_v26 = vadd.f32 %v8926_v30, %v8638_v19  ;;  %v13362_v4 = vadd.f32 %v9087_v53, %v12902_v20  ;;  %v8928_v48 = vpop.f32.mrf.mxu0  ;;  %v9090_v38 = vpop.f32.mrf.mxu1 }
 0x403   :  { %v4747_v57 = vld [vmem:[#allocation3 + $0xfc] sm:$0xf]  ;;  %5703 = vst [vmem:[#allocation2 + $0x74c] sm:$0x8] %v5702_v10  ;;  %4681 = vst [vmem:[#allocation2 + $0x840] sm:$0x1] %v4680_v40  ;;  %v4397_v8 = vor.u32 %v4395_v35, %v4394_v39 }
 0x404   :  { %v4398_v41 = vrot.slane %v4394_v39, 4  ;;  %v4403_v46 = vshll.u32 %v3926_v16, 16  ;;  %4807 = vst [vmem:[#allocation2 + $0x8b0] sm:$0xf] %v4747_v57  ;;  %v4866_v58 = vld [vmem:[#allocation3 + $0xe8] sm:$0xf]  ;;  %v5379_v31 = vsel %vm11765_vm13, %v5374_v49, %v5378_v54  ;;  %v9092_v57 = vpop.f32.mrf.mxu1 }
 0x405   :  { %v11401_v9 = vld [vmem:[#allocation2 + $0x6e0] ss:$36 sps:$4 sm:$0xff]   ;;  %v5384_v52 = vrot.slane %v5383_v11, 4  ;;  %v5386_v33 = vshrl.u32 %v4866_v58, 16  ;;  %v4584_v35 = vsel %vm11598_vm7, %v4397_v8, %v4583_v17  ;;  %v4867_v16 = vld [vmem:[#allocation3 + $0xec] sm:$0xf] }
 0x406   :  { %v4405_v37 = vor.u32 %v4403_v46, %v4402_v50  ;;  %v5389_v51 = vshll.u32 %v4866_v58, 16  ;;  %10875 = vmatprep.mubr.bf16.mxu0 %v11401_v9  ;;  %5606 = vst [vmem:[#allocation2 + $0x7b8] sm:$0xf] %v5379_v31  ;;  %4585 = vst [vmem:[#allocation2 + $0x888] sm:$0xf] %v4584_v35  ;;  %v5395_v20 = vshll.u32 %v4867_v16, 16  ;;  %v8929_v50 = vpop.f32.mrf.mxu0  ;;  %v13378_v35 = vadd.f32 %v9090_v38, %v12908_v63 }
 0x407   :  { %v5608_v19 = vsel %vm11771_vm14, %v5384_v52, %v5607_v59  ;;  %v5388_v39 = vrot.slane %v5386_v33, 4  ;;  %v5399_v53 = vshrl.u32 %v4867_v16, 16  ;;  %v4868_v10 = vld [vmem:[#allocation3 + $0xf0] sm:$0xf]  ;;  %v4869_v17 = vld [vmem:[#allocation3 + $0xf4] sm:$0xf]  ;;  %v13373_v33 = vadd.f32 %v8929_v50, %v13347_v21 }
 0x408   :  { %5609 = vst [vmem:[#allocation2 + $0x7dc] sm:$0xf] %v5608_v19  ;;  %v4406_v54 = vsel %vm11592_vm6, %v4398_v41, %v4405_v37  ;;  %v5391_v22 = vrot.slane %v5389_v51, 5  ;;  %v5405_v40 = vshrl.u32 %v4868_v10, 16  ;;  %v5408_v11 = vshll.u32 %v4868_v10, 16  ;;  %v8931_v18 = vpop.f32.mrf.mxu0  ;;  %v13832_v63 = vld [vmem:[#allocation26_spill] sm:$0xff] }
 0x409   :  { %4586 = vst [vmem:[#allocation2 + $0x8ac] sm:$0xf] %v4406_v54  ;;  %v5397_v49 = vrot.slane %v5395_v20, 5  ;;  %v5401_v8 = vrot.slane %v5399_v53, 4  ;;  %v5414_v46 = vshll.u32 %v4869_v17, 16  ;;  %v5418_v59 = vshrl.u32 %v4869_v17, 16  ;;  %v9095_v20 = vpop.f32.mrf.mxu1 }
 0x40a   :  { %v5704_v58 = vld [vmem:[#allocation2 + $0x794] sm:$0x8]  ;;  %v5392_v30 = vor.u32 %v5391_v22, %v5388_v39  ;;  %v5611_v44 = vld [vmem:[#allocation2 + $0x824] sm:$0xf]  ;;  %v5407_v9 = vrot.slane %v5405_v40, 4  ;;  %v5410_v52 = vrot.slane %v5408_v11, 5  ;;  %v13383_v40 = vadd.f32 %v9095_v20, %v12934_v43 }
 0x40b   :  { %v11402_v41 = vld [vmem:[#allocation2 + $0x728] ss:$36 sps:$4 sm:$0xff]   ;;  %v5705_v31 = vsel %vm11727_vm10, 0, %v5704_v58  ;;  %v5402_v37 = vor.u32 %v5401_v8, %v5397_v49  ;;  %v11403_v16 = vld [vmem:[#allocation2 + $0x840] ss:$36 sps:$4 sm:$0xff]   ;;  %v5416_v39 = vrot.slane %v5414_v46, 5  ;;  %v8649_v38 = vadd.f32 %v12924_v32, %v13832_v63  ;;  %v8934_v8 = vpop.f32.mrf.mxu0  ;;  %v9097_v46 = vpop.f32.mrf.mxu1 }
 0x40c   :  { %v11405_v51 = vld [vmem:[#allocation2 + $0x844] ss:$36 sps:$4 sm:$0xff]   ;;  %5706 = vst [vmem:[#allocation2 + $0x794] sm:$0x8] %v5705_v31  ;;  %v5393_v48 = vrot.slane %v5392_v30, 4  ;;  %v5411_v19 = vor.u32 %v5410_v52, %v5407_v9  ;;  %v13831_v53 = vld [vmem:[#allocation25_spill] sm:$0xff]  ;;  %10876 = vmatmul.mubr.bf16.gmra.mxu0 %v11402_v41 }
 0x40d   :  { %v8646_v21 = vadd.f32 %v12920_v29, %v13831_v53  ;;  %v5403_v10 = vrot.slane %v5402_v37, 4  ;;  %v5420_v54 = vrot.slane %v5418_v59, 4  ;;  %v4685_v22 = vld [vmem:[#allocation2 + $0x8d0] sm:$0x1]  ;;  %v4870_v17 = vld [vmem:[#allocation3 + $0xf8] sm:$0xf]  ;;  %9221 = vmatprep.mubr.bf16.mxu1 %v11405_v51  ;;  %v8936_v31 = vpop.f32.mrf.mxu0  ;;  %v9098_v37 = vpop.f32.mrf.mxu1 }
 0x40e   :  { %v4682_v11 = vld [vmem:[#allocation2 + $0x888] sm:$0x1]  ;;  %v5398_v50 = vsel %vm11765_vm13, %v5393_v48, %v5397_v49  ;;  %v5412_v57 = vrot.slane %v5411_v19, 4  ;;  %v4686_v29 = vsel %vm11580_vm2, 0, %v4685_v22  ;;  %9222 = vmatmul.mubr.bf16.gmra.mxu1 %v11403_v16  ;;  %v4871_v30 = vld [vmem:[#allocation3 + $0xfc] sm:$0xf] }
 0x40f   :  { %v5707_v59 = vld [vmem:[#allocation2 + $0x7dc] sm:$0x8]  ;;  %v4683_v43 = vsel %vm11580_vm2, 0, %v4682_v11  ;;  %5610 = vst [vmem:[#allocation2 + $0x800] sm:$0xf] %v5398_v50  ;;  %v5612_v32 = vsel %vm11771_vm14, %v5403_v10, %v5611_v44  ;;  %v5421_v58 = vor.u32 %v5420_v54, %v5416_v39  ;;  %v5424_v9 = vshrl.u32 %v4870_v17, 16  ;;  %v8937_v54 = vpop.f32.mrf.mxu0  ;;  %v9100_v22 = vpop.f32.mrf.mxu1 }
 0x410   :  { %4687 = vst [vmem:[#allocation2 + $0x8d0] sm:$0x1] %v4686_v29  ;;  %v5708_v49 = vsel %vm11727_vm10, 0, %v5707_v59  ;;  %4684 = vst [vmem:[#allocation2 + $0x888] sm:$0x1] %v4683_v43  ;;  %v5417_v52 = vsel %vm11765_vm13, %v5412_v57, %v5416_v39  ;;  %v5427_v41 = vshll.u32 %v4870_v17, 16  ;;  %v13399_v19 = vadd.f32 %v8934_v8, %v8646_v21 }
 0x411   :  { %5613 = vst [vmem:[#allocation2 + $0x824] sm:$0xf] %v5612_v32  ;;  %v5615_v18 = vld [vmem:[#allocation2 + $0x86c] sm:$0xf]  ;;  %v5433_v5 = vshll.u32 %v4871_v30, 16  ;;  %v5422_v16 = vrot.slane %v5421_v58, 4  ;;  %v13404_v39 = vadd.f32 %v9098_v37, %v12950_v12  ;;  %v13408_v50 = vadd.f32 %v8937_v54, %v8649_v38  ;;  %v8939_v57 = vpop.f32.mrf.mxu0  ;;  %v9103_v59 = vpop.f32.mrf.mxu1 }
 0x412   :  { %5709 = vst [vmem:[#allocation2 + $0x7dc] sm:$0x8] %v5708_v49  ;;  %5614 = vst [vmem:[#allocation2 + $0x848] sm:$0xf] %v5417_v52  ;;  %v5426_v44 = vrot.slane %v5424_v9, 4  ;;  %v5437_v51 = vshrl.u32 %v4871_v30, 16 }
 0x413   :  { %v5719_v48 = vld [vmem:[#allocation2 + $0x8fc] sm:$0x8]  ;;  %v5429_v20 = vrot.slane %v5427_v41, 5  ;;  %v5435_v53 = vrot.slane %v5433_v5, 5  ;;  %v11406_v17 = vld [vmem:[#allocation2 + $0x770] ss:$36 sps:$4 sm:$0xff]   ;;  %v5616_v63 = vsel %vm11771_vm14, %v5422_v16, %v5615_v18  ;;  %v8942_v5 = vpop.f32.mrf.mxu0  ;;  %v9105_v31 = vpop.f32.mrf.mxu1 }
 0x414   :  { %v5720_v10 = vsel %vm11727_vm10, 0, %v5719_v48  ;;  %v5439_v11 = vrot.slane %v5437_v51, 4  ;;  %5617 = vst [vmem:[#allocation2 + $0x86c] sm:$0xf] %v5616_v63  ;;  %10879 = vmatprep.mubr.bf16.mxu0 %v11406_v17  ;;  %v5619_v46 = vld [vmem:[#allocation2 + $0x8b4] sm:$0xf] }
 0x415   :  { %5721 = vst [vmem:[#allocation2 + $0x8fc] sm:$0x8] %v5720_v10  ;;  %v5430_v21 = vor.u32 %v5429_v20, %v5426_v44  ;;  %v13833_v43 = vld [vmem:[#allocation27_spill] sm:$0xff]  ;;  %v13834_v12 = vld [vmem:[#allocation40_spill] sm:$0xff]  ;;  %v13835_v49 = vld [vmem:[#allocation41_spill] sm:$0xff]  ;;  %v8944_v48 = vpop.f32.mrf.mxu0  ;;  %v9106_v1 = vpop.f32.mrf.mxu1 }
 0x416   :  { %v5440_v29 = vor.u32 %v5439_v11, %v5435_v53  ;;  %v8654_v32 = vadd.f32 %v13834_v12, %v13833_v43  ;;  %v11410_v30 = vld [vmem:[#allocation2 + $0x88c] ss:$36 sps:$4 sm:$0xff]   ;;  %v13413_v52 = vadd.f32 %v9103_v59, %v13835_v49  ;;  %v11415_v16 = vld [vmem:[#allocation2 + $0x8d4] ss:$36 sps:$4 sm:$0xff]   ;;  %v13426_v22 = vadd.f32 %v9106_v1, %v12974_v0 }
 0x417   :  { %v5431_v8 = vrot.slane %v5430_v21, 4  ;;  %v11408_v58 = vld [vmem:[#allocation2 + $0x888] ss:$36 sps:$4 sm:$0xff]   ;;  %9229 = vmatprep.mubr.bf16.mxu1 %v11410_v30  ;;  %v8945_v17 = vpop.f32.mrf.mxu0  ;;  %v9108_v63 = vpop.f32.mrf.mxu1  ;;  %v11413_v21 = vld [vmem:[#allocation2 + $0x8d0] ss:$36 sps:$4 sm:$0xff]  }
 0x418   :  { %v5441_v9 = vrot.slane %v5440_v29, 4  ;;  %v5710_v38 = vld [vmem:[#allocation2 + $0x824] sm:$0x8]  ;;  %v13421_v51 = vadd.f32 %v8942_v5, %v8654_v32  ;;  %9230 = vmatmul.mubr.bf16.gmra.mxu1 %v11408_v58  ;;  %v13836_v20 = vld [vmem:[#allocation28_spill] sm:$0xff]  ;;  %v13839_v43 = vld [vmem:[#allocation29_spill] sm:$0xff] }
 0x419   :  { %v11407_v18 = vld [vmem:[#allocation2 + $0x7b8] ss:$36 sps:$4 sm:$0xff]   ;;  %v5436_v41 = vsel %vm11765_vm13, %v5431_v8, %v5435_v53  ;;  %v5711_v37 = vsel %vm11727_vm10, 0, %v5710_v38  ;;  %v13837_v53 = vld [vmem:[#allocation68_spill] sm:$0xff]  ;;  %9237 = vmatprep.mubr.bf16.mxu1 %v11415_v16  ;;  %v8947_v57 = vpop.f32.mrf.mxu0  ;;  %v9111_v29 = vpop.f32.mrf.mxu1  ;;  %v13838_v8 = vld [vmem:[#allocation43_spill] sm:$0xff] }
 0x41a   :  { %5618 = vst [vmem:[#allocation2 + $0x890] sm:$0xf] %v5436_v41  ;;  %v5620_v44 = vsel %vm11771_vm14, %v5441_v9, %v5619_v46  ;;  %10880 = vmatmul.mubr.bf16.gmra.mxu0 %v11407_v18  ;;  %5712 = vst [vmem:[#allocation2 + $0x824] sm:$0x8] %v5711_v37  ;;  %v8657_v10 = vadd.f32 %v13837_v53, %v13836_v20  ;;  %v13433_v46 = vadd.f32 %v9111_v29, %v13838_v8  ;;  %v13840_v12 = vld [vmem:[#allocation69_spill] sm:$0xff]  ;;  %v13841_v38 = vld [vmem:[#allocation44_spill] sm:$0xff] }
 0x41b   :  { %5621 = vst [vmem:[#allocation2 + $0x8b4] sm:$0xf] %v5620_v44  ;;  %v5713_v54 = vld [vmem:[#allocation2 + $0x86c] sm:$0x8]  ;;  %v9113_v59 = vpop.f32.mrf.mxu1  ;;  %v8662_v32 = vadd.f32 %v13840_v12, %v13839_v43  ;;  %v8950_v9 = vpop.f32.mrf.mxu0  ;;  %v13842_v16 = vld [vmem:[#allocation31_spill] sm:$0xff]  ;;  %v13843_v44 = vld [vmem:[#allocation42_spill] sm:$0xff] }
 0x41c   :  { %v5714_v6 = vsel %vm11727_vm10, 0, %v5713_v54  ;;  %v13430_v11 = vadd.f32 %v8945_v17, %v8657_v10  ;;  %v8665_v48 = vadd.f32 %v13843_v44, %v13842_v16  ;;  %v13844_v53 = vld [vmem:[#allocation46_spill] sm:$0xff] }
 0x41d   :  { %5715 = vst [vmem:[#allocation2 + $0x86c] sm:$0x8] %v5714_v6  ;;  %v9114_v49 = vpop.f32.mrf.mxu1  ;;  %v13439_v18 = vadd.f32 %v8950_v9, %v8662_v32  ;;  %v8952_v31 = vpop.f32.mrf.mxu0  ;;  %v11417_v63 = vld [vmem:[#allocation2 + $0x8d8] ss:$36 sps:$4 sm:$0xff]  }
 0x41e   :  { %v13442_v41 = vadd.f32 %v9114_v49, %v13841_v38 }
 0x41f   :  { %v9116_v37 = vpop.f32.mrf.mxu1  ;;  %v8953_v1 = vpop.f32.mrf.mxu0 }
 0x420   :  { %9238 = vmatmul.mubr.bf16.gmra.mxu1 %v11413_v21  ;;  %v13446_v20 = vadd.f32 %v8953_v1, %v8665_v48 }
 0x421   :  { %v11411_v0 = vld [vmem:[#allocation2 + $0x800] ss:$36 sps:$4 sm:$0xff]   ;;  %v9119_v34 = vpop.f32.mrf.mxu1  ;;  %v8955_v54 = vpop.f32.mrf.mxu0 }
 0x422   :  { %v5716_v58 = vld [vmem:[#allocation2 + $0x8b4] sm:$0x8]  ;;  %10883 = vmatprep.mubr.bf16.mxu0 %v11411_v0  ;;  %v13449_v10 = vadd.f32 %v9119_v34, %v13844_v53 }
 0x423   :  { %v5717_v30 = vsel %vm11727_vm10, 0, %v5716_v58  ;;  %v9121_v6 = vpop.f32.mrf.mxu1  ;;  %v10829_v8 = vpop.f32.mrf.mxu0  ;;  %v13845_v58 = vld [vmem:[#allocation45_spill] sm:$0xff] }
 0x424   :  { %5718 = vst [vmem:[#allocation2 + $0x8b4] sm:$0x8] %v5717_v30  ;;  %v11412_v5 = vld [vmem:[#allocation2 + $0x848] ss:$36 sps:$4 sm:$0xff]   ;;  %v9289_v0 = vadd.f32 %v10829_v8, %v13049_v27 }
 0x425   :  { %10884 = vmatmul.mubr.bf16.gmra.mxu0 %v11412_v5  ;;  %v9122_v21 = vpop.f32.mrf.mxu1  ;;  %v9280_v59 = vpop.f32.mrf.mxu0 }
 0x426   :  { %v13452_v57 = vadd.f32 %v9122_v21, %v13037_v56  ;;  %v9281_v30 = vadd.f32 %v9280_v59, %v13845_v58  ;;  %v9926_v27 = vmul.f32 %v9289_v0, %v9289_v0  ;;  %v13846_v58 = vld [vmem:[#allocation47_spill] sm:$0xff] }
 0x427   :  { %v9124_v29 = vpop.f32.mrf.mxu1  ;;  %v10830_v12 = vpop.f32.mrf.mxu0 }
 0x428   :  { %v9292_v9 = vadd.f32 %v10830_v12, %v13060_v36  ;;  %v9924_v16 = vmul.f32 %v9281_v30, %v9281_v30 }
 0x429   :  { %v9127_v43 = vpop.f32.mrf.mxu1  ;;  %v9283_v38 = vpop.f32.mrf.mxu0 }
 0x42a   :  { %v13455_v32 = vadd.f32 %v9127_v43, %v13057_v15  ;;  %v10588_v56 = vpack.c.bf16 %v9292_v9, %v9289_v0  ;;  %v9284_v5 = vadd.f32 %v9283_v38, %v13040_v3  ;;  %v9927_v36 = vmul.f32 %v9292_v9, %v9292_v9 }
 0x42b   :  { %v11416_v17 = vld [vmem:[#allocation2 + $0x890] ss:$36 sps:$4 sm:$0xff]   ;;  %v9129_v49 = vpop.f32.mrf.mxu1  ;;  %v10833_v6 = vpop.f32.mrf.mxu0 }
 0x42c   :  { %10887 = vmatprep.mubr.bf16.mxu0 %v11416_v17  ;;  %10740 = vst [vmem:[#allocation8 + $0x8] sm:$0xff] %v10588_v56   ;;  %v10583_v44 = vpack.c.bf16 %v9284_v5, %v9281_v30  ;;  %v9855_v15 = vadd.f32 %v9284_v5, %v9281_v30  ;;  %v9925_v48 = vmul.f32 %v9284_v5, %v9284_v5 }
 0x42d   :  { %10888 = vmatmul.mubr.bf16.gmra.mxu0 %v11417_v63  ;;  %v9130_v31 = vpop.f32.mrf.mxu1  ;;  %v9296_v63 = vpop.f32.mrf.mxu0 }
 0x42e   :  { %v13462_v37 = vadd.f32 %v9130_v31, %v13066_v47  ;;  %10584 = vst [vmem:[#allocation8] sm:$0xff] %v10583_v44   ;;  %v9856_v34 = vadd.f32 %v9855_v15, %v9289_v0  ;;  %v9988_v53 = vadd.f32 %v9925_v48, %v9924_v16  ;;  %v9297_v21 = vadd.f32 %v9296_v63, %v13075_v42 }
 0x42f   :  { %v9132_v1 = vpop.f32.mrf.mxu1  ;;  %v9305_v47 = vadd.f32 %v10833_v6, %v13103_v7  ;;  %v10834_v29 = vpop.f32.mrf.mxu0 }
 0x430   :  { %v9989_v54 = vadd.f32 %v9988_v53, %v9926_v27  ;;  %v9857_v17 = vadd.f32 %v9856_v34, %v9292_v9  ;;  %v9928_v43 = vmul.f32 %v9297_v21, %v9297_v21  ;;  %v9308_v12 = vadd.f32 %v10834_v29, %v13116_v62  ;;  %v13847_v9 = vld [vmem:[#allocation76_spill] sm:$0xff] }
 0x431   :  { %v9135_v8 = vpop.f32.mrf.mxu1  ;;  %v9299_v0 = vpop.f32.mrf.mxu0  ;;  %v9930_v48 = vmul.f32 %v9305_v47, %v9305_v47 }
 0x432   :  { %v9990_v3 = vadd.f32 %v9989_v54, %v9927_v36  ;;  %v9858_v59 = vadd.f32 %v9857_v17, %v9297_v21  ;;  %v13468_v30 = vadd.f32 %v9135_v8, %v13846_v58  ;;  %v10598_v56 = vpack.c.bf16 %v9308_v12, %v9305_v47 }
 0x433   :  { %v9137_v49 = vpop.f32.mrf.mxu1  ;;  %v9300_v5 = vadd.f32 %v9299_v0, %v13847_v9  ;;  %v9931_v27 = vmul.f32 %v9308_v12, %v9308_v12  ;;  %v10837_v54 = vpop.f32.mrf.mxu0 }
 0x434   :  { %v9991_v38 = vadd.f32 %v9990_v3, %v9928_v43  ;;  %10742 = vst [vmem:[#allocation8 + $0x18] sm:$0xff] %v10598_v56   ;;  %v9321_v29 = vadd.f32 %v10837_v54, %v13155_v60 }
 0x435   :  { %v9138_v31 = vpop.f32.mrf.mxu1  ;;  %v10593_v42 = vpack.c.bf16 %v9300_v5, %v9297_v21  ;;  %v9859_v16 = vadd.f32 %v9858_v59, %v9300_v5  ;;  %v9929_v7 = vmul.f32 %v9300_v5, %v9300_v5  ;;  %v9312_v6 = vpop.f32.mrf.mxu0 }
 0x436   :  { %v13472_v44 = vadd.f32 %v9138_v31, %v13094_v23  ;;  %v9313_v63 = vadd.f32 %v9312_v6, %v13129_v61  ;;  %v9934_v5 = vmul.f32 %v9321_v29, %v9321_v29 }
 0x437   :  { %v9140_v15 = vpop.f32.mrf.mxu1  ;;  %10741 = vst [vmem:[#allocation8 + $0x10] sm:$0xff] %v10593_v42   ;;  %v9860_v62 = vadd.f32 %v9859_v16, %v9305_v47  ;;  %v9992_v1 = vadd.f32 %v9991_v38, %v9929_v7  ;;  %v10838_v21 = vpop.f32.mrf.mxu0 }
 0x438   :  { %v9932_v59 = vmul.f32 %v9313_v63, %v9313_v63  ;;  %v9324_v47 = vadd.f32 %v10838_v21, %v13172_v14 }
 0x439   :  { %v9993_v34 = vadd.f32 %v9992_v1, %v9930_v48  ;;  %v9861_v53 = vadd.f32 %v9860_v62, %v9308_v12  ;;  %v9143_v17 = vpop.f32.mrf.mxu1  ;;  %v9315_v43 = vpop.f32.mrf.mxu0 }
 0x43a   :  { %v13476_v3 = vadd.f32 %v9143_v17, %v13113_v45  ;;  %v10608_v0 = vpack.c.bf16 %v9324_v47, %v9321_v29  ;;  %v9316_v49 = vadd.f32 %v9315_v43, %v13142_v2  ;;  %v9935_v42 = vmul.f32 %v9324_v47, %v9324_v47  ;;  %v13848_v17 = vld [vmem:[#allocation49_spill] sm:$0xff] }
 0x43b   :  { %v9994_v36 = vadd.f32 %v9993_v34, %v9931_v27  ;;  %v9145_v23 = vpop.f32.mrf.mxu1  ;;  %v9862_v8 = vadd.f32 %v9861_v53, %v9313_v63 }
 0x43c   :  { %10744 = vst [vmem:[#allocation8 + $0x28] sm:$0xff] %v10608_v0   ;;  %v10603_v45 = vpack.c.bf16 %v9316_v49, %v9313_v63  ;;  %v9933_v9 = vmul.f32 %v9316_v49, %v9316_v49 }
 0x43d   :  { %v9146_v58 = vpop.f32.mrf.mxu1  ;;  %v9995_v12 = vadd.f32 %v9994_v36, %v9932_v59  ;;  %v9863_v56 = vadd.f32 %v9862_v8, %v9316_v49  ;;  %v13849_v8 = vld [vmem:[#allocation54_spill] sm:$0xff] }
 0x43e   :  { %v13482_v38 = vadd.f32 %v9146_v58, %v13118_v25  ;;  %10743 = vst [vmem:[#allocation8 + $0x20] sm:$0xff] %v10603_v45   ;;  %v10841_v16 = vpop.f32.mrf.mxu0 }
 0x43f   :  { %v9148_v61 = vpop.f32.mrf.mxu1  ;;  %v9864_v60 = vadd.f32 %v9863_v56, %v9321_v29  ;;  %v9996_v31 = vadd.f32 %v9995_v12, %v9933_v9  ;;  %v9337_v27 = vadd.f32 %v10841_v16, %v13222_v24  ;;  %v13850_v56 = vld [vmem:[#allocation51_spill] sm:$0xff] }
 0x440   :  { %v9328_v2 = vpop.f32.mrf.mxu0  ;;  %v13852_v16 = vld [vmem:[#allocation63_spill] sm:$0xff] }
 0x441   :  { %v9997_v14 = vadd.f32 %v9996_v31, %v9934_v5  ;;  %v9865_v7 = vadd.f32 %v9864_v60, %v9324_v47  ;;  %v9151_v15 = vpop.f32.mrf.mxu1  ;;  %v9329_v1 = vadd.f32 %v9328_v2, %v13185_v28  ;;  %v9938_v24 = vmul.f32 %v9337_v27, %v9337_v27  ;;  %v13851_v31 = vld [vmem:[#allocation58_spill] sm:$0xff] }
 0x442   :  { %v13485_v48 = vadd.f32 %v9151_v15, %v13126_v13  ;;  %v10842_v34 = vpop.f32.mrf.mxu0 }
 0x443   :  { %v9998_v25 = vadd.f32 %v9997_v14, %v9935_v42  ;;  %v9153_v62 = vpop.f32.mrf.mxu1  ;;  %v9866_v36 = vadd.f32 %v9865_v7, %v9329_v1  ;;  %v9936_v54 = vmul.f32 %v9329_v1, %v9329_v1  ;;  %v9340_v6 = vadd.f32 %v10842_v34, %v13230_v55  ;;  %v13854_v34 = vld [vmem:[#allocation77_spill] sm:$0xff] }
 0x444   :  { %v9331_v21 = vpop.f32.mrf.mxu0 }
 0x445   :  { %v9154_v53 = vpop.f32.mrf.mxu1  ;;  %v9999_v13 = vadd.f32 %v9998_v25, %v9936_v54  ;;  %v10618_v29 = vpack.c.bf16 %v9340_v6, %v9337_v27  ;;  %v9332_v59 = vadd.f32 %v9331_v21, %v13849_v8  ;;  %v9939_v55 = vmul.f32 %v9340_v6, %v9340_v6  ;;  %v13855_v21 = vld [vmem:[#allocation62_spill] sm:$0xff] }
 0x446   :  { %v13491_v63 = vadd.f32 %v9154_v53, %v13848_v17 }
 0x447   :  { %v9156_v23 = vpop.f32.mrf.mxu1  ;;  %10746 = vst [vmem:[#allocation8 + $0x38] sm:$0xff] %v10618_v29   ;;  %v10613_v47 = vpack.c.bf16 %v9332_v59, %v9329_v1  ;;  %v9867_v28 = vadd.f32 %v9866_v36, %v9332_v59  ;;  %v9937_v43 = vmul.f32 %v9332_v59, %v9332_v59  ;;  %v13853_v1 = vld [vmem:[#allocation67_spill] sm:$0xff] }
 0x449   :  { %10745 = vst [vmem:[#allocation8 + $0x30] sm:$0xff] %v10613_v47   ;;  %v9868_v58 = vadd.f32 %v9867_v28, %v9337_v27  ;;  %v10000_v12 = vadd.f32 %v9999_v13, %v9937_v43 }
 0x44a   :  { %v9159_v49 = vpop.f32.mrf.mxu1 }
 0x44b   :  { %v10845_v0 = vpop.f32.mrf.mxu0  ;;  %v10001_v61 = vadd.f32 %v10000_v12, %v9938_v24  ;;  %v9869_v45 = vadd.f32 %v9868_v58, %v9340_v6  ;;  %v13495_v9 = vadd.f32 %v9159_v49, %v13850_v56  ;;  %v13856_v49 = vld [vmem:[#allocation71_spill] sm:$0xff] }
 0x44c   :  { %v9161_v60 = vpop.f32.mrf.mxu1  ;;  %v9353_v7 = vadd.f32 %v10845_v0, %v13852_v16 }
 0x44d   :  { %v9344_v5 = vpop.f32.mrf.mxu0  ;;  %v10002_v14 = vadd.f32 %v10001_v61, %v9939_v55 }
 0x44e   :  { %v9345_v42 = vadd.f32 %v9344_v5, %v13851_v31  ;;  %v9162_v2 = vpop.f32.mrf.mxu1  ;;  %v9942_v59 = vmul.f32 %v9353_v7, %v9353_v7 }
 0x44f   :  { %v10846_v15 = vpop.f32.mrf.mxu0  ;;  %v13501_v53 = vadd.f32 %v9162_v2, %v13854_v34 }
 0x450   :  { %v9870_v25 = vadd.f32 %v9869_v45, %v9345_v42  ;;  %v9940_v62 = vmul.f32 %v9345_v42, %v9345_v42  ;;  %v9356_v27 = vadd.f32 %v10846_v15, %v13853_v1  ;;  %v9164_v54 = vpop.f32.mrf.mxu1  ;;  %v13857_v45 = vld [vmem:[#allocation82_spill] sm:$0xff] }
 0x451   :  { %v9347_v36 = vpop.f32.mrf.mxu0  ;;  %v13859_v15 = vld [vmem:[#allocation78_spill] sm:$0xff] }
 0x452   :  { %v10003_v6 = vadd.f32 %v10002_v14, %v9940_v62  ;;  %v10628_v17 = vpack.c.bf16 %v9356_v27, %v9353_v7  ;;  %v9348_v23 = vadd.f32 %v9347_v36, %v13855_v21  ;;  %v9943_v24 = vmul.f32 %v9356_v27, %v9356_v27  ;;  %v13858_v14 = vld [vmem:[#allocation75_spill] sm:$0xff] }
 0x453   :  { %v13861_v21 = vld [vmem:[#allocation79_spill] sm:$0xff] }
 0x454   :  { %10748 = vst [vmem:[#allocation8 + $0x48] sm:$0xff] %v10628_v17   ;;  %v10623_v13 = vpack.c.bf16 %v9348_v23, %v9345_v42  ;;  %v9871_v29 = vadd.f32 %v9870_v25, %v9348_v23  ;;  %v9941_v8 = vmul.f32 %v9348_v23, %v9348_v23 }
 0x456   :  { %10747 = vst [vmem:[#allocation8 + $0x40] sm:$0xff] %v10623_v13   ;;  %v9872_v47 = vadd.f32 %v9871_v29, %v9353_v7  ;;  %v10004_v28 = vadd.f32 %v10003_v6, %v9941_v8 }
 0x458   :  { %v10005_v58 = vadd.f32 %v10004_v28, %v9942_v59  ;;  %v9873_v12 = vadd.f32 %v9872_v47, %v9356_v27  ;;  %v13860_v27 = vld [vmem:[#allocation73_spill] sm:$0xff] }
 0x459   :  { %v10849_v43 = vpop.f32.mrf.mxu0 }
 0x45a   :  { %v10006_v61 = vadd.f32 %v10005_v58, %v9943_v24  ;;  %v9369_v56 = vadd.f32 %v10849_v43, %v13857_v45 }
 0x45b   :  { %v9360_v0 = vpop.f32.mrf.mxu0 }
 0x45c   :  { %v9361_v55 = vadd.f32 %v9360_v0, %v13856_v49  ;;  %v9946_v29 = vmul.f32 %v9369_v56, %v9369_v56  ;;  %v13862_v0 = vld [vmem:[#allocation80_spill] sm:$0xff] }
 0x45d   :  { %v10850_v5 = vpop.f32.mrf.mxu0 }
 0x45e   :  { %v9167_v60 = vpop.f32.mrf.mxu1  ;;  %v9874_v31 = vadd.f32 %v9873_v12, %v9361_v55  ;;  %v9944_v42 = vmul.f32 %v9361_v55, %v9361_v55  ;;  %v9372_v16 = vadd.f32 %v10850_v5, %v13858_v14 }
 0x45f   :  { %v13508_v2 = vadd.f32 %v9167_v60, %v13859_v15  ;;  %v9363_v7 = vpop.f32.mrf.mxu0 }
 0x460   :  { %v9169_v25 = vpop.f32.mrf.mxu1  ;;  %v10007_v62 = vadd.f32 %v10006_v61, %v9944_v42  ;;  %v10638_v1 = vpack.c.bf16 %v9372_v16, %v9369_v56  ;;  %v9364_v34 = vadd.f32 %v9363_v7, %v13860_v27  ;;  %v9947_v47 = vmul.f32 %v9372_v16, %v9372_v16 }
 0x462   :  { %v9170_v36 = vpop.f32.mrf.mxu1  ;;  %10750 = vst [vmem:[#allocation8 + $0x58] sm:$0xff] %v10638_v1   ;;  %v10633_v54 = vpack.c.bf16 %v9364_v34, %v9361_v55  ;;  %v9875_v6 = vadd.f32 %v9874_v31, %v9364_v34  ;;  %v9945_v17 = vmul.f32 %v9364_v34, %v9364_v34 }
 0x463   :  { %v13512_v23 = vadd.f32 %v9170_v36, %v13861_v21 }
 0x464   :  { %v9172_v13 = vpop.f32.mrf.mxu1  ;;  %10749 = vst [vmem:[#allocation8 + $0x50] sm:$0xff] %v10633_v54   ;;  %v9876_v8 = vadd.f32 %v9875_v6, %v9369_v56  ;;  %v10008_v59 = vadd.f32 %v10007_v62, %v9945_v17 }
 0x466   :  { %v10009_v28 = vadd.f32 %v10008_v59, %v9946_v29  ;;  %v9877_v43 = vadd.f32 %v9876_v8, %v9372_v16 }
 0x468   :  { %v10010_v58 = vadd.f32 %v10009_v28, %v9947_v47 }
 0x469   :  { %v10853_v24 = vpop.f32.mrf.mxu0  ;;  %v9175_v12 = vpop.f32.mrf.mxu1 }
 0x46a   :  { %v13515_v49 = vadd.f32 %v9175_v12, %v13862_v0  ;;  %v9385_v31 = vadd.f32 %v10853_v24, %v13383_v40 }
 0x46b   :  { %v9376_v55 = vpop.f32.mrf.mxu0  ;;  %v9177_v61 = vpop.f32.mrf.mxu1 }
 0x46c   :  { %v9377_v45 = vadd.f32 %v9376_v55, %v13362_v4  ;;  %v9950_v36 = vmul.f32 %v9385_v31, %v9385_v31 }
 0x46d   :  { %v10854_v5 = vpop.f32.mrf.mxu0  ;;  %v13518_v60 = vpop.f32.mrf.mxu1 }
 0x46e   :  { %v9878_v56 = vadd.f32 %v9877_v43, %v9377_v45  ;;  %v9948_v42 = vmul.f32 %v9377_v45, %v9377_v45  ;;  %v9388_v14 = vadd.f32 %v10854_v5, %v13404_v39 }
 0x46f   :  { %v9379_v16 = vpop.f32.mrf.mxu0  ;;  %v9180_v15 = vpop.f32.mrf.mxu1 }
 0x470   :  { %v10011_v7 = vadd.f32 %v10010_v58, %v9948_v42  ;;  %v10648_v25 = vpack.c.bf16 %v9388_v14, %v9385_v31  ;;  %v9380_v62 = vadd.f32 %v9379_v16, %v13378_v35  ;;  %v9951_v21 = vmul.f32 %v9388_v14, %v9388_v14  ;;  %v13863_v35 = vld [vmem:[#allocation59_spill] sm:$0xff] }
 0x472   :  { %10752 = vst [vmem:[#allocation8 + $0x68] sm:$0xff] %v10648_v25   ;;  %v10643_v1 = vpack.c.bf16 %v9380_v62, %v9377_v45  ;;  %v9879_v27 = vadd.f32 %v9878_v56, %v9380_v62  ;;  %v9949_v34 = vmul.f32 %v9380_v62, %v9380_v62 }
 0x474   :  { %10751 = vst [vmem:[#allocation8 + $0x60] sm:$0xff] %v10643_v1   ;;  %v9880_v54 = vadd.f32 %v9879_v27, %v9385_v31  ;;  %v10012_v6 = vadd.f32 %v10011_v7, %v9949_v34 }
 0x475   :  { %v10857_v4 = vpop.f32.mrf.mxu0 }
 0x476   :  { %v10013_v13 = vadd.f32 %v10012_v6, %v9950_v36  ;;  %v9881_v29 = vadd.f32 %v9880_v54, %v9388_v14  ;;  %v9401_v8 = vadd.f32 %v10857_v4, %v13433_v46 }
 0x477   :  { %v9392_v40 = vpop.f32.mrf.mxu0 }
 0x478   :  { %v9183_v17 = vpop.f32.mrf.mxu1  ;;  %v9393_v39 = vadd.f32 %v9392_v40, %v13413_v52  ;;  %v10014_v58 = vadd.f32 %v10013_v13, %v9951_v21  ;;  %v13864_v52 = vld [vmem:[#allocation81_spill] sm:$0xff]  ;;  %v9954_v16 = vmul.f32 %v9401_v8, %v9401_v8 }
 0x479   :  { %v10858_v59 = vpop.f32.mrf.mxu0  ;;  %v13526_v47 = vadd.f32 %v9183_v17, %v13863_v35 }
 0x47a   :  { %v9185_v28 = vpop.f32.mrf.mxu1  ;;  %v9882_v43 = vadd.f32 %v9881_v29, %v9393_v39  ;;  %v9952_v24 = vmul.f32 %v9393_v39, %v9393_v39  ;;  %v9404_v12 = vadd.f32 %v10858_v59, %v13442_v41 }
 0x47b   :  { %v9395_v0 = vpop.f32.mrf.mxu0 }
 0x47c   :  { %v9186_v55 = vpop.f32.mrf.mxu1  ;;  %v10015_v61 = vadd.f32 %v10014_v58, %v9952_v24  ;;  %v10658_v45 = vpack.c.bf16 %v9404_v12, %v9401_v8  ;;  %v9396_v5 = vadd.f32 %v9395_v0, %v13426_v22  ;;  %v9955_v25 = vmul.f32 %v9404_v12, %v9404_v12 }
 0x47d   :  { %v13531_v31 = vadd.f32 %v9186_v55, %v13864_v52 }
 0x47e   :  { %v9188_v46 = vpop.f32.mrf.mxu1  ;;  %10754 = vst [vmem:[#allocation8 + $0x78] sm:$0xff] %v10658_v45   ;;  %v10653_v56 = vpack.c.bf16 %v9396_v5, %v9393_v39  ;;  %v9883_v42 = vadd.f32 %v9882_v43, %v9396_v5  ;;  %v9953_v14 = vmul.f32 %v9396_v5, %v9396_v5 }
 0x480   :  { %10753 = vst [vmem:[#allocation8 + $0x70] sm:$0xff] %v10653_v56   ;;  %v9884_v15 = vadd.f32 %v9883_v42, %v9401_v8  ;;  %v10016_v7 = vadd.f32 %v10015_v61, %v9953_v14 }
 0x482   :  { %v10017_v41 = vadd.f32 %v10016_v7, %v9954_v16  ;;  %v9885_v62 = vadd.f32 %v9884_v15, %v9404_v12 }
 0x484   :  { %v10018_v1 = vadd.f32 %v10017_v41, %v9955_v25 }
 0x48b   :  { %v10861_v27 = vpop.f32.mrf.mxu0  ;;  %v13533_v34 = vpop.f32.mrf.mxu1 }
 0x48c   :  { %v9417_v40 = vadd.f32 %v10861_v27, %v13455_v32 }
 0x48d   :  { %v9408_v22 = vpop.f32.mrf.mxu0  ;;  %v9193_v4 = vpop.f32.mrf.mxu1 }
 0x48e   :  { %v9409_v36 = vadd.f32 %v9408_v22, %v13449_v10  ;;  %v9958_v10 = vmul.f32 %v9417_v40, %v9417_v40 }
 0x48f   :  { %v10862_v54 = vpop.f32.mrf.mxu0  ;;  %v13536_v6 = vpop.f32.mrf.mxu1 }
 0x490   :  { %v9886_v17 = vadd.f32 %v9885_v62, %v9409_v36  ;;  %v9956_v21 = vmul.f32 %v9409_v36, %v9409_v36  ;;  %v9420_v13 = vadd.f32 %v10862_v54, %v13462_v37 }
 0x491   :  { %v9411_v39 = vpop.f32.mrf.mxu0  ;;  %v9196_v29 = vpop.f32.mrf.mxu1 }
 0x492   :  { %v10019_v8 = vadd.f32 %v10018_v1, %v9956_v21  ;;  %v10668_v59 = vpack.c.bf16 %v9420_v13, %v9417_v40  ;;  %v9412_v35 = vadd.f32 %v9411_v39, %v13452_v57  ;;  %v9959_v32 = vmul.f32 %v9420_v13, %v9420_v13 }
 0x494   :  { %10756 = vst [vmem:[#allocation8 + $0x88] sm:$0xff] %v10668_v59   ;;  %v10663_v28 = vpack.c.bf16 %v9412_v35, %v9409_v36  ;;  %v9887_v43 = vadd.f32 %v9886_v17, %v9412_v35  ;;  %v9957_v24 = vmul.f32 %v9412_v35, %v9412_v35 }
 0x496   :  { %10755 = vst [vmem:[#allocation8 + $0x80] sm:$0xff] %v10663_v28   ;;  %v9888_v58 = vadd.f32 %v9887_v43, %v9417_v40  ;;  %v10020_v12 = vadd.f32 %v10019_v8, %v9957_v24 }
 0x498   :  { %v10865_v0 = vpop.f32.mrf.mxu0  ;;  %v10021_v55 = vadd.f32 %v10020_v12, %v9958_v10  ;;  %v9889_v45 = vadd.f32 %v9888_v58, %v9420_v13 }
 0x499   :  { %v9433_v56 = vadd.f32 %v10865_v0, %v13476_v3 }
 0x49a   :  { %v9424_v61 = vpop.f32.mrf.mxu0  ;;  %v10022_v52 = vadd.f32 %v10021_v55, %v9959_v32 }
 0x49b   :  { %v13541_v37 = vpop.f32.mrf.mxu1  ;;  %v9425_v5 = vadd.f32 %v9424_v61, %v13468_v30  ;;  %v9962_v4 = vmul.f32 %v9433_v56, %v9433_v56 }
 0x49c   :  { %v10866_v46 = vpop.f32.mrf.mxu0 }
 0x49d   :  { %v9201_v57 = vpop.f32.mrf.mxu1  ;;  %v9890_v42 = vadd.f32 %v9889_v45, %v9425_v5  ;;  %v9960_v14 = vmul.f32 %v9425_v5, %v9425_v5  ;;  %v9436_v16 = vadd.f32 %v10866_v46, %v13482_v38 }
 0x49e   :  { %v9427_v15 = vpop.f32.mrf.mxu0 }
 0x49f   :  { %v13546_v7 = vpop.f32.mrf.mxu1  ;;  %v10023_v25 = vadd.f32 %v10022_v52, %v9960_v14  ;;  %v10678_v41 = vpack.c.bf16 %v9436_v16, %v9433_v56  ;;  %v9428_v62 = vadd.f32 %v9427_v15, %v13472_v44  ;;  %v9963_v54 = vmul.f32 %v9436_v16, %v9436_v16 }
 0x4a1   :  { %v9204_v1 = vpop.f32.mrf.mxu1  ;;  %10758 = vst [vmem:[#allocation8 + $0x98] sm:$0xff] %v10678_v41   ;;  %v10673_v27 = vpack.c.bf16 %v9428_v62, %v9425_v5  ;;  %v9891_v30 = vadd.f32 %v9890_v42, %v9428_v62  ;;  %v9961_v22 = vmul.f32 %v9428_v62, %v9428_v62  ;;  %v13865_v42 = vld [vmem:[#allocation55_spill] sm:$0xff] }
 0x4a2   :  { %v9179_v14 = vadd.f32 %v13518_v60, %v13865_v42 }
 0x4a3   :  { %10757 = vst [vmem:[#allocation8 + $0x90] sm:$0xff] %v10673_v27   ;;  %v9892_v36 = vadd.f32 %v9891_v30, %v9433_v56  ;;  %v10024_v3 = vadd.f32 %v10023_v25, %v9961_v22 }
 0x4a5   :  { %v10025_v40 = vadd.f32 %v10024_v3, %v9962_v4  ;;  %v9893_v38 = vadd.f32 %v9892_v36, %v9436_v16 }
 0x4a7   :  { %v10026_v13 = vadd.f32 %v10025_v40, %v9963_v54 }
 0x4a8   :  { %v10869_v17 = vpop.f32.mrf.mxu0 }
 0x4a9   :  { %v9449_v59 = vadd.f32 %v10869_v17, %v13495_v9 }
 0x4aa   :  { %v9440_v21 = vpop.f32.mrf.mxu0  ;;  %v13549_v39 = vpop.f32.mrf.mxu1 }
 0x4ab   :  { %v9441_v29 = vadd.f32 %v9440_v21, %v13485_v48  ;;  %v9966_v45 = vmul.f32 %v9449_v59, %v9449_v59 }
 0x4ac   :  { %v10870_v44 = vpop.f32.mrf.mxu0  ;;  %v9209_v8 = vpop.f32.mrf.mxu1 }
 0x4ad   :  { %v9894_v35 = vadd.f32 %v9893_v38, %v9441_v29  ;;  %v9964_v28 = vmul.f32 %v9441_v29, %v9441_v29  ;;  %v9452_v43 = vadd.f32 %v10870_v44, %v13501_v53 }
 0x4ae   :  { %v9443_v24 = vpop.f32.mrf.mxu0  ;;  %v13554_v10 = vpop.f32.mrf.mxu1 }
 0x4af   :  { %v10027_v58 = vadd.f32 %v10026_v13, %v9964_v28  ;;  %v10688_v12 = vpack.c.bf16 %v9452_v43, %v9449_v59  ;;  %v9444_v0 = vadd.f32 %v9443_v24, %v13491_v63  ;;  %v9967_v46 = vmul.f32 %v9452_v43, %v9452_v43  ;;  %v13867_v24 = vld [vmem:[#allocation70_spill] sm:$0xff] }
 0x4b0   :  { %v9212_v32 = vpop.f32.mrf.mxu1 }
 0x4b1   :  { %10760 = vst [vmem:[#allocation8 + $0xa8] sm:$0xff] %v10688_v12   ;;  %v10683_v55 = vpack.c.bf16 %v9444_v0, %v9441_v29  ;;  %v9895_v61 = vadd.f32 %v9894_v35, %v9444_v0  ;;  %v9965_v48 = vmul.f32 %v9444_v0, %v9444_v0 }
 0x4b3   :  { %10759 = vst [vmem:[#allocation8 + $0xa0] sm:$0xff] %v10683_v55   ;;  %v9896_v5 = vadd.f32 %v9895_v61, %v9449_v59  ;;  %v10028_v9 = vadd.f32 %v10027_v58, %v9965_v48  ;;  %v9195_v58 = vadd.f32 %v13536_v6, %v13867_v24 }
 0x4b5   :  { %v10029_v57 = vadd.f32 %v10028_v9, %v9966_v45  ;;  %v9897_v53 = vadd.f32 %v9896_v5, %v9452_v43 }
 0x4b7   :  { %v10030_v63 = vadd.f32 %v10029_v57, %v9967_v46 }
 0x4b8   :  { %v10873_v52 = vpop.f32.mrf.mxu0 }
 0x4b9   :  { %v9465_v41 = vadd.f32 %v10873_v52, %v13515_v49 }
 0x4ba   :  { %v9456_v56 = vpop.f32.mrf.mxu0 }
 0x4bb   :  { %v9457_v16 = vadd.f32 %v9456_v56, %v13508_v2  ;;  %v9970_v38 = vmul.f32 %v9465_v41, %v9465_v41 }
 0x4bc   :  { %v10874_v25 = vpop.f32.mrf.mxu0 }
 0x4bd   :  { %v13560_v15 = vpop.f32.mrf.mxu1  ;;  %v9898_v62 = vadd.f32 %v9897_v53, %v9457_v16  ;;  %v9968_v1 = vmul.f32 %v9457_v16, %v9457_v16  ;;  %v9468_v27 = vadd.f32 %v10874_v25, %v9179_v14 }
 0x4be   :  { %v9459_v22 = vpop.f32.mrf.mxu0 }
 0x4bf   :  { %v9217_v30 = vpop.f32.mrf.mxu1  ;;  %v10031_v4 = vadd.f32 %v10030_v63, %v9968_v1  ;;  %v10698_v36 = vpack.c.bf16 %v9468_v27, %v9465_v41  ;;  %v9460_v3 = vadd.f32 %v9459_v22, %v13512_v23  ;;  %v9971_v13 = vmul.f32 %v9468_v27, %v9468_v27  ;;  %v13866_v23 = vld [vmem:[#allocation66_spill] sm:$0xff]  ;;  %v13868_v1 = vld [vmem:[#allocation72_spill] sm:$0xff] }
 0x4c0   :  { %v9192_v43 = vadd.f32 %v13533_v34, %v13866_v23 }
 0x4c1   :  { %v13564_v54 = vpop.f32.mrf.mxu1  ;;  %10762 = vst [vmem:[#allocation8 + $0xb8] sm:$0xff] %v10698_v36   ;;  %v10693_v60 = vpack.c.bf16 %v9460_v3, %v9457_v16  ;;  %v9899_v2 = vadd.f32 %v9898_v62, %v9460_v3  ;;  %v9969_v40 = vmul.f32 %v9460_v3, %v9460_v3  ;;  %v13870_v3 = vld [vmem:[#allocation84_spill] sm:$0xff] }
 0x4c3   :  { %v9220_v17 = vpop.f32.mrf.mxu1  ;;  %10761 = vst [vmem:[#allocation8 + $0xb0] sm:$0xff] %v10693_v60   ;;  %v9900_v21 = vadd.f32 %v9899_v2, %v9465_v41  ;;  %v10032_v49 = vadd.f32 %v10031_v4, %v9969_v40  ;;  %v13869_v4 = vld [vmem:[#allocation83_spill] sm:$0xff]  ;;  %v9211_v60 = vadd.f32 %v13554_v10, %v13870_v3  ;;  %v13871_v40 = vld [vmem:[#allocation74_spill] sm:$0xff] }
 0x4c4   :  { %v9208_v36 = vadd.f32 %v13549_v39, %v13869_v4  ;;  %v9203_v17 = vadd.f32 %v13546_v7, %v13871_v40 }
 0x4c5   :  { %v10033_v29 = vadd.f32 %v10032_v49, %v9970_v38  ;;  %v9901_v44 = vadd.f32 %v9900_v21, %v9468_v27  ;;  %v9200_v27 = vadd.f32 %v13541_v37, %v13868_v1 }
 0x4c7   :  { %v10034_v8 = vadd.f32 %v10033_v29, %v9971_v13 }
 0x4cc   :  { %v10877_v59 = vpop.f32.mrf.mxu0 }
 0x4cd   :  { %v9481_v55 = vadd.f32 %v10877_v59, %v9192_v43 }
 0x4ce   :  { %v9472_v35 = vpop.f32.mrf.mxu0  ;;  %v13566_v28 = vpop.f32.mrf.mxu1 }
 0x4cf   :  { %v9473_v12 = vadd.f32 %v9472_v35, %v13526_v47  ;;  %v9974_v6 = vmul.f32 %v9481_v55, %v9481_v55 }
 0x4d0   :  { %v10878_v0 = vpop.f32.mrf.mxu0  ;;  %v9225_v32 = vpop.f32.mrf.mxu1 }
 0x4d1   :  { %v9902_v61 = vadd.f32 %v9901_v44, %v9473_v12  ;;  %v9972_v48 = vmul.f32 %v9473_v12, %v9473_v12  ;;  %v9484_v45 = vadd.f32 %v10878_v0, %v9195_v58 }
 0x4d2   :  { %v9475_v5 = vpop.f32.mrf.mxu0  ;;  %v9226_v9 = vpop.f32.mrf.mxu1 }
 0x4d3   :  { %v10035_v52 = vadd.f32 %v10034_v8, %v9972_v48  ;;  %v10708_v46 = vpack.c.bf16 %v9484_v45, %v9481_v55  ;;  %v9476_v57 = vadd.f32 %v9475_v5, %v13531_v31  ;;  %v9975_v16 = vmul.f32 %v9484_v45, %v9484_v45 }
 0x4d4   :  { %v9228_v53 = vpop.f32.mrf.mxu1 }
 0x4d5   :  { %10764 = vst [vmem:[#allocation8 + $0xc8] sm:$0xff] %v10708_v46   ;;  %v10703_v34 = vpack.c.bf16 %v9476_v57, %v9473_v12  ;;  %v9903_v56 = vadd.f32 %v9902_v61, %v9476_v57  ;;  %v9973_v42 = vmul.f32 %v9476_v57, %v9476_v57  ;;  %v9216_v61 = vadd.f32 %v13560_v15, %v13359_v26 }
 0x4d6   :  { %v9224_v57 = vadd.f32 %v13566_v28, %v13399_v19  ;;  %v9227_v53 = vadd.f32 %v9226_v9, %v13408_v50 }
 0x4d7   :  { %10763 = vst [vmem:[#allocation8 + $0xc0] sm:$0xff] %v10703_v34   ;;  %v9904_v47 = vadd.f32 %v9903_v56, %v9481_v55  ;;  %v10036_v14 = vadd.f32 %v10035_v52, %v9973_v42  ;;  %v9219_v42 = vadd.f32 %v13564_v54, %v13373_v33 }
 0x4d8   :  { %v9231_v62 = vpop.f32.mrf.mxu1 }
 0x4d9   :  { %v10037_v63 = vadd.f32 %v10036_v14, %v9974_v6  ;;  %v9905_v41 = vadd.f32 %v9904_v47, %v9484_v45  ;;  %v9232_v1 = vadd.f32 %v9231_v62, %v13421_v51 }
 0x4da   :  { %v10881_v25 = vpop.f32.mrf.mxu0  ;;  %v9233_v31 = vpop.f32.mrf.mxu1 }
 0x4db   :  { %v10038_v22 = vadd.f32 %v10037_v63, %v9975_v16  ;;  %v9497_v49 = vadd.f32 %v10881_v25, %v9208_v36 }
 0x4dc   :  { %v9488_v30 = vpop.f32.mrf.mxu0  ;;  %v9234_v21 = vpop.f32.mrf.mxu1 }
 0x4dd   :  { %v9489_v2 = vadd.f32 %v9488_v30, %v9200_v27  ;;  %v9978_v12 = vmul.f32 %v9497_v49, %v9497_v49 }
 0x4de   :  { %v10882_v38 = vpop.f32.mrf.mxu0  ;;  %v9236_v8 = vpop.f32.mrf.mxu1 }
 0x4df   :  { %v9906_v13 = vadd.f32 %v9905_v41, %v9489_v2  ;;  %v9976_v29 = vmul.f32 %v9489_v2, %v9489_v2  ;;  %v9500_v44 = vadd.f32 %v10882_v38, %v9211_v60 }
 0x4e0   :  { %v9491_v37 = vpop.f32.mrf.mxu0  ;;  %v9239_v43 = vpop.f32.mrf.mxu1 }
 0x4e1   :  { %v10039_v59 = vadd.f32 %v10038_v22, %v9976_v29  ;;  %v10718_v35 = vpack.c.bf16 %v9500_v44, %v9497_v49  ;;  %v9492_v23 = vadd.f32 %v9491_v37, %v9203_v17  ;;  %v9979_v48 = vmul.f32 %v9500_v44, %v9500_v44 }
 0x4e2   :  { %v9241_v58 = vpop.f32.mrf.mxu1  ;;  %v9240_v19 = vadd.f32 %v9239_v43, %v13439_v18  ;;  %v9235_v18 = vadd.f32 %v9234_v21, %v13430_v11 }
 0x4e3   :  { %10766 = vst [vmem:[#allocation8 + $0xd8] sm:$0xff] %v10718_v35   ;;  %v10713_v39 = vpack.c.bf16 %v9492_v23, %v9489_v2  ;;  %v9907_v24 = vadd.f32 %v9906_v13, %v9492_v23  ;;  %v9977_v10 = vmul.f32 %v9492_v23, %v9492_v23 }
 0x4e4   :  { %v9242_v55 = vpop.f32.mrf.mxu1 }
 0x4e5   :  { %10765 = vst [vmem:[#allocation8 + $0xd0] sm:$0xff] %v10713_v39   ;;  %v9908_v7 = vadd.f32 %v9907_v24, %v9497_v49  ;;  %v10040_v0 = vadd.f32 %v10039_v59, %v9977_v10  ;;  %v10885_v32 = vpop.f32.mrf.mxu0  ;;  %v9243_v33 = vadd.f32 %v9242_v55, %v13446_v20 }
 0x4e6   :  { %v9244_v46 = vpop.f32.mrf.mxu1  ;;  %v9513_v47 = vadd.f32 %v10885_v32, %v9224_v57 }
 0x4e7   :  { %v10041_v45 = vadd.f32 %v10040_v0, %v9978_v12  ;;  %v9909_v5 = vadd.f32 %v9908_v7, %v9500_v44  ;;  %v9504_v52 = vpop.f32.mrf.mxu0 }
 0x4e8   :  { %v9505_v34 = vadd.f32 %v9504_v52, %v9216_v61  ;;  %v9982_v30 = vmul.f32 %v9513_v47, %v9513_v47 }
 0x4e9   :  { %v10042_v56 = vadd.f32 %v10041_v45, %v9979_v48  ;;  %v10886_v6 = vpop.f32.mrf.mxu0 }
 0x4ea   :  { %v9910_v14 = vadd.f32 %v9909_v5, %v9505_v34  ;;  %v9980_v16 = vmul.f32 %v9505_v34, %v9505_v34  ;;  %v9516_v26 = vadd.f32 %v10886_v6, %v9227_v53 }
 0x4eb   :  { %v9507_v15 = vpop.f32.mrf.mxu0 }
 0x4ec   :  { %v10043_v63 = vadd.f32 %v10042_v56, %v9980_v16  ;;  %v10728_v25 = vpack.c.bf16 %v9516_v26, %v9513_v47  ;;  %v9508_v41 = vadd.f32 %v9507_v15, %v9219_v42  ;;  %v9983_v36 = vmul.f32 %v9516_v26, %v9516_v26 }
 0x4ed   :  { %v10889_v28 = vpop.f32.mrf.mxu0 }
 0x4ee   :  { %10768 = vst [vmem:[#allocation8 + $0xe8] sm:$0xff] %v10728_v25   ;;  %v10723_v50 = vpack.c.bf16 %v9508_v41, %v9505_v34  ;;  %v9911_v9 = vadd.f32 %v9910_v14, %v9508_v41  ;;  %v9981_v27 = vmul.f32 %v9508_v41, %v9508_v41  ;;  %v9529_v2 = vadd.f32 %v10889_v28, %v9240_v19 }
 0x4ef   :  { %v9520_v54 = vpop.f32.mrf.mxu0 }
 0x4f0   :  { %10767 = vst [vmem:[#allocation8 + $0xe0] sm:$0xff] %v10723_v50   ;;  %v9912_v22 = vadd.f32 %v9911_v9, %v9513_v47  ;;  %v10044_v31 = vadd.f32 %v10043_v63, %v9981_v27  ;;  %v9521_v4 = vadd.f32 %v9520_v54, %v9232_v1  ;;  %v9986_v59 = vmul.f32 %v9529_v2, %v9529_v2 }
 0x4f1   :  { %v10890_v3 = vpop.f32.mrf.mxu0 }
 0x4f2   :  { %v10045_v60 = vadd.f32 %v10044_v31, %v9982_v30  ;;  %v9913_v51 = vadd.f32 %v9912_v22, %v9516_v26  ;;  %v9532_v62 = vadd.f32 %v10890_v3, %v9243_v33  ;;  %v9984_v38 = vmul.f32 %v9521_v4, %v9521_v4 }
 0x4f3   :  { %v9523_v40 = vpop.f32.mrf.mxu0 }
 0x4f4   :  { %v9914_v17 = vadd.f32 %v9913_v51, %v9521_v4  ;;  %v10046_v49 = vadd.f32 %v10045_v60, %v9983_v36  ;;  %v10738_v13 = vpack.c.bf16 %v9532_v62, %v9529_v2  ;;  %v9524_v20 = vadd.f32 %v9523_v40, %v9235_v18 }
 0x4f6   :  { %v10047_v29 = vadd.f32 %v10046_v49, %v9984_v38  ;;  %10770 = vst [vmem:[#allocation8 + $0xf8] sm:$0xff] %v10738_v13   ;;  %v10733_v44 = vpack.c.bf16 %v9524_v20, %v9521_v4  ;;  %v9915_v37 = vadd.f32 %v9914_v17, %v9524_v20  ;;  %v9985_v8 = vmul.f32 %v9524_v20, %v9524_v20 }
 0x4f8   :  { %10769 = vst [vmem:[#allocation8 + $0xf0] sm:$0xff] %v10733_v44   ;;  %v9916_v35 = vadd.f32 %v9915_v37, %v9529_v2  ;;  %v10048_v23 = vadd.f32 %v10047_v29, %v9985_v8 }
 0x4f9   :  { %11470 = shalt.err (!%p11467_p0)
}
 0x4fa   :  { %10071 = dma.vmem_to_hbm [thread:$0]  %s10066_s1, 4096, %s13605_s2, [#allocation5], %s11508_s15, %s11508_s15, %s11509_s16   ;;  %v9987_v11 = vmul.f32 %v9532_v62, %v9532_v62  ;;  %v9917_v21 = vadd.f32 %v9916_v35, %v9532_v62  ;;  %v10049_v43 = vadd.f32 %v10048_v23, %v9986_v59 }
 0x4fb   :  { %s11513_s27 = smov [#allocation9]  }
 0x4fc   :  { %v9918_v39 = vrot.slane %v9917_v21, 4  ;;  %v10050_v24 = vadd.f32 %v10049_v43, %v9987_v11  ;;  %s10078_s28 = sshll.u32 %s11513_s27, 4  ;;  %s10079_s28 = int_to_ptr.vmem [resolvable:$true] %s10078_s28 }
 0x4fd   :  { %s11479_s2 = scalar_lea.vmem %s10079_s28, 32  ;;  %p11484_p2 = scmp.lt.s32.totalorder %s10079_s28, %s10079_s28 }
 0x4fe   :  { %v9919_v10 = vadd.f32 %v9918_v39, %v9917_v21  ;;  %v10051_v58 = vrot.slane %v10050_v24, 4  ;;  %p11480_p1 = scmp.ne.s32.totalorder %s10079_s28, %s11479_s2  ;;  %p11485_p3 = scmp.lt.s32.totalorder %s11479_s2, %s11479_s2 }
 0x500   :  { %v9920_v12 = vrot.slane %v9919_v10, 2  ;;  %v10052_v7 = vadd.f32 %v10051_v58, %v10050_v24  ;;  %p11486_p4 = por %p11485_p3, %p11484_p2 }
 0x502   :  { %v9921_v0 = vadd.f32 %v9920_v12, %v9919_v10  ;;  %v10053_v32 = vrot.slane %v10052_v7, 2  ;;  %p11487_p5 = pnand %p11486_p4, %p11480_p1 }
 0x504   :  { %v9922_v55 = vrot.slane %v9921_v0, 1  ;;  %v10054_v61 = vadd.f32 %v10053_v32, %v10052_v7 }
 0x506   :  { %v10055_v48 = vrot.slane %v10054_v61, 1  ;;  %v9923_v45 = vadd.f32 %v9922_v55, %v9921_v0 }
 0x508   :  { %v10056_v5 = vadd.f32 %v10055_v48, %v10054_v61 }
 0x50a   :  { %v10058_v52 = vsel %vm775_vm1, %v9923_v45, %v10056_v5 }
 0x50b   :  { %10059 = vst [vmem:[#allocation9] sm:$0x3] %v10058_v52 }
 0x50c   :  { %11490 = shalt.err (!%p11487_p5)
}
 0x50d   :  { %10081 = dma.vmem_to_hbm [thread:$0]  %s10079_s28, 32, %s13606_s3, [#allocation10]  }
 0x50e   :  { %11503 = dma.done.wait [#allocation5], 4096  }
 0x50f   :  { %11504 = vsyncadd [#allocation5], 4294963200 }
 0x510   :  { %11505 = dma.done.wait [#allocation10], 32  }
 0x511   :  { %11506 = vsyncadd [#allocation10], 4294967264 }
 0x512   :  { %10088 = vsyncpa [#allocation4], 1 }
 0x513   :  { %10089 = vsyncpa [#allocation7], 1 }
 0x514   :  { %10090 = vsyncpa [#allocation5], 1 }
 0x515   :  { %10091 = vsyncpa [#allocation10], 1 }

</bundles_post_ra>
